<compile_context>
chip_gen: v7x
topology: tpu7x:2x2x1
jax: 0.10.0
libtpu: 0.0.40
codegen_flags: <defaults>
</compile_context>

<pallas_src>
import jax
import jax.numpy as jnp
from jax.experimental import pallas as pl
from jax.experimental.pallas import tpu as pltpu

K = 3               # conv kernel size
D1, D2 = 2, 1       # dilations of the two convs
P1 = D1 * (K // 2)  # "same" padding of conv #1 (= 2)
P2 = D2 * (K // 2)  # "same" padding of conv #2 (= 1)
LANE = 128          # TPU vreg lane width


def dblock_inv1_forward(x, w1, b1, w2, b2, compute_dtype=jnp.float32):
    """x: (N, C, H, W) f32; w*: (C, C, K, K) OIHW; b*: (C,). Returns (N, C, H, W) f32.

    compute_dtype: dtype of the packed input / intermediate scratches and tap math
    (accumulation is always f32).  Use jnp.bfloat16 on v6e/v7x, f32 on v5e.
    """
    N, C, H, W = x.shape
    cdt = compute_dtype

    # ---- lane-dense packing: Nb images side by side on the lane axis ----------
    Nb = max(1, -(-LANE // W))            # images packed per grid step
    G = -(-N // Nb)                       # grid steps
    Npad = G * Nb
    if Npad != N:
        x = jnp.concatenate([x, jnp.zeros((Npad - N, C, H, W), x.dtype)], axis=0)
    L = Nb * W                            # packed lane width (>= 128 when W <= 128)
    # (Npad,C,H,W) -> (G,C,H,Nb*W); lane index inside a block = nb*W + w.
    xp = (x.reshape(G, Nb, C, H, W)
            .transpose(0, 2, 3, 1, 4)
            .reshape(G, C, H, L)
            .astype(cdt))

    w1f = w1.reshape(-1).astype(jnp.float32)
    w2f = w2.reshape(-1).astype(jnp.float32)
    b1f = b1.reshape(-1).astype(jnp.float32)
    b2f = b2.reshape(-1).astype(jnp.float32)

    def kernel(x_ref, w1_ref, b1_ref, w2_ref, b2_ref, o_ref, xpad_ref, ypad_ref):
        # x_ref   : (1, C, H, L)            packed images, L = Nb*W on lanes
        # w*_ref  : (C*C*K*K,) SMEM         flattened [co, ci, ky, kx]
        # b*_ref  : (C,)       SMEM
        # o_ref   : (1, C, H, L)
        # xpad_ref: (C, H + 2*P1, L) VMEM   H-padded input (no lane padding)
        # ypad_ref: (C, H + 2*P2, L) VMEM   H-padded conv1 output

        def lane_mask(o, hp):
            # valid iff 0 <= (lane % W) + o < W  -> kills both per-image edge taps
            # and cross-image leakage introduced by the lane roll.
            lane = jax.lax.broadcasted_iota(jnp.int32, (hp, L), 1) % W
            return lane < (W - o) if o > 0 else lane >= (-o)

        def conv_bias_relu(src_ref, w_ref, b_ref, dil, pad):
            hp = H + 2 * pad
            # Hoist all SMEM scalar reads out of the tap loops (review #3).
            w = [[[[w_ref[((co * C + ci) * K + ky) * K + kx]
                    for kx in range(K)] for ky in range(K)]
                  for ci in range(C)] for co in range(C)]
            b = [b_ref[co] for co in range(C)]
            # Hoist the two boundary lane masks (offsets -dil, +dil) (review #2/#5).
            masks = {o: lane_mask(o, hp) for o in (-dil, dil)}

            accs = [None] * C
            for ci in range(C):
                full = src_ref[ci]                       # (hp, L), read once per ci
                for kx in range(K):
                    o = kx * dil - pad                   # lane offset of this tap
                    if o == 0:
                        col = full
                    else:
                        # One XLU lane rotation per (ci, kx) + hoisted mask.
                        rolled = pltpu.roll(full, shift=(-o) % L, axis=1)
                        col = jnp.where(masks[o], rolled, jnp.zeros_like(rolled))
                    for ky in range(K):
                        tap = col[ky * dil:ky * dil + H, :]   # sublane-only slice
                        for co in range(C):
                            t = tap * w[co][ci][ky][kx]       # promotes to f32 acc
                            accs[co] = t if accs[co] is None else accs[co] + t
            return [jnp.maximum(accs[co] + b[co], 0.0) for co in range(C)]

        # ---- H-only zero halo for the input; only border strips re-zeroed ------
        zb1 = jnp.zeros((P1, L), cdt)
        for ci in range(C):
            xpad_ref[ci, :P1, :] = zb1
            xpad_ref[ci, P1 + H:, :] = zb1
            xpad_ref[ci, P1:P1 + H, :] = x_ref[0, ci].astype(cdt)

        # ---- stage 1: conv(dilation=2) + bias + ReLU ----------------------------
        y1 = conv_bias_relu(xpad_ref, w1_ref, b1_ref, D1, P1)
        zb2 = jnp.zeros((P2, L), cdt)
        for co in range(C):
            ypad_ref[co, :P2, :] = zb2
            ypad_ref[co, P2 + H:, :] = zb2
            ypad_ref[co, P2:P2 + H, :] = y1[co].astype(cdt)

        # ---- stage 2: conv(dilation=1) + bias + ReLU -> lane-dense output ------
        y2 = conv_bias_relu(ypad_ref, w2_ref, b2_ref, D2, P2)
        for co in range(C):
            o_ref[0, co, :, :] = y2[co].astype(o_ref.dtype)

    out = pl.pallas_call(
        kernel,
        out_shape=jax.ShapeDtypeStruct((G, C, H, L), jnp.float32),
        grid_spec=pltpu.PrefetchScalarGridSpec(
            num_scalar_prefetch=0,
            grid=(G,),
            in_specs=[
                pl.BlockSpec((1, C, H, L), lambda g: (g, 0, 0, 0)),
                pl.BlockSpec(memory_space=pltpu.MemorySpace.SMEM),
                pl.BlockSpec(memory_space=pltpu.MemorySpace.SMEM),
                pl.BlockSpec(memory_space=pltpu.MemorySpace.SMEM),
                pl.BlockSpec(memory_space=pltpu.MemorySpace.SMEM),
            ],
            out_specs=pl.BlockSpec((1, C, H, L), lambda g: (g, 0, 0, 0)),
            scratch_shapes=[
                pltpu.VMEM((C, H + 2 * P1, L), cdt),
                pltpu.VMEM((C, H + 2 * P2, L), cdt),
            ],
        ),
        compiler_params=pltpu.CompilerParams(
            dimension_semantics=("parallel",)),
    )(xp, w1f, b1f, w2f, b2f)

    # ---- unpack lanes back to (N, C, H, W) ------------------------------------
    out = (out.reshape(G, C, H, Nb, W)
              .transpose(0, 3, 1, 2, 4)
              .reshape(Npad, C, H, W))
    return out[:N]


def reference_forward(x, w1, b1, w2, b2):
    """Pure-JAX reference matching the PyTorch DBlock_inv1 forward."""
    dn = ("NCHW", "OIHW", "NCHW")
    y = jax.lax.conv_general_dilated(
        x, w1, window_strides=(1, 1), padding=((P1, P1), (P1, P1)),
        rhs_dilation=(D1, D1), dimension_numbers=dn)
    y = jnp.maximum(y + b1[None, :, None, None], 0.0)
    y = jax.lax.conv_general_dilated(
        y, w2, window_strides=(1, 1), padding=((P2, P2), (P2, P2)),
        rhs_dilation=(D2, D2), dimension_numbers=dn)
    y = jnp.maximum(y + b2[None, :, None, None], 0.0)
    return y


if __name__ == "__main__":
    key = jax.random.PRNGKey(0)
    k_x, k_w1, k_b1, k_w2, k_b2 = jax.random.split(key, 5)

    N, C, H, W = 2, 4, 16, 16
    x = jax.random.normal(k_x, (N, C, H, W), jnp.float32)
    w1 = jax.random.normal(k_w1, (C, C, K, K), jnp.float32) * 0.1
    b1 = jax.random.normal(k_b1, (C,), jnp.float32) * 0.1
    w2 = jax.random.normal(k_w2, (C, C, K, K), jnp.float32) * 0.1
    b2 = jax.random.normal(k_b2, (C,), jnp.float32) * 0.1

    out = dblock_inv1_forward(x, w1, b1, w2, b2)
    out = jax.block_until_ready(out)

    ref = reference_forward(x, w1, b1, w2, b2)
    assert out.shape == (N, C, H, W)
    assert jnp.allclose(out, ref, atol=1e-4, rtol=1e-4), "mismatch vs reference"

    print("KERNEL_OK")
</pallas_src>

<mosaic_0001>
module attributes {stable_mosaic.version = 11 : i64} {
  func.func @kernel(%arg0: i32, %arg1: memref<1x4x16x128xf32, #tpu.memory_space<vmem>>, %arg2: memref<144xf32, #tpu.memory_space<smem>>, %arg3: memref<4xf32, #tpu.memory_space<smem>>, %arg4: memref<144xf32, #tpu.memory_space<smem>>, %arg5: memref<4xf32, #tpu.memory_space<smem>>, %arg6: memref<1x4x16x128xf32, #tpu.memory_space<vmem>>, %arg7: memref<4x20x128xf32, #tpu.memory_space<vmem>>, %arg8: memref<4x18x128xf32, #tpu.memory_space<vmem>>) attributes {dimension_semantics = [#tpu.dimension_semantics<parallel>], iteration_bounds = array<i64: 1>, scalar_prefetch = 0 : i64, scratch_operands = 2 : i64, tpu.core_type = #tpu.core_type<tc>, window_params = [{transform_indices = @transform_0, window_bounds = array<i64: 1, 4, 16, 128>}, {transform_indices = @transform_1, window_bounds = array<i64: 144>}, {transform_indices = @transform_2, window_bounds = array<i64: 4>}, {transform_indices = @transform_3, window_bounds = array<i64: 144>}, {transform_indices = @transform_4, window_bounds = array<i64: 4>}, {transform_indices = @transform_5, window_bounds = array<i64: 1, 4, 16, 128>}]} {
    %cst = arith.constant 0.000000e+00 : f32
    %0 = vector.broadcast %cst : f32 to vector<2x128xf32>
    %c0 = arith.constant 0 : index
    %c0_0 = arith.constant 0 : index
    %c0_1 = arith.constant 0 : index
    %1 = vector.load %arg7[%c0, %c0_0, %c0_1] : memref<4x20x128xf32, #tpu.memory_space<vmem>>, vector<1x2x128xf32>
    %2 = vector.shape_cast %1 : vector<1x2x128xf32> to vector<2x128xf32>
    %3 = vector.shape_cast %0 : vector<2x128xf32> to vector<1x2x128xf32>
    tpu.vector_store %arg7[%c0, %c0_0, %c0_1], %3 {strides = array<i32>} : memref<4x20x128xf32, #tpu.memory_space<vmem>>, vector<1x2x128xf32>,
    %c0_2 = arith.constant 0 : index
    %c18 = arith.constant 18 : index
    %c0_3 = arith.constant 0 : index
    %4 = vector.load %arg7[%c0_2, %c18, %c0_3] : memref<4x20x128xf32, #tpu.memory_space<vmem>>, vector<1x2x128xf32>
    %5 = vector.shape_cast %4 : vector<1x2x128xf32> to vector<2x128xf32>
    %6 = vector.shape_cast %0 : vector<2x128xf32> to vector<1x2x128xf32>
    tpu.vector_store %arg7[%c0_2, %c18, %c0_3], %6 {strides = array<i32>} : memref<4x20x128xf32, #tpu.memory_space<vmem>>, vector<1x2x128xf32>,
    %c0_4 = arith.constant 0 : index
    %c0_5 = arith.constant 0 : index
    %c0_6 = arith.constant 0 : index
    %c0_7 = arith.constant 0 : index
    %7 = vector.load %arg1[%c0_4, %c0_5, %c0_6, %c0_7] : memref<1x4x16x128xf32, #tpu.memory_space<vmem>>, vector<1x1x16x128xf32>
    %8 = vector.shape_cast %7 : vector<1x1x16x128xf32> to vector<16x128xf32>
    %c0_8 = arith.constant 0 : index
    %c2 = arith.constant 2 : index
    %c0_9 = arith.constant 0 : index
    %9 = vector.load %arg7[%c0_8, %c2, %c0_9] : memref<4x20x128xf32, #tpu.memory_space<vmem>>, vector<1x16x128xf32>
    %10 = vector.shape_cast %9 : vector<1x16x128xf32> to vector<16x128xf32>
    %11 = vector.shape_cast %8 : vector<16x128xf32> to vector<1x16x128xf32>
    tpu.vector_store %arg7[%c0_8, %c2, %c0_9], %11 {strides = array<i32>} : memref<4x20x128xf32, #tpu.memory_space<vmem>>, vector<1x16x128xf32>,
    %c1 = arith.constant 1 : index
    %c0_10 = arith.constant 0 : index
    %c0_11 = arith.constant 0 : index
    %12 = vector.load %arg7[%c1, %c0_10, %c0_11] : memref<4x20x128xf32, #tpu.memory_space<vmem>>, vector<1x2x128xf32>
    %13 = vector.shape_cast %12 : vector<1x2x128xf32> to vector<2x128xf32>
    %14 = vector.shape_cast %0 : vector<2x128xf32> to vector<1x2x128xf32>
    tpu.vector_store %arg7[%c1, %c0_10, %c0_11], %14 {strides = array<i32>} : memref<4x20x128xf32, #tpu.memory_space<vmem>>, vector<1x2x128xf32>,
    %c1_12 = arith.constant 1 : index
    %c18_13 = arith.constant 18 : index
    %c0_14 = arith.constant 0 : index
    %15 = vector.load %arg7[%c1_12, %c18_13, %c0_14] : memref<4x20x128xf32, #tpu.memory_space<vmem>>, vector<1x2x128xf32>
    %16 = vector.shape_cast %15 : vector<1x2x128xf32> to vector<2x128xf32>
    %17 = vector.shape_cast %0 : vector<2x128xf32> to vector<1x2x128xf32>
    tpu.vector_store %arg7[%c1_12, %c18_13, %c0_14], %17 {strides = array<i32>} : memref<4x20x128xf32, #tpu.memory_space<vmem>>, vector<1x2x128xf32>,
    %c0_15 = arith.constant 0 : index
    %c1_16 = arith.constant 1 : index
    %c0_17 = arith.constant 0 : index
    %c0_18 = arith.constant 0 : index
    %18 = vector.load %arg1[%c0_15, %c1_16, %c0_17, %c0_18] : memref<1x4x16x128xf32, #tpu.memory_space<vmem>>, vector<1x1x16x128xf32>
    %19 = vector.shape_cast %18 : vector<1x1x16x128xf32> to vector<16x128xf32>
    %c1_19 = arith.constant 1 : index
    %c2_20 = arith.constant 2 : index
    %c0_21 = arith.constant 0 : index
    %20 = vector.load %arg7[%c1_19, %c2_20, %c0_21] : memref<4x20x128xf32, #tpu.memory_space<vmem>>, vector<1x16x128xf32>
    %21 = vector.shape_cast %20 : vector<1x16x128xf32> to vector<16x128xf32>
    %22 = vector.shape_cast %19 : vector<16x128xf32> to vector<1x16x128xf32>
    tpu.vector_store %arg7[%c1_19, %c2_20, %c0_21], %22 {strides = array<i32>} : memref<4x20x128xf32, #tpu.memory_space<vmem>>, vector<1x16x128xf32>,
    %c2_22 = arith.constant 2 : index
    %c0_23 = arith.constant 0 : index
    %c0_24 = arith.constant 0 : index
    %23 = vector.load %arg7[%c2_22, %c0_23, %c0_24] : memref<4x20x128xf32, #tpu.memory_space<vmem>>, vector<1x2x128xf32>
    %24 = vector.shape_cast %23 : vector<1x2x128xf32> to vector<2x128xf32>
    %25 = vector.shape_cast %0 : vector<2x128xf32> to vector<1x2x128xf32>
    tpu.vector_store %arg7[%c2_22, %c0_23, %c0_24], %25 {strides = array<i32>} : memref<4x20x128xf32, #tpu.memory_space<vmem>>, vector<1x2x128xf32>,
    %c2_25 = arith.constant 2 : index
    %c18_26 = arith.constant 18 : index
    %c0_27 = arith.constant 0 : index
    %26 = vector.load %arg7[%c2_25, %c18_26, %c0_27] : memref<4x20x128xf32, #tpu.memory_space<vmem>>, vector<1x2x128xf32>
    %27 = vector.shape_cast %26 : vector<1x2x128xf32> to vector<2x128xf32>
    %28 = vector.shape_cast %0 : vector<2x128xf32> to vector<1x2x128xf32>
    tpu.vector_store %arg7[%c2_25, %c18_26, %c0_27], %28 {strides = array<i32>} : memref<4x20x128xf32, #tpu.memory_space<vmem>>, vector<1x2x128xf32>,
    %c0_28 = arith.constant 0 : index
    %c2_29 = arith.constant 2 : index
    %c0_30 = arith.constant 0 : index
    %c0_31 = arith.constant 0 : index
    %29 = vector.load %arg1[%c0_28, %c2_29, %c0_30, %c0_31] : memref<1x4x16x128xf32, #tpu.memory_space<vmem>>, vector<1x1x16x128xf32>
    %30 = vector.shape_cast %29 : vector<1x1x16x128xf32> to vector<16x128xf32>
    %c2_32 = arith.constant 2 : index
    %c2_33 = arith.constant 2 : index
    %c0_34 = arith.constant 0 : index
    %31 = vector.load %arg7[%c2_32, %c2_33, %c0_34] : memref<4x20x128xf32, #tpu.memory_space<vmem>>, vector<1x16x128xf32>
    %32 = vector.shape_cast %31 : vector<1x16x128xf32> to vector<16x128xf32>
    %33 = vector.shape_cast %30 : vector<16x128xf32> to vector<1x16x128xf32>
    tpu.vector_store %arg7[%c2_32, %c2_33, %c0_34], %33 {strides = array<i32>} : memref<4x20x128xf32, #tpu.memory_space<vmem>>, vector<1x16x128xf32>,
    %c3 = arith.constant 3 : index
    %c0_35 = arith.constant 0 : index
    %c0_36 = arith.constant 0 : index
    %34 = vector.load %arg7[%c3, %c0_35, %c0_36] : memref<4x20x128xf32, #tpu.memory_space<vmem>>, vector<1x2x128xf32>
    %35 = vector.shape_cast %34 : vector<1x2x128xf32> to vector<2x128xf32>
    %36 = vector.shape_cast %0 : vector<2x128xf32> to vector<1x2x128xf32>
    tpu.vector_store %arg7[%c3, %c0_35, %c0_36], %36 {strides = array<i32>} : memref<4x20x128xf32, #tpu.memory_space<vmem>>, vector<1x2x128xf32>,
    %c3_37 = arith.constant 3 : index
    %c18_38 = arith.constant 18 : index
    %c0_39 = arith.constant 0 : index
    %37 = vector.load %arg7[%c3_37, %c18_38, %c0_39] : memref<4x20x128xf32, #tpu.memory_space<vmem>>, vector<1x2x128xf32>
    %38 = vector.shape_cast %37 : vector<1x2x128xf32> to vector<2x128xf32>
    %39 = vector.shape_cast %0 : vector<2x128xf32> to vector<1x2x128xf32>
    tpu.vector_store %arg7[%c3_37, %c18_38, %c0_39], %39 {strides = array<i32>} : memref<4x20x128xf32, #tpu.memory_space<vmem>>, vector<1x2x128xf32>,
    %c0_40 = arith.constant 0 : index
    %c3_41 = arith.constant 3 : index
    %c0_42 = arith.constant 0 : index
    %c0_43 = arith.constant 0 : index
    %40 = vector.load %arg1[%c0_40, %c3_41, %c0_42, %c0_43] : memref<1x4x16x128xf32, #tpu.memory_space<vmem>>, vector<1x1x16x128xf32>
    %41 = vector.shape_cast %40 : vector<1x1x16x128xf32> to vector<16x128xf32>
    %c3_44 = arith.constant 3 : index
    %c2_45 = arith.constant 2 : index
    %c0_46 = arith.constant 0 : index
    %42 = vector.load %arg7[%c3_44, %c2_45, %c0_46] : memref<4x20x128xf32, #tpu.memory_space<vmem>>, vector<1x16x128xf32>
    %43 = vector.shape_cast %42 : vector<1x16x128xf32> to vector<16x128xf32>
    %44 = vector.shape_cast %41 : vector<16x128xf32> to vector<1x16x128xf32>
    tpu.vector_store %arg7[%c3_44, %c2_45, %c0_46], %44 {strides = array<i32>} : memref<4x20x128xf32, #tpu.memory_space<vmem>>, vector<1x16x128xf32>,
    %c0_47 = arith.constant 0 : index
    %45 = memref.load %arg2[%c0_47] : memref<144xf32, #tpu.memory_space<smem>>
    %c1_48 = arith.constant 1 : index
    %46 = memref.load %arg2[%c1_48] : memref<144xf32, #tpu.memory_space<smem>>
    %c2_49 = arith.constant 2 : index
    %47 = memref.load %arg2[%c2_49] : memref<144xf32, #tpu.memory_space<smem>>
    %c3_50 = arith.constant 3 : index
    %48 = memref.load %arg2[%c3_50] : memref<144xf32, #tpu.memory_space<smem>>
    %c4 = arith.constant 4 : index
    %49 = memref.load %arg2[%c4] : memref<144xf32, #tpu.memory_space<smem>>
    %c5 = arith.constant 5 : index
    %50 = memref.load %arg2[%c5] : memref<144xf32, #tpu.memory_space<smem>>
    %c6 = arith.constant 6 : index
    %51 = memref.load %arg2[%c6] : memref<144xf32, #tpu.memory_space<smem>>
    %c7 = arith.constant 7 : index
    %52 = memref.load %arg2[%c7] : memref<144xf32, #tpu.memory_space<smem>>
    %c8 = arith.constant 8 : index
    %53 = memref.load %arg2[%c8] : memref<144xf32, #tpu.memory_space<smem>>
    %c9 = arith.constant 9 : index
    %54 = memref.load %arg2[%c9] : memref<144xf32, #tpu.memory_space<smem>>
    %c10 = arith.constant 10 : index
    %55 = memref.load %arg2[%c10] : memref<144xf32, #tpu.memory_space<smem>>
    %c11 = arith.constant 11 : index
    %56 = memref.load %arg2[%c11] : memref<144xf32, #tpu.memory_space<smem>>
    %c12 = arith.constant 12 : index
    %57 = memref.load %arg2[%c12] : memref<144xf32, #tpu.memory_space<smem>>
    %c13 = arith.constant 13 : index
    %58 = memref.load %arg2[%c13] : memref<144xf32, #tpu.memory_space<smem>>
    %c14 = arith.constant 14 : index
    %59 = memref.load %arg2[%c14] : memref<144xf32, #tpu.memory_space<smem>>
    %c15 = arith.constant 15 : index
    %60 = memref.load %arg2[%c15] : memref<144xf32, #tpu.memory_space<smem>>
    %c16 = arith.constant 16 : index
    %61 = memref.load %arg2[%c16] : memref<144xf32, #tpu.memory_space<smem>>
    %c17 = arith.constant 17 : index
    %62 = memref.load %arg2[%c17] : memref<144xf32, #tpu.memory_space<smem>>
    %c18_51 = arith.constant 18 : index
    %63 = memref.load %arg2[%c18_51] : memref<144xf32, #tpu.memory_space<smem>>
    %c19 = arith.constant 19 : index
    %64 = memref.load %arg2[%c19] : memref<144xf32, #tpu.memory_space<smem>>
    %c20 = arith.constant 20 : index
    %65 = memref.load %arg2[%c20] : memref<144xf32, #tpu.memory_space<smem>>
    %c21 = arith.constant 21 : index
    %66 = memref.load %arg2[%c21] : memref<144xf32, #tpu.memory_space<smem>>
    %c22 = arith.constant 22 : index
    %67 = memref.load %arg2[%c22] : memref<144xf32, #tpu.memory_space<smem>>
    %c23 = arith.constant 23 : index
    %68 = memref.load %arg2[%c23] : memref<144xf32, #tpu.memory_space<smem>>
    %c24 = arith.constant 24 : index
    %69 = memref.load %arg2[%c24] : memref<144xf32, #tpu.memory_space<smem>>
    %c25 = arith.constant 25 : index
    %70 = memref.load %arg2[%c25] : memref<144xf32, #tpu.memory_space<smem>>
    %c26 = arith.constant 26 : index
    %71 = memref.load %arg2[%c26] : memref<144xf32, #tpu.memory_space<smem>>
    %c27 = arith.constant 27 : index
    %72 = memref.load %arg2[%c27] : memref<144xf32, #tpu.memory_space<smem>>
    %c28 = arith.constant 28 : index
    %73 = memref.load %arg2[%c28] : memref<144xf32, #tpu.memory_space<smem>>
    %c29 = arith.constant 29 : index
    %74 = memref.load %arg2[%c29] : memref<144xf32, #tpu.memory_space<smem>>
    %c30 = arith.constant 30 : index
    %75 = memref.load %arg2[%c30] : memref<144xf32, #tpu.memory_space<smem>>
    %c31 = arith.constant 31 : index
    %76 = memref.load %arg2[%c31] : memref<144xf32, #tpu.memory_space<smem>>
    %c32 = arith.constant 32 : index
    %77 = memref.load %arg2[%c32] : memref<144xf32, #tpu.memory_space<smem>>
    %c33 = arith.constant 33 : index
    %78 = memref.load %arg2[%c33] : memref<144xf32, #tpu.memory_space<smem>>
    %c34 = arith.constant 34 : index
    %79 = memref.load %arg2[%c34] : memref<144xf32, #tpu.memory_space<smem>>
    %c35 = arith.constant 35 : index
    %80 = memref.load %arg2[%c35] : memref<144xf32, #tpu.memory_space<smem>>
    %c36 = arith.constant 36 : index
    %81 = memref.load %arg2[%c36] : memref<144xf32, #tpu.memory_space<smem>>
    %c37 = arith.constant 37 : index
    %82 = memref.load %arg2[%c37] : memref<144xf32, #tpu.memory_space<smem>>
    %c38 = arith.constant 38 : index
    %83 = memref.load %arg2[%c38] : memref<144xf32, #tpu.memory_space<smem>>
    %c39 = arith.constant 39 : index
    %84 = memref.load %arg2[%c39] : memref<144xf32, #tpu.memory_space<smem>>
    %c40 = arith.constant 40 : index
    %85 = memref.load %arg2[%c40] : memref<144xf32, #tpu.memory_space<smem>>
    %c41 = arith.constant 41 : index
    %86 = memref.load %arg2[%c41] : memref<144xf32, #tpu.memory_space<smem>>
    %c42 = arith.constant 42 : index
    %87 = memref.load %arg2[%c42] : memref<144xf32, #tpu.memory_space<smem>>
    %c43 = arith.constant 43 : index
    %88 = memref.load %arg2[%c43] : memref<144xf32, #tpu.memory_space<smem>>
    %c44 = arith.constant 44 : index
    %89 = memref.load %arg2[%c44] : memref<144xf32, #tpu.memory_space<smem>>
    %c45 = arith.constant 45 : index
    %90 = memref.load %arg2[%c45] : memref<144xf32, #tpu.memory_space<smem>>
    %c46 = arith.constant 46 : index
    %91 = memref.load %arg2[%c46] : memref<144xf32, #tpu.memory_space<smem>>
    %c47 = arith.constant 47 : index
    %92 = memref.load %arg2[%c47] : memref<144xf32, #tpu.memory_space<smem>>
    %c48 = arith.constant 48 : index
    %93 = memref.load %arg2[%c48] : memref<144xf32, #tpu.memory_space<smem>>
    %c49 = arith.constant 49 : index
    %94 = memref.load %arg2[%c49] : memref<144xf32, #tpu.memory_space<smem>>
    %c50 = arith.constant 50 : index
    %95 = memref.load %arg2[%c50] : memref<144xf32, #tpu.memory_space<smem>>
    %c51 = arith.constant 51 : index
    %96 = memref.load %arg2[%c51] : memref<144xf32, #tpu.memory_space<smem>>
    %c52 = arith.constant 52 : index
    %97 = memref.load %arg2[%c52] : memref<144xf32, #tpu.memory_space<smem>>
    %c53 = arith.constant 53 : index
    %98 = memref.load %arg2[%c53] : memref<144xf32, #tpu.memory_space<smem>>
    %c54 = arith.constant 54 : index
    %99 = memref.load %arg2[%c54] : memref<144xf32, #tpu.memory_space<smem>>
    %c55 = arith.constant 55 : index
    %100 = memref.load %arg2[%c55] : memref<144xf32, #tpu.memory_space<smem>>
    %c56 = arith.constant 56 : index
    %101 = memref.load %arg2[%c56] : memref<144xf32, #tpu.memory_space<smem>>
    %c57 = arith.constant 57 : index
    %102 = memref.load %arg2[%c57] : memref<144xf32, #tpu.memory_space<smem>>
    %c58 = arith.constant 58 : index
    %103 = memref.load %arg2[%c58] : memref<144xf32, #tpu.memory_space<smem>>
    %c59 = arith.constant 59 : index
    %104 = memref.load %arg2[%c59] : memref<144xf32, #tpu.memory_space<smem>>
    %c60 = arith.constant 60 : index
    %105 = memref.load %arg2[%c60] : memref<144xf32, #tpu.memory_space<smem>>
    %c61 = arith.constant 61 : index
    %106 = memref.load %arg2[%c61] : memref<144xf32, #tpu.memory_space<smem>>
    %c62 = arith.constant 62 : index
    %107 = memref.load %arg2[%c62] : memref<144xf32, #tpu.memory_space<smem>>
    %c63 = arith.constant 63 : index
    %108 = memref.load %arg2[%c63] : memref<144xf32, #tpu.memory_space<smem>>
    %c64 = arith.constant 64 : index
    %109 = memref.load %arg2[%c64] : memref<144xf32, #tpu.memory_space<smem>>
    %c65 = arith.constant 65 : index
    %110 = memref.load %arg2[%c65] : memref<144xf32, #tpu.memory_space<smem>>
    %c66 = arith.constant 66 : index
    %111 = memref.load %arg2[%c66] : memref<144xf32, #tpu.memory_space<smem>>
    %c67 = arith.constant 67 : index
    %112 = memref.load %arg2[%c67] : memref<144xf32, #tpu.memory_space<smem>>
    %c68 = arith.constant 68 : index
    %113 = memref.load %arg2[%c68] : memref<144xf32, #tpu.memory_space<smem>>
    %c69 = arith.constant 69 : index
    %114 = memref.load %arg2[%c69] : memref<144xf32, #tpu.memory_space<smem>>
    %c70 = arith.constant 70 : index
    %115 = memref.load %arg2[%c70] : memref<144xf32, #tpu.memory_space<smem>>
    %c71 = arith.constant 71 : index
    %116 = memref.load %arg2[%c71] : memref<144xf32, #tpu.memory_space<smem>>
    %c72 = arith.constant 72 : index
    %117 = memref.load %arg2[%c72] : memref<144xf32, #tpu.memory_space<smem>>
    %c73 = arith.constant 73 : index
    %118 = memref.load %arg2[%c73] : memref<144xf32, #tpu.memory_space<smem>>
    %c74 = arith.constant 74 : index
    %119 = memref.load %arg2[%c74] : memref<144xf32, #tpu.memory_space<smem>>
    %c75 = arith.constant 75 : index
    %120 = memref.load %arg2[%c75] : memref<144xf32, #tpu.memory_space<smem>>
    %c76 = arith.constant 76 : index
    %121 = memref.load %arg2[%c76] : memref<144xf32, #tpu.memory_space<smem>>
    %c77 = arith.constant 77 : index
    %122 = memref.load %arg2[%c77] : memref<144xf32, #tpu.memory_space<smem>>
    %c78 = arith.constant 78 : index
    %123 = memref.load %arg2[%c78] : memref<144xf32, #tpu.memory_space<smem>>
    %c79 = arith.constant 79 : index
    %124 = memref.load %arg2[%c79] : memref<144xf32, #tpu.memory_space<smem>>
    %c80 = arith.constant 80 : index
    %125 = memref.load %arg2[%c80] : memref<144xf32, #tpu.memory_space<smem>>
    %c81 = arith.constant 81 : index
    %126 = memref.load %arg2[%c81] : memref<144xf32, #tpu.memory_space<smem>>
    %c82 = arith.constant 82 : index
    %127 = memref.load %arg2[%c82] : memref<144xf32, #tpu.memory_space<smem>>
    %c83 = arith.constant 83 : index
    %128 = memref.load %arg2[%c83] : memref<144xf32, #tpu.memory_space<smem>>
    %c84 = arith.constant 84 : index
    %129 = memref.load %arg2[%c84] : memref<144xf32, #tpu.memory_space<smem>>
    %c85 = arith.constant 85 : index
    %130 = memref.load %arg2[%c85] : memref<144xf32, #tpu.memory_space<smem>>
    %c86 = arith.constant 86 : index
    %131 = memref.load %arg2[%c86] : memref<144xf32, #tpu.memory_space<smem>>
    %c87 = arith.constant 87 : index
    %132 = memref.load %arg2[%c87] : memref<144xf32, #tpu.memory_space<smem>>
    %c88 = arith.constant 88 : index
    %133 = memref.load %arg2[%c88] : memref<144xf32, #tpu.memory_space<smem>>
    %c89 = arith.constant 89 : index
    %134 = memref.load %arg2[%c89] : memref<144xf32, #tpu.memory_space<smem>>
    %c90 = arith.constant 90 : index
    %135 = memref.load %arg2[%c90] : memref<144xf32, #tpu.memory_space<smem>>
    %c91 = arith.constant 91 : index
    %136 = memref.load %arg2[%c91] : memref<144xf32, #tpu.memory_space<smem>>
    %c92 = arith.constant 92 : index
    %137 = memref.load %arg2[%c92] : memref<144xf32, #tpu.memory_space<smem>>
    %c93 = arith.constant 93 : index
    %138 = memref.load %arg2[%c93] : memref<144xf32, #tpu.memory_space<smem>>
    %c94 = arith.constant 94 : index
    %139 = memref.load %arg2[%c94] : memref<144xf32, #tpu.memory_space<smem>>
    %c95 = arith.constant 95 : index
    %140 = memref.load %arg2[%c95] : memref<144xf32, #tpu.memory_space<smem>>
    %c96 = arith.constant 96 : index
    %141 = memref.load %arg2[%c96] : memref<144xf32, #tpu.memory_space<smem>>
    %c97 = arith.constant 97 : index
    %142 = memref.load %arg2[%c97] : memref<144xf32, #tpu.memory_space<smem>>
    %c98 = arith.constant 98 : index
    %143 = memref.load %arg2[%c98] : memref<144xf32, #tpu.memory_space<smem>>
    %c99 = arith.constant 99 : index
    %144 = memref.load %arg2[%c99] : memref<144xf32, #tpu.memory_space<smem>>
    %c100 = arith.constant 100 : index
    %145 = memref.load %arg2[%c100] : memref<144xf32, #tpu.memory_space<smem>>
    %c101 = arith.constant 101 : index
    %146 = memref.load %arg2[%c101] : memref<144xf32, #tpu.memory_space<smem>>
    %c102 = arith.constant 102 : index
    %147 = memref.load %arg2[%c102] : memref<144xf32, #tpu.memory_space<smem>>
    %c103 = arith.constant 103 : index
    %148 = memref.load %arg2[%c103] : memref<144xf32, #tpu.memory_space<smem>>
    %c104 = arith.constant 104 : index
    %149 = memref.load %arg2[%c104] : memref<144xf32, #tpu.memory_space<smem>>
    %c105 = arith.constant 105 : index
    %150 = memref.load %arg2[%c105] : memref<144xf32, #tpu.memory_space<smem>>
    %c106 = arith.constant 106 : index
    %151 = memref.load %arg2[%c106] : memref<144xf32, #tpu.memory_space<smem>>
    %c107 = arith.constant 107 : index
    %152 = memref.load %arg2[%c107] : memref<144xf32, #tpu.memory_space<smem>>
    %c108 = arith.constant 108 : index
    %153 = memref.load %arg2[%c108] : memref<144xf32, #tpu.memory_space<smem>>
    %c109 = arith.constant 109 : index
    %154 = memref.load %arg2[%c109] : memref<144xf32, #tpu.memory_space<smem>>
    %c110 = arith.constant 110 : index
    %155 = memref.load %arg2[%c110] : memref<144xf32, #tpu.memory_space<smem>>
    %c111 = arith.constant 111 : index
    %156 = memref.load %arg2[%c111] : memref<144xf32, #tpu.memory_space<smem>>
    %c112 = arith.constant 112 : index
    %157 = memref.load %arg2[%c112] : memref<144xf32, #tpu.memory_space<smem>>
    %c113 = arith.constant 113 : index
    %158 = memref.load %arg2[%c113] : memref<144xf32, #tpu.memory_space<smem>>
    %c114 = arith.constant 114 : index
    %159 = memref.load %arg2[%c114] : memref<144xf32, #tpu.memory_space<smem>>
    %c115 = arith.constant 115 : index
    %160 = memref.load %arg2[%c115] : memref<144xf32, #tpu.memory_space<smem>>
    %c116 = arith.constant 116 : index
    %161 = memref.load %arg2[%c116] : memref<144xf32, #tpu.memory_space<smem>>
    %c117 = arith.constant 117 : index
    %162 = memref.load %arg2[%c117] : memref<144xf32, #tpu.memory_space<smem>>
    %c118 = arith.constant 118 : index
    %163 = memref.load %arg2[%c118] : memref<144xf32, #tpu.memory_space<smem>>
    %c119 = arith.constant 119 : index
    %164 = memref.load %arg2[%c119] : memref<144xf32, #tpu.memory_space<smem>>
    %c120 = arith.constant 120 : index
    %165 = memref.load %arg2[%c120] : memref<144xf32, #tpu.memory_space<smem>>
    %c121 = arith.constant 121 : index
    %166 = memref.load %arg2[%c121] : memref<144xf32, #tpu.memory_space<smem>>
    %c122 = arith.constant 122 : index
    %167 = memref.load %arg2[%c122] : memref<144xf32, #tpu.memory_space<smem>>
    %c123 = arith.constant 123 : index
    %168 = memref.load %arg2[%c123] : memref<144xf32, #tpu.memory_space<smem>>
    %c124 = arith.constant 124 : index
    %169 = memref.load %arg2[%c124] : memref<144xf32, #tpu.memory_space<smem>>
    %c125 = arith.constant 125 : index
    %170 = memref.load %arg2[%c125] : memref<144xf32, #tpu.memory_space<smem>>
    %c126 = arith.constant 126 : index
    %171 = memref.load %arg2[%c126] : memref<144xf32, #tpu.memory_space<smem>>
    %c127 = arith.constant 127 : index
    %172 = memref.load %arg2[%c127] : memref<144xf32, #tpu.memory_space<smem>>
    %c128 = arith.constant 128 : index
    %173 = memref.load %arg2[%c128] : memref<144xf32, #tpu.memory_space<smem>>
    %c129 = arith.constant 129 : index
    %174 = memref.load %arg2[%c129] : memref<144xf32, #tpu.memory_space<smem>>
    %c130 = arith.constant 130 : index
    %175 = memref.load %arg2[%c130] : memref<144xf32, #tpu.memory_space<smem>>
    %c131 = arith.constant 131 : index
    %176 = memref.load %arg2[%c131] : memref<144xf32, #tpu.memory_space<smem>>
    %c132 = arith.constant 132 : index
    %177 = memref.load %arg2[%c132] : memref<144xf32, #tpu.memory_space<smem>>
    %c133 = arith.constant 133 : index
    %178 = memref.load %arg2[%c133] : memref<144xf32, #tpu.memory_space<smem>>
    %c134 = arith.constant 134 : index
    %179 = memref.load %arg2[%c134] : memref<144xf32, #tpu.memory_space<smem>>
    %c135 = arith.constant 135 : index
    %180 = memref.load %arg2[%c135] : memref<144xf32, #tpu.memory_space<smem>>
    %c136 = arith.constant 136 : index
    %181 = memref.load %arg2[%c136] : memref<144xf32, #tpu.memory_space<smem>>
    %c137 = arith.constant 137 : index
    %182 = memref.load %arg2[%c137] : memref<144xf32, #tpu.memory_space<smem>>
    %c138 = arith.constant 138 : index
    %183 = memref.load %arg2[%c138] : memref<144xf32, #tpu.memory_space<smem>>
    %c139 = arith.constant 139 : index
    %184 = memref.load %arg2[%c139] : memref<144xf32, #tpu.memory_space<smem>>
    %c140 = arith.constant 140 : index
    %185 = memref.load %arg2[%c140] : memref<144xf32, #tpu.memory_space<smem>>
    %c141 = arith.constant 141 : index
    %186 = memref.load %arg2[%c141] : memref<144xf32, #tpu.memory_space<smem>>
    %c142 = arith.constant 142 : index
    %187 = memref.load %arg2[%c142] : memref<144xf32, #tpu.memory_space<smem>>
    %c143 = arith.constant 143 : index
    %188 = memref.load %arg2[%c143] : memref<144xf32, #tpu.memory_space<smem>>
    %c0_52 = arith.constant 0 : index
    %189 = memref.load %arg3[%c0_52] : memref<4xf32, #tpu.memory_space<smem>>
    %c1_53 = arith.constant 1 : index
    %190 = memref.load %arg3[%c1_53] : memref<4xf32, #tpu.memory_space<smem>>
    %c2_54 = arith.constant 2 : index
    %191 = memref.load %arg3[%c2_54] : memref<4xf32, #tpu.memory_space<smem>>
    %c3_55 = arith.constant 3 : index
    %192 = memref.load %arg3[%c3_55] : memref<4xf32, #tpu.memory_space<smem>>
    %193 = tpu.iota {dimensions = array<i32: 1>} : vector<20x128xi32>
    %c16_i32 = arith.constant 16 : i32
    %c0_i32 = arith.constant 0 : i32
    %194 = arith.cmpi eq, %c16_i32, %c0_i32 : i32
    %c1_i32 = arith.constant 1 : i32
    %195 = arith.select %194, %c1_i32, %c16_i32 : i32
    %196 = vector.broadcast %195 : i32 to vector<20x128xi32>
    %197 = arith.remsi %193, %196 : vector<20x128xi32>
    %c0_i32_56 = arith.constant 0 : i32
    %198 = vector.broadcast %c0_i32_56 : i32 to vector<20x128xi32>
    %199 = arith.cmpi ne, %197, %198 : vector<20x128xi32>
    %c0_i32_57 = arith.constant 0 : i32
    %200 = vector.broadcast %c0_i32_57 : i32 to vector<20x128xi32>
    %201 = arith.cmpi slt, %197, %200 : vector<20x128xi32>
    %c0_i32_58 = arith.constant 0 : i32
    %202 = arith.cmpi slt, %195, %c0_i32_58 : i32
    %203 = vector.broadcast %202 : i1 to vector<20x128xi1>
    %204 = vector.broadcast %203 : vector<20x128xi1> to vector<20x128xi1>
    %205 = arith.xori %201, %204 : vector<20x128xi1>
    %206 = arith.andi %205, %199 : vector<20x128xi1>
    %207 = vector.broadcast %195 : i32 to vector<20x128xi32>
    %208 = arith.addi %197, %207 : vector<20x128xi32>
    %209 = arith.select %206, %208, %197 : vector<20x128xi1>, vector<20x128xi32>
    %c2_i32 = arith.constant 2 : i32
    %210 = vector.broadcast %c2_i32 : i32 to vector<20x128xi32>
    %211 = arith.cmpi sge, %209, %210 : vector<20x128xi32>
    %212 = tpu.iota {dimensions = array<i32: 1>} : vector<20x128xi32>
    %c16_i32_59 = arith.constant 16 : i32
    %c0_i32_60 = arith.constant 0 : i32
    %213 = arith.cmpi eq, %c16_i32_59, %c0_i32_60 : i32
    %c1_i32_61 = arith.constant 1 : i32
    %214 = arith.select %213, %c1_i32_61, %c16_i32_59 : i32
    %215 = vector.broadcast %214 : i32 to vector<20x128xi32>
    %216 = arith.remsi %212, %215 : vector<20x128xi32>
    %c0_i32_62 = arith.constant 0 : i32
    %217 = vector.broadcast %c0_i32_62 : i32 to vector<20x128xi32>
    %218 = arith.cmpi ne, %216, %217 : vector<20x128xi32>
    %c0_i32_63 = arith.constant 0 : i32
    %219 = vector.broadcast %c0_i32_63 : i32 to vector<20x128xi32>
    %220 = arith.cmpi slt, %216, %219 : vector<20x128xi32>
    %c0_i32_64 = arith.constant 0 : i32
    %221 = arith.cmpi slt, %214, %c0_i32_64 : i32
    %222 = vector.broadcast %221 : i1 to vector<20x128xi1>
    %223 = vector.broadcast %222 : vector<20x128xi1> to vector<20x128xi1>
    %224 = arith.xori %220, %223 : vector<20x128xi1>
    %225 = arith.andi %224, %218 : vector<20x128xi1>
    %226 = vector.broadcast %214 : i32 to vector<20x128xi32>
    %227 = arith.addi %216, %226 : vector<20x128xi32>
    %228 = arith.select %225, %227, %216 : vector<20x128xi1>, vector<20x128xi32>
    %c14_i32 = arith.constant 14 : i32
    %229 = vector.broadcast %c14_i32 : i32 to vector<20x128xi32>
    %230 = arith.cmpi slt, %228, %229 : vector<20x128xi32>
    %c0_65 = arith.constant 0 : index
    %c0_66 = arith.constant 0 : index
    %c0_67 = arith.constant 0 : index
    %231 = vector.load %arg7[%c0_65, %c0_66, %c0_67] : memref<4x20x128xf32, #tpu.memory_space<vmem>>, vector<1x20x128xf32>
    %232 = vector.shape_cast %231 : vector<1x20x128xf32> to vector<20x128xf32>
    %c2_i32_68 = arith.constant 2 : i32
    %233 = tpu.dynamic_rotate %232 by %c2_i32_68 dim 1 : vector<20x128xf32>, i32 -> vector<20x128xf32>
    %cst_69 = arith.constant 0.000000e+00 : f32
    %234 = vector.broadcast %cst_69 : f32 to vector<20x128xf32>
    %235 = arith.select %211, %233, %234 : vector<20x128xi1>, vector<20x128xf32>
    %236 = vector.extract_strided_slice %235 {offsets = [0, 0], sizes = [16, 128], strides = [1, 1]} : vector<20x128xf32> to vector<16x128xf32>
    %237 = vector.broadcast %45 : f32 to vector<16x128xf32>
    %238 = arith.mulf %236, %237 : vector<16x128xf32>
    %239 = vector.broadcast %81 : f32 to vector<16x128xf32>
    %240 = arith.mulf %236, %239 : vector<16x128xf32>
    %241 = vector.broadcast %117 : f32 to vector<16x128xf32>
    %242 = arith.mulf %236, %241 : vector<16x128xf32>
    %243 = vector.broadcast %153 : f32 to vector<16x128xf32>
    %244 = arith.mulf %236, %243 : vector<16x128xf32>
    %245 = vector.extract_strided_slice %235 {offsets = [2, 0], sizes = [16, 128], strides = [1, 1]} : vector<20x128xf32> to vector<16x128xf32>
    %246 = vector.broadcast %48 : f32 to vector<16x128xf32>
    %247 = arith.mulf %245, %246 : vector<16x128xf32>
    %248 = arith.addf %238, %247 : vector<16x128xf32>
    %249 = vector.broadcast %84 : f32 to vector<16x128xf32>
    %250 = arith.mulf %245, %249 : vector<16x128xf32>
    %251 = arith.addf %240, %250 : vector<16x128xf32>
    %252 = vector.broadcast %120 : f32 to vector<16x128xf32>
    %253 = arith.mulf %245, %252 : vector<16x128xf32>
    %254 = arith.addf %242, %253 : vector<16x128xf32>
    %255 = vector.broadcast %156 : f32 to vector<16x128xf32>
    %256 = arith.mulf %245, %255 : vector<16x128xf32>
    %257 = arith.addf %244, %256 : vector<16x128xf32>
    %258 = vector.extract_strided_slice %235 {offsets = [4, 0], sizes = [16, 128], strides = [1, 1]} : vector<20x128xf32> to vector<16x128xf32>
    %259 = vector.broadcast %51 : f32 to vector<16x128xf32>
    %260 = arith.mulf %258, %259 : vector<16x128xf32>
    %261 = arith.addf %248, %260 : vector<16x128xf32>
    %262 = vector.broadcast %87 : f32 to vector<16x128xf32>
    %263 = arith.mulf %258, %262 : vector<16x128xf32>
    %264 = arith.addf %251, %263 : vector<16x128xf32>
    %265 = vector.broadcast %123 : f32 to vector<16x128xf32>
    %266 = arith.mulf %258, %265 : vector<16x128xf32>
    %267 = arith.addf %254, %266 : vector<16x128xf32>
    %268 = vector.broadcast %159 : f32 to vector<16x128xf32>
    %269 = arith.mulf %258, %268 : vector<16x128xf32>
    %270 = arith.addf %257, %269 : vector<16x128xf32>
    %271 = vector.extract_strided_slice %232 {offsets = [0, 0], sizes = [16, 128], strides = [1, 1]} : vector<20x128xf32> to vector<16x128xf32>
    %272 = vector.broadcast %46 : f32 to vector<16x128xf32>
    %273 = arith.mulf %271, %272 : vector<16x128xf32>
    %274 = arith.addf %261, %273 : vector<16x128xf32>
    %275 = vector.broadcast %82 : f32 to vector<16x128xf32>
    %276 = arith.mulf %271, %275 : vector<16x128xf32>
    %277 = arith.addf %264, %276 : vector<16x128xf32>
    %278 = vector.broadcast %118 : f32 to vector<16x128xf32>
    %279 = arith.mulf %271, %278 : vector<16x128xf32>
    %280 = arith.addf %267, %279 : vector<16x128xf32>
    %281 = vector.broadcast %154 : f32 to vector<16x128xf32>
    %282 = arith.mulf %271, %281 : vector<16x128xf32>
    %283 = arith.addf %270, %282 : vector<16x128xf32>
    %284 = vector.extract_strided_slice %232 {offsets = [2, 0], sizes = [16, 128], strides = [1, 1]} : vector<20x128xf32> to vector<16x128xf32>
    %285 = vector.broadcast %49 : f32 to vector<16x128xf32>
    %286 = arith.mulf %284, %285 : vector<16x128xf32>
    %287 = arith.addf %274, %286 : vector<16x128xf32>
    %288 = vector.broadcast %85 : f32 to vector<16x128xf32>
    %289 = arith.mulf %284, %288 : vector<16x128xf32>
    %290 = arith.addf %277, %289 : vector<16x128xf32>
    %291 = vector.broadcast %121 : f32 to vector<16x128xf32>
    %292 = arith.mulf %284, %291 : vector<16x128xf32>
    %293 = arith.addf %280, %292 : vector<16x128xf32>
    %294 = vector.broadcast %157 : f32 to vector<16x128xf32>
    %295 = arith.mulf %284, %294 : vector<16x128xf32>
    %296 = arith.addf %283, %295 : vector<16x128xf32>
    %297 = vector.extract_strided_slice %232 {offsets = [4, 0], sizes = [16, 128], strides = [1, 1]} : vector<20x128xf32> to vector<16x128xf32>
    %298 = vector.broadcast %52 : f32 to vector<16x128xf32>
    %299 = arith.mulf %297, %298 : vector<16x128xf32>
    %300 = arith.addf %287, %299 : vector<16x128xf32>
    %301 = vector.broadcast %88 : f32 to vector<16x128xf32>
    %302 = arith.mulf %297, %301 : vector<16x128xf32>
    %303 = arith.addf %290, %302 : vector<16x128xf32>
    %304 = vector.broadcast %124 : f32 to vector<16x128xf32>
    %305 = arith.mulf %297, %304 : vector<16x128xf32>
    %306 = arith.addf %293, %305 : vector<16x128xf32>
    %307 = vector.broadcast %160 : f32 to vector<16x128xf32>
    %308 = arith.mulf %297, %307 : vector<16x128xf32>
    %309 = arith.addf %296, %308 : vector<16x128xf32>
    %c126_i32 = arith.constant 126 : i32
    %310 = tpu.dynamic_rotate %232 by %c126_i32 dim 1 : vector<20x128xf32>, i32 -> vector<20x128xf32>
    %cst_70 = arith.constant 0.000000e+00 : f32
    %311 = vector.broadcast %cst_70 : f32 to vector<20x128xf32>
    %312 = arith.select %230, %310, %311 : vector<20x128xi1>, vector<20x128xf32>
    %313 = vector.extract_strided_slice %312 {offsets = [0, 0], sizes = [16, 128], strides = [1, 1]} : vector<20x128xf32> to vector<16x128xf32>
    %314 = vector.broadcast %47 : f32 to vector<16x128xf32>
    %315 = arith.mulf %313, %314 : vector<16x128xf32>
    %316 = arith.addf %300, %315 : vector<16x128xf32>
    %317 = vector.broadcast %83 : f32 to vector<16x128xf32>
    %318 = arith.mulf %313, %317 : vector<16x128xf32>
    %319 = arith.addf %303, %318 : vector<16x128xf32>
    %320 = vector.broadcast %119 : f32 to vector<16x128xf32>
    %321 = arith.mulf %313, %320 : vector<16x128xf32>
    %322 = arith.addf %306, %321 : vector<16x128xf32>
    %323 = vector.broadcast %155 : f32 to vector<16x128xf32>
    %324 = arith.mulf %313, %323 : vector<16x128xf32>
    %325 = arith.addf %309, %324 : vector<16x128xf32>
    %326 = vector.extract_strided_slice %312 {offsets = [2, 0], sizes = [16, 128], strides = [1, 1]} : vector<20x128xf32> to vector<16x128xf32>
    %327 = vector.broadcast %50 : f32 to vector<16x128xf32>
    %328 = arith.mulf %326, %327 : vector<16x128xf32>
    %329 = arith.addf %316, %328 : vector<16x128xf32>
    %330 = vector.broadcast %86 : f32 to vector<16x128xf32>
    %331 = arith.mulf %326, %330 : vector<16x128xf32>
    %332 = arith.addf %319, %331 : vector<16x128xf32>
    %333 = vector.broadcast %122 : f32 to vector<16x128xf32>
    %334 = arith.mulf %326, %333 : vector<16x128xf32>
    %335 = arith.addf %322, %334 : vector<16x128xf32>
    %336 = vector.broadcast %158 : f32 to vector<16x128xf32>
    %337 = arith.mulf %326, %336 : vector<16x128xf32>
    %338 = arith.addf %325, %337 : vector<16x128xf32>
    %339 = vector.extract_strided_slice %312 {offsets = [4, 0], sizes = [16, 128], strides = [1, 1]} : vector<20x128xf32> to vector<16x128xf32>
    %340 = vector.broadcast %53 : f32 to vector<16x128xf32>
    %341 = arith.mulf %339, %340 : vector<16x128xf32>
    %342 = arith.addf %329, %341 : vector<16x128xf32>
    %343 = vector.broadcast %89 : f32 to vector<16x128xf32>
    %344 = arith.mulf %339, %343 : vector<16x128xf32>
    %345 = arith.addf %332, %344 : vector<16x128xf32>
    %346 = vector.broadcast %125 : f32 to vector<16x128xf32>
    %347 = arith.mulf %339, %346 : vector<16x128xf32>
    %348 = arith.addf %335, %347 : vector<16x128xf32>
    %349 = vector.broadcast %161 : f32 to vector<16x128xf32>
    %350 = arith.mulf %339, %349 : vector<16x128xf32>
    %351 = arith.addf %338, %350 : vector<16x128xf32>
    %c1_71 = arith.constant 1 : index
    %c0_72 = arith.constant 0 : index
    %c0_73 = arith.constant 0 : index
    %352 = vector.load %arg7[%c1_71, %c0_72, %c0_73] : memref<4x20x128xf32, #tpu.memory_space<vmem>>, vector<1x20x128xf32>
    %353 = vector.shape_cast %352 : vector<1x20x128xf32> to vector<20x128xf32>
    %c2_i32_74 = arith.constant 2 : i32
    %354 = tpu.dynamic_rotate %353 by %c2_i32_74 dim 1 : vector<20x128xf32>, i32 -> vector<20x128xf32>
    %cst_75 = arith.constant 0.000000e+00 : f32
    %355 = vector.broadcast %cst_75 : f32 to vector<20x128xf32>
    %356 = arith.select %211, %354, %355 : vector<20x128xi1>, vector<20x128xf32>
    %357 = vector.extract_strided_slice %356 {offsets = [0, 0], sizes = [16, 128], strides = [1, 1]} : vector<20x128xf32> to vector<16x128xf32>
    %358 = vector.broadcast %54 : f32 to vector<16x128xf32>
    %359 = arith.mulf %357, %358 : vector<16x128xf32>
    %360 = arith.addf %342, %359 : vector<16x128xf32>
    %361 = vector.broadcast %90 : f32 to vector<16x128xf32>
    %362 = arith.mulf %357, %361 : vector<16x128xf32>
    %363 = arith.addf %345, %362 : vector<16x128xf32>
    %364 = vector.broadcast %126 : f32 to vector<16x128xf32>
    %365 = arith.mulf %357, %364 : vector<16x128xf32>
    %366 = arith.addf %348, %365 : vector<16x128xf32>
    %367 = vector.broadcast %162 : f32 to vector<16x128xf32>
    %368 = arith.mulf %357, %367 : vector<16x128xf32>
    %369 = arith.addf %351, %368 : vector<16x128xf32>
    %370 = vector.extract_strided_slice %356 {offsets = [2, 0], sizes = [16, 128], strides = [1, 1]} : vector<20x128xf32> to vector<16x128xf32>
    %371 = vector.broadcast %57 : f32 to vector<16x128xf32>
    %372 = arith.mulf %370, %371 : vector<16x128xf32>
    %373 = arith.addf %360, %372 : vector<16x128xf32>
    %374 = vector.broadcast %93 : f32 to vector<16x128xf32>
    %375 = arith.mulf %370, %374 : vector<16x128xf32>
    %376 = arith.addf %363, %375 : vector<16x128xf32>
    %377 = vector.broadcast %129 : f32 to vector<16x128xf32>
    %378 = arith.mulf %370, %377 : vector<16x128xf32>
    %379 = arith.addf %366, %378 : vector<16x128xf32>
    %380 = vector.broadcast %165 : f32 to vector<16x128xf32>
    %381 = arith.mulf %370, %380 : vector<16x128xf32>
    %382 = arith.addf %369, %381 : vector<16x128xf32>
    %383 = vector.extract_strided_slice %356 {offsets = [4, 0], sizes = [16, 128], strides = [1, 1]} : vector<20x128xf32> to vector<16x128xf32>
    %384 = vector.broadcast %60 : f32 to vector<16x128xf32>
    %385 = arith.mulf %383, %384 : vector<16x128xf32>
    %386 = arith.addf %373, %385 : vector<16x128xf32>
    %387 = vector.broadcast %96 : f32 to vector<16x128xf32>
    %388 = arith.mulf %383, %387 : vector<16x128xf32>
    %389 = arith.addf %376, %388 : vector<16x128xf32>
    %390 = vector.broadcast %132 : f32 to vector<16x128xf32>
    %391 = arith.mulf %383, %390 : vector<16x128xf32>
    %392 = arith.addf %379, %391 : vector<16x128xf32>
    %393 = vector.broadcast %168 : f32 to vector<16x128xf32>
    %394 = arith.mulf %383, %393 : vector<16x128xf32>
    %395 = arith.addf %382, %394 : vector<16x128xf32>
    %396 = vector.extract_strided_slice %353 {offsets = [0, 0], sizes = [16, 128], strides = [1, 1]} : vector<20x128xf32> to vector<16x128xf32>
    %397 = vector.broadcast %55 : f32 to vector<16x128xf32>
    %398 = arith.mulf %396, %397 : vector<16x128xf32>
    %399 = arith.addf %386, %398 : vector<16x128xf32>
    %400 = vector.broadcast %91 : f32 to vector<16x128xf32>
    %401 = arith.mulf %396, %400 : vector<16x128xf32>
    %402 = arith.addf %389, %401 : vector<16x128xf32>
    %403 = vector.broadcast %127 : f32 to vector<16x128xf32>
    %404 = arith.mulf %396, %403 : vector<16x128xf32>
    %405 = arith.addf %392, %404 : vector<16x128xf32>
    %406 = vector.broadcast %163 : f32 to vector<16x128xf32>
    %407 = arith.mulf %396, %406 : vector<16x128xf32>
    %408 = arith.addf %395, %407 : vector<16x128xf32>
    %409 = vector.extract_strided_slice %353 {offsets = [2, 0], sizes = [16, 128], strides = [1, 1]} : vector<20x128xf32> to vector<16x128xf32>
    %410 = vector.broadcast %58 : f32 to vector<16x128xf32>
    %411 = arith.mulf %409, %410 : vector<16x128xf32>
    %412 = arith.addf %399, %411 : vector<16x128xf32>
    %413 = vector.broadcast %94 : f32 to vector<16x128xf32>
    %414 = arith.mulf %409, %413 : vector<16x128xf32>
    %415 = arith.addf %402, %414 : vector<16x128xf32>
    %416 = vector.broadcast %130 : f32 to vector<16x128xf32>
    %417 = arith.mulf %409, %416 : vector<16x128xf32>
    %418 = arith.addf %405, %417 : vector<16x128xf32>
    %419 = vector.broadcast %166 : f32 to vector<16x128xf32>
    %420 = arith.mulf %409, %419 : vector<16x128xf32>
    %421 = arith.addf %408, %420 : vector<16x128xf32>
    %422 = vector.extract_strided_slice %353 {offsets = [4, 0], sizes = [16, 128], strides = [1, 1]} : vector<20x128xf32> to vector<16x128xf32>
    %423 = vector.broadcast %61 : f32 to vector<16x128xf32>
    %424 = arith.mulf %422, %423 : vector<16x128xf32>
    %425 = arith.addf %412, %424 : vector<16x128xf32>
    %426 = vector.broadcast %97 : f32 to vector<16x128xf32>
    %427 = arith.mulf %422, %426 : vector<16x128xf32>
    %428 = arith.addf %415, %427 : vector<16x128xf32>
    %429 = vector.broadcast %133 : f32 to vector<16x128xf32>
    %430 = arith.mulf %422, %429 : vector<16x128xf32>
    %431 = arith.addf %418, %430 : vector<16x128xf32>
    %432 = vector.broadcast %169 : f32 to vector<16x128xf32>
    %433 = arith.mulf %422, %432 : vector<16x128xf32>
    %434 = arith.addf %421, %433 : vector<16x128xf32>
    %c126_i32_76 = arith.constant 126 : i32
    %435 = tpu.dynamic_rotate %353 by %c126_i32_76 dim 1 : vector<20x128xf32>, i32 -> vector<20x128xf32>
    %cst_77 = arith.constant 0.000000e+00 : f32
    %436 = vector.broadcast %cst_77 : f32 to vector<20x128xf32>
    %437 = arith.select %230, %435, %436 : vector<20x128xi1>, vector<20x128xf32>
    %438 = vector.extract_strided_slice %437 {offsets = [0, 0], sizes = [16, 128], strides = [1, 1]} : vector<20x128xf32> to vector<16x128xf32>
    %439 = vector.broadcast %56 : f32 to vector<16x128xf32>
    %440 = arith.mulf %438, %439 : vector<16x128xf32>
    %441 = arith.addf %425, %440 : vector<16x128xf32>
    %442 = vector.broadcast %92 : f32 to vector<16x128xf32>
    %443 = arith.mulf %438, %442 : vector<16x128xf32>
    %444 = arith.addf %428, %443 : vector<16x128xf32>
    %445 = vector.broadcast %128 : f32 to vector<16x128xf32>
    %446 = arith.mulf %438, %445 : vector<16x128xf32>
    %447 = arith.addf %431, %446 : vector<16x128xf32>
    %448 = vector.broadcast %164 : f32 to vector<16x128xf32>
    %449 = arith.mulf %438, %448 : vector<16x128xf32>
    %450 = arith.addf %434, %449 : vector<16x128xf32>
    %451 = vector.extract_strided_slice %437 {offsets = [2, 0], sizes = [16, 128], strides = [1, 1]} : vector<20x128xf32> to vector<16x128xf32>
    %452 = vector.broadcast %59 : f32 to vector<16x128xf32>
    %453 = arith.mulf %451, %452 : vector<16x128xf32>
    %454 = arith.addf %441, %453 : vector<16x128xf32>
    %455 = vector.broadcast %95 : f32 to vector<16x128xf32>
    %456 = arith.mulf %451, %455 : vector<16x128xf32>
    %457 = arith.addf %444, %456 : vector<16x128xf32>
    %458 = vector.broadcast %131 : f32 to vector<16x128xf32>
    %459 = arith.mulf %451, %458 : vector<16x128xf32>
    %460 = arith.addf %447, %459 : vector<16x128xf32>
    %461 = vector.broadcast %167 : f32 to vector<16x128xf32>
    %462 = arith.mulf %451, %461 : vector<16x128xf32>
    %463 = arith.addf %450, %462 : vector<16x128xf32>
    %464 = vector.extract_strided_slice %437 {offsets = [4, 0], sizes = [16, 128], strides = [1, 1]} : vector<20x128xf32> to vector<16x128xf32>
    %465 = vector.broadcast %62 : f32 to vector<16x128xf32>
    %466 = arith.mulf %464, %465 : vector<16x128xf32>
    %467 = arith.addf %454, %466 : vector<16x128xf32>
    %468 = vector.broadcast %98 : f32 to vector<16x128xf32>
    %469 = arith.mulf %464, %468 : vector<16x128xf32>
    %470 = arith.addf %457, %469 : vector<16x128xf32>
    %471 = vector.broadcast %134 : f32 to vector<16x128xf32>
    %472 = arith.mulf %464, %471 : vector<16x128xf32>
    %473 = arith.addf %460, %472 : vector<16x128xf32>
    %474 = vector.broadcast %170 : f32 to vector<16x128xf32>
    %475 = arith.mulf %464, %474 : vector<16x128xf32>
    %476 = arith.addf %463, %475 : vector<16x128xf32>
    %c2_78 = arith.constant 2 : index
    %c0_79 = arith.constant 0 : index
    %c0_80 = arith.constant 0 : index
    %477 = vector.load %arg7[%c2_78, %c0_79, %c0_80] : memref<4x20x128xf32, #tpu.memory_space<vmem>>, vector<1x20x128xf32>
    %478 = vector.shape_cast %477 : vector<1x20x128xf32> to vector<20x128xf32>
    %c2_i32_81 = arith.constant 2 : i32
    %479 = tpu.dynamic_rotate %478 by %c2_i32_81 dim 1 : vector<20x128xf32>, i32 -> vector<20x128xf32>
    %cst_82 = arith.constant 0.000000e+00 : f32
    %480 = vector.broadcast %cst_82 : f32 to vector<20x128xf32>
    %481 = arith.select %211, %479, %480 : vector<20x128xi1>, vector<20x128xf32>
    %482 = vector.extract_strided_slice %481 {offsets = [0, 0], sizes = [16, 128], strides = [1, 1]} : vector<20x128xf32> to vector<16x128xf32>
    %483 = vector.broadcast %63 : f32 to vector<16x128xf32>
    %484 = arith.mulf %482, %483 : vector<16x128xf32>
    %485 = arith.addf %467, %484 : vector<16x128xf32>
    %486 = vector.broadcast %99 : f32 to vector<16x128xf32>
    %487 = arith.mulf %482, %486 : vector<16x128xf32>
    %488 = arith.addf %470, %487 : vector<16x128xf32>
    %489 = vector.broadcast %135 : f32 to vector<16x128xf32>
    %490 = arith.mulf %482, %489 : vector<16x128xf32>
    %491 = arith.addf %473, %490 : vector<16x128xf32>
    %492 = vector.broadcast %171 : f32 to vector<16x128xf32>
    %493 = arith.mulf %482, %492 : vector<16x128xf32>
    %494 = arith.addf %476, %493 : vector<16x128xf32>
    %495 = vector.extract_strided_slice %481 {offsets = [2, 0], sizes = [16, 128], strides = [1, 1]} : vector<20x128xf32> to vector<16x128xf32>
    %496 = vector.broadcast %66 : f32 to vector<16x128xf32>
    %497 = arith.mulf %495, %496 : vector<16x128xf32>
    %498 = arith.addf %485, %497 : vector<16x128xf32>
    %499 = vector.broadcast %102 : f32 to vector<16x128xf32>
    %500 = arith.mulf %495, %499 : vector<16x128xf32>
    %501 = arith.addf %488, %500 : vector<16x128xf32>
    %502 = vector.broadcast %138 : f32 to vector<16x128xf32>
    %503 = arith.mulf %495, %502 : vector<16x128xf32>
    %504 = arith.addf %491, %503 : vector<16x128xf32>
    %505 = vector.broadcast %174 : f32 to vector<16x128xf32>
    %506 = arith.mulf %495, %505 : vector<16x128xf32>
    %507 = arith.addf %494, %506 : vector<16x128xf32>
    %508 = vector.extract_strided_slice %481 {offsets = [4, 0], sizes = [16, 128], strides = [1, 1]} : vector<20x128xf32> to vector<16x128xf32>
    %509 = vector.broadcast %69 : f32 to vector<16x128xf32>
    %510 = arith.mulf %508, %509 : vector<16x128xf32>
    %511 = arith.addf %498, %510 : vector<16x128xf32>
    %512 = vector.broadcast %105 : f32 to vector<16x128xf32>
    %513 = arith.mulf %508, %512 : vector<16x128xf32>
    %514 = arith.addf %501, %513 : vector<16x128xf32>
    %515 = vector.broadcast %141 : f32 to vector<16x128xf32>
    %516 = arith.mulf %508, %515 : vector<16x128xf32>
    %517 = arith.addf %504, %516 : vector<16x128xf32>
    %518 = vector.broadcast %177 : f32 to vector<16x128xf32>
    %519 = arith.mulf %508, %518 : vector<16x128xf32>
    %520 = arith.addf %507, %519 : vector<16x128xf32>
    %521 = vector.extract_strided_slice %478 {offsets = [0, 0], sizes = [16, 128], strides = [1, 1]} : vector<20x128xf32> to vector<16x128xf32>
    %522 = vector.broadcast %64 : f32 to vector<16x128xf32>
    %523 = arith.mulf %521, %522 : vector<16x128xf32>
    %524 = arith.addf %511, %523 : vector<16x128xf32>
    %525 = vector.broadcast %100 : f32 to vector<16x128xf32>
    %526 = arith.mulf %521, %525 : vector<16x128xf32>
    %527 = arith.addf %514, %526 : vector<16x128xf32>
    %528 = vector.broadcast %136 : f32 to vector<16x128xf32>
    %529 = arith.mulf %521, %528 : vector<16x128xf32>
    %530 = arith.addf %517, %529 : vector<16x128xf32>
    %531 = vector.broadcast %172 : f32 to vector<16x128xf32>
    %532 = arith.mulf %521, %531 : vector<16x128xf32>
    %533 = arith.addf %520, %532 : vector<16x128xf32>
    %534 = vector.extract_strided_slice %478 {offsets = [2, 0], sizes = [16, 128], strides = [1, 1]} : vector<20x128xf32> to vector<16x128xf32>
    %535 = vector.broadcast %67 : f32 to vector<16x128xf32>
    %536 = arith.mulf %534, %535 : vector<16x128xf32>
    %537 = arith.addf %524, %536 : vector<16x128xf32>
    %538 = vector.broadcast %103 : f32 to vector<16x128xf32>
    %539 = arith.mulf %534, %538 : vector<16x128xf32>
    %540 = arith.addf %527, %539 : vector<16x128xf32>
    %541 = vector.broadcast %139 : f32 to vector<16x128xf32>
    %542 = arith.mulf %534, %541 : vector<16x128xf32>
    %543 = arith.addf %530, %542 : vector<16x128xf32>
    %544 = vector.broadcast %175 : f32 to vector<16x128xf32>
    %545 = arith.mulf %534, %544 : vector<16x128xf32>
    %546 = arith.addf %533, %545 : vector<16x128xf32>
    %547 = vector.extract_strided_slice %478 {offsets = [4, 0], sizes = [16, 128], strides = [1, 1]} : vector<20x128xf32> to vector<16x128xf32>
    %548 = vector.broadcast %70 : f32 to vector<16x128xf32>
    %549 = arith.mulf %547, %548 : vector<16x128xf32>
    %550 = arith.addf %537, %549 : vector<16x128xf32>
    %551 = vector.broadcast %106 : f32 to vector<16x128xf32>
    %552 = arith.mulf %547, %551 : vector<16x128xf32>
    %553 = arith.addf %540, %552 : vector<16x128xf32>
    %554 = vector.broadcast %142 : f32 to vector<16x128xf32>
    %555 = arith.mulf %547, %554 : vector<16x128xf32>
    %556 = arith.addf %543, %555 : vector<16x128xf32>
    %557 = vector.broadcast %178 : f32 to vector<16x128xf32>
    %558 = arith.mulf %547, %557 : vector<16x128xf32>
    %559 = arith.addf %546, %558 : vector<16x128xf32>
    %c126_i32_83 = arith.constant 126 : i32
    %560 = tpu.dynamic_rotate %478 by %c126_i32_83 dim 1 : vector<20x128xf32>, i32 -> vector<20x128xf32>
    %cst_84 = arith.constant 0.000000e+00 : f32
    %561 = vector.broadcast %cst_84 : f32 to vector<20x128xf32>
    %562 = arith.select %230, %560, %561 : vector<20x128xi1>, vector<20x128xf32>
    %563 = vector.extract_strided_slice %562 {offsets = [0, 0], sizes = [16, 128], strides = [1, 1]} : vector<20x128xf32> to vector<16x128xf32>
    %564 = vector.broadcast %65 : f32 to vector<16x128xf32>
    %565 = arith.mulf %563, %564 : vector<16x128xf32>
    %566 = arith.addf %550, %565 : vector<16x128xf32>
    %567 = vector.broadcast %101 : f32 to vector<16x128xf32>
    %568 = arith.mulf %563, %567 : vector<16x128xf32>
    %569 = arith.addf %553, %568 : vector<16x128xf32>
    %570 = vector.broadcast %137 : f32 to vector<16x128xf32>
    %571 = arith.mulf %563, %570 : vector<16x128xf32>
    %572 = arith.addf %556, %571 : vector<16x128xf32>
    %573 = vector.broadcast %173 : f32 to vector<16x128xf32>
    %574 = arith.mulf %563, %573 : vector<16x128xf32>
    %575 = arith.addf %559, %574 : vector<16x128xf32>
    %576 = vector.extract_strided_slice %562 {offsets = [2, 0], sizes = [16, 128], strides = [1, 1]} : vector<20x128xf32> to vector<16x128xf32>
    %577 = vector.broadcast %68 : f32 to vector<16x128xf32>
    %578 = arith.mulf %576, %577 : vector<16x128xf32>
    %579 = arith.addf %566, %578 : vector<16x128xf32>
    %580 = vector.broadcast %104 : f32 to vector<16x128xf32>
    %581 = arith.mulf %576, %580 : vector<16x128xf32>
    %582 = arith.addf %569, %581 : vector<16x128xf32>
    %583 = vector.broadcast %140 : f32 to vector<16x128xf32>
    %584 = arith.mulf %576, %583 : vector<16x128xf32>
    %585 = arith.addf %572, %584 : vector<16x128xf32>
    %586 = vector.broadcast %176 : f32 to vector<16x128xf32>
    %587 = arith.mulf %576, %586 : vector<16x128xf32>
    %588 = arith.addf %575, %587 : vector<16x128xf32>
    %589 = vector.extract_strided_slice %562 {offsets = [4, 0], sizes = [16, 128], strides = [1, 1]} : vector<20x128xf32> to vector<16x128xf32>
    %590 = vector.broadcast %71 : f32 to vector<16x128xf32>
    %591 = arith.mulf %589, %590 : vector<16x128xf32>
    %592 = arith.addf %579, %591 : vector<16x128xf32>
    %593 = vector.broadcast %107 : f32 to vector<16x128xf32>
    %594 = arith.mulf %589, %593 : vector<16x128xf32>
    %595 = arith.addf %582, %594 : vector<16x128xf32>
    %596 = vector.broadcast %143 : f32 to vector<16x128xf32>
    %597 = arith.mulf %589, %596 : vector<16x128xf32>
    %598 = arith.addf %585, %597 : vector<16x128xf32>
    %599 = vector.broadcast %179 : f32 to vector<16x128xf32>
    %600 = arith.mulf %589, %599 : vector<16x128xf32>
    %601 = arith.addf %588, %600 : vector<16x128xf32>
    %c3_85 = arith.constant 3 : index
    %c0_86 = arith.constant 0 : index
    %c0_87 = arith.constant 0 : index
    %602 = vector.load %arg7[%c3_85, %c0_86, %c0_87] : memref<4x20x128xf32, #tpu.memory_space<vmem>>, vector<1x20x128xf32>
    %603 = vector.shape_cast %602 : vector<1x20x128xf32> to vector<20x128xf32>
    %c2_i32_88 = arith.constant 2 : i32
    %604 = tpu.dynamic_rotate %603 by %c2_i32_88 dim 1 : vector<20x128xf32>, i32 -> vector<20x128xf32>
    %cst_89 = arith.constant 0.000000e+00 : f32
    %605 = vector.broadcast %cst_89 : f32 to vector<20x128xf32>
    %606 = arith.select %211, %604, %605 : vector<20x128xi1>, vector<20x128xf32>
    %607 = vector.extract_strided_slice %606 {offsets = [0, 0], sizes = [16, 128], strides = [1, 1]} : vector<20x128xf32> to vector<16x128xf32>
    %608 = vector.broadcast %72 : f32 to vector<16x128xf32>
    %609 = arith.mulf %607, %608 : vector<16x128xf32>
    %610 = arith.addf %592, %609 : vector<16x128xf32>
    %611 = vector.broadcast %108 : f32 to vector<16x128xf32>
    %612 = arith.mulf %607, %611 : vector<16x128xf32>
    %613 = arith.addf %595, %612 : vector<16x128xf32>
    %614 = vector.broadcast %144 : f32 to vector<16x128xf32>
    %615 = arith.mulf %607, %614 : vector<16x128xf32>
    %616 = arith.addf %598, %615 : vector<16x128xf32>
    %617 = vector.broadcast %180 : f32 to vector<16x128xf32>
    %618 = arith.mulf %607, %617 : vector<16x128xf32>
    %619 = arith.addf %601, %618 : vector<16x128xf32>
    %620 = vector.extract_strided_slice %606 {offsets = [2, 0], sizes = [16, 128], strides = [1, 1]} : vector<20x128xf32> to vector<16x128xf32>
    %621 = vector.broadcast %75 : f32 to vector<16x128xf32>
    %622 = arith.mulf %620, %621 : vector<16x128xf32>
    %623 = arith.addf %610, %622 : vector<16x128xf32>
    %624 = vector.broadcast %111 : f32 to vector<16x128xf32>
    %625 = arith.mulf %620, %624 : vector<16x128xf32>
    %626 = arith.addf %613, %625 : vector<16x128xf32>
    %627 = vector.broadcast %147 : f32 to vector<16x128xf32>
    %628 = arith.mulf %620, %627 : vector<16x128xf32>
    %629 = arith.addf %616, %628 : vector<16x128xf32>
    %630 = vector.broadcast %183 : f32 to vector<16x128xf32>
    %631 = arith.mulf %620, %630 : vector<16x128xf32>
    %632 = arith.addf %619, %631 : vector<16x128xf32>
    %633 = vector.extract_strided_slice %606 {offsets = [4, 0], sizes = [16, 128], strides = [1, 1]} : vector<20x128xf32> to vector<16x128xf32>
    %634 = vector.broadcast %78 : f32 to vector<16x128xf32>
    %635 = arith.mulf %633, %634 : vector<16x128xf32>
    %636 = arith.addf %623, %635 : vector<16x128xf32>
    %637 = vector.broadcast %114 : f32 to vector<16x128xf32>
    %638 = arith.mulf %633, %637 : vector<16x128xf32>
    %639 = arith.addf %626, %638 : vector<16x128xf32>
    %640 = vector.broadcast %150 : f32 to vector<16x128xf32>
    %641 = arith.mulf %633, %640 : vector<16x128xf32>
    %642 = arith.addf %629, %641 : vector<16x128xf32>
    %643 = vector.broadcast %186 : f32 to vector<16x128xf32>
    %644 = arith.mulf %633, %643 : vector<16x128xf32>
    %645 = arith.addf %632, %644 : vector<16x128xf32>
    %646 = vector.extract_strided_slice %603 {offsets = [0, 0], sizes = [16, 128], strides = [1, 1]} : vector<20x128xf32> to vector<16x128xf32>
    %647 = vector.broadcast %73 : f32 to vector<16x128xf32>
    %648 = arith.mulf %646, %647 : vector<16x128xf32>
    %649 = arith.addf %636, %648 : vector<16x128xf32>
    %650 = vector.broadcast %109 : f32 to vector<16x128xf32>
    %651 = arith.mulf %646, %650 : vector<16x128xf32>
    %652 = arith.addf %639, %651 : vector<16x128xf32>
    %653 = vector.broadcast %145 : f32 to vector<16x128xf32>
    %654 = arith.mulf %646, %653 : vector<16x128xf32>
    %655 = arith.addf %642, %654 : vector<16x128xf32>
    %656 = vector.broadcast %181 : f32 to vector<16x128xf32>
    %657 = arith.mulf %646, %656 : vector<16x128xf32>
    %658 = arith.addf %645, %657 : vector<16x128xf32>
    %659 = vector.extract_strided_slice %603 {offsets = [2, 0], sizes = [16, 128], strides = [1, 1]} : vector<20x128xf32> to vector<16x128xf32>
    %660 = vector.broadcast %76 : f32 to vector<16x128xf32>
    %661 = arith.mulf %659, %660 : vector<16x128xf32>
    %662 = arith.addf %649, %661 : vector<16x128xf32>
    %663 = vector.broadcast %112 : f32 to vector<16x128xf32>
    %664 = arith.mulf %659, %663 : vector<16x128xf32>
    %665 = arith.addf %652, %664 : vector<16x128xf32>
    %666 = vector.broadcast %148 : f32 to vector<16x128xf32>
    %667 = arith.mulf %659, %666 : vector<16x128xf32>
    %668 = arith.addf %655, %667 : vector<16x128xf32>
    %669 = vector.broadcast %184 : f32 to vector<16x128xf32>
    %670 = arith.mulf %659, %669 : vector<16x128xf32>
    %671 = arith.addf %658, %670 : vector<16x128xf32>
    %672 = vector.extract_strided_slice %603 {offsets = [4, 0], sizes = [16, 128], strides = [1, 1]} : vector<20x128xf32> to vector<16x128xf32>
    %673 = vector.broadcast %79 : f32 to vector<16x128xf32>
    %674 = arith.mulf %672, %673 : vector<16x128xf32>
    %675 = arith.addf %662, %674 : vector<16x128xf32>
    %676 = vector.broadcast %115 : f32 to vector<16x128xf32>
    %677 = arith.mulf %672, %676 : vector<16x128xf32>
    %678 = arith.addf %665, %677 : vector<16x128xf32>
    %679 = vector.broadcast %151 : f32 to vector<16x128xf32>
    %680 = arith.mulf %672, %679 : vector<16x128xf32>
    %681 = arith.addf %668, %680 : vector<16x128xf32>
    %682 = vector.broadcast %187 : f32 to vector<16x128xf32>
    %683 = arith.mulf %672, %682 : vector<16x128xf32>
    %684 = arith.addf %671, %683 : vector<16x128xf32>
    %c126_i32_90 = arith.constant 126 : i32
    %685 = tpu.dynamic_rotate %603 by %c126_i32_90 dim 1 : vector<20x128xf32>, i32 -> vector<20x128xf32>
    %cst_91 = arith.constant 0.000000e+00 : f32
    %686 = vector.broadcast %cst_91 : f32 to vector<20x128xf32>
    %687 = arith.select %230, %685, %686 : vector<20x128xi1>, vector<20x128xf32>
    %688 = vector.extract_strided_slice %687 {offsets = [0, 0], sizes = [16, 128], strides = [1, 1]} : vector<20x128xf32> to vector<16x128xf32>
    %689 = vector.broadcast %74 : f32 to vector<16x128xf32>
    %690 = arith.mulf %688, %689 : vector<16x128xf32>
    %691 = arith.addf %675, %690 : vector<16x128xf32>
    %692 = vector.broadcast %110 : f32 to vector<16x128xf32>
    %693 = arith.mulf %688, %692 : vector<16x128xf32>
    %694 = arith.addf %678, %693 : vector<16x128xf32>
    %695 = vector.broadcast %146 : f32 to vector<16x128xf32>
    %696 = arith.mulf %688, %695 : vector<16x128xf32>
    %697 = arith.addf %681, %696 : vector<16x128xf32>
    %698 = vector.broadcast %182 : f32 to vector<16x128xf32>
    %699 = arith.mulf %688, %698 : vector<16x128xf32>
    %700 = arith.addf %684, %699 : vector<16x128xf32>
    %701 = vector.extract_strided_slice %687 {offsets = [2, 0], sizes = [16, 128], strides = [1, 1]} : vector<20x128xf32> to vector<16x128xf32>
    %702 = vector.broadcast %77 : f32 to vector<16x128xf32>
    %703 = arith.mulf %701, %702 : vector<16x128xf32>
    %704 = arith.addf %691, %703 : vector<16x128xf32>
    %705 = vector.broadcast %113 : f32 to vector<16x128xf32>
    %706 = arith.mulf %701, %705 : vector<16x128xf32>
    %707 = arith.addf %694, %706 : vector<16x128xf32>
    %708 = vector.broadcast %149 : f32 to vector<16x128xf32>
    %709 = arith.mulf %701, %708 : vector<16x128xf32>
    %710 = arith.addf %697, %709 : vector<16x128xf32>
    %711 = vector.broadcast %185 : f32 to vector<16x128xf32>
    %712 = arith.mulf %701, %711 : vector<16x128xf32>
    %713 = arith.addf %700, %712 : vector<16x128xf32>
    %714 = vector.extract_strided_slice %687 {offsets = [4, 0], sizes = [16, 128], strides = [1, 1]} : vector<20x128xf32> to vector<16x128xf32>
    %715 = vector.broadcast %80 : f32 to vector<16x128xf32>
    %716 = arith.mulf %714, %715 : vector<16x128xf32>
    %717 = arith.addf %704, %716 : vector<16x128xf32>
    %718 = vector.broadcast %116 : f32 to vector<16x128xf32>
    %719 = arith.mulf %714, %718 : vector<16x128xf32>
    %720 = arith.addf %707, %719 : vector<16x128xf32>
    %721 = vector.broadcast %152 : f32 to vector<16x128xf32>
    %722 = arith.mulf %714, %721 : vector<16x128xf32>
    %723 = arith.addf %710, %722 : vector<16x128xf32>
    %724 = vector.broadcast %188 : f32 to vector<16x128xf32>
    %725 = arith.mulf %714, %724 : vector<16x128xf32>
    %726 = arith.addf %713, %725 : vector<16x128xf32>
    %727 = vector.broadcast %189 : f32 to vector<16x128xf32>
    %728 = arith.addf %717, %727 : vector<16x128xf32>
    %cst_92 = arith.constant 0.000000e+00 : f32
    %729 = vector.broadcast %cst_92 : f32 to vector<16x128xf32>
    %730 = arith.maximumf %728, %729 : vector<16x128xf32>
    %731 = vector.broadcast %190 : f32 to vector<16x128xf32>
    %732 = arith.addf %720, %731 : vector<16x128xf32>
    %cst_93 = arith.constant 0.000000e+00 : f32
    %733 = vector.broadcast %cst_93 : f32 to vector<16x128xf32>
    %734 = arith.maximumf %732, %733 : vector<16x128xf32>
    %735 = vector.broadcast %191 : f32 to vector<16x128xf32>
    %736 = arith.addf %723, %735 : vector<16x128xf32>
    %cst_94 = arith.constant 0.000000e+00 : f32
    %737 = vector.broadcast %cst_94 : f32 to vector<16x128xf32>
    %738 = arith.maximumf %736, %737 : vector<16x128xf32>
    %739 = vector.broadcast %192 : f32 to vector<16x128xf32>
    %740 = arith.addf %726, %739 : vector<16x128xf32>
    %cst_95 = arith.constant 0.000000e+00 : f32
    %741 = vector.broadcast %cst_95 : f32 to vector<16x128xf32>
    %742 = arith.maximumf %740, %741 : vector<16x128xf32>
    %cst_96 = arith.constant 0.000000e+00 : f32
    %743 = vector.broadcast %cst_96 : f32 to vector<1x128xf32>
    %c0_97 = arith.constant 0 : index
    %c0_98 = arith.constant 0 : index
    %c0_99 = arith.constant 0 : index
    %744 = vector.load %arg8[%c0_97, %c0_98, %c0_99] : memref<4x18x128xf32, #tpu.memory_space<vmem>>, vector<1x1x128xf32>
    %745 = vector.shape_cast %744 : vector<1x1x128xf32> to vector<1x128xf32>
    %746 = vector.shape_cast %743 : vector<1x128xf32> to vector<1x1x128xf32>
    tpu.vector_store %arg8[%c0_97, %c0_98, %c0_99], %746 {strides = array<i32>} : memref<4x18x128xf32, #tpu.memory_space<vmem>>, vector<1x1x128xf32>,
    %c0_100 = arith.constant 0 : index
    %c17_101 = arith.constant 17 : index
    %c0_102 = arith.constant 0 : index
    %747 = vector.load %arg8[%c0_100, %c17_101, %c0_102] : memref<4x18x128xf32, #tpu.memory_space<vmem>>, vector<1x1x128xf32>
    %748 = vector.shape_cast %747 : vector<1x1x128xf32> to vector<1x128xf32>
    %749 = vector.shape_cast %743 : vector<1x128xf32> to vector<1x1x128xf32>
    tpu.vector_store %arg8[%c0_100, %c17_101, %c0_102], %749 {strides = array<i32>} : memref<4x18x128xf32, #tpu.memory_space<vmem>>, vector<1x1x128xf32>,
    %c0_103 = arith.constant 0 : index
    %c1_104 = arith.constant 1 : index
    %c0_105 = arith.constant 0 : index
    %750 = vector.load %arg8[%c0_103, %c1_104, %c0_105] : memref<4x18x128xf32, #tpu.memory_space<vmem>>, vector<1x16x128xf32>
    %751 = vector.shape_cast %750 : vector<1x16x128xf32> to vector<16x128xf32>
    %752 = vector.shape_cast %730 : vector<16x128xf32> to vector<1x16x128xf32>
    tpu.vector_store %arg8[%c0_103, %c1_104, %c0_105], %752 {strides = array<i32>} : memref<4x18x128xf32, #tpu.memory_space<vmem>>, vector<1x16x128xf32>,
    %c1_106 = arith.constant 1 : index
    %c0_107 = arith.constant 0 : index
    %c0_108 = arith.constant 0 : index
    %753 = vector.load %arg8[%c1_106, %c0_107, %c0_108] : memref<4x18x128xf32, #tpu.memory_space<vmem>>, vector<1x1x128xf32>
    %754 = vector.shape_cast %753 : vector<1x1x128xf32> to vector<1x128xf32>
    %755 = vector.shape_cast %743 : vector<1x128xf32> to vector<1x1x128xf32>
    tpu.vector_store %arg8[%c1_106, %c0_107, %c0_108], %755 {strides = array<i32>} : memref<4x18x128xf32, #tpu.memory_space<vmem>>, vector<1x1x128xf32>,
    %c1_109 = arith.constant 1 : index
    %c17_110 = arith.constant 17 : index
    %c0_111 = arith.constant 0 : index
    %756 = vector.load %arg8[%c1_109, %c17_110, %c0_111] : memref<4x18x128xf32, #tpu.memory_space<vmem>>, vector<1x1x128xf32>
    %757 = vector.shape_cast %756 : vector<1x1x128xf32> to vector<1x128xf32>
    %758 = vector.shape_cast %743 : vector<1x128xf32> to vector<1x1x128xf32>
    tpu.vector_store %arg8[%c1_109, %c17_110, %c0_111], %758 {strides = array<i32>} : memref<4x18x128xf32, #tpu.memory_space<vmem>>, vector<1x1x128xf32>,
    %c1_112 = arith.constant 1 : index
    %c1_113 = arith.constant 1 : index
    %c0_114 = arith.constant 0 : index
    %759 = vector.load %arg8[%c1_112, %c1_113, %c0_114] : memref<4x18x128xf32, #tpu.memory_space<vmem>>, vector<1x16x128xf32>
    %760 = vector.shape_cast %759 : vector<1x16x128xf32> to vector<16x128xf32>
    %761 = vector.shape_cast %734 : vector<16x128xf32> to vector<1x16x128xf32>
    tpu.vector_store %arg8[%c1_112, %c1_113, %c0_114], %761 {strides = array<i32>} : memref<4x18x128xf32, #tpu.memory_space<vmem>>, vector<1x16x128xf32>,
    %c2_115 = arith.constant 2 : index
    %c0_116 = arith.constant 0 : index
    %c0_117 = arith.constant 0 : index
    %762 = vector.load %arg8[%c2_115, %c0_116, %c0_117] : memref<4x18x128xf32, #tpu.memory_space<vmem>>, vector<1x1x128xf32>
    %763 = vector.shape_cast %762 : vector<1x1x128xf32> to vector<1x128xf32>
    %764 = vector.shape_cast %743 : vector<1x128xf32> to vector<1x1x128xf32>
    tpu.vector_store %arg8[%c2_115, %c0_116, %c0_117], %764 {strides = array<i32>} : memref<4x18x128xf32, #tpu.memory_space<vmem>>, vector<1x1x128xf32>,
    %c2_118 = arith.constant 2 : index
    %c17_119 = arith.constant 17 : index
    %c0_120 = arith.constant 0 : index
    %765 = vector.load %arg8[%c2_118, %c17_119, %c0_120] : memref<4x18x128xf32, #tpu.memory_space<vmem>>, vector<1x1x128xf32>
    %766 = vector.shape_cast %765 : vector<1x1x128xf32> to vector<1x128xf32>
    %767 = vector.shape_cast %743 : vector<1x128xf32> to vector<1x1x128xf32>
    tpu.vector_store %arg8[%c2_118, %c17_119, %c0_120], %767 {strides = array<i32>} : memref<4x18x128xf32, #tpu.memory_space<vmem>>, vector<1x1x128xf32>,
    %c2_121 = arith.constant 2 : index
    %c1_122 = arith.constant 1 : index
    %c0_123 = arith.constant 0 : index
    %768 = vector.load %arg8[%c2_121, %c1_122, %c0_123] : memref<4x18x128xf32, #tpu.memory_space<vmem>>, vector<1x16x128xf32>
    %769 = vector.shape_cast %768 : vector<1x16x128xf32> to vector<16x128xf32>
    %770 = vector.shape_cast %738 : vector<16x128xf32> to vector<1x16x128xf32>
    tpu.vector_store %arg8[%c2_121, %c1_122, %c0_123], %770 {strides = array<i32>} : memref<4x18x128xf32, #tpu.memory_space<vmem>>, vector<1x16x128xf32>,
    %c3_124 = arith.constant 3 : index
    %c0_125 = arith.constant 0 : index
    %c0_126 = arith.constant 0 : index
    %771 = vector.load %arg8[%c3_124, %c0_125, %c0_126] : memref<4x18x128xf32, #tpu.memory_space<vmem>>, vector<1x1x128xf32>
    %772 = vector.shape_cast %771 : vector<1x1x128xf32> to vector<1x128xf32>
    %773 = vector.shape_cast %743 : vector<1x128xf32> to vector<1x1x128xf32>
    tpu.vector_store %arg8[%c3_124, %c0_125, %c0_126], %773 {strides = array<i32>} : memref<4x18x128xf32, #tpu.memory_space<vmem>>, vector<1x1x128xf32>,
    %c3_127 = arith.constant 3 : index
    %c17_128 = arith.constant 17 : index
    %c0_129 = arith.constant 0 : index
    %774 = vector.load %arg8[%c3_127, %c17_128, %c0_129] : memref<4x18x128xf32, #tpu.memory_space<vmem>>, vector<1x1x128xf32>
    %775 = vector.shape_cast %774 : vector<1x1x128xf32> to vector<1x128xf32>
    %776 = vector.shape_cast %743 : vector<1x128xf32> to vector<1x1x128xf32>
    tpu.vector_store %arg8[%c3_127, %c17_128, %c0_129], %776 {strides = array<i32>} : memref<4x18x128xf32, #tpu.memory_space<vmem>>, vector<1x1x128xf32>,
    %c3_130 = arith.constant 3 : index
    %c1_131 = arith.constant 1 : index
    %c0_132 = arith.constant 0 : index
    %777 = vector.load %arg8[%c3_130, %c1_131, %c0_132] : memref<4x18x128xf32, #tpu.memory_space<vmem>>, vector<1x16x128xf32>
    %778 = vector.shape_cast %777 : vector<1x16x128xf32> to vector<16x128xf32>
    %779 = vector.shape_cast %742 : vector<16x128xf32> to vector<1x16x128xf32>
    tpu.vector_store %arg8[%c3_130, %c1_131, %c0_132], %779 {strides = array<i32>} : memref<4x18x128xf32, #tpu.memory_space<vmem>>, vector<1x16x128xf32>,
    %c0_133 = arith.constant 0 : index
    %780 = memref.load %arg4[%c0_133] : memref<144xf32, #tpu.memory_space<smem>>
    %c1_134 = arith.constant 1 : index
    %781 = memref.load %arg4[%c1_134] : memref<144xf32, #tpu.memory_space<smem>>
    %c2_135 = arith.constant 2 : index
    %782 = memref.load %arg4[%c2_135] : memref<144xf32, #tpu.memory_space<smem>>
    %c3_136 = arith.constant 3 : index
    %783 = memref.load %arg4[%c3_136] : memref<144xf32, #tpu.memory_space<smem>>
    %c4_137 = arith.constant 4 : index
    %784 = memref.load %arg4[%c4_137] : memref<144xf32, #tpu.memory_space<smem>>
    %c5_138 = arith.constant 5 : index
    %785 = memref.load %arg4[%c5_138] : memref<144xf32, #tpu.memory_space<smem>>
    %c6_139 = arith.constant 6 : index
    %786 = memref.load %arg4[%c6_139] : memref<144xf32, #tpu.memory_space<smem>>
    %c7_140 = arith.constant 7 : index
    %787 = memref.load %arg4[%c7_140] : memref<144xf32, #tpu.memory_space<smem>>
    %c8_141 = arith.constant 8 : index
    %788 = memref.load %arg4[%c8_141] : memref<144xf32, #tpu.memory_space<smem>>
    %c9_142 = arith.constant 9 : index
    %789 = memref.load %arg4[%c9_142] : memref<144xf32, #tpu.memory_space<smem>>
    %c10_143 = arith.constant 10 : index
    %790 = memref.load %arg4[%c10_143] : memref<144xf32, #tpu.memory_space<smem>>
    %c11_144 = arith.constant 11 : index
    %791 = memref.load %arg4[%c11_144] : memref<144xf32, #tpu.memory_space<smem>>
    %c12_145 = arith.constant 12 : index
    %792 = memref.load %arg4[%c12_145] : memref<144xf32, #tpu.memory_space<smem>>
    %c13_146 = arith.constant 13 : index
    %793 = memref.load %arg4[%c13_146] : memref<144xf32, #tpu.memory_space<smem>>
    %c14_147 = arith.constant 14 : index
    %794 = memref.load %arg4[%c14_147] : memref<144xf32, #tpu.memory_space<smem>>
    %c15_148 = arith.constant 15 : index
    %795 = memref.load %arg4[%c15_148] : memref<144xf32, #tpu.memory_space<smem>>
    %c16_149 = arith.constant 16 : index
    %796 = memref.load %arg4[%c16_149] : memref<144xf32, #tpu.memory_space<smem>>
    %c17_150 = arith.constant 17 : index
    %797 = memref.load %arg4[%c17_150] : memref<144xf32, #tpu.memory_space<smem>>
    %c18_151 = arith.constant 18 : index
    %798 = memref.load %arg4[%c18_151] : memref<144xf32, #tpu.memory_space<smem>>
    %c19_152 = arith.constant 19 : index
    %799 = memref.load %arg4[%c19_152] : memref<144xf32, #tpu.memory_space<smem>>
    %c20_153 = arith.constant 20 : index
    %800 = memref.load %arg4[%c20_153] : memref<144xf32, #tpu.memory_space<smem>>
    %c21_154 = arith.constant 21 : index
    %801 = memref.load %arg4[%c21_154] : memref<144xf32, #tpu.memory_space<smem>>
    %c22_155 = arith.constant 22 : index
    %802 = memref.load %arg4[%c22_155] : memref<144xf32, #tpu.memory_space<smem>>
    %c23_156 = arith.constant 23 : index
    %803 = memref.load %arg4[%c23_156] : memref<144xf32, #tpu.memory_space<smem>>
    %c24_157 = arith.constant 24 : index
    %804 = memref.load %arg4[%c24_157] : memref<144xf32, #tpu.memory_space<smem>>
    %c25_158 = arith.constant 25 : index
    %805 = memref.load %arg4[%c25_158] : memref<144xf32, #tpu.memory_space<smem>>
    %c26_159 = arith.constant 26 : index
    %806 = memref.load %arg4[%c26_159] : memref<144xf32, #tpu.memory_space<smem>>
    %c27_160 = arith.constant 27 : index
    %807 = memref.load %arg4[%c27_160] : memref<144xf32, #tpu.memory_space<smem>>
    %c28_161 = arith.constant 28 : index
    %808 = memref.load %arg4[%c28_161] : memref<144xf32, #tpu.memory_space<smem>>
    %c29_162 = arith.constant 29 : index
    %809 = memref.load %arg4[%c29_162] : memref<144xf32, #tpu.memory_space<smem>>
    %c30_163 = arith.constant 30 : index
    %810 = memref.load %arg4[%c30_163] : memref<144xf32, #tpu.memory_space<smem>>
    %c31_164 = arith.constant 31 : index
    %811 = memref.load %arg4[%c31_164] : memref<144xf32, #tpu.memory_space<smem>>
    %c32_165 = arith.constant 32 : index
    %812 = memref.load %arg4[%c32_165] : memref<144xf32, #tpu.memory_space<smem>>
    %c33_166 = arith.constant 33 : index
    %813 = memref.load %arg4[%c33_166] : memref<144xf32, #tpu.memory_space<smem>>
    %c34_167 = arith.constant 34 : index
    %814 = memref.load %arg4[%c34_167] : memref<144xf32, #tpu.memory_space<smem>>
    %c35_168 = arith.constant 35 : index
    %815 = memref.load %arg4[%c35_168] : memref<144xf32, #tpu.memory_space<smem>>
    %c36_169 = arith.constant 36 : index
    %816 = memref.load %arg4[%c36_169] : memref<144xf32, #tpu.memory_space<smem>>
    %c37_170 = arith.constant 37 : index
    %817 = memref.load %arg4[%c37_170] : memref<144xf32, #tpu.memory_space<smem>>
    %c38_171 = arith.constant 38 : index
    %818 = memref.load %arg4[%c38_171] : memref<144xf32, #tpu.memory_space<smem>>
    %c39_172 = arith.constant 39 : index
    %819 = memref.load %arg4[%c39_172] : memref<144xf32, #tpu.memory_space<smem>>
    %c40_173 = arith.constant 40 : index
    %820 = memref.load %arg4[%c40_173] : memref<144xf32, #tpu.memory_space<smem>>
    %c41_174 = arith.constant 41 : index
    %821 = memref.load %arg4[%c41_174] : memref<144xf32, #tpu.memory_space<smem>>
    %c42_175 = arith.constant 42 : index
    %822 = memref.load %arg4[%c42_175] : memref<144xf32, #tpu.memory_space<smem>>
    %c43_176 = arith.constant 43 : index
    %823 = memref.load %arg4[%c43_176] : memref<144xf32, #tpu.memory_space<smem>>
    %c44_177 = arith.constant 44 : index
    %824 = memref.load %arg4[%c44_177] : memref<144xf32, #tpu.memory_space<smem>>
    %c45_178 = arith.constant 45 : index
    %825 = memref.load %arg4[%c45_178] : memref<144xf32, #tpu.memory_space<smem>>
    %c46_179 = arith.constant 46 : index
    %826 = memref.load %arg4[%c46_179] : memref<144xf32, #tpu.memory_space<smem>>
    %c47_180 = arith.constant 47 : index
    %827 = memref.load %arg4[%c47_180] : memref<144xf32, #tpu.memory_space<smem>>
    %c48_181 = arith.constant 48 : index
    %828 = memref.load %arg4[%c48_181] : memref<144xf32, #tpu.memory_space<smem>>
    %c49_182 = arith.constant 49 : index
    %829 = memref.load %arg4[%c49_182] : memref<144xf32, #tpu.memory_space<smem>>
    %c50_183 = arith.constant 50 : index
    %830 = memref.load %arg4[%c50_183] : memref<144xf32, #tpu.memory_space<smem>>
    %c51_184 = arith.constant 51 : index
    %831 = memref.load %arg4[%c51_184] : memref<144xf32, #tpu.memory_space<smem>>
    %c52_185 = arith.constant 52 : index
    %832 = memref.load %arg4[%c52_185] : memref<144xf32, #tpu.memory_space<smem>>
    %c53_186 = arith.constant 53 : index
    %833 = memref.load %arg4[%c53_186] : memref<144xf32, #tpu.memory_space<smem>>
    %c54_187 = arith.constant 54 : index
    %834 = memref.load %arg4[%c54_187] : memref<144xf32, #tpu.memory_space<smem>>
    %c55_188 = arith.constant 55 : index
    %835 = memref.load %arg4[%c55_188] : memref<144xf32, #tpu.memory_space<smem>>
    %c56_189 = arith.constant 56 : index
    %836 = memref.load %arg4[%c56_189] : memref<144xf32, #tpu.memory_space<smem>>
    %c57_190 = arith.constant 57 : index
    %837 = memref.load %arg4[%c57_190] : memref<144xf32, #tpu.memory_space<smem>>
    %c58_191 = arith.constant 58 : index
    %838 = memref.load %arg4[%c58_191] : memref<144xf32, #tpu.memory_space<smem>>
    %c59_192 = arith.constant 59 : index
    %839 = memref.load %arg4[%c59_192] : memref<144xf32, #tpu.memory_space<smem>>
    %c60_193 = arith.constant 60 : index
    %840 = memref.load %arg4[%c60_193] : memref<144xf32, #tpu.memory_space<smem>>
    %c61_194 = arith.constant 61 : index
    %841 = memref.load %arg4[%c61_194] : memref<144xf32, #tpu.memory_space<smem>>
    %c62_195 = arith.constant 62 : index
    %842 = memref.load %arg4[%c62_195] : memref<144xf32, #tpu.memory_space<smem>>
    %c63_196 = arith.constant 63 : index
    %843 = memref.load %arg4[%c63_196] : memref<144xf32, #tpu.memory_space<smem>>
    %c64_197 = arith.constant 64 : index
    %844 = memref.load %arg4[%c64_197] : memref<144xf32, #tpu.memory_space<smem>>
    %c65_198 = arith.constant 65 : index
    %845 = memref.load %arg4[%c65_198] : memref<144xf32, #tpu.memory_space<smem>>
    %c66_199 = arith.constant 66 : index
    %846 = memref.load %arg4[%c66_199] : memref<144xf32, #tpu.memory_space<smem>>
    %c67_200 = arith.constant 67 : index
    %847 = memref.load %arg4[%c67_200] : memref<144xf32, #tpu.memory_space<smem>>
    %c68_201 = arith.constant 68 : index
    %848 = memref.load %arg4[%c68_201] : memref<144xf32, #tpu.memory_space<smem>>
    %c69_202 = arith.constant 69 : index
    %849 = memref.load %arg4[%c69_202] : memref<144xf32, #tpu.memory_space<smem>>
    %c70_203 = arith.constant 70 : index
    %850 = memref.load %arg4[%c70_203] : memref<144xf32, #tpu.memory_space<smem>>
    %c71_204 = arith.constant 71 : index
    %851 = memref.load %arg4[%c71_204] : memref<144xf32, #tpu.memory_space<smem>>
    %c72_205 = arith.constant 72 : index
    %852 = memref.load %arg4[%c72_205] : memref<144xf32, #tpu.memory_space<smem>>
    %c73_206 = arith.constant 73 : index
    %853 = memref.load %arg4[%c73_206] : memref<144xf32, #tpu.memory_space<smem>>
    %c74_207 = arith.constant 74 : index
    %854 = memref.load %arg4[%c74_207] : memref<144xf32, #tpu.memory_space<smem>>
    %c75_208 = arith.constant 75 : index
    %855 = memref.load %arg4[%c75_208] : memref<144xf32, #tpu.memory_space<smem>>
    %c76_209 = arith.constant 76 : index
    %856 = memref.load %arg4[%c76_209] : memref<144xf32, #tpu.memory_space<smem>>
    %c77_210 = arith.constant 77 : index
    %857 = memref.load %arg4[%c77_210] : memref<144xf32, #tpu.memory_space<smem>>
    %c78_211 = arith.constant 78 : index
    %858 = memref.load %arg4[%c78_211] : memref<144xf32, #tpu.memory_space<smem>>
    %c79_212 = arith.constant 79 : index
    %859 = memref.load %arg4[%c79_212] : memref<144xf32, #tpu.memory_space<smem>>
    %c80_213 = arith.constant 80 : index
    %860 = memref.load %arg4[%c80_213] : memref<144xf32, #tpu.memory_space<smem>>
    %c81_214 = arith.constant 81 : index
    %861 = memref.load %arg4[%c81_214] : memref<144xf32, #tpu.memory_space<smem>>
    %c82_215 = arith.constant 82 : index
    %862 = memref.load %arg4[%c82_215] : memref<144xf32, #tpu.memory_space<smem>>
    %c83_216 = arith.constant 83 : index
    %863 = memref.load %arg4[%c83_216] : memref<144xf32, #tpu.memory_space<smem>>
    %c84_217 = arith.constant 84 : index
    %864 = memref.load %arg4[%c84_217] : memref<144xf32, #tpu.memory_space<smem>>
    %c85_218 = arith.constant 85 : index
    %865 = memref.load %arg4[%c85_218] : memref<144xf32, #tpu.memory_space<smem>>
    %c86_219 = arith.constant 86 : index
    %866 = memref.load %arg4[%c86_219] : memref<144xf32, #tpu.memory_space<smem>>
    %c87_220 = arith.constant 87 : index
    %867 = memref.load %arg4[%c87_220] : memref<144xf32, #tpu.memory_space<smem>>
    %c88_221 = arith.constant 88 : index
    %868 = memref.load %arg4[%c88_221] : memref<144xf32, #tpu.memory_space<smem>>
    %c89_222 = arith.constant 89 : index
    %869 = memref.load %arg4[%c89_222] : memref<144xf32, #tpu.memory_space<smem>>
    %c90_223 = arith.constant 90 : index
    %870 = memref.load %arg4[%c90_223] : memref<144xf32, #tpu.memory_space<smem>>
    %c91_224 = arith.constant 91 : index
    %871 = memref.load %arg4[%c91_224] : memref<144xf32, #tpu.memory_space<smem>>
    %c92_225 = arith.constant 92 : index
    %872 = memref.load %arg4[%c92_225] : memref<144xf32, #tpu.memory_space<smem>>
    %c93_226 = arith.constant 93 : index
    %873 = memref.load %arg4[%c93_226] : memref<144xf32, #tpu.memory_space<smem>>
    %c94_227 = arith.constant 94 : index
    %874 = memref.load %arg4[%c94_227] : memref<144xf32, #tpu.memory_space<smem>>
    %c95_228 = arith.constant 95 : index
    %875 = memref.load %arg4[%c95_228] : memref<144xf32, #tpu.memory_space<smem>>
    %c96_229 = arith.constant 96 : index
    %876 = memref.load %arg4[%c96_229] : memref<144xf32, #tpu.memory_space<smem>>
    %c97_230 = arith.constant 97 : index
    %877 = memref.load %arg4[%c97_230] : memref<144xf32, #tpu.memory_space<smem>>
    %c98_231 = arith.constant 98 : index
    %878 = memref.load %arg4[%c98_231] : memref<144xf32, #tpu.memory_space<smem>>
    %c99_232 = arith.constant 99 : index
    %879 = memref.load %arg4[%c99_232] : memref<144xf32, #tpu.memory_space<smem>>
    %c100_233 = arith.constant 100 : index
    %880 = memref.load %arg4[%c100_233] : memref<144xf32, #tpu.memory_space<smem>>
    %c101_234 = arith.constant 101 : index
    %881 = memref.load %arg4[%c101_234] : memref<144xf32, #tpu.memory_space<smem>>
    %c102_235 = arith.constant 102 : index
    %882 = memref.load %arg4[%c102_235] : memref<144xf32, #tpu.memory_space<smem>>
    %c103_236 = arith.constant 103 : index
    %883 = memref.load %arg4[%c103_236] : memref<144xf32, #tpu.memory_space<smem>>
    %c104_237 = arith.constant 104 : index
    %884 = memref.load %arg4[%c104_237] : memref<144xf32, #tpu.memory_space<smem>>
    %c105_238 = arith.constant 105 : index
    %885 = memref.load %arg4[%c105_238] : memref<144xf32, #tpu.memory_space<smem>>
    %c106_239 = arith.constant 106 : index
    %886 = memref.load %arg4[%c106_239] : memref<144xf32, #tpu.memory_space<smem>>
    %c107_240 = arith.constant 107 : index
    %887 = memref.load %arg4[%c107_240] : memref<144xf32, #tpu.memory_space<smem>>
    %c108_241 = arith.constant 108 : index
    %888 = memref.load %arg4[%c108_241] : memref<144xf32, #tpu.memory_space<smem>>
    %c109_242 = arith.constant 109 : index
    %889 = memref.load %arg4[%c109_242] : memref<144xf32, #tpu.memory_space<smem>>
    %c110_243 = arith.constant 110 : index
    %890 = memref.load %arg4[%c110_243] : memref<144xf32, #tpu.memory_space<smem>>
    %c111_244 = arith.constant 111 : index
    %891 = memref.load %arg4[%c111_244] : memref<144xf32, #tpu.memory_space<smem>>
    %c112_245 = arith.constant 112 : index
    %892 = memref.load %arg4[%c112_245] : memref<144xf32, #tpu.memory_space<smem>>
    %c113_246 = arith.constant 113 : index
    %893 = memref.load %arg4[%c113_246] : memref<144xf32, #tpu.memory_space<smem>>
    %c114_247 = arith.constant 114 : index
    %894 = memref.load %arg4[%c114_247] : memref<144xf32, #tpu.memory_space<smem>>
    %c115_248 = arith.constant 115 : index
    %895 = memref.load %arg4[%c115_248] : memref<144xf32, #tpu.memory_space<smem>>
    %c116_249 = arith.constant 116 : index
    %896 = memref.load %arg4[%c116_249] : memref<144xf32, #tpu.memory_space<smem>>
    %c117_250 = arith.constant 117 : index
    %897 = memref.load %arg4[%c117_250] : memref<144xf32, #tpu.memory_space<smem>>
    %c118_251 = arith.constant 118 : index
    %898 = memref.load %arg4[%c118_251] : memref<144xf32, #tpu.memory_space<smem>>
    %c119_252 = arith.constant 119 : index
    %899 = memref.load %arg4[%c119_252] : memref<144xf32, #tpu.memory_space<smem>>
    %c120_253 = arith.constant 120 : index
    %900 = memref.load %arg4[%c120_253] : memref<144xf32, #tpu.memory_space<smem>>
    %c121_254 = arith.constant 121 : index
    %901 = memref.load %arg4[%c121_254] : memref<144xf32, #tpu.memory_space<smem>>
    %c122_255 = arith.constant 122 : index
    %902 = memref.load %arg4[%c122_255] : memref<144xf32, #tpu.memory_space<smem>>
    %c123_256 = arith.constant 123 : index
    %903 = memref.load %arg4[%c123_256] : memref<144xf32, #tpu.memory_space<smem>>
    %c124_257 = arith.constant 124 : index
    %904 = memref.load %arg4[%c124_257] : memref<144xf32, #tpu.memory_space<smem>>
    %c125_258 = arith.constant 125 : index
    %905 = memref.load %arg4[%c125_258] : memref<144xf32, #tpu.memory_space<smem>>
    %c126_259 = arith.constant 126 : index
    %906 = memref.load %arg4[%c126_259] : memref<144xf32, #tpu.memory_space<smem>>
    %c127_260 = arith.constant 127 : index
    %907 = memref.load %arg4[%c127_260] : memref<144xf32, #tpu.memory_space<smem>>
    %c128_261 = arith.constant 128 : index
    %908 = memref.load %arg4[%c128_261] : memref<144xf32, #tpu.memory_space<smem>>
    %c129_262 = arith.constant 129 : index
    %909 = memref.load %arg4[%c129_262] : memref<144xf32, #tpu.memory_space<smem>>
    %c130_263 = arith.constant 130 : index
    %910 = memref.load %arg4[%c130_263] : memref<144xf32, #tpu.memory_space<smem>>
    %c131_264 = arith.constant 131 : index
    %911 = memref.load %arg4[%c131_264] : memref<144xf32, #tpu.memory_space<smem>>
    %c132_265 = arith.constant 132 : index
    %912 = memref.load %arg4[%c132_265] : memref<144xf32, #tpu.memory_space<smem>>
    %c133_266 = arith.constant 133 : index
    %913 = memref.load %arg4[%c133_266] : memref<144xf32, #tpu.memory_space<smem>>
    %c134_267 = arith.constant 134 : index
    %914 = memref.load %arg4[%c134_267] : memref<144xf32, #tpu.memory_space<smem>>
    %c135_268 = arith.constant 135 : index
    %915 = memref.load %arg4[%c135_268] : memref<144xf32, #tpu.memory_space<smem>>
    %c136_269 = arith.constant 136 : index
    %916 = memref.load %arg4[%c136_269] : memref<144xf32, #tpu.memory_space<smem>>
    %c137_270 = arith.constant 137 : index
    %917 = memref.load %arg4[%c137_270] : memref<144xf32, #tpu.memory_space<smem>>
    %c138_271 = arith.constant 138 : index
    %918 = memref.load %arg4[%c138_271] : memref<144xf32, #tpu.memory_space<smem>>
    %c139_272 = arith.constant 139 : index
    %919 = memref.load %arg4[%c139_272] : memref<144xf32, #tpu.memory_space<smem>>
    %c140_273 = arith.constant 140 : index
    %920 = memref.load %arg4[%c140_273] : memref<144xf32, #tpu.memory_space<smem>>
    %c141_274 = arith.constant 141 : index
    %921 = memref.load %arg4[%c141_274] : memref<144xf32, #tpu.memory_space<smem>>
    %c142_275 = arith.constant 142 : index
    %922 = memref.load %arg4[%c142_275] : memref<144xf32, #tpu.memory_space<smem>>
    %c143_276 = arith.constant 143 : index
    %923 = memref.load %arg4[%c143_276] : memref<144xf32, #tpu.memory_space<smem>>
    %c0_277 = arith.constant 0 : index
    %924 = memref.load %arg5[%c0_277] : memref<4xf32, #tpu.memory_space<smem>>
    %c1_278 = arith.constant 1 : index
    %925 = memref.load %arg5[%c1_278] : memref<4xf32, #tpu.memory_space<smem>>
    %c2_279 = arith.constant 2 : index
    %926 = memref.load %arg5[%c2_279] : memref<4xf32, #tpu.memory_space<smem>>
    %c3_280 = arith.constant 3 : index
    %927 = memref.load %arg5[%c3_280] : memref<4xf32, #tpu.memory_space<smem>>
    %928 = tpu.iota {dimensions = array<i32: 1>} : vector<18x128xi32>
    %c16_i32_281 = arith.constant 16 : i32
    %c0_i32_282 = arith.constant 0 : i32
    %929 = arith.cmpi eq, %c16_i32_281, %c0_i32_282 : i32
    %c1_i32_283 = arith.constant 1 : i32
    %930 = arith.select %929, %c1_i32_283, %c16_i32_281 : i32
    %931 = vector.broadcast %930 : i32 to vector<18x128xi32>
    %932 = arith.remsi %928, %931 : vector<18x128xi32>
    %c0_i32_284 = arith.constant 0 : i32
    %933 = vector.broadcast %c0_i32_284 : i32 to vector<18x128xi32>
    %934 = arith.cmpi ne, %932, %933 : vector<18x128xi32>
    %c0_i32_285 = arith.constant 0 : i32
    %935 = vector.broadcast %c0_i32_285 : i32 to vector<18x128xi32>
    %936 = arith.cmpi slt, %932, %935 : vector<18x128xi32>
    %c0_i32_286 = arith.constant 0 : i32
    %937 = arith.cmpi slt, %930, %c0_i32_286 : i32
    %938 = vector.broadcast %937 : i1 to vector<18x128xi1>
    %939 = vector.broadcast %938 : vector<18x128xi1> to vector<18x128xi1>
    %940 = arith.xori %936, %939 : vector<18x128xi1>
    %941 = arith.andi %940, %934 : vector<18x128xi1>
    %942 = vector.broadcast %930 : i32 to vector<18x128xi32>
    %943 = arith.addi %932, %942 : vector<18x128xi32>
    %944 = arith.select %941, %943, %932 : vector<18x128xi1>, vector<18x128xi32>
    %c1_i32_287 = arith.constant 1 : i32
    %945 = vector.broadcast %c1_i32_287 : i32 to vector<18x128xi32>
    %946 = arith.cmpi sge, %944, %945 : vector<18x128xi32>
    %947 = tpu.iota {dimensions = array<i32: 1>} : vector<18x128xi32>
    %c16_i32_288 = arith.constant 16 : i32
    %c0_i32_289 = arith.constant 0 : i32
    %948 = arith.cmpi eq, %c16_i32_288, %c0_i32_289 : i32
    %c1_i32_290 = arith.constant 1 : i32
    %949 = arith.select %948, %c1_i32_290, %c16_i32_288 : i32
    %950 = vector.broadcast %949 : i32 to vector<18x128xi32>
    %951 = arith.remsi %947, %950 : vector<18x128xi32>
    %c0_i32_291 = arith.constant 0 : i32
    %952 = vector.broadcast %c0_i32_291 : i32 to vector<18x128xi32>
    %953 = arith.cmpi ne, %951, %952 : vector<18x128xi32>
    %c0_i32_292 = arith.constant 0 : i32
    %954 = vector.broadcast %c0_i32_292 : i32 to vector<18x128xi32>
    %955 = arith.cmpi slt, %951, %954 : vector<18x128xi32>
    %c0_i32_293 = arith.constant 0 : i32
    %956 = arith.cmpi slt, %949, %c0_i32_293 : i32
    %957 = vector.broadcast %956 : i1 to vector<18x128xi1>
    %958 = vector.broadcast %957 : vector<18x128xi1> to vector<18x128xi1>
    %959 = arith.xori %955, %958 : vector<18x128xi1>
    %960 = arith.andi %959, %953 : vector<18x128xi1>
    %961 = vector.broadcast %949 : i32 to vector<18x128xi32>
    %962 = arith.addi %951, %961 : vector<18x128xi32>
    %963 = arith.select %960, %962, %951 : vector<18x128xi1>, vector<18x128xi32>
    %c15_i32 = arith.constant 15 : i32
    %964 = vector.broadcast %c15_i32 : i32 to vector<18x128xi32>
    %965 = arith.cmpi slt, %963, %964 : vector<18x128xi32>
    %c0_294 = arith.constant 0 : index
    %c0_295 = arith.constant 0 : index
    %c0_296 = arith.constant 0 : index
    %966 = vector.load %arg8[%c0_294, %c0_295, %c0_296] : memref<4x18x128xf32, #tpu.memory_space<vmem>>, vector<1x18x128xf32>
    %967 = vector.shape_cast %966 : vector<1x18x128xf32> to vector<18x128xf32>
    %c1_i32_297 = arith.constant 1 : i32
    %968 = tpu.dynamic_rotate %967 by %c1_i32_297 dim 1 : vector<18x128xf32>, i32 -> vector<18x128xf32>
    %cst_298 = arith.constant 0.000000e+00 : f32
    %969 = vector.broadcast %cst_298 : f32 to vector<18x128xf32>
    %970 = arith.select %946, %968, %969 : vector<18x128xi1>, vector<18x128xf32>
    %971 = vector.extract_strided_slice %970 {offsets = [0, 0], sizes = [16, 128], strides = [1, 1]} : vector<18x128xf32> to vector<16x128xf32>
    %972 = vector.broadcast %780 : f32 to vector<16x128xf32>
    %973 = arith.mulf %971, %972 : vector<16x128xf32>
    %974 = vector.broadcast %816 : f32 to vector<16x128xf32>
    %975 = arith.mulf %971, %974 : vector<16x128xf32>
    %976 = vector.broadcast %852 : f32 to vector<16x128xf32>
    %977 = arith.mulf %971, %976 : vector<16x128xf32>
    %978 = vector.broadcast %888 : f32 to vector<16x128xf32>
    %979 = arith.mulf %971, %978 : vector<16x128xf32>
    %980 = vector.extract_strided_slice %970 {offsets = [1, 0], sizes = [16, 128], strides = [1, 1]} : vector<18x128xf32> to vector<16x128xf32>
    %981 = vector.broadcast %783 : f32 to vector<16x128xf32>
    %982 = arith.mulf %980, %981 : vector<16x128xf32>
    %983 = arith.addf %973, %982 : vector<16x128xf32>
    %984 = vector.broadcast %819 : f32 to vector<16x128xf32>
    %985 = arith.mulf %980, %984 : vector<16x128xf32>
    %986 = arith.addf %975, %985 : vector<16x128xf32>
    %987 = vector.broadcast %855 : f32 to vector<16x128xf32>
    %988 = arith.mulf %980, %987 : vector<16x128xf32>
    %989 = arith.addf %977, %988 : vector<16x128xf32>
    %990 = vector.broadcast %891 : f32 to vector<16x128xf32>
    %991 = arith.mulf %980, %990 : vector<16x128xf32>
    %992 = arith.addf %979, %991 : vector<16x128xf32>
    %993 = vector.extract_strided_slice %970 {offsets = [2, 0], sizes = [16, 128], strides = [1, 1]} : vector<18x128xf32> to vector<16x128xf32>
    %994 = vector.broadcast %786 : f32 to vector<16x128xf32>
    %995 = arith.mulf %993, %994 : vector<16x128xf32>
    %996 = arith.addf %983, %995 : vector<16x128xf32>
    %997 = vector.broadcast %822 : f32 to vector<16x128xf32>
    %998 = arith.mulf %993, %997 : vector<16x128xf32>
    %999 = arith.addf %986, %998 : vector<16x128xf32>
    %1000 = vector.broadcast %858 : f32 to vector<16x128xf32>
    %1001 = arith.mulf %993, %1000 : vector<16x128xf32>
    %1002 = arith.addf %989, %1001 : vector<16x128xf32>
    %1003 = vector.broadcast %894 : f32 to vector<16x128xf32>
    %1004 = arith.mulf %993, %1003 : vector<16x128xf32>
    %1005 = arith.addf %992, %1004 : vector<16x128xf32>
    %1006 = vector.extract_strided_slice %967 {offsets = [0, 0], sizes = [16, 128], strides = [1, 1]} : vector<18x128xf32> to vector<16x128xf32>
    %1007 = vector.broadcast %781 : f32 to vector<16x128xf32>
    %1008 = arith.mulf %1006, %1007 : vector<16x128xf32>
    %1009 = arith.addf %996, %1008 : vector<16x128xf32>
    %1010 = vector.broadcast %817 : f32 to vector<16x128xf32>
    %1011 = arith.mulf %1006, %1010 : vector<16x128xf32>
    %1012 = arith.addf %999, %1011 : vector<16x128xf32>
    %1013 = vector.broadcast %853 : f32 to vector<16x128xf32>
    %1014 = arith.mulf %1006, %1013 : vector<16x128xf32>
    %1015 = arith.addf %1002, %1014 : vector<16x128xf32>
    %1016 = vector.broadcast %889 : f32 to vector<16x128xf32>
    %1017 = arith.mulf %1006, %1016 : vector<16x128xf32>
    %1018 = arith.addf %1005, %1017 : vector<16x128xf32>
    %1019 = vector.extract_strided_slice %967 {offsets = [1, 0], sizes = [16, 128], strides = [1, 1]} : vector<18x128xf32> to vector<16x128xf32>
    %1020 = vector.broadcast %784 : f32 to vector<16x128xf32>
    %1021 = arith.mulf %1019, %1020 : vector<16x128xf32>
    %1022 = arith.addf %1009, %1021 : vector<16x128xf32>
    %1023 = vector.broadcast %820 : f32 to vector<16x128xf32>
    %1024 = arith.mulf %1019, %1023 : vector<16x128xf32>
    %1025 = arith.addf %1012, %1024 : vector<16x128xf32>
    %1026 = vector.broadcast %856 : f32 to vector<16x128xf32>
    %1027 = arith.mulf %1019, %1026 : vector<16x128xf32>
    %1028 = arith.addf %1015, %1027 : vector<16x128xf32>
    %1029 = vector.broadcast %892 : f32 to vector<16x128xf32>
    %1030 = arith.mulf %1019, %1029 : vector<16x128xf32>
    %1031 = arith.addf %1018, %1030 : vector<16x128xf32>
    %1032 = vector.extract_strided_slice %967 {offsets = [2, 0], sizes = [16, 128], strides = [1, 1]} : vector<18x128xf32> to vector<16x128xf32>
    %1033 = vector.broadcast %787 : f32 to vector<16x128xf32>
    %1034 = arith.mulf %1032, %1033 : vector<16x128xf32>
    %1035 = arith.addf %1022, %1034 : vector<16x128xf32>
    %1036 = vector.broadcast %823 : f32 to vector<16x128xf32>
    %1037 = arith.mulf %1032, %1036 : vector<16x128xf32>
    %1038 = arith.addf %1025, %1037 : vector<16x128xf32>
    %1039 = vector.broadcast %859 : f32 to vector<16x128xf32>
    %1040 = arith.mulf %1032, %1039 : vector<16x128xf32>
    %1041 = arith.addf %1028, %1040 : vector<16x128xf32>
    %1042 = vector.broadcast %895 : f32 to vector<16x128xf32>
    %1043 = arith.mulf %1032, %1042 : vector<16x128xf32>
    %1044 = arith.addf %1031, %1043 : vector<16x128xf32>
    %c127_i32 = arith.constant 127 : i32
    %1045 = tpu.dynamic_rotate %967 by %c127_i32 dim 1 : vector<18x128xf32>, i32 -> vector<18x128xf32>
    %cst_299 = arith.constant 0.000000e+00 : f32
    %1046 = vector.broadcast %cst_299 : f32 to vector<18x128xf32>
    %1047 = arith.select %965, %1045, %1046 : vector<18x128xi1>, vector<18x128xf32>
    %1048 = vector.extract_strided_slice %1047 {offsets = [0, 0], sizes = [16, 128], strides = [1, 1]} : vector<18x128xf32> to vector<16x128xf32>
    %1049 = vector.broadcast %782 : f32 to vector<16x128xf32>
    %1050 = arith.mulf %1048, %1049 : vector<16x128xf32>
    %1051 = arith.addf %1035, %1050 : vector<16x128xf32>
    %1052 = vector.broadcast %818 : f32 to vector<16x128xf32>
    %1053 = arith.mulf %1048, %1052 : vector<16x128xf32>
    %1054 = arith.addf %1038, %1053 : vector<16x128xf32>
    %1055 = vector.broadcast %854 : f32 to vector<16x128xf32>
    %1056 = arith.mulf %1048, %1055 : vector<16x128xf32>
    %1057 = arith.addf %1041, %1056 : vector<16x128xf32>
    %1058 = vector.broadcast %890 : f32 to vector<16x128xf32>
    %1059 = arith.mulf %1048, %1058 : vector<16x128xf32>
    %1060 = arith.addf %1044, %1059 : vector<16x128xf32>
    %1061 = vector.extract_strided_slice %1047 {offsets = [1, 0], sizes = [16, 128], strides = [1, 1]} : vector<18x128xf32> to vector<16x128xf32>
    %1062 = vector.broadcast %785 : f32 to vector<16x128xf32>
    %1063 = arith.mulf %1061, %1062 : vector<16x128xf32>
    %1064 = arith.addf %1051, %1063 : vector<16x128xf32>
    %1065 = vector.broadcast %821 : f32 to vector<16x128xf32>
    %1066 = arith.mulf %1061, %1065 : vector<16x128xf32>
    %1067 = arith.addf %1054, %1066 : vector<16x128xf32>
    %1068 = vector.broadcast %857 : f32 to vector<16x128xf32>
    %1069 = arith.mulf %1061, %1068 : vector<16x128xf32>
    %1070 = arith.addf %1057, %1069 : vector<16x128xf32>
    %1071 = vector.broadcast %893 : f32 to vector<16x128xf32>
    %1072 = arith.mulf %1061, %1071 : vector<16x128xf32>
    %1073 = arith.addf %1060, %1072 : vector<16x128xf32>
    %1074 = vector.extract_strided_slice %1047 {offsets = [2, 0], sizes = [16, 128], strides = [1, 1]} : vector<18x128xf32> to vector<16x128xf32>
    %1075 = vector.broadcast %788 : f32 to vector<16x128xf32>
    %1076 = arith.mulf %1074, %1075 : vector<16x128xf32>
    %1077 = arith.addf %1064, %1076 : vector<16x128xf32>
    %1078 = vector.broadcast %824 : f32 to vector<16x128xf32>
    %1079 = arith.mulf %1074, %1078 : vector<16x128xf32>
    %1080 = arith.addf %1067, %1079 : vector<16x128xf32>
    %1081 = vector.broadcast %860 : f32 to vector<16x128xf32>
    %1082 = arith.mulf %1074, %1081 : vector<16x128xf32>
    %1083 = arith.addf %1070, %1082 : vector<16x128xf32>
    %1084 = vector.broadcast %896 : f32 to vector<16x128xf32>
    %1085 = arith.mulf %1074, %1084 : vector<16x128xf32>
    %1086 = arith.addf %1073, %1085 : vector<16x128xf32>
    %c1_300 = arith.constant 1 : index
    %c0_301 = arith.constant 0 : index
    %c0_302 = arith.constant 0 : index
    %1087 = vector.load %arg8[%c1_300, %c0_301, %c0_302] : memref<4x18x128xf32, #tpu.memory_space<vmem>>, vector<1x18x128xf32>
    %1088 = vector.shape_cast %1087 : vector<1x18x128xf32> to vector<18x128xf32>
    %c1_i32_303 = arith.constant 1 : i32
    %1089 = tpu.dynamic_rotate %1088 by %c1_i32_303 dim 1 : vector<18x128xf32>, i32 -> vector<18x128xf32>
    %cst_304 = arith.constant 0.000000e+00 : f32
    %1090 = vector.broadcast %cst_304 : f32 to vector<18x128xf32>
    %1091 = arith.select %946, %1089, %1090 : vector<18x128xi1>, vector<18x128xf32>
    %1092 = vector.extract_strided_slice %1091 {offsets = [0, 0], sizes = [16, 128], strides = [1, 1]} : vector<18x128xf32> to vector<16x128xf32>
    %1093 = vector.broadcast %789 : f32 to vector<16x128xf32>
    %1094 = arith.mulf %1092, %1093 : vector<16x128xf32>
    %1095 = arith.addf %1077, %1094 : vector<16x128xf32>
    %1096 = vector.broadcast %825 : f32 to vector<16x128xf32>
    %1097 = arith.mulf %1092, %1096 : vector<16x128xf32>
    %1098 = arith.addf %1080, %1097 : vector<16x128xf32>
    %1099 = vector.broadcast %861 : f32 to vector<16x128xf32>
    %1100 = arith.mulf %1092, %1099 : vector<16x128xf32>
    %1101 = arith.addf %1083, %1100 : vector<16x128xf32>
    %1102 = vector.broadcast %897 : f32 to vector<16x128xf32>
    %1103 = arith.mulf %1092, %1102 : vector<16x128xf32>
    %1104 = arith.addf %1086, %1103 : vector<16x128xf32>
    %1105 = vector.extract_strided_slice %1091 {offsets = [1, 0], sizes = [16, 128], strides = [1, 1]} : vector<18x128xf32> to vector<16x128xf32>
    %1106 = vector.broadcast %792 : f32 to vector<16x128xf32>
    %1107 = arith.mulf %1105, %1106 : vector<16x128xf32>
    %1108 = arith.addf %1095, %1107 : vector<16x128xf32>
    %1109 = vector.broadcast %828 : f32 to vector<16x128xf32>
    %1110 = arith.mulf %1105, %1109 : vector<16x128xf32>
    %1111 = arith.addf %1098, %1110 : vector<16x128xf32>
    %1112 = vector.broadcast %864 : f32 to vector<16x128xf32>
    %1113 = arith.mulf %1105, %1112 : vector<16x128xf32>
    %1114 = arith.addf %1101, %1113 : vector<16x128xf32>
    %1115 = vector.broadcast %900 : f32 to vector<16x128xf32>
    %1116 = arith.mulf %1105, %1115 : vector<16x128xf32>
    %1117 = arith.addf %1104, %1116 : vector<16x128xf32>
    %1118 = vector.extract_strided_slice %1091 {offsets = [2, 0], sizes = [16, 128], strides = [1, 1]} : vector<18x128xf32> to vector<16x128xf32>
    %1119 = vector.broadcast %795 : f32 to vector<16x128xf32>
    %1120 = arith.mulf %1118, %1119 : vector<16x128xf32>
    %1121 = arith.addf %1108, %1120 : vector<16x128xf32>
    %1122 = vector.broadcast %831 : f32 to vector<16x128xf32>
    %1123 = arith.mulf %1118, %1122 : vector<16x128xf32>
    %1124 = arith.addf %1111, %1123 : vector<16x128xf32>
    %1125 = vector.broadcast %867 : f32 to vector<16x128xf32>
    %1126 = arith.mulf %1118, %1125 : vector<16x128xf32>
    %1127 = arith.addf %1114, %1126 : vector<16x128xf32>
    %1128 = vector.broadcast %903 : f32 to vector<16x128xf32>
    %1129 = arith.mulf %1118, %1128 : vector<16x128xf32>
    %1130 = arith.addf %1117, %1129 : vector<16x128xf32>
    %1131 = vector.extract_strided_slice %1088 {offsets = [0, 0], sizes = [16, 128], strides = [1, 1]} : vector<18x128xf32> to vector<16x128xf32>
    %1132 = vector.broadcast %790 : f32 to vector<16x128xf32>
    %1133 = arith.mulf %1131, %1132 : vector<16x128xf32>
    %1134 = arith.addf %1121, %1133 : vector<16x128xf32>
    %1135 = vector.broadcast %826 : f32 to vector<16x128xf32>
    %1136 = arith.mulf %1131, %1135 : vector<16x128xf32>
    %1137 = arith.addf %1124, %1136 : vector<16x128xf32>
    %1138 = vector.broadcast %862 : f32 to vector<16x128xf32>
    %1139 = arith.mulf %1131, %1138 : vector<16x128xf32>
    %1140 = arith.addf %1127, %1139 : vector<16x128xf32>
    %1141 = vector.broadcast %898 : f32 to vector<16x128xf32>
    %1142 = arith.mulf %1131, %1141 : vector<16x128xf32>
    %1143 = arith.addf %1130, %1142 : vector<16x128xf32>
    %1144 = vector.extract_strided_slice %1088 {offsets = [1, 0], sizes = [16, 128], strides = [1, 1]} : vector<18x128xf32> to vector<16x128xf32>
    %1145 = vector.broadcast %793 : f32 to vector<16x128xf32>
    %1146 = arith.mulf %1144, %1145 : vector<16x128xf32>
    %1147 = arith.addf %1134, %1146 : vector<16x128xf32>
    %1148 = vector.broadcast %829 : f32 to vector<16x128xf32>
    %1149 = arith.mulf %1144, %1148 : vector<16x128xf32>
    %1150 = arith.addf %1137, %1149 : vector<16x128xf32>
    %1151 = vector.broadcast %865 : f32 to vector<16x128xf32>
    %1152 = arith.mulf %1144, %1151 : vector<16x128xf32>
    %1153 = arith.addf %1140, %1152 : vector<16x128xf32>
    %1154 = vector.broadcast %901 : f32 to vector<16x128xf32>
    %1155 = arith.mulf %1144, %1154 : vector<16x128xf32>
    %1156 = arith.addf %1143, %1155 : vector<16x128xf32>
    %1157 = vector.extract_strided_slice %1088 {offsets = [2, 0], sizes = [16, 128], strides = [1, 1]} : vector<18x128xf32> to vector<16x128xf32>
    %1158 = vector.broadcast %796 : f32 to vector<16x128xf32>
    %1159 = arith.mulf %1157, %1158 : vector<16x128xf32>
    %1160 = arith.addf %1147, %1159 : vector<16x128xf32>
    %1161 = vector.broadcast %832 : f32 to vector<16x128xf32>
    %1162 = arith.mulf %1157, %1161 : vector<16x128xf32>
    %1163 = arith.addf %1150, %1162 : vector<16x128xf32>
    %1164 = vector.broadcast %868 : f32 to vector<16x128xf32>
    %1165 = arith.mulf %1157, %1164 : vector<16x128xf32>
    %1166 = arith.addf %1153, %1165 : vector<16x128xf32>
    %1167 = vector.broadcast %904 : f32 to vector<16x128xf32>
    %1168 = arith.mulf %1157, %1167 : vector<16x128xf32>
    %1169 = arith.addf %1156, %1168 : vector<16x128xf32>
    %c127_i32_305 = arith.constant 127 : i32
    %1170 = tpu.dynamic_rotate %1088 by %c127_i32_305 dim 1 : vector<18x128xf32>, i32 -> vector<18x128xf32>
    %cst_306 = arith.constant 0.000000e+00 : f32
    %1171 = vector.broadcast %cst_306 : f32 to vector<18x128xf32>
    %1172 = arith.select %965, %1170, %1171 : vector<18x128xi1>, vector<18x128xf32>
    %1173 = vector.extract_strided_slice %1172 {offsets = [0, 0], sizes = [16, 128], strides = [1, 1]} : vector<18x128xf32> to vector<16x128xf32>
    %1174 = vector.broadcast %791 : f32 to vector<16x128xf32>
    %1175 = arith.mulf %1173, %1174 : vector<16x128xf32>
    %1176 = arith.addf %1160, %1175 : vector<16x128xf32>
    %1177 = vector.broadcast %827 : f32 to vector<16x128xf32>
    %1178 = arith.mulf %1173, %1177 : vector<16x128xf32>
    %1179 = arith.addf %1163, %1178 : vector<16x128xf32>
    %1180 = vector.broadcast %863 : f32 to vector<16x128xf32>
    %1181 = arith.mulf %1173, %1180 : vector<16x128xf32>
    %1182 = arith.addf %1166, %1181 : vector<16x128xf32>
    %1183 = vector.broadcast %899 : f32 to vector<16x128xf32>
    %1184 = arith.mulf %1173, %1183 : vector<16x128xf32>
    %1185 = arith.addf %1169, %1184 : vector<16x128xf32>
    %1186 = vector.extract_strided_slice %1172 {offsets = [1, 0], sizes = [16, 128], strides = [1, 1]} : vector<18x128xf32> to vector<16x128xf32>
    %1187 = vector.broadcast %794 : f32 to vector<16x128xf32>
    %1188 = arith.mulf %1186, %1187 : vector<16x128xf32>
    %1189 = arith.addf %1176, %1188 : vector<16x128xf32>
    %1190 = vector.broadcast %830 : f32 to vector<16x128xf32>
    %1191 = arith.mulf %1186, %1190 : vector<16x128xf32>
    %1192 = arith.addf %1179, %1191 : vector<16x128xf32>
    %1193 = vector.broadcast %866 : f32 to vector<16x128xf32>
    %1194 = arith.mulf %1186, %1193 : vector<16x128xf32>
    %1195 = arith.addf %1182, %1194 : vector<16x128xf32>
    %1196 = vector.broadcast %902 : f32 to vector<16x128xf32>
    %1197 = arith.mulf %1186, %1196 : vector<16x128xf32>
    %1198 = arith.addf %1185, %1197 : vector<16x128xf32>
    %1199 = vector.extract_strided_slice %1172 {offsets = [2, 0], sizes = [16, 128], strides = [1, 1]} : vector<18x128xf32> to vector<16x128xf32>
    %1200 = vector.broadcast %797 : f32 to vector<16x128xf32>
    %1201 = arith.mulf %1199, %1200 : vector<16x128xf32>
    %1202 = arith.addf %1189, %1201 : vector<16x128xf32>
    %1203 = vector.broadcast %833 : f32 to vector<16x128xf32>
    %1204 = arith.mulf %1199, %1203 : vector<16x128xf32>
    %1205 = arith.addf %1192, %1204 : vector<16x128xf32>
    %1206 = vector.broadcast %869 : f32 to vector<16x128xf32>
    %1207 = arith.mulf %1199, %1206 : vector<16x128xf32>
    %1208 = arith.addf %1195, %1207 : vector<16x128xf32>
    %1209 = vector.broadcast %905 : f32 to vector<16x128xf32>
    %1210 = arith.mulf %1199, %1209 : vector<16x128xf32>
    %1211 = arith.addf %1198, %1210 : vector<16x128xf32>
    %c2_307 = arith.constant 2 : index
    %c0_308 = arith.constant 0 : index
    %c0_309 = arith.constant 0 : index
    %1212 = vector.load %arg8[%c2_307, %c0_308, %c0_309] : memref<4x18x128xf32, #tpu.memory_space<vmem>>, vector<1x18x128xf32>
    %1213 = vector.shape_cast %1212 : vector<1x18x128xf32> to vector<18x128xf32>
    %c1_i32_310 = arith.constant 1 : i32
    %1214 = tpu.dynamic_rotate %1213 by %c1_i32_310 dim 1 : vector<18x128xf32>, i32 -> vector<18x128xf32>
    %cst_311 = arith.constant 0.000000e+00 : f32
    %1215 = vector.broadcast %cst_311 : f32 to vector<18x128xf32>
    %1216 = arith.select %946, %1214, %1215 : vector<18x128xi1>, vector<18x128xf32>
    %1217 = vector.extract_strided_slice %1216 {offsets = [0, 0], sizes = [16, 128], strides = [1, 1]} : vector<18x128xf32> to vector<16x128xf32>
    %1218 = vector.broadcast %798 : f32 to vector<16x128xf32>
    %1219 = arith.mulf %1217, %1218 : vector<16x128xf32>
    %1220 = arith.addf %1202, %1219 : vector<16x128xf32>
    %1221 = vector.broadcast %834 : f32 to vector<16x128xf32>
    %1222 = arith.mulf %1217, %1221 : vector<16x128xf32>
    %1223 = arith.addf %1205, %1222 : vector<16x128xf32>
    %1224 = vector.broadcast %870 : f32 to vector<16x128xf32>
    %1225 = arith.mulf %1217, %1224 : vector<16x128xf32>
    %1226 = arith.addf %1208, %1225 : vector<16x128xf32>
    %1227 = vector.broadcast %906 : f32 to vector<16x128xf32>
    %1228 = arith.mulf %1217, %1227 : vector<16x128xf32>
    %1229 = arith.addf %1211, %1228 : vector<16x128xf32>
    %1230 = vector.extract_strided_slice %1216 {offsets = [1, 0], sizes = [16, 128], strides = [1, 1]} : vector<18x128xf32> to vector<16x128xf32>
    %1231 = vector.broadcast %801 : f32 to vector<16x128xf32>
    %1232 = arith.mulf %1230, %1231 : vector<16x128xf32>
    %1233 = arith.addf %1220, %1232 : vector<16x128xf32>
    %1234 = vector.broadcast %837 : f32 to vector<16x128xf32>
    %1235 = arith.mulf %1230, %1234 : vector<16x128xf32>
    %1236 = arith.addf %1223, %1235 : vector<16x128xf32>
    %1237 = vector.broadcast %873 : f32 to vector<16x128xf32>
    %1238 = arith.mulf %1230, %1237 : vector<16x128xf32>
    %1239 = arith.addf %1226, %1238 : vector<16x128xf32>
    %1240 = vector.broadcast %909 : f32 to vector<16x128xf32>
    %1241 = arith.mulf %1230, %1240 : vector<16x128xf32>
    %1242 = arith.addf %1229, %1241 : vector<16x128xf32>
    %1243 = vector.extract_strided_slice %1216 {offsets = [2, 0], sizes = [16, 128], strides = [1, 1]} : vector<18x128xf32> to vector<16x128xf32>
    %1244 = vector.broadcast %804 : f32 to vector<16x128xf32>
    %1245 = arith.mulf %1243, %1244 : vector<16x128xf32>
    %1246 = arith.addf %1233, %1245 : vector<16x128xf32>
    %1247 = vector.broadcast %840 : f32 to vector<16x128xf32>
    %1248 = arith.mulf %1243, %1247 : vector<16x128xf32>
    %1249 = arith.addf %1236, %1248 : vector<16x128xf32>
    %1250 = vector.broadcast %876 : f32 to vector<16x128xf32>
    %1251 = arith.mulf %1243, %1250 : vector<16x128xf32>
    %1252 = arith.addf %1239, %1251 : vector<16x128xf32>
    %1253 = vector.broadcast %912 : f32 to vector<16x128xf32>
    %1254 = arith.mulf %1243, %1253 : vector<16x128xf32>
    %1255 = arith.addf %1242, %1254 : vector<16x128xf32>
    %1256 = vector.extract_strided_slice %1213 {offsets = [0, 0], sizes = [16, 128], strides = [1, 1]} : vector<18x128xf32> to vector<16x128xf32>
    %1257 = vector.broadcast %799 : f32 to vector<16x128xf32>
    %1258 = arith.mulf %1256, %1257 : vector<16x128xf32>
    %1259 = arith.addf %1246, %1258 : vector<16x128xf32>
    %1260 = vector.broadcast %835 : f32 to vector<16x128xf32>
    %1261 = arith.mulf %1256, %1260 : vector<16x128xf32>
    %1262 = arith.addf %1249, %1261 : vector<16x128xf32>
    %1263 = vector.broadcast %871 : f32 to vector<16x128xf32>
    %1264 = arith.mulf %1256, %1263 : vector<16x128xf32>
    %1265 = arith.addf %1252, %1264 : vector<16x128xf32>
    %1266 = vector.broadcast %907 : f32 to vector<16x128xf32>
    %1267 = arith.mulf %1256, %1266 : vector<16x128xf32>
    %1268 = arith.addf %1255, %1267 : vector<16x128xf32>
    %1269 = vector.extract_strided_slice %1213 {offsets = [1, 0], sizes = [16, 128], strides = [1, 1]} : vector<18x128xf32> to vector<16x128xf32>
    %1270 = vector.broadcast %802 : f32 to vector<16x128xf32>
    %1271 = arith.mulf %1269, %1270 : vector<16x128xf32>
    %1272 = arith.addf %1259, %1271 : vector<16x128xf32>
    %1273 = vector.broadcast %838 : f32 to vector<16x128xf32>
    %1274 = arith.mulf %1269, %1273 : vector<16x128xf32>
    %1275 = arith.addf %1262, %1274 : vector<16x128xf32>
    %1276 = vector.broadcast %874 : f32 to vector<16x128xf32>
    %1277 = arith.mulf %1269, %1276 : vector<16x128xf32>
    %1278 = arith.addf %1265, %1277 : vector<16x128xf32>
    %1279 = vector.broadcast %910 : f32 to vector<16x128xf32>
    %1280 = arith.mulf %1269, %1279 : vector<16x128xf32>
    %1281 = arith.addf %1268, %1280 : vector<16x128xf32>
    %1282 = vector.extract_strided_slice %1213 {offsets = [2, 0], sizes = [16, 128], strides = [1, 1]} : vector<18x128xf32> to vector<16x128xf32>
    %1283 = vector.broadcast %805 : f32 to vector<16x128xf32>
    %1284 = arith.mulf %1282, %1283 : vector<16x128xf32>
    %1285 = arith.addf %1272, %1284 : vector<16x128xf32>
    %1286 = vector.broadcast %841 : f32 to vector<16x128xf32>
    %1287 = arith.mulf %1282, %1286 : vector<16x128xf32>
    %1288 = arith.addf %1275, %1287 : vector<16x128xf32>
    %1289 = vector.broadcast %877 : f32 to vector<16x128xf32>
    %1290 = arith.mulf %1282, %1289 : vector<16x128xf32>
    %1291 = arith.addf %1278, %1290 : vector<16x128xf32>
    %1292 = vector.broadcast %913 : f32 to vector<16x128xf32>
    %1293 = arith.mulf %1282, %1292 : vector<16x128xf32>
    %1294 = arith.addf %1281, %1293 : vector<16x128xf32>
    %c127_i32_312 = arith.constant 127 : i32
    %1295 = tpu.dynamic_rotate %1213 by %c127_i32_312 dim 1 : vector<18x128xf32>, i32 -> vector<18x128xf32>
    %cst_313 = arith.constant 0.000000e+00 : f32
    %1296 = vector.broadcast %cst_313 : f32 to vector<18x128xf32>
    %1297 = arith.select %965, %1295, %1296 : vector<18x128xi1>, vector<18x128xf32>
    %1298 = vector.extract_strided_slice %1297 {offsets = [0, 0], sizes = [16, 128], strides = [1, 1]} : vector<18x128xf32> to vector<16x128xf32>
    %1299 = vector.broadcast %800 : f32 to vector<16x128xf32>
    %1300 = arith.mulf %1298, %1299 : vector<16x128xf32>
    %1301 = arith.addf %1285, %1300 : vector<16x128xf32>
    %1302 = vector.broadcast %836 : f32 to vector<16x128xf32>
    %1303 = arith.mulf %1298, %1302 : vector<16x128xf32>
    %1304 = arith.addf %1288, %1303 : vector<16x128xf32>
    %1305 = vector.broadcast %872 : f32 to vector<16x128xf32>
    %1306 = arith.mulf %1298, %1305 : vector<16x128xf32>
    %1307 = arith.addf %1291, %1306 : vector<16x128xf32>
    %1308 = vector.broadcast %908 : f32 to vector<16x128xf32>
    %1309 = arith.mulf %1298, %1308 : vector<16x128xf32>
    %1310 = arith.addf %1294, %1309 : vector<16x128xf32>
    %1311 = vector.extract_strided_slice %1297 {offsets = [1, 0], sizes = [16, 128], strides = [1, 1]} : vector<18x128xf32> to vector<16x128xf32>
    %1312 = vector.broadcast %803 : f32 to vector<16x128xf32>
    %1313 = arith.mulf %1311, %1312 : vector<16x128xf32>
    %1314 = arith.addf %1301, %1313 : vector<16x128xf32>
    %1315 = vector.broadcast %839 : f32 to vector<16x128xf32>
    %1316 = arith.mulf %1311, %1315 : vector<16x128xf32>
    %1317 = arith.addf %1304, %1316 : vector<16x128xf32>
    %1318 = vector.broadcast %875 : f32 to vector<16x128xf32>
    %1319 = arith.mulf %1311, %1318 : vector<16x128xf32>
    %1320 = arith.addf %1307, %1319 : vector<16x128xf32>
    %1321 = vector.broadcast %911 : f32 to vector<16x128xf32>
    %1322 = arith.mulf %1311, %1321 : vector<16x128xf32>
    %1323 = arith.addf %1310, %1322 : vector<16x128xf32>
    %1324 = vector.extract_strided_slice %1297 {offsets = [2, 0], sizes = [16, 128], strides = [1, 1]} : vector<18x128xf32> to vector<16x128xf32>
    %1325 = vector.broadcast %806 : f32 to vector<16x128xf32>
    %1326 = arith.mulf %1324, %1325 : vector<16x128xf32>
    %1327 = arith.addf %1314, %1326 : vector<16x128xf32>
    %1328 = vector.broadcast %842 : f32 to vector<16x128xf32>
    %1329 = arith.mulf %1324, %1328 : vector<16x128xf32>
    %1330 = arith.addf %1317, %1329 : vector<16x128xf32>
    %1331 = vector.broadcast %878 : f32 to vector<16x128xf32>
    %1332 = arith.mulf %1324, %1331 : vector<16x128xf32>
    %1333 = arith.addf %1320, %1332 : vector<16x128xf32>
    %1334 = vector.broadcast %914 : f32 to vector<16x128xf32>
    %1335 = arith.mulf %1324, %1334 : vector<16x128xf32>
    %1336 = arith.addf %1323, %1335 : vector<16x128xf32>
    %c3_314 = arith.constant 3 : index
    %c0_315 = arith.constant 0 : index
    %c0_316 = arith.constant 0 : index
    %1337 = vector.load %arg8[%c3_314, %c0_315, %c0_316] : memref<4x18x128xf32, #tpu.memory_space<vmem>>, vector<1x18x128xf32>
    %1338 = vector.shape_cast %1337 : vector<1x18x128xf32> to vector<18x128xf32>
    %c1_i32_317 = arith.constant 1 : i32
    %1339 = tpu.dynamic_rotate %1338 by %c1_i32_317 dim 1 : vector<18x128xf32>, i32 -> vector<18x128xf32>
    %cst_318 = arith.constant 0.000000e+00 : f32
    %1340 = vector.broadcast %cst_318 : f32 to vector<18x128xf32>
    %1341 = arith.select %946, %1339, %1340 : vector<18x128xi1>, vector<18x128xf32>
    %1342 = vector.extract_strided_slice %1341 {offsets = [0, 0], sizes = [16, 128], strides = [1, 1]} : vector<18x128xf32> to vector<16x128xf32>
    %1343 = vector.broadcast %807 : f32 to vector<16x128xf32>
    %1344 = arith.mulf %1342, %1343 : vector<16x128xf32>
    %1345 = arith.addf %1327, %1344 : vector<16x128xf32>
    %1346 = vector.broadcast %843 : f32 to vector<16x128xf32>
    %1347 = arith.mulf %1342, %1346 : vector<16x128xf32>
    %1348 = arith.addf %1330, %1347 : vector<16x128xf32>
    %1349 = vector.broadcast %879 : f32 to vector<16x128xf32>
    %1350 = arith.mulf %1342, %1349 : vector<16x128xf32>
    %1351 = arith.addf %1333, %1350 : vector<16x128xf32>
    %1352 = vector.broadcast %915 : f32 to vector<16x128xf32>
    %1353 = arith.mulf %1342, %1352 : vector<16x128xf32>
    %1354 = arith.addf %1336, %1353 : vector<16x128xf32>
    %1355 = vector.extract_strided_slice %1341 {offsets = [1, 0], sizes = [16, 128], strides = [1, 1]} : vector<18x128xf32> to vector<16x128xf32>
    %1356 = vector.broadcast %810 : f32 to vector<16x128xf32>
    %1357 = arith.mulf %1355, %1356 : vector<16x128xf32>
    %1358 = arith.addf %1345, %1357 : vector<16x128xf32>
    %1359 = vector.broadcast %846 : f32 to vector<16x128xf32>
    %1360 = arith.mulf %1355, %1359 : vector<16x128xf32>
    %1361 = arith.addf %1348, %1360 : vector<16x128xf32>
    %1362 = vector.broadcast %882 : f32 to vector<16x128xf32>
    %1363 = arith.mulf %1355, %1362 : vector<16x128xf32>
    %1364 = arith.addf %1351, %1363 : vector<16x128xf32>
    %1365 = vector.broadcast %918 : f32 to vector<16x128xf32>
    %1366 = arith.mulf %1355, %1365 : vector<16x128xf32>
    %1367 = arith.addf %1354, %1366 : vector<16x128xf32>
    %1368 = vector.extract_strided_slice %1341 {offsets = [2, 0], sizes = [16, 128], strides = [1, 1]} : vector<18x128xf32> to vector<16x128xf32>
    %1369 = vector.broadcast %813 : f32 to vector<16x128xf32>
    %1370 = arith.mulf %1368, %1369 : vector<16x128xf32>
    %1371 = arith.addf %1358, %1370 : vector<16x128xf32>
    %1372 = vector.broadcast %849 : f32 to vector<16x128xf32>
    %1373 = arith.mulf %1368, %1372 : vector<16x128xf32>
    %1374 = arith.addf %1361, %1373 : vector<16x128xf32>
    %1375 = vector.broadcast %885 : f32 to vector<16x128xf32>
    %1376 = arith.mulf %1368, %1375 : vector<16x128xf32>
    %1377 = arith.addf %1364, %1376 : vector<16x128xf32>
    %1378 = vector.broadcast %921 : f32 to vector<16x128xf32>
    %1379 = arith.mulf %1368, %1378 : vector<16x128xf32>
    %1380 = arith.addf %1367, %1379 : vector<16x128xf32>
    %1381 = vector.extract_strided_slice %1338 {offsets = [0, 0], sizes = [16, 128], strides = [1, 1]} : vector<18x128xf32> to vector<16x128xf32>
    %1382 = vector.broadcast %808 : f32 to vector<16x128xf32>
    %1383 = arith.mulf %1381, %1382 : vector<16x128xf32>
    %1384 = arith.addf %1371, %1383 : vector<16x128xf32>
    %1385 = vector.broadcast %844 : f32 to vector<16x128xf32>
    %1386 = arith.mulf %1381, %1385 : vector<16x128xf32>
    %1387 = arith.addf %1374, %1386 : vector<16x128xf32>
    %1388 = vector.broadcast %880 : f32 to vector<16x128xf32>
    %1389 = arith.mulf %1381, %1388 : vector<16x128xf32>
    %1390 = arith.addf %1377, %1389 : vector<16x128xf32>
    %1391 = vector.broadcast %916 : f32 to vector<16x128xf32>
    %1392 = arith.mulf %1381, %1391 : vector<16x128xf32>
    %1393 = arith.addf %1380, %1392 : vector<16x128xf32>
    %1394 = vector.extract_strided_slice %1338 {offsets = [1, 0], sizes = [16, 128], strides = [1, 1]} : vector<18x128xf32> to vector<16x128xf32>
    %1395 = vector.broadcast %811 : f32 to vector<16x128xf32>
    %1396 = arith.mulf %1394, %1395 : vector<16x128xf32>
    %1397 = arith.addf %1384, %1396 : vector<16x128xf32>
    %1398 = vector.broadcast %847 : f32 to vector<16x128xf32>
    %1399 = arith.mulf %1394, %1398 : vector<16x128xf32>
    %1400 = arith.addf %1387, %1399 : vector<16x128xf32>
    %1401 = vector.broadcast %883 : f32 to vector<16x128xf32>
    %1402 = arith.mulf %1394, %1401 : vector<16x128xf32>
    %1403 = arith.addf %1390, %1402 : vector<16x128xf32>
    %1404 = vector.broadcast %919 : f32 to vector<16x128xf32>
    %1405 = arith.mulf %1394, %1404 : vector<16x128xf32>
    %1406 = arith.addf %1393, %1405 : vector<16x128xf32>
    %1407 = vector.extract_strided_slice %1338 {offsets = [2, 0], sizes = [16, 128], strides = [1, 1]} : vector<18x128xf32> to vector<16x128xf32>
    %1408 = vector.broadcast %814 : f32 to vector<16x128xf32>
    %1409 = arith.mulf %1407, %1408 : vector<16x128xf32>
    %1410 = arith.addf %1397, %1409 : vector<16x128xf32>
    %1411 = vector.broadcast %850 : f32 to vector<16x128xf32>
    %1412 = arith.mulf %1407, %1411 : vector<16x128xf32>
    %1413 = arith.addf %1400, %1412 : vector<16x128xf32>
    %1414 = vector.broadcast %886 : f32 to vector<16x128xf32>
    %1415 = arith.mulf %1407, %1414 : vector<16x128xf32>
    %1416 = arith.addf %1403, %1415 : vector<16x128xf32>
    %1417 = vector.broadcast %922 : f32 to vector<16x128xf32>
    %1418 = arith.mulf %1407, %1417 : vector<16x128xf32>
    %1419 = arith.addf %1406, %1418 : vector<16x128xf32>
    %c127_i32_319 = arith.constant 127 : i32
    %1420 = tpu.dynamic_rotate %1338 by %c127_i32_319 dim 1 : vector<18x128xf32>, i32 -> vector<18x128xf32>
    %cst_320 = arith.constant 0.000000e+00 : f32
    %1421 = vector.broadcast %cst_320 : f32 to vector<18x128xf32>
    %1422 = arith.select %965, %1420, %1421 : vector<18x128xi1>, vector<18x128xf32>
    %1423 = vector.extract_strided_slice %1422 {offsets = [0, 0], sizes = [16, 128], strides = [1, 1]} : vector<18x128xf32> to vector<16x128xf32>
    %1424 = vector.broadcast %809 : f32 to vector<16x128xf32>
    %1425 = arith.mulf %1423, %1424 : vector<16x128xf32>
    %1426 = arith.addf %1410, %1425 : vector<16x128xf32>
    %1427 = vector.broadcast %845 : f32 to vector<16x128xf32>
    %1428 = arith.mulf %1423, %1427 : vector<16x128xf32>
    %1429 = arith.addf %1413, %1428 : vector<16x128xf32>
    %1430 = vector.broadcast %881 : f32 to vector<16x128xf32>
    %1431 = arith.mulf %1423, %1430 : vector<16x128xf32>
    %1432 = arith.addf %1416, %1431 : vector<16x128xf32>
    %1433 = vector.broadcast %917 : f32 to vector<16x128xf32>
    %1434 = arith.mulf %1423, %1433 : vector<16x128xf32>
    %1435 = arith.addf %1419, %1434 : vector<16x128xf32>
    %1436 = vector.extract_strided_slice %1422 {offsets = [1, 0], sizes = [16, 128], strides = [1, 1]} : vector<18x128xf32> to vector<16x128xf32>
    %1437 = vector.broadcast %812 : f32 to vector<16x128xf32>
    %1438 = arith.mulf %1436, %1437 : vector<16x128xf32>
    %1439 = arith.addf %1426, %1438 : vector<16x128xf32>
    %1440 = vector.broadcast %848 : f32 to vector<16x128xf32>
    %1441 = arith.mulf %1436, %1440 : vector<16x128xf32>
    %1442 = arith.addf %1429, %1441 : vector<16x128xf32>
    %1443 = vector.broadcast %884 : f32 to vector<16x128xf32>
    %1444 = arith.mulf %1436, %1443 : vector<16x128xf32>
    %1445 = arith.addf %1432, %1444 : vector<16x128xf32>
    %1446 = vector.broadcast %920 : f32 to vector<16x128xf32>
    %1447 = arith.mulf %1436, %1446 : vector<16x128xf32>
    %1448 = arith.addf %1435, %1447 : vector<16x128xf32>
    %1449 = vector.extract_strided_slice %1422 {offsets = [2, 0], sizes = [16, 128], strides = [1, 1]} : vector<18x128xf32> to vector<16x128xf32>
    %1450 = vector.broadcast %815 : f32 to vector<16x128xf32>
    %1451 = arith.mulf %1449, %1450 : vector<16x128xf32>
    %1452 = arith.addf %1439, %1451 : vector<16x128xf32>
    %1453 = vector.broadcast %851 : f32 to vector<16x128xf32>
    %1454 = arith.mulf %1449, %1453 : vector<16x128xf32>
    %1455 = arith.addf %1442, %1454 : vector<16x128xf32>
    %1456 = vector.broadcast %887 : f32 to vector<16x128xf32>
    %1457 = arith.mulf %1449, %1456 : vector<16x128xf32>
    %1458 = arith.addf %1445, %1457 : vector<16x128xf32>
    %1459 = vector.broadcast %923 : f32 to vector<16x128xf32>
    %1460 = arith.mulf %1449, %1459 : vector<16x128xf32>
    %1461 = arith.addf %1448, %1460 : vector<16x128xf32>
    %1462 = vector.broadcast %924 : f32 to vector<16x128xf32>
    %1463 = arith.addf %1452, %1462 : vector<16x128xf32>
    %cst_321 = arith.constant 0.000000e+00 : f32
    %1464 = vector.broadcast %cst_321 : f32 to vector<16x128xf32>
    %1465 = arith.maximumf %1463, %1464 : vector<16x128xf32>
    %1466 = vector.broadcast %925 : f32 to vector<16x128xf32>
    %1467 = arith.addf %1455, %1466 : vector<16x128xf32>
    %cst_322 = arith.constant 0.000000e+00 : f32
    %1468 = vector.broadcast %cst_322 : f32 to vector<16x128xf32>
    %1469 = arith.maximumf %1467, %1468 : vector<16x128xf32>
    %1470 = vector.broadcast %926 : f32 to vector<16x128xf32>
    %1471 = arith.addf %1458, %1470 : vector<16x128xf32>
    %cst_323 = arith.constant 0.000000e+00 : f32
    %1472 = vector.broadcast %cst_323 : f32 to vector<16x128xf32>
    %1473 = arith.maximumf %1471, %1472 : vector<16x128xf32>
    %1474 = vector.broadcast %927 : f32 to vector<16x128xf32>
    %1475 = arith.addf %1461, %1474 : vector<16x128xf32>
    %cst_324 = arith.constant 0.000000e+00 : f32
    %1476 = vector.broadcast %cst_324 : f32 to vector<16x128xf32>
    %1477 = arith.maximumf %1475, %1476 : vector<16x128xf32>
    %c0_325 = arith.constant 0 : index
    %c0_326 = arith.constant 0 : index
    %c0_327 = arith.constant 0 : index
    %c0_328 = arith.constant 0 : index
    %1478 = vector.load %arg6[%c0_325, %c0_326, %c0_327, %c0_328] : memref<1x4x16x128xf32, #tpu.memory_space<vmem>>, vector<1x1x16x128xf32>
    %1479 = vector.shape_cast %1478 : vector<1x1x16x128xf32> to vector<16x128xf32>
    %1480 = vector.shape_cast %1465 : vector<16x128xf32> to vector<1x1x16x128xf32>
    tpu.vector_store %arg6[%c0_325, %c0_326, %c0_327, %c0_328], %1480 {strides = array<i32>} : memref<1x4x16x128xf32, #tpu.memory_space<vmem>>, vector<1x1x16x128xf32>,
    %c0_329 = arith.constant 0 : index
    %c1_330 = arith.constant 1 : index
    %c0_331 = arith.constant 0 : index
    %c0_332 = arith.constant 0 : index
    %1481 = vector.load %arg6[%c0_329, %c1_330, %c0_331, %c0_332] : memref<1x4x16x128xf32, #tpu.memory_space<vmem>>, vector<1x1x16x128xf32>
    %1482 = vector.shape_cast %1481 : vector<1x1x16x128xf32> to vector<16x128xf32>
    %1483 = vector.shape_cast %1469 : vector<16x128xf32> to vector<1x1x16x128xf32>
    tpu.vector_store %arg6[%c0_329, %c1_330, %c0_331, %c0_332], %1483 {strides = array<i32>} : memref<1x4x16x128xf32, #tpu.memory_space<vmem>>, vector<1x1x16x128xf32>,
    %c0_333 = arith.constant 0 : index
    %c2_334 = arith.constant 2 : index
    %c0_335 = arith.constant 0 : index
    %c0_336 = arith.constant 0 : index
    %1484 = vector.load %arg6[%c0_333, %c2_334, %c0_335, %c0_336] : memref<1x4x16x128xf32, #tpu.memory_space<vmem>>, vector<1x1x16x128xf32>
    %1485 = vector.shape_cast %1484 : vector<1x1x16x128xf32> to vector<16x128xf32>
    %1486 = vector.shape_cast %1473 : vector<16x128xf32> to vector<1x1x16x128xf32>
    tpu.vector_store %arg6[%c0_333, %c2_334, %c0_335, %c0_336], %1486 {strides = array<i32>} : memref<1x4x16x128xf32, #tpu.memory_space<vmem>>, vector<1x1x16x128xf32>,
    %c0_337 = arith.constant 0 : index
    %c3_338 = arith.constant 3 : index
    %c0_339 = arith.constant 0 : index
    %c0_340 = arith.constant 0 : index
    %1487 = vector.load %arg6[%c0_337, %c3_338, %c0_339, %c0_340] : memref<1x4x16x128xf32, #tpu.memory_space<vmem>>, vector<1x1x16x128xf32>
    %1488 = vector.shape_cast %1487 : vector<1x1x16x128xf32> to vector<16x128xf32>
    %1489 = vector.shape_cast %1477 : vector<16x128xf32> to vector<1x1x16x128xf32>
    tpu.vector_store %arg6[%c0_337, %c3_338, %c0_339, %c0_340], %1489 {strides = array<i32>} : memref<1x4x16x128xf32, #tpu.memory_space<vmem>>, vector<1x1x16x128xf32>,
    return
  }
  func.func @transform_0(%arg0: i32) -> (i32, i32, i32, i32) {
    %c0_i32 = arith.constant 0 : i32
    %c0_i32_0 = arith.constant 0 : i32
    %c0_i32_1 = arith.constant 0 : i32
    %c0_i32_2 = arith.constant 0 : i32
    return %arg0, %c0_i32, %c0_i32_0, %c0_i32_1 : i32, i32, i32, i32
  }
  func.func @transform_1(%arg0: i32) -> i32 {
    %c0_i32 = arith.constant 0 : i32
    %c0_i32_0 = arith.constant 0 : i32
    return %c0_i32 : i32
  }
  func.func @transform_2(%arg0: i32) -> i32 {
    %c0_i32 = arith.constant 0 : i32
    %c0_i32_0 = arith.constant 0 : i32
    return %c0_i32 : i32
  }
  func.func @transform_3(%arg0: i32) -> i32 {
    %c0_i32 = arith.constant 0 : i32
    %c0_i32_0 = arith.constant 0 : i32
    return %c0_i32 : i32
  }
  func.func @transform_4(%arg0: i32) -> i32 {
    %c0_i32 = arith.constant 0 : i32
    %c0_i32_0 = arith.constant 0 : i32
    return %c0_i32 : i32
  }
  func.func @transform_5(%arg0: i32) -> (i32, i32, i32, i32) {
    %c0_i32 = arith.constant 0 : i32
    %c0_i32_0 = arith.constant 0 : i32
    %c0_i32_1 = arith.constant 0 : i32
    %c0_i32_2 = arith.constant 0 : i32
    return %arg0, %c0_i32, %c0_i32_0, %c0_i32_1 : i32, i32, i32, i32
  }
}

</mosaic_0001>

<bundles_post_ra>
// kernel: tpu_custom_call.1
= control target key start
LH: loop header
LB: loop body
LE: loop exit
PB: predicated region body
PF: predicated region fallthrough
CT: control target
= control target key end

     0   :  { %s9318_s0 = inlined_call_operand.hbm [shape: f32[1,4,16,128], index: 0, kind: input, shape index: {}]   ;;  %s9319_s1 = inlined_call_operand.vmem [shape: f32[144], index: 1, kind: input, shape index: {}]   ;;  %s9320_s2 = inlined_call_operand.vmem [shape: f32[4], index: 2, kind: input, shape index: {}]   ;;  %s9321_s3 = inlined_call_operand.vmem [shape: f32[144], index: 3, kind: input, shape index: {}]   ;;  %s9322_s4 = inlined_call_operand.vmem [shape: f32[4], index: 4, kind: input, shape index: {}]   ;;  %s9323_s5 = inlined_call_operand.hbm [shape: f32[1,4,16,128], index: 5, kind: output, shape index: {}]  }
   0x1   :  { %9465 = sst [smem:[#allocation148_spill]] %s9323_s5 }
   0x2   :  { %10 = vsyncpa [#allocation5], 0 }
   0x3   :  { %11 = vsyncpa [#allocation7], 0 }
   0x4   :  { %12 = vsyncpa [#allocation10], 0 }
   0x5   :  { %13 = vsyncpa [#allocation13], 0  ;;  %s43_s20 = sshll.u32 %s9320_s2, 4  ;;  %s44_s20 = int_to_ptr.vmem [resolvable:$true] %s43_s20 }
   0x6   :  { %14 = vsyncpa [#allocation6], 0  ;;  %s4535_s21 = scalar_lea.vmem %s44_s20, 16  ;;  %p4540_p1 = scmp.lt.s32.totalorder %s44_s20, %s44_s20 }
   0x7   :  { %p4536_p0 = scmp.ne.s32.totalorder %s44_s20, %s4535_s21  ;;  %p4541_p2 = scmp.lt.s32.totalorder %s4535_s21, %s4535_s21 }
   0x9   :  { %p4542_p3 = por %p4541_p2, %p4540_p1 }
   0xb   :  { %p4543_p4 = pnand %p4542_p3, %p4536_p0 }
   0xd   :  { %4546 = shalt.err (!%p4543_p4)
}
   0xe   :  { %s4637_s22 = smov [#allocation9]   ;;  %s4638_s23 = smov [#allocation4]  }
   0xf   :  { %46 = dma.vmem_to_smem %s44_s20, 16, %s4637_s22, [#allocation10]  }
  0x10   :  { %s20_s24 = sshll.u32 %s4638_s23, 4  ;;  %s4547_s27 = scalar_lea.hbm %s9318_s0, 1024  ;;  %s21_s24 = int_to_ptr.vmem [resolvable:$true] %s20_s24 }
  0x11   :  { %p4548_p5 = scmp.ne.s32.totalorder %s9318_s0, %s4547_s27  ;;  %p4551_p6 = scmp.lt.u32.totalorder %s4547_s27, %s9318_s0 }
  0x13   :  { %p4553_p7 = pnand %p4551_p6, %p4548_p5 }
  0x15   :  { %4556 = shalt.err (!%p4553_p7)
}
  0x16   :  { %s4557_s6 = scalar_lea.vmem %s21_s24, 1024  ;;  %p4562_p9 = scmp.lt.s32.totalorder %s21_s24, %s21_s24 }
  0x17   :  { %p4558_p8 = scmp.ne.s32.totalorder %s21_s24, %s4557_s6  ;;  %p4563_p10 = scmp.lt.s32.totalorder %s4557_s6, %s4557_s6 }
  0x19   :  { %p4564_p11 = por %p4563_p10, %p4562_p9 }
  0x1b   :  { %p4565_p12 = pnand %p4564_p11, %p4558_p8 }
  0x1d   :  { %4568 = shalt.err (!%p4565_p12)
}
  0x1e   :  { %s9324_s7 = smov 128   ;;  %s9325_s8 = smov 8  }
  0x1f   :  { %26 = dma.hbm_to_vmem [thread:$0]  %s9318_s0, 1024, %s21_s24, [#allocation5], %s9324_s7, %s9324_s7, %s9325_s8  }
  0x20   :  { %s33_s13 = sshll.u32 %s9319_s1, 4  ;;  %s53_s16 = sshll.u32 %s9321_s3, 4  ;;  %s34_s13 = int_to_ptr.vmem [resolvable:$true] %s33_s13  ;;  %s54_s16 = int_to_ptr.vmem [resolvable:$true] %s53_s16 }
  0x21   :  { %s4569_s17 = scalar_lea.vmem %s34_s13, 32  ;;  %p4574_p0 = scmp.lt.s32.totalorder %s34_s13, %s34_s13 }
  0x22   :  { %p4570_p13 = scmp.ne.s32.totalorder %s34_s13, %s4569_s17  ;;  %p4575_p1 = scmp.lt.s32.totalorder %s4569_s17, %s4569_s17 }
  0x24   :  { %p4576_p2 = por %p4575_p1, %p4574_p0 }
  0x26   :  { %p4577_p3 = pnand %p4576_p2, %p4570_p13 }
  0x28   :  { %4580 = shalt.err (!%p4577_p3)
}
  0x29   :  { %s4641_s18 = smov [#allocation8]   ;;  %s4581_s0 = scalar_lea.vmem %s54_s16, 32 }
  0x2a   :  { %36 = dma.vmem_to_smem %s34_s13, 32, %s4641_s18, [#allocation7]  }
  0x2b   :  { %p4582_p4 = scmp.ne.s32.totalorder %s54_s16, %s4581_s0  ;;  %p4586_p5 = scmp.lt.s32.totalorder %s54_s16, %s54_s16 }
  0x2c   :  { %p4587_p6 = scmp.lt.s32.totalorder %s4581_s0, %s4581_s0 }
  0x2e   :  { %p4588_p7 = por %p4587_p6, %p4586_p5 }
  0x30   :  { %p4589_p8 = pnand %p4588_p7, %p4582_p4 }
  0x32   :  { %4592 = shalt.err (!%p4589_p8)
}
  0x33   :  { %s4642_s1 = smov [#allocation11]   ;;  %s63_s20 = sshll.u32 %s9322_s4, 4  ;;  %s64_s20 = int_to_ptr.vmem [resolvable:$true] %s63_s20 }
  0x34   :  { %56 = dma.vmem_to_smem %s54_s16, 32, %s4642_s1, [#allocation10]  }
  0x35   :  { %s4593_s21 = scalar_lea.vmem %s64_s20, 16  ;;  %p4598_p10 = scmp.lt.s32.totalorder %s64_s20, %s64_s20 }
  0x36   :  { %p4594_p9 = scmp.ne.s32.totalorder %s64_s20, %s4593_s21  ;;  %p4599_p11 = scmp.lt.s32.totalorder %s4593_s21, %s4593_s21 }
  0x38   :  { %p4600_p12 = por %p4599_p11, %p4598_p10 }
  0x3a   :  { %p4601_p13 = pnand %p4600_p12, %p4594_p9 }
  0x3c   :  { %4604 = shalt.err (!%p4601_p13)
}
  0x3d   :  { %s4643_s22 = smov [#allocation12]  }
  0x3e   :  { %66 = dma.vmem_to_smem %s64_s20, 16, %s4643_s22, [#allocation13]  }
  0x3f   :  { %4627 = dma.done.wait [#allocation5], 1024  }
  0x40   :  { %4628 = vsyncadd [#allocation5], 4294966272 }
  0x41   :  { %4629 = dma.done.wait [#allocation7], 32  }
  0x42   :  { %4630 = vsyncadd [#allocation7], 4294967264 }
  0x43   :  { %4631 = dma.done.wait [#allocation10], 48  }
  0x44   :  { %4632 = vsyncadd [#allocation10], 4294967248 }
  0x45   :  { %4633 = dma.done.wait [#allocation13], 16  }
  0x46   :  { %4634 = vsyncadd [#allocation13], 4294967280 }
  0x47   :  { %82 = sfence }
  0x48   :  { %v85_v0 = vld [vmem:[#allocation4] sm:$0xff]  ;;  %v86_v1 = vld [vmem:[#allocation4 + $0x8] sm:$0xff]  ;;  %v93_v2 = vld [vmem:[#allocation4 + $0x10] sm:$0xff]  ;;  %v4644_v3 = vmov 0.0   ;;  %s4227_s4 = sld [smem:[#allocation8 + $0x4]]  ;;  %s4645_s23 = smov 2  }
  0x49   :  { %83 = vst [vmem:[#allocation2] sm:$0x3] %v4644_v3  ;;  %87 = vst [vmem:[#allocation2 + $0x2] sm:$0xff] %v85_v0  ;;  %v94_v4 = vld [vmem:[#allocation4 + $0x18] sm:$0xff]  ;;  %v101_v5 = vld [vmem:[#allocation4 + $0x20] sm:$0xff]  ;;  %s4230_s24 = sld [smem:[#allocation8 + $0x7]] }
  0x4a   :  { %84 = vst [vmem:[#allocation2 + $0x12] sm:$0x3] %v4644_v3  ;;  %90 = vst [vmem:[#allocation2 + $0x18] sm:$0x3] %v4644_v3  ;;  %v102_v6 = vld [vmem:[#allocation4 + $0x28] sm:$0xff]  ;;  %v109_v7 = vld [vmem:[#allocation4 + $0x30] sm:$0xff] }
  0x4b   :  { %91 = vst [vmem:[#allocation2 + $0x2a] sm:$0x3] %v4644_v3  ;;  %98 = vst [vmem:[#allocation2 + $0x30] sm:$0x3] %v4644_v3  ;;  %v110_v8 = vld [vmem:[#allocation4 + $0x38] sm:$0xff]  ;;  %s4646_s25 = smov 126  }
  0x4c   :  { %99 = vst [vmem:[#allocation2 + $0x42] sm:$0x3] %v4644_v3  ;;  %106 = vst [vmem:[#allocation2 + $0x48] sm:$0x3] %v4644_v3  ;;  %s4263_s26 = sld [smem:[#allocation8 + $0x28]]  ;;  %s4266_s27 = sld [smem:[#allocation8 + $0x2b]] }
  0x4d   :  { %107 = vst [vmem:[#allocation2 + $0x5a] sm:$0x3] %v4644_v3  ;;  %2151 = vst [vmem:[#allocation3] sm:$0x1] %v4644_v3  ;;  %s4299_s28 = sld [smem:[#allocation8 + $0x4c]]  ;;  %vm308_vm0 = vcmask 1045504  }
  0x4e   :  { %2152 = vst [vmem:[#allocation3 + $0x11] sm:$0x1] %v4644_v3  ;;  %2156 = vst [vmem:[#allocation3 + $0x18] sm:$0x1] %v4644_v3  ;;  %v4721_v12 = vstv %s4227_s4  ;;  %s4302_s2 = sld [smem:[#allocation8 + $0x4f]]  ;;  %vm373_vm1 = vcmask 1043456  }
  0x4f   :  { %2157 = vst [vmem:[#allocation3 + $0x29] sm:$0x1] %v4644_v3  ;;  %2161 = vst [vmem:[#allocation3 + $0x30] sm:$0x1] %v4644_v3  ;;  %v4729_v15 = vstv %s4230_s24  ;;  %s4335_s29 = sld [smem:[#allocation8 + $0x70]]  ;;  %s4338_s30 = sld [smem:[#allocation8 + $0x73]] }
  0x50   :  { %2162 = vst [vmem:[#allocation3 + $0x41] sm:$0x1] %v4644_v3  ;;  %2166 = vst [vmem:[#allocation3 + $0x48] sm:$0x1] %v4644_v3  ;;  %v4707_v9 = vld [vmem:[#allocation2] sm:$0xff]  ;;  %s4865_s6 = sld [smem:[#allocation8]] }
  0x51   :  { %2167 = vst [vmem:[#allocation3 + $0x59] sm:$0x1] %v4644_v3  ;;  %88 = vst [vmem:[#allocation2 + $0xa] sm:$0xff] %v86_v1  ;;  %280 = vrot.lane.b32.xlu0 %v4707_v9, %s4645_s23  ;;  %v452_v0 = vmul.f32 %v4721_v12, %v4707_v9  ;;  %s4867_s9 = sld [smem:[#allocation8 + $0x24]]  ;;  %s4869_s10 = sld [smem:[#allocation8 + $0x48]]  ;;  %vm2351_vm4 = vcmask 1046528  }
  0x52   :  { %95 = vst [vmem:[#allocation2 + $0x1a] sm:$0xff] %v93_v2  ;;  %96 = vst [vmem:[#allocation2 + $0x22] sm:$0xff] %v94_v4  ;;  %v467_v25 = vstv %s4263_s26  ;;  %v531_v29 = vstv %s4266_s27  ;;  %s4871_s11 = sld [smem:[#allocation8 + $0x6c]]  ;;  %s4873_s12 = sld [smem:[#allocation8 + $0x3]] }
  0x53   :  { %103 = vst [vmem:[#allocation2 + $0x32] sm:$0xff] %v101_v5  ;;  %104 = vst [vmem:[#allocation2 + $0x3a] sm:$0xff] %v102_v6  ;;  %v483_v35 = vstv %s4299_s28  ;;  %v468_v1 = vmul.f32 %v467_v25, %v4707_v9  ;;  %v516_v6 = vmul.f32 %v4729_v15, %v4707_v9  ;;  %s4875_s13 = sld [smem:[#allocation8 + $0x6]]  ;;  %s4877_s14 = sld [smem:[#allocation8 + $0x27]] }
  0x54   :  { %111 = vst [vmem:[#allocation2 + $0x4a] sm:$0xff] %v109_v7  ;;  %112 = vst [vmem:[#allocation2 + $0x52] sm:$0xff] %v110_v8  ;;  %v547_v41 = vstv %s4302_s2  ;;  %v484_v4 = vmul.f32 %v483_v35, %v4707_v9  ;;  %v458_v7 = vrot.slane %v452_v0, 2  ;;  %s4879_s15 = sld [smem:[#allocation8 + $0x2a]]  ;;  %s4881_s16 = sld [smem:[#allocation8 + $0x4b]] }
  0x55   :  { %v499_v44 = vstv %s4335_s29  ;;  %v563_v51 = vstv %s4338_s30  ;;  %v474_v8 = vrot.slane %v468_v1, 2  ;;  %s4883_s17 = sld [smem:[#allocation8 + $0x4e]]  ;;  %s4885_s18 = sld [smem:[#allocation8 + $0x6f]] }
  0x56   :  { %v500_v5 = vmul.f32 %v499_v44, %v4707_v9  ;;  %9481 = sst [smem:[#allocation35_spill]] %s4865_s6  ;;  %s4887_s0 = sld [smem:[#allocation8 + $0x72]] }
  0x57   :  { %9482 = sst [smem:[#allocation36_spill]] %s4869_s10  ;;  %s4891_s3 = sld [smem:[#allocation8 + $0x2]] }
  0x58   :  { %v4709_v10 = vld [vmem:[#allocation2 + $0x10] sm:$0xf]  ;;  %v4715_v11 = vld [vmem:[#allocation2 + $0x8] sm:$0xff]  ;;  %s4889_s1 = sld [smem:[#allocation8 + $0x1]]  ;;  %s4893_s19 = sld [smem:[#allocation8 + $0x5]] }
  0x59   :  { %284 = vrot.lane.b32.xlu1 %v4709_v10, %s4645_s23  ;;  %282 = vrot.lane.b32.xlu0 %v4715_v11, %s4645_s23  ;;  %v4725_v13 = vmul.f32 %v4721_v12, %v4715_v11  ;;  %v454_v14 = vmul.f32 %v4721_v12, %v4709_v10  ;;  %v4734_v18 = vmul.f32 %v4729_v15, %v4715_v11  ;;  %v4742_v20 = vld [vmem:[#allocation2 + $0x18] sm:$0xff]  ;;  %v4744_v21 = vld [vmem:[#allocation2 + $0x20] sm:$0xff]  ;;  %v4765_v30 = vld [vmem:[#allocation2 + $0x28] sm:$0xf]  ;;  %v490_v12 = vrot.slane %v484_v4, 2  ;;  %s4895_s20 = sld [smem:[#allocation8 + $0x8]] }
  0x5a   :  { %v518_v19 = vmul.f32 %v4729_v15, %v4709_v10  ;;  %v4762_v27 = vmul.f32 %v467_v25, %v4715_v11  ;;  %v470_v28 = vmul.f32 %v467_v25, %v4709_v10  ;;  %v4768_v31 = vmul.f32 %v531_v29, %v4715_v11  ;;  %v4797_v56 = vld [vmem:[#allocation2 + $0x30] sm:$0xff]  ;;  %v4799_v57 = vld [vmem:[#allocation2 + $0x38] sm:$0xff]  ;;  %v1203_v2 = vld [vmem:[#allocation2 + $0x40] sm:$0xf]  ;;  %s4897_s21 = sld [smem:[#allocation8 + $0x25]]  ;;  %s4899_s22 = sld [smem:[#allocation8 + $0x26]] }
  0x5b   :  { %v459_v16 = vrot.slane %v4725_v13, 2  ;;  %v461_v17 = vrot.slane %v454_v14, 2  ;;  %v523_v23 = vrot.slane %v4734_v18, 4  ;;  %v534_v32 = vmul.f32 %v531_v29, %v4709_v10  ;;  %v1667_v18 = vld [vmem:[#allocation2 + $0x50] sm:$0xff]  ;;  %s4901_s4 = sld [smem:[#allocation8 + $0x29]]  ;;  %s4909_s26 = sld [smem:[#allocation8 + $0x4d]] }
  0x5c   :  { %v525_v24 = vrot.slane %v518_v19, 4  ;;  %v475_v33 = vrot.slane %v4762_v27, 2  ;;  %v477_v34 = vrot.slane %v470_v28, 2  ;;  %v485_v36 = vmul.f32 %v483_v35, %v4715_v11  ;;  %s4905_s24 = sld [smem:[#allocation8 + $0x49]]  ;;  %s4911_s27 = sld [smem:[#allocation8 + $0x50]] }
  0x5d   :  { %579 = vrot.lane.b32.xlu1 %v4707_v9, %s4646_s25  ;;  %581 = vrot.lane.b32.xlu0 %v4715_v11, %s4646_s25  ;;  %v4749_v22 = vsel %vm308_vm0, %v459_v16, %v461_v17  ;;  %v486_v37 = vmul.f32 %v483_v35, %v4709_v10  ;;  %v539_v38 = vrot.slane %v4768_v31, 4  ;;  %v541_v39 = vrot.slane %v534_v32, 4  ;;  %v1666_v35 = vld [vmem:[#allocation2 + $0x48] sm:$0xff]  ;;  %s4913_s28 = sld [smem:[#allocation8 + $0x6d]]  ;;  %s4915_s2 = sld [smem:[#allocation8 + $0x6e]] }
  0x5e   :  { %9466 = vst [vmem:[#allocation20_spill] sm:$0xff] %v4749_v22  ;;  %v4755_v26 = vsel %vm373_vm1, %v523_v23, %v525_v24  ;;  %v4780_v40 = vsel %vm308_vm0, %v475_v33, %v477_v34  ;;  %v491_v42 = vrot.slane %v485_v36, 2  ;;  %v501_v45 = vmul.f32 %v499_v44, %v4715_v11  ;;  %s4917_s29 = sld [smem:[#allocation8 + $0x71]]  ;;  %s4919_s30 = sld [smem:[#allocation8 + $0x74]] }
  0x5f   :  { %9467 = vst [vmem:[#allocation21_spill] sm:$0xff] %v4755_v26  ;;  %9468 = vst [vmem:[#allocation22_spill] sm:$0xff] %v4780_v40  ;;  %v493_v43 = vrot.slane %v486_v37, 2  ;;  %v502_v46 = vmul.f32 %v499_v44, %v4709_v10  ;;  %v4785_v47 = vsel %vm373_vm1, %v539_v38, %v541_v39  ;;  %v549_v48 = vmul.f32 %v547_v41, %v4715_v11  ;;  %s4921_s7 = sld [smem:[#allocation8 + $0x9]]  ;;  %s4923_s8 = sld [smem:[#allocation8 + $0xc]] }
  0x60   :  { %9469 = vst [vmem:[#allocation23_spill] sm:$0xff] %v4785_v47  ;;  %v550_v50 = vmul.f32 %v547_v41, %v4709_v10  ;;  %v507_v52 = vrot.slane %v501_v45, 2  ;;  %v565_v55 = vmul.f32 %v563_v51, %v4715_v11  ;;  %v566_v59 = vmul.f32 %v563_v51, %v4709_v10  ;;  %9483 = sst [smem:[#allocation37_spill]] %s4899_s22  ;;  %s4925_s5 = sld [smem:[#allocation8 + $0xf]] }
  0x61   :  { %583 = vrot.lane.b32.xlu1 %v4709_v10, %s4646_s25  ;;  %739 = vrot.lane.b32.xlu0 %v4742_v20, %s4645_s23  ;;  %v4789_v49 = vsel %vm308_vm0, %v491_v42, %v493_v43  ;;  %v509_v53 = vrot.slane %v502_v46, 2  ;;  %v555_v54 = vrot.slane %v549_v48, 4  ;;  %v532_v10 = vmul.f32 %v531_v29, %v4707_v9  ;;  %9485 = sst [smem:[#allocation39_spill]] %s4909_s26  ;;  %s4931_s26 = sld [smem:[#allocation8 + $0x30]] }
  0x62   :  { %9470 = vst [vmem:[#allocation24_spill] sm:$0xff] %v4789_v49  ;;  %v557_v58 = vrot.slane %v550_v50, 4  ;;  %v571_v61 = vrot.slane %v565_v55, 4  ;;  %v573_v63 = vrot.slane %v566_v59, 4  ;;  %v548_v14 = vmul.f32 %v547_v41, %v4707_v9  ;;  %9486 = sst [smem:[#allocation40_spill]] %s4911_s27  ;;  %s4953_s6 = sld [smem:[#allocation8 + $0xa]] }
  0x63   :  { %v4803_v60 = vsel %vm308_vm0, %v507_v52, %v509_v53  ;;  %v506_v17 = vrot.slane %v500_v5, 2  ;;  %v522_v19 = vrot.slane %v516_v6, 4  ;;  %v564_v24 = vmul.f32 %v563_v51, %v4707_v9  ;;  %9487 = sst [smem:[#allocation41_spill]] %s4915_s2  ;;  %s4927_s27 = sld [smem:[#allocation8 + $0x2d]] }
  0x64   :  { %9471 = vst [vmem:[#allocation25_spill] sm:$0xff] %v4803_v60  ;;  %v4806_v62 = vsel %vm373_vm1, %v555_v54, %v557_v58  ;;  %v4816_v3 = vsel %vm373_vm1, %v571_v61, %v573_v63  ;;  %v4831_v15 = vsel %vm308_vm0, %v458_v7, %v459_v16  ;;  %v4834_v25 = vsel %vm308_vm0, %v474_v8, %v475_v33  ;;  %9488 = sst [smem:[#allocation42_spill]] %s4917_s29  ;;  %s4933_s29 = sld [smem:[#allocation8 + $0x33]] }
  0x65   :  { %741 = vrot.lane.b32.xlu1 %v4744_v21, %s4645_s23  ;;  %743 = vrot.lane.b32.xlu0 %v4765_v30, %s4645_s23  ;;  %9472 = vst [vmem:[#allocation26_spill] sm:$0xff] %v4806_v62  ;;  %9473 = vst [vmem:[#allocation27_spill] sm:$0xff] %v4816_v3  ;;  %v538_v27 = vrot.slane %v532_v10, 4  ;;  %v554_v28 = vrot.slane %v548_v14, 4  ;;  %v4837_v29 = vsel %vm308_vm0, %v490_v12, %v491_v42  ;;  %v570_v13 = vrot.slane %v564_v24, 4  ;;  %9489 = sst [smem:[#allocation43_spill]] %s4921_s7 }
  0x66   :  { %9474 = vst [vmem:[#allocation28_spill] sm:$0xff] %v4834_v25  ;;  %9475 = vst [vmem:[#allocation29_spill] sm:$0xff] %v4837_v29  ;;  %v4840_v31 = vsel %vm308_vm0, %v506_v17, %v507_v52  ;;  %v4845_v32 = vsel %vm373_vm1, %v522_v19, %v523_v23  ;;  %v1668_v23 = vld [vmem:[#allocation2 + $0x58] sm:$0xf]  ;;  %v261_v36 = vlaneseq  ;;  %9490 = sst [smem:[#allocation44_spill]] %s4923_s8  ;;  %v4944_v44 = vstv %s4873_s12  ;;  %s4955_s10 = sld [smem:[#allocation8 + $0xd]] }
  0x67   :  { %9476 = vst [vmem:[#allocation30_spill] sm:$0xff] %v4840_v31  ;;  %9477 = vst [vmem:[#allocation31_spill] sm:$0xff] %v4845_v32  ;;  %v4848_v16 = vsel %vm373_vm1, %v538_v27, %v539_v38  ;;  %v4851_v33 = vsel %vm373_vm1, %v554_v28, %v555_v54  ;;  %v4854_v34 = vsel %vm373_vm1, %v570_v13, %v571_v61  ;;  %9491 = sst [smem:[#allocation45_spill]] %s4925_s5  ;;  %s4939_s8 = sld [smem:[#allocation8 + $0x51]]  ;;  %v4947_v45 = vstv %s4877_s14 }
  0x68   :  { %9478 = vst [vmem:[#allocation32_spill] sm:$0xff] %v4848_v16  ;;  %9479 = vst [vmem:[#allocation33_spill] sm:$0xff] %v4851_v33  ;;  %v262_v37 = vand.u32 127, %v261_v36  ;;  %s4941_s5 = sld [smem:[#allocation8 + $0x54]]  ;;  %v4950_v46 = vstv %s4875_s13  ;;  %v431_v48 = vstv %s4889_s1  ;;  %v4958_v50 = vstv %s4881_s16  ;;  %s4967_s12 = sld [smem:[#allocation8 + $0x2e]] }
  0x69   :  { %1044 = vrot.lane.b32.xlu1 %v4742_v20, %s4646_s25  ;;  %1046 = vrot.lane.b32.xlu0 %v4744_v21, %s4646_s25  ;;  %9480 = vst [vmem:[#allocation34_spill] sm:$0xff] %v4854_v34  ;;  %9492 = sst [smem:[#allocation46_spill]] %s4927_s27  ;;  %v4961_v51 = vstv %s4885_s18  ;;  %v4964_v52 = vstv %s4879_s15  ;;  %s4969_s13 = sld [smem:[#allocation8 + $0x31]]  ;;  %v4984_v61 = vmul.f32 %v431_v48, %v4715_v11  ;;  %v5019_v14 = vmul.f32 %v431_v48, %v4707_v9 }
  0x6a   :  { %v4929_v38 = vand.u32 15, %v262_v37  ;;  %v436_v53 = vstv %s4897_s21  ;;  %v4972_v54 = vstv %s4883_s17  ;;  %v4975_v55 = vstv %s4887_s0  ;;  %s4979_s14 = sld [smem:[#allocation8 + $0x57]]  ;;  %s4981_s16 = sld [smem:[#allocation8 + $0x75]] }
  0x6b   :  { %v441_v58 = vstv %s4905_s24  ;;  %v446_v59 = vstv %s4913_s28  ;;  %s9496_s15 = sld [smem:[#allocation39_spill]]  ;;  %v4989_v1 = vstv %s4893_s19  ;;  %s9497_s17 = sld [smem:[#allocation42_spill]]  ;;  %v4999_v4 = vstv %s4901_s4 }
  0x6c   :  { %9493 = vst [vmem:[#allocation47_spill] sm:$0xff] %v4929_v38  ;;  %s4991_s18 = sld [smem:[#allocation8 + $0x52]]  ;;  %s9498_s0 = sld [smem:[#allocation40_spill]]  ;;  %9499 = vst [vmem:[#allocation50_spill] sm:$0xff] %v4999_v4  ;;  %v5002_v5 = vstv %s4895_s20  ;;  %v5012_v7 = vmul.f32 %v441_v58, %v4715_v11  ;;  %v5015_v8 = vmul.f32 %v446_v59, %v4715_v11  ;;  %v5037_v27 = vmul.f32 %v436_v53, %v4707_v9 }
  0x6d   :  { %1048 = vrot.lane.b32.xlu1 %v4765_v30, %s4646_s25  ;;  %1204 = vrot.lane.b32.xlu0 %v4797_v56, %s4645_s23  ;;  %9494 = sst [smem:[#allocation48_spill]] %s4939_s8  ;;  %s4993_s1 = sld [smem:[#allocation8 + $0x78]]  ;;  %9500 = vst [vmem:[#allocation51_spill] sm:$0xff] %v5002_v5  ;;  %v5040_v28 = vmul.f32 %v441_v58, %v4707_v9  ;;  %v5043_v13 = vmul.f32 %v446_v59, %v4707_v9  ;;  %v5053_v36 = vstv %s4931_s26  ;;  %v916_v9 = vstv %s4955_s10 }
  0x6e   :  { %s5007_s21 = sld [smem:[#allocation8 + $0x76]]  ;;  %s5009_s19 = sld [smem:[#allocation8 + $0x7b]]  ;;  %9509 = vst [vmem:[#allocation58_spill] sm:$0xff] %v5053_v36  ;;  %v5057_v48 = vstv %s4941_s5  ;;  %v901_v37 = vstv %s4967_s12  ;;  %v5089_v42 = vmul.f32 %v916_v9, %v4742_v20  ;;  %v5097_v39 = vmul.f32 %v916_v9, %v4744_v21 }
  0x6f   :  { %s9502_s24 = sld [smem:[#allocation44_spill]]  ;;  %s5021_s20 = sld [smem:[#allocation8 + $0x55]]  ;;  %9510 = vst [vmem:[#allocation59_spill] sm:$0xff] %v5057_v48  ;;  %v932_v0 = vstv %s4969_s13  ;;  %vm275_vm2 = vcmp.ge.s32.totalorder %v4929_v38, 2  ;;  %vm276_vm3 = vcmp.lt.s32.totalorder %v4929_v38, 14 }
  0x70   :  { %9495 = sst [smem:[#allocation49_spill]] %s4981_s16  ;;  %s9506_s4 = sld [smem:[#allocation45_spill]] }
  0x71   :  { %1206 = vrot.lane.b32.xlu1 %v4799_v57, %s4645_s23  ;;  %1208 = vrot.lane.b32.xlu0 %v1203_v2, %s4645_s23  ;;  %v5025_v17 = vstv %s9496_s15  ;;  %v5028_v19 = vstv %s9497_s17  ;;  %s5061_s28 = sld [smem:[#allocation8 + $0x10]]  ;;  %s5142_s10 = sld [smem:[#allocation8 + $0xb]] }
  0x72   :  { %9503 = vst [vmem:[#allocation53_spill] sm:$0xff] %v5025_v17  ;;  %9504 = vst [vmem:[#allocation54_spill] sm:$0xff] %v5028_v19  ;;  %v5031_v24 = vstv %s9498_s0  ;;  %v906_v10 = vstv %s4991_s18  ;;  %s5091_s5 = sld [smem:[#allocation8 + $0x58]]  ;;  %s5144_s26 = sld [smem:[#allocation8 + $0xe]] }
  0x73   :  { %9505 = vst [vmem:[#allocation55_spill] sm:$0xff] %v5031_v24  ;;  %v5076_v12 = vstv %s4993_s1  ;;  %s5154_s12 = sld [smem:[#allocation8 + $0x2f]]  ;;  %s5161_s13 = sld [smem:[#allocation8 + $0x32]] }
  0x74   :  { %9514 = vst [vmem:[#allocation63_spill] sm:$0xff] %v5076_v12  ;;  %v5082_v63 = vstv %s5009_s19  ;;  %v911_v58 = vstv %s5007_s21  ;;  %v5124_v12 = vmul.f32 %v932_v0, %v4765_v30  ;;  %s5166_s15 = sld [smem:[#allocation8 + $0x53]]  ;;  %s5168_s17 = sld [smem:[#allocation8 + $0x56]] }
  0x75   :  { %1509 = vrot.lane.b32.xlu1 %v4797_v56, %s4646_s25  ;;  %1511 = vrot.lane.b32.xlu0 %v4799_v57, %s4646_s25  ;;  %9515 = vst [vmem:[#allocation64_spill] sm:$0xff] %v5082_v63  ;;  %v948_v63 = vstv %s5021_s20  ;;  %s5174_s18 = sld [smem:[#allocation8 + $0x59]]  ;;  %s5176_s0 = sld [smem:[#allocation8 + $0x77]] }
  0x76   :  { %v5065_v59 = vstv %s9506_s4  ;;  %v5135_v48 = vmul.f32 %v948_v63, %v4742_v20  ;;  %v942_v36 = vrot.slane %v5124_v12, 2  ;;  %s5182_s1 = sld [smem:[#allocation8 + $0x7a]]  ;;  %s5184_s21 = sld [smem:[#allocation8 + $0x7d]] }
  0x77   :  { %9511 = vst [vmem:[#allocation60_spill] sm:$0xff] %v5065_v59  ;;  %v5112_v59 = vmul.f32 %v906_v10, %v4742_v20  ;;  %s5190_s19 = sld [smem:[#allocation8 + $0x12]]  ;;  %s5196_s20 = sld [smem:[#allocation8 + $0x18]] }
  0x78   :  { %v1012_v12 = vstv %s5091_s5  ;;  %s5198_s4 = sld [smem:[#allocation8 + $0x36]]  ;;  %s5214_s5 = sld [smem:[#allocation8 + $0x5d]] }
  0x79   :  { %1513 = vrot.lane.b32.xlu1 %v1203_v2, %s4646_s25  ;;  %1669 = vrot.lane.b32.xlu0 %v1666_v35, %s4645_s23  ;;  %v4996_v2 = vmul.f32 %v436_v53, %v4715_v11  ;;  %v5034_v11 = vstv %s4919_s30  ;;  %v896_v53 = vstv %s4953_s6  ;;  %s5073_s30 = sld [smem:[#allocation8 + $0x34]]  ;;  %9520 = vst [vmem:[#allocation69_spill] sm:$0xff] %v5112_v59  ;;  %v923_v59 = vrot.slane %v5089_v42, 2  ;;  %s5224_s16 = sld [smem:[#allocation8 + $0x7e]] }
  0x7a   :  { %9507 = vst [vmem:[#allocation56_spill] sm:$0xff] %v5034_v11  ;;  %v5085_v43 = vmul.f32 %v896_v53, %v4742_v20  ;;  %v5094_v41 = vmul.f32 %v896_v53, %v4744_v21  ;;  %s5103_s6 = sld [smem:[#allocation8 + $0x7c]]  ;;  %v5115_v53 = vmul.f32 %v932_v0, %v4742_v20  ;;  %v1013_v60 = vmul.f32 %v1012_v12, %v4742_v20  ;;  %s5232_s8 = sld [smem:[#allocation8 + $0x13]] }
  0x7b   :  { %v1015_v31 = vmul.f32 %v1012_v12, %v4765_v30  ;;  %s5234_s27 = sld [smem:[#allocation8 + $0x37]]  ;;  %s5242_s7 = sld [smem:[#allocation8 + $0x5b]] }
  0x7c   :  { %9516 = vst [vmem:[#allocation65_spill] sm:$0xff] %v5085_v43  ;;  %9517 = vst [vmem:[#allocation66_spill] sm:$0xff] %v5094_v41  ;;  %v5106_v43 = vmul.f32 %v901_v37, %v4742_v20  ;;  %v5118_v41 = vmul.f32 %v906_v10, %v4744_v21  ;;  %v924_v10 = vrot.slane %v5097_v39, 2  ;;  %s5244_s2 = sld [smem:[#allocation8 + $0x7f]]  ;;  %s5261_s22 = sld [smem:[#allocation8 + $0x84]] }
  0x7d   :  { %1671 = vrot.lane.b32.xlu1 %v1667_v18, %s4645_s23  ;;  %1673 = vrot.lane.b32.xlu0 %v1668_v23, %s4645_s23  ;;  %s4903_s23 = sld [smem:[#allocation8 + $0x2c]] }
  0x7e   :  { %9518 = vst [vmem:[#allocation67_spill] sm:$0xff] %v5106_v43  ;;  %9521 = vst [vmem:[#allocation70_spill] sm:$0xff] %v5118_v41 }
  0x7f   :  { %v996_v39 = vstv %s5073_s30  ;;  %s5212_s30 = sld [smem:[#allocation8 + $0x5a]] }
  0x80   :  { %v997_v62 = vmul.f32 %v996_v39, %v4742_v20  ;;  %v998_v16 = vmul.f32 %v996_v39, %v4744_v21 }
  0x81   :  { %1974 = vrot.lane.b32.xlu1 %v1666_v35, %s4646_s25  ;;  %1976 = vrot.lane.b32.xlu0 %v1667_v18, %s4646_s25  ;;  %v5068_v35 = vstv %s4933_s29  ;;  %v5071_v18 = vstv %s4979_s14  ;;  %s5152_s29 = sld [smem:[#allocation8 + $0x11]]  ;;  %s5163_s14 = sld [smem:[#allocation8 + $0x35]] }
  0x82   :  { %9512 = vst [vmem:[#allocation61_spill] sm:$0xff] %v5068_v35  ;;  %9513 = vst [vmem:[#allocation62_spill] sm:$0xff] %v5071_v18  ;;  %v5100_v18 = vmul.f32 %v916_v9, %v4765_v30  ;;  %v5109_v35 = vmul.f32 %v901_v37, %v4744_v21  ;;  %v5121_v9 = vmul.f32 %v932_v0, %v4744_v21 }
  0x83   :  { %v5005_v6 = vstv %s4903_s23  ;;  %s5045_s23 = sld [smem:[#allocation8 + $0x79]]  ;;  %v5128_v37 = vmul.f32 %v911_v58, %v4742_v20  ;;  %v5140_v0 = vmul.f32 %v948_v63, %v4744_v21 }
  0x84   :  { %9501 = vst [vmem:[#allocation52_spill] sm:$0xff] %v5005_v6  ;;  %9519 = vst [vmem:[#allocation68_spill] sm:$0xff] %v5109_v35  ;;  %v5131_v35 = vmul.f32 %v911_v58, %v4744_v21  ;;  %v926_v41 = vrot.slane %v5100_v18, 2  ;;  %v939_v58 = vrot.slane %v5115_v53, 2  ;;  %v940_v18 = vrot.slane %v5121_v9, 2 }
  0x85   :  { %1978 = vrot.lane.b32.xlu1 %v1668_v23, %s4646_s25  ;;  %s4907_s25 = sld [smem:[#allocation8 + $0x4a]]  ;;  %v5050_v23 = vstv %s9502_s24  ;;  %9522 = vst [vmem:[#allocation71_spill] sm:$0xff] %v5128_v37  ;;  %v980_v37 = vstv %s5061_s28  ;;  %v956_v34 = vrot.slane %v5140_v0, 2  ;;  %v999_v0 = vmul.f32 %v996_v39, %v4765_v30  ;;  %s5192_s24 = sld [smem:[#allocation8 + $0x15]] }
  0x86   :  { %9508 = vst [vmem:[#allocation57_spill] sm:$0xff] %v5050_v23  ;;  %9523 = vst [vmem:[#allocation72_spill] sm:$0xff] %v5131_v35  ;;  %v951_v35 = vmul.f32 %v948_v63, %v4765_v30  ;;  %v955_v63 = vrot.slane %v5135_v48, 2  ;;  %v981_v3 = vmul.f32 %v980_v37, %v4742_v20  ;;  %v982_v9 = vmul.f32 %v980_v37, %v4744_v21  ;;  %s5204_s28 = sld [smem:[#allocation8 + $0x3c]] }
  0x87   :  { %v1028_v48 = vstv %s5103_s6  ;;  %v1003_v39 = vrot.slane %v997_v62, 4  ;;  %v1019_v62 = vrot.slane %v1013_v60, 4  ;;  %s5222_s6 = sld [smem:[#allocation8 + $0x60]] }
  0x88   :  { %v958_v33 = vrot.slane %v951_v35, 2  ;;  %v987_v35 = vrot.slane %v981_v3, 4  ;;  %v1029_v49 = vmul.f32 %v1028_v48, %v4742_v20  ;;  %v1031_v29 = vmul.f32 %v1028_v48, %v4765_v30 }
  0x89   :  { %v964_v43 = vstv %s5045_s23  ;;  %s5202_s23 = sld [smem:[#allocation8 + $0x39]]  ;;  %v5207_v3 = vsel %vm308_vm0, %v923_v59, %v924_v10  ;;  %v1022_v59 = vrot.slane %v1015_v31, 4 }
  0x8a   :  { %v5150_v42 = vmul.f32 %v964_v43, %v4742_v20  ;;  %v966_v23 = vmul.f32 %v964_v43, %v4744_v21  ;;  %v967_v53 = vmul.f32 %v964_v43, %v4765_v30  ;;  %v983_v43 = vmul.f32 %v980_v37, %v4765_v30  ;;  %9524 = vst [vmem:[#allocation73_spill] sm:$0xff] %v5207_v3 }
  0x8b   :  { %9484 = sst [smem:[#allocation38_spill]] %s4907_s25  ;;  %v1014_v37 = vmul.f32 %v1012_v12, %v4744_v21  ;;  %v1004_v20 = vrot.slane %v998_v16, 4  ;;  %v1006_v12 = vrot.slane %v999_v0, 4  ;;  %v5220_v30 = vsel %vm308_vm0, %v940_v18, %v942_v36  ;;  %s5259_s25 = sld [smem:[#allocation8 + $0x81]] }
  0x8c   :  { %v971_v47 = vrot.slane %v5150_v42, 2  ;;  %v972_v26 = vrot.slane %v966_v23, 2  ;;  %v974_v32 = vrot.slane %v967_v53, 2  ;;  %v988_v42 = vrot.slane %v982_v9, 4  ;;  %9527 = vst [vmem:[#allocation76_spill] sm:$0xff] %v5220_v30 }
  0x8d   :  { %v990_v23 = vrot.slane %v983_v43, 4  ;;  %v1030_v53 = vmul.f32 %v1028_v48, %v4744_v21  ;;  %v5210_v9 = vsel %vm308_vm0, %v924_v10, %v926_v41  ;;  %v5217_v21 = vsel %vm308_vm0, %v939_v58, %v940_v18 }
  0x8e   :  { %9525 = vst [vmem:[#allocation74_spill] sm:$0xff] %v5210_v9  ;;  %9526 = vst [vmem:[#allocation75_spill] sm:$0xff] %v5217_v21  ;;  %v1020_v43 = vrot.slane %v1014_v37, 4  ;;  %v5227_v41 = vsel %vm308_vm0, %v955_v63, %v956_v34  ;;  %v5230_v16 = vsel %vm308_vm0, %v956_v34, %v958_v33  ;;  %v1035_v10 = vrot.slane %v1029_v49, 4 }
  0x8f   :  { %9528 = vst [vmem:[#allocation77_spill] sm:$0xff] %v5227_v41  ;;  %9529 = vst [vmem:[#allocation78_spill] sm:$0xff] %v5230_v16  ;;  %v5237_v60 = vsel %vm308_vm0, %v971_v47, %v972_v26  ;;  %v5240_v36 = vsel %vm308_vm0, %v972_v26, %v974_v32  ;;  %v1036_v58 = vrot.slane %v1030_v53, 4  ;;  %v1038_v18 = vrot.slane %v1031_v29, 4 }
  0x90   :  { %9530 = vst [vmem:[#allocation79_spill] sm:$0xff] %v5237_v60  ;;  %9531 = vst [vmem:[#allocation80_spill] sm:$0xff] %v5240_v36  ;;  %v5248_v49 = vsel %vm373_vm1, %v987_v35, %v988_v42  ;;  %v5251_v47 = vsel %vm373_vm1, %v988_v42, %v990_v23  ;;  %v5254_v26 = vsel %vm373_vm1, %v1003_v39, %v1004_v20  ;;  %v5274_v0 = vstv %s5144_s26  ;;  %s5291_s26 = sld [smem:[#allocation8 + $0x16]] }
  0x91   :  { %9532 = vst [vmem:[#allocation81_spill] sm:$0xff] %v5248_v49  ;;  %9533 = vst [vmem:[#allocation82_spill] sm:$0xff] %v5251_v47  ;;  %v5257_v29 = vsel %vm373_vm1, %v1004_v20, %v1006_v12  ;;  %v5264_v31 = vsel %vm373_vm1, %v1019_v62, %v1020_v43  ;;  %v5270_v63 = vsel %vm373_vm1, %v1020_v43, %v1022_v59  ;;  %v5277_v37 = vstv %s5161_s13  ;;  %s5293_s13 = sld [smem:[#allocation8 + $0x3a]] }
  0x92   :  { %9534 = vst [vmem:[#allocation83_spill] sm:$0xff] %v5254_v26  ;;  %9535 = vst [vmem:[#allocation84_spill] sm:$0xff] %v5257_v29  ;;  %v5280_v35 = vsel %vm373_vm1, %v1035_v10, %v1036_v58  ;;  %v5283_v42 = vsel %vm373_vm1, %v1036_v58, %v1038_v18  ;;  %v5286_v23 = vstv %s5168_s17  ;;  %v5289_v39 = vstv %s5182_s1  ;;  %s6191_s17 = sld [smem:[#allocation8 + $0x14]]  ;;  %s6204_s1 = sld [smem:[#allocation8 + $0x1a]] }
  0x93   :  { %9536 = vst [vmem:[#allocation85_spill] sm:$0xff] %v5264_v31  ;;  %9537 = vst [vmem:[#allocation86_spill] sm:$0xff] %v5270_v63  ;;  %v5296_v53 = vstv %s5152_s29  ;;  %v5299_v20 = vstv %s5163_s14  ;;  %v5302_v12 = vstv %s5174_s18  ;;  %v5305_v62 = vstv %s5184_s21  ;;  %s9556_s29 = sld [smem:[#allocation35_spill]]  ;;  %s5775_s14 = sld [smem:[#allocation8 + $0x82]] }
  0x94   :  { %9538 = vst [vmem:[#allocation87_spill] sm:$0xff] %v5274_v0  ;;  %9539 = vst [vmem:[#allocation88_spill] sm:$0xff] %v5277_v37  ;;  %v5310_v10 = vstv %s5192_s24  ;;  %v5313_v58 = vstv %s5202_s23  ;;  %v5318_v34 = vstv %s5214_s5  ;;  %v5321_v33 = vstv %s5196_s20  ;;  %s6193_s18 = sld [smem:[#allocation8 + $0x38]]  ;;  %s6206_s21 = sld [smem:[#allocation8 + $0x3b]] }
  0x95   :  { %9540 = vst [vmem:[#allocation89_spill] sm:$0xff] %v5280_v35  ;;  %9541 = vst [vmem:[#allocation90_spill] sm:$0xff] %v5283_v42  ;;  %v1361_v32 = vstv %s5232_s8  ;;  %v1366_v42 = vstv %s5234_s27  ;;  %v1371_v35 = vstv %s5242_s7  ;;  %v1376_v63 = vstv %s5244_s2  ;;  %s9559_s7 = sld [smem:[#allocation36_spill]]  ;;  %s9574_s8 = sld [smem:[#allocation37_spill]] }
  0x96   :  { %9542 = vst [vmem:[#allocation91_spill] sm:$0xff] %v5286_v23  ;;  %9543 = vst [vmem:[#allocation92_spill] sm:$0xff] %v5289_v39  ;;  %v5328_v31 = vstv %s5259_s25  ;;  %v5331_v29 = vstv %s5204_s28  ;;  %v5334_v59 = vstv %s5222_s6  ;;  %v5337_v43 = vstv %s5261_s22  ;;  %s9575_s22 = sld [smem:[#allocation38_spill]]  ;;  %s9576_s25 = sld [smem:[#allocation41_spill]] }
  0x97   :  { %9544 = vst [vmem:[#allocation93_spill] sm:$0xff] %v5296_v53  ;;  %9545 = vst [vmem:[#allocation94_spill] sm:$0xff] %v5299_v20  ;;  %v5340_v48 = vmul.f32 %v1361_v32, %v4797_v56  ;;  %v5343_v18 = vmul.f32 %v1361_v32, %v4799_v57  ;;  %v5359_v32 = vmul.f32 %v1376_v63, %v4797_v56  ;;  %s9643_s27 = sld [smem:[#allocation49_spill]]  ;;  %s5773_s2 = sld [smem:[#allocation8 + $0x5e]] }
  0x98   :  { %9546 = vst [vmem:[#allocation95_spill] sm:$0xff] %v5302_v12  ;;  %9547 = vst [vmem:[#allocation96_spill] sm:$0xff] %v5305_v62  ;;  %s6223_s24 = sld [smem:[#allocation8 + $0x80]]  ;;  %s6226_s20 = sld [smem:[#allocation8 + $0x5f]] }
  0x99   :  { %9548 = vst [vmem:[#allocation97_spill] sm:$0xff] %v5310_v10  ;;  %9549 = vst [vmem:[#allocation98_spill] sm:$0xff] %v5313_v58  ;;  %s6236_s23 = sld [smem:[#allocation8 + $0x3e]]  ;;  %s6240_s28 = sld [smem:[#allocation8 + $0x62]] }
  0x9a   :  { %9550 = vst [vmem:[#allocation99_spill] sm:$0xff] %v5318_v34  ;;  %9551 = vst [vmem:[#allocation100_spill] sm:$0xff] %v5321_v33  ;;  %v5346_v33 = vmul.f32 %v1366_v42, %v4797_v56  ;;  %v5372_v34 = vstv %s5293_s13  ;;  %s6345_s5 = sld [smem:[#allocation8 + $0x1b]]  ;;  %s6347_s6 = sld [smem:[#allocation8 + $0x3f]] }
  0x9b   :  { %9552 = vst [vmem:[#allocation101_spill] sm:$0xff] %v5328_v31  ;;  %9553 = vst [vmem:[#allocation102_spill] sm:$0xff] %v5331_v29  ;;  %v5349_v29 = vmul.f32 %v1366_v42, %v4799_v57  ;;  %s6364_s13 = sld [smem:[#allocation8 + $0x63]] }
  0x9c   :  { %9554 = vst [vmem:[#allocation103_spill] sm:$0xff] %v5334_v59  ;;  %9555 = vst [vmem:[#allocation104_spill] sm:$0xff] %v5337_v43  ;;  %v5353_v43 = vmul.f32 %v1371_v35, %v4797_v56  ;;  %v9570_v56 = vstv %s9559_s7 }
  0x9d   :  { %9557 = vst [vmem:[#allocation105_spill] sm:$0xff] %v5340_v48  ;;  %9558 = vst [vmem:[#allocation106_spill] sm:$0xff] %v5343_v18  ;;  %v5356_v48 = vmul.f32 %v1371_v35, %v4799_v57  ;;  %v5362_v18 = vmul.f32 %v1376_v63, %v4799_v57  ;;  %v9569_v35 = vstv %s4867_s9  ;;  %v9571_v57 = vstv %s4871_s11 }
  0x9e   :  { %9560 = vst [vmem:[#allocation107_spill] sm:$0xff] %v5346_v33  ;;  %9561 = vst [vmem:[#allocation108_spill] sm:$0xff] %v5349_v29  ;;  %v5369_v33 = vstv %s5291_s26  ;;  %s6357_s26 = sld [smem:[#allocation8 + $0x1e]] }
  0x9f   :  { %9562 = vst [vmem:[#allocation109_spill] sm:$0xff] %v5353_v43  ;;  %9563 = vst [vmem:[#allocation110_spill] sm:$0xff] %v5356_v48  ;;  %v9568_v43 = vstv %s9556_s29 }
  0xa0   :  { %9564 = vst [vmem:[#allocation111_spill] sm:$0xff] %v5359_v32  ;;  %9565 = vst [vmem:[#allocation112_spill] sm:$0xff] %v5362_v18 }
  0xa1   :  { %9566 = vst [vmem:[#allocation113_spill] sm:$0xff] %v5369_v33  ;;  %9567 = vst [vmem:[#allocation114_spill] sm:$0xff] %v5372_v34 }
  0xc3   :  { %v281_v59 = vpop.permute.xlu0 %280 }
  0xc4   :  { %v286_v42 = vsel %vm275_vm2, %v281_v59, 0.0 }
  0xc5   :  { %v5376_v58 = vmul.f32 %v9568_v43, %v286_v42  ;;  %v5380_v48 = vmul.f32 %v9569_v35, %v286_v42  ;;  %v5384_v32 = vmul.f32 %v9570_v56, %v286_v42  ;;  %v5388_v63 = vmul.f32 %v9571_v57, %v286_v42 }
  0xc6   :  { %v5391_v59 = vmul.f32 %v4944_v44, %v286_v42  ;;  %v5397_v18 = vmul.f32 %v4947_v45, %v286_v42  ;;  %v5403_v35 = vmul.f32 %v4958_v50, %v286_v42  ;;  %v5409_v57 = vmul.f32 %v4961_v51, %v286_v42 }
  0xc7   :  { %v5423_v23 = vmul.f32 %v4950_v46, %v286_v42  ;;  %v5429_v49 = vmul.f32 %v4964_v52, %v286_v42  ;;  %v5435_v20 = vmul.f32 %v4972_v54, %v286_v42  ;;  %v5441_v36 = vmul.f32 %v4975_v55, %v286_v42 }
  0xcb   :  { %v285_v31 = vpop.permute.xlu1 %284  ;;  %v283_v10 = vpop.permute.xlu0 %282 }
  0xcc   :  { %v288_v29 = vsel %vm275_vm2, %v285_v31, 0.0 }
  0xcd   :  { %v5394_v31 = vmul.f32 %v4944_v44, %v288_v29  ;;  %v5400_v43 = vmul.f32 %v4947_v45, %v288_v29  ;;  %v5406_v56 = vmul.f32 %v4958_v50, %v288_v29  ;;  %v5412_v34 = vmul.f32 %v4961_v51, %v288_v29 }
  0xce   :  { %v5426_v37 = vmul.f32 %v4950_v46, %v288_v29  ;;  %v5432_v62 = vmul.f32 %v4964_v52, %v288_v29  ;;  %v5438_v53 = vmul.f32 %v4972_v54, %v288_v29  ;;  %v5444_v39 = vmul.f32 %v4975_v55, %v288_v29 }
  0xcf   :  { %v580_v26 = vpop.permute.xlu1 %579  ;;  %v582_v12 = vpop.permute.xlu0 %581  ;;  %v287_v29 = vsel %vm275_vm2, %v283_v10, 0.0 }
  0xd0   :  { %v585_v16 = vsel %vm276_vm3, %v580_v26, 0.0  ;;  %v5460_v0 = vsel %vm276_vm3, %v582_v12, 0.0  ;;  %v303_v30 = vmul.f32 %v4944_v44, %v287_v29  ;;  %v320_v42 = vmul.f32 %v4947_v45, %v287_v29 }
  0xd1   :  { %9572 = vst [vmem:[#allocation115_spill] sm:$0xff] %v5460_v0  ;;  %v336_v21 = vmul.f32 %v4958_v50, %v287_v29  ;;  %v352_v10 = vmul.f32 %v4961_v51, %v287_v29  ;;  %v368_v26 = vmul.f32 %v4950_v46, %v287_v29  ;;  %v385_v12 = vmul.f32 %v4964_v52, %v287_v29 }
  0xd2   :  { %v401_v41 = vmul.f32 %v4972_v54, %v287_v29  ;;  %v310_v33 = vrot.slane %v303_v30, 2  ;;  %v326_v44 = vrot.slane %v320_v42, 2  ;;  %v9577_v0 = vstv %s4891_s3 }
  0xd3   :  { %v584_v47 = vpop.permute.xlu1 %583  ;;  %v342_v9 = vrot.slane %v336_v21, 2  ;;  %v358_v3 = vrot.slane %v352_v10, 2  ;;  %v375_v45 = vrot.slane %v368_v26, 4  ;;  %v391_v38 = vrot.slane %v385_v12, 4 }
  0xd4   :  { %v5464_v60 = vsel %vm276_vm3, %v584_v47, 0.0  ;;  %v417_v47 = vmul.f32 %v4975_v55, %v287_v29  ;;  %v5476_v40 = vmul.f32 %v9577_v0, %v585_v16  ;;  %v9578_v51 = vstv %s9574_s8 }
  0xd5   :  { %9573 = vst [vmem:[#allocation116_spill] sm:$0xff] %v5464_v60  ;;  %v407_v60 = vrot.slane %v401_v41, 4  ;;  %v5480_v25 = vmul.f32 %v9578_v51, %v585_v16  ;;  %v9579_v46 = vstv %s9575_s22  ;;  %v9580_v54 = vstv %s9576_s25 }
  0xd6   :  { %v423_v50 = vrot.slane %v417_v47, 4  ;;  %v5484_v52 = vmul.f32 %v9579_v46, %v585_v16  ;;  %v5488_v22 = vmul.f32 %v9580_v54, %v585_v16  ;;  %v5491_v55 = vmul.f32 %v4989_v1, %v585_v16 }
  0xd7   :  { %v5494_v21 = vmul.f32 %v4999_v4, %v585_v16  ;;  %v5497_v30 = vmul.f32 %v5025_v17, %v585_v16  ;;  %v5500_v41 = vmul.f32 %v5028_v19, %v585_v16  ;;  %v5503_v0 = vmul.f32 %v5002_v5, %v585_v16 }
  0xd8   :  { %9581 = vst [vmem:[#allocation117_spill] sm:$0xff] %v5491_v55  ;;  %v5506_v42 = vmul.f32 %v5005_v6, %v585_v16  ;;  %v5509_v10 = vmul.f32 %v5031_v24, %v585_v16  ;;  %v5512_v26 = vmul.f32 %v5034_v11, %v585_v16  ;;  %v9583_v19 = vstv %s9556_s29  ;;  %s6366_s29 = sld [smem:[#allocation8 + $0x87]] }
  0xd9   :  { %v291_v17 = vmul.f32 %v9583_v19, %v287_v29  ;;  %v9584_v16 = vstv %s4867_s9  ;;  %v9585_v4 = vstv %s9559_s7  ;;  %v9586_v55 = vstv %s4871_s11  ;;  %s9638_s9 = sld [smem:[#allocation43_spill]]  ;;  %s9640_s11 = sld [smem:[#allocation46_spill]] }
  0xda   :  { %9582 = vst [vmem:[#allocation118_spill] sm:$0xff] %v5512_v26  ;;  %v294_v11 = vmul.f32 %v9584_v16, %v287_v29  ;;  %v297_v12 = vmul.f32 %v9585_v4, %v287_v29  ;;  %v300_v47 = vmul.f32 %v9586_v55, %v287_v29  ;;  %v9587_v51 = vrot.slane %v5391_v59, 2  ;;  %s6374_s7 = sld [smem:[#allocation8 + $0x42]] }
  0xdb   :  { %v9588_v54 = vrot.slane %v5394_v31, 2  ;;  %v9589_v6 = vrot.slane %v5397_v18, 2  ;;  %v9590_v19 = vrot.slane %v5400_v43, 2  ;;  %v9591_v55 = vrot.slane %v5403_v35, 2 }
  0xdc   :  { %v311_v46 = vsel %vm308_vm0, %v9587_v51, %v310_v33 }
  0xdd   :  { %v313_v5 = vsel %vm308_vm0, %v310_v33, %v9588_v54  ;;  %v327_v24 = vsel %vm308_vm0, %v9589_v6, %v326_v44  ;;  %v329_v16 = vsel %vm308_vm0, %v326_v44, %v9590_v19  ;;  %v316_v4 = vadd.f32 %v311_v46, %v5376_v58 }
  0xde   :  { %v317_v26 = vadd.f32 %v313_v5, %v291_v17  ;;  %v332_v29 = vadd.f32 %v327_v24, %v5380_v48  ;;  %v333_v59 = vadd.f32 %v329_v16, %v294_v11  ;;  %v343_v31 = vsel %vm308_vm0, %v9591_v55, %v342_v9 }
  0xdf   :  { %v9592_v33 = vrot.slane %v5406_v56, 2  ;;  %v9593_v6 = vrot.slane %v5409_v57, 2  ;;  %v9594_v44 = vrot.slane %v5412_v34, 2  ;;  %v348_v5 = vadd.f32 %v343_v31, %v5384_v32  ;;  %v9603_v31 = vld [vmem:[#allocation20_spill] sm:$0xff] }
  0xe0   :  { %v9595_v48 = vrot.slane %v5423_v23, 4  ;;  %v9597_v57 = vrot.slane %v5429_v49, 4  ;;  %v9599_v23 = vrot.slane %v5435_v20, 4  ;;  %v9601_v49 = vrot.slane %v5441_v36, 4 }
  0xe1   :  { %v345_v18 = vsel %vm308_vm0, %v342_v9, %v9592_v33  ;;  %v359_v43 = vsel %vm308_vm0, %v9593_v6, %v358_v3  ;;  %v361_v58 = vsel %vm308_vm0, %v358_v3, %v9594_v44  ;;  %v9596_v9 = vrot.slane %v5426_v37, 4  ;;  %v9606_v6 = vld [vmem:[#allocation29_spill] sm:$0xff] }
  0xe2   :  { %v349_v17 = vadd.f32 %v345_v18, %v297_v12  ;;  %v364_v24 = vadd.f32 %v359_v43, %v5388_v63  ;;  %v365_v11 = vadd.f32 %v361_v58, %v300_v47  ;;  %v376_v35 = vsel %vm373_vm1, %v9595_v48, %v375_v45  ;;  %v9607_v43 = vld [vmem:[#allocation24_spill] sm:$0xff]  ;;  %v9610_v58 = vld [vmem:[#allocation31_spill] sm:$0xff] }
  0xe3   :  { %v378_v56 = vsel %vm373_vm1, %v375_v45, %v9596_v9  ;;  %v392_v34 = vsel %vm373_vm1, %v9597_v57, %v391_v38  ;;  %v9598_v3 = vrot.slane %v5432_v62, 4  ;;  %v381_v12 = vadd.f32 %v376_v35, %v316_v4  ;;  %v9613_v48 = vld [vmem:[#allocation23_spill] sm:$0xff]  ;;  %v9614_v9 = vld [vmem:[#allocation33_spill] sm:$0xff]  ;;  %v9615_v57 = vld [vmem:[#allocation26_spill] sm:$0xff] }
  0xe4   :  { %v382_v51 = vadd.f32 %v378_v56, %v317_v26  ;;  %v397_v63 = vadd.f32 %v392_v34, %v332_v29  ;;  %v408_v46 = vsel %vm373_vm1, %v9599_v23, %v407_v60  ;;  %v9600_v37 = vrot.slane %v5438_v53, 4 }
  0xe5   :  { %v394_v32 = vsel %vm373_vm1, %v391_v38, %v9598_v3  ;;  %v424_v54 = vsel %vm373_vm1, %v9601_v49, %v423_v50  ;;  %v9602_v62 = vrot.slane %v5444_v39, 4  ;;  %v413_v19 = vadd.f32 %v408_v46, %v348_v5  ;;  %v9611_v5 = vld [vmem:[#allocation21_spill] sm:$0xff]  ;;  %v9616_v3 = vld [vmem:[#allocation34_spill] sm:$0xff] }
  0xe6   :  { %v398_v47 = vadd.f32 %v394_v32, %v333_v59  ;;  %v410_v45 = vsel %vm373_vm1, %v407_v60, %v9600_v37  ;;  %v429_v16 = vadd.f32 %v424_v54, %v364_v24  ;;  %v434_v20 = vadd.f32 %v5019_v14, %v381_v12  ;;  %v9604_v14 = vld [vmem:[#allocation28_spill] sm:$0xff]  ;;  %v9617_v12 = vld [vmem:[#allocation27_spill] sm:$0xff] }
  0xe7   :  { %v426_v38 = vsel %vm373_vm1, %v423_v50, %v9602_v62  ;;  %v414_v26 = vadd.f32 %v410_v45, %v349_v17  ;;  %v435_v29 = vadd.f32 %v4984_v61, %v382_v51  ;;  %v439_v53 = vadd.f32 %v5037_v27, %v397_v63  ;;  %v9605_v61 = vld [vmem:[#allocation22_spill] sm:$0xff]  ;;  %v9612_v24 = vld [vmem:[#allocation32_spill] sm:$0xff]  ;;  %v9618_v63 = vld [vmem:[#allocation115_spill] sm:$0xff] }
  0xe8   :  { %v430_v4 = vadd.f32 %v426_v38, %v365_v11  ;;  %v440_v60 = vadd.f32 %v4996_v2, %v398_v47  ;;  %v444_v36 = vadd.f32 %v5040_v28, %v413_v19  ;;  %v449_v39 = vadd.f32 %v5043_v13, %v429_v16  ;;  %v9609_v13 = vld [vmem:[#allocation25_spill] sm:$0xff] }
  0xe9   :  { %v445_v59 = vadd.f32 %v5012_v7, %v414_v26  ;;  %v465_v55 = vadd.f32 %v4831_v15, %v434_v20  ;;  %v466_v33 = vadd.f32 %v9603_v31, %v435_v29  ;;  %v481_v18 = vadd.f32 %v9604_v14, %v439_v53  ;;  %v9608_v7 = vld [vmem:[#allocation30_spill] sm:$0xff] }
  0xea   :  { %v450_v50 = vadd.f32 %v5015_v8, %v430_v4  ;;  %v482_v27 = vadd.f32 %v9605_v61, %v440_v60  ;;  %v497_v2 = vadd.f32 %v9606_v6, %v444_v36  ;;  %v513_v44 = vadd.f32 %v9608_v7, %v449_v39  ;;  %v9623_v29 = vld [vmem:[#allocation116_spill] sm:$0xff]  ;;  %v9624_v36 = vld [vmem:[#allocation50_spill] sm:$0xff] }
  0xeb   :  { %v498_v28 = vadd.f32 %v9607_v43, %v445_v59  ;;  %v529_v15 = vadd.f32 %v9610_v58, %v465_v55  ;;  %v530_v17 = vadd.f32 %v9611_v5, %v466_v33  ;;  %v545_v11 = vadd.f32 %v9612_v24, %v481_v18 }
  0xec   :  { %v514_v8 = vadd.f32 %v9609_v13, %v450_v50  ;;  %v546_v35 = vadd.f32 %v9613_v48, %v482_v27  ;;  %v561_v56 = vadd.f32 %v9614_v9, %v497_v2  ;;  %v577_v32 = vadd.f32 %v9616_v3, %v513_v44  ;;  %v9627_v27 = vld [vmem:[#allocation117_spill] sm:$0xff]  ;;  %v9631_v3 = vld [vmem:[#allocation51_spill] sm:$0xff] }
  0xed   :  { %v562_v34 = vadd.f32 %v9615_v57, %v498_v28  ;;  %v9619_v47 = vstv %s4891_s3  ;;  %v591_v46 = vadd.f32 %v5476_v40, %v529_v15  ;;  %v9620_v37 = vstv %s9574_s8  ;;  %s9641_s3 = sld [smem:[#allocation48_spill]]  ;;  %s6381_s8 = sld [smem:[#allocation8 + $0x66]] }
  0xee   :  { %v578_v51 = vadd.f32 %v9617_v12, %v514_v8  ;;  %v590_v23 = vmul.f32 %v9619_v47, %v9618_v63  ;;  %v595_v45 = vmul.f32 %v9620_v37, %v9618_v63  ;;  %v596_v49 = vadd.f32 %v5480_v25, %v545_v11  ;;  %v9632_v12 = vld [vmem:[#allocation52_spill] sm:$0xff]  ;;  %v9634_v37 = vld [vmem:[#allocation55_spill] sm:$0xff] }
  0xef   :  { %v9621_v54 = vstv %s9575_s22  ;;  %v601_v38 = vadd.f32 %v5484_v52, %v561_v56  ;;  %v9622_v19 = vstv %s9576_s25  ;;  %v606_v16 = vadd.f32 %v5488_v22, %v577_v32  ;;  %v9625_v22 = vld [vmem:[#allocation53_spill] sm:$0xff]  ;;  %s6383_s22 = sld [smem:[#allocation8 + $0x8a]]  ;;  %s6404_s25 = sld [smem:[#allocation8 + $0x21]] }
  0xf0   :  { %v600_v62 = vmul.f32 %v9621_v54, %v9618_v63  ;;  %v605_v26 = vmul.f32 %v9622_v19, %v9618_v63  ;;  %v592_v4 = vadd.f32 %v590_v23, %v530_v17  ;;  %v597_v20 = vadd.f32 %v595_v45, %v546_v35 }
  0xf1   :  { %v610_v40 = vmul.f32 %v4989_v1, %v9618_v63  ;;  %v611_v53 = vmul.f32 %v4989_v1, %v9623_v29  ;;  %v626_v59 = vmul.f32 %v9624_v36, %v9618_v63  ;;  %v627_v52 = vmul.f32 %v9624_v36, %v9623_v29  ;;  %v9626_v1 = vld [vmem:[#allocation54_spill] sm:$0xff] }
  0xf2   :  { %v602_v60 = vadd.f32 %v600_v62, %v562_v34  ;;  %v607_v25 = vadd.f32 %v605_v26, %v578_v51  ;;  %v642_v55 = vmul.f32 %v9625_v22, %v9618_v63  ;;  %v643_v31 = vmul.f32 %v9625_v22, %v9623_v29  ;;  %v740_v34 = vpop.permute.xlu0 %739 }
  0xf3   :  { %v616_v39 = vrot.slane %v610_v40, 2  ;;  %v618_v50 = vrot.slane %v611_v53, 2  ;;  %v632_v33 = vrot.slane %v626_v59, 2  ;;  %v634_v14 = vrot.slane %v627_v52, 2  ;;  %v742_v53 = vpop.permute.xlu1 %741  ;;  %v9636_v59 = vld [vmem:[#allocation56_spill] sm:$0xff] }
  0xf4   :  { %v658_v18 = vmul.f32 %v9626_v1, %v9618_v63  ;;  %v659_v61 = vmul.f32 %v9626_v1, %v9623_v29  ;;  %v9628_v6 = vrot.slane %v9627_v27, 2  ;;  %v648_v28 = vrot.slane %v642_v55, 2 }
  0xf5   :  { %v619_v43 = vsel %vm308_vm0, %v616_v39, %v618_v50  ;;  %v650_v7 = vrot.slane %v643_v31, 2  ;;  %v9629_v8 = vrot.slane %v5494_v21, 2  ;;  %v635_v15 = vsel %vm308_vm0, %v632_v33, %v634_v14 }
  0xf6   :  { %v617_v2 = vsel %vm308_vm0, %v9628_v6, %v616_v39  ;;  %v623_v13 = vadd.f32 %v619_v43, %v592_v4  ;;  %v639_v17 = vadd.f32 %v635_v15, %v597_v20  ;;  %v9630_v24 = vrot.slane %v5497_v30, 2  ;;  %v9642_v6 = vld [vmem:[#allocation47_spill] sm:$0xff] }
  0xf7   :  { %v622_v44 = vadd.f32 %v617_v2, %v591_v46  ;;  %v633_v58 = vsel %vm308_vm0, %v9629_v8, %v632_v33  ;;  %v651_v48 = vsel %vm308_vm0, %v648_v28, %v650_v7  ;;  %v664_v56 = vrot.slane %v658_v18, 2  ;;  %v1045_v27 = vpop.permute.xlu1 %1044  ;;  %v9644_v7 = vld [vmem:[#allocation118_spill] sm:$0xff] }
  0xf8   :  { %v638_v5 = vadd.f32 %v633_v58, %v596_v49  ;;  %v649_v11 = vsel %vm308_vm0, %v9630_v24, %v648_v28  ;;  %v655_v9 = vadd.f32 %v651_v48, %v602_v60  ;;  %v666_v57 = vrot.slane %v659_v61, 2 }
  0xf9   :  { %v654_v35 = vadd.f32 %v649_v11, %v601_v38  ;;  %v674_v21 = vmul.f32 %v9631_v3, %v9618_v63  ;;  %v675_v32 = vmul.f32 %v9631_v3, %v9623_v29  ;;  %v690_v51 = vmul.f32 %v9632_v12, %v9618_v63 }
  0xfa   :  { %v691_v30 = vmul.f32 %v9632_v12, %v9623_v29  ;;  %v9633_v47 = vrot.slane %v5500_v41, 2  ;;  %v667_v46 = vsel %vm308_vm0, %v664_v56, %v666_v57  ;;  %v706_v45 = vmul.f32 %v9634_v37, %v9618_v63 }
  0xfb   :  { %v707_v49 = vmul.f32 %v9634_v37, %v9623_v29  ;;  %v671_v62 = vadd.f32 %v667_v46, %v607_v25  ;;  %v680_v38 = vrot.slane %v674_v21, 4  ;;  %v682_v19 = vrot.slane %v675_v32, 4  ;;  %v9654_v46 = vld [vmem:[#allocation57_spill] sm:$0xff] }
  0xfc   :  { %v665_v23 = vsel %vm308_vm0, %v9633_v47, %v664_v56  ;;  %v696_v26 = vrot.slane %v690_v51, 4  ;;  %v698_v4 = vrot.slane %v691_v30, 4  ;;  %v712_v20 = vrot.slane %v706_v45, 4 }
  0xfd   :  { %v670_v54 = vadd.f32 %v665_v23, %v606_v16  ;;  %v714_v40 = vrot.slane %v707_v49, 4  ;;  %v9635_v41 = vrot.slane %v5503_v0, 4  ;;  %v683_v36 = vsel %vm373_vm1, %v680_v38, %v682_v19  ;;  %v744_v0 = vpop.permute.xlu0 %743  ;;  %v9656_v19 = vld [vmem:[#allocation59_spill] sm:$0xff] }
  0xfe   :  { %v722_v52 = vmul.f32 %v9636_v59, %v9618_v63  ;;  %v723_v16 = vmul.f32 %v9636_v59, %v9623_v29  ;;  %v687_v39 = vadd.f32 %v683_v36, %v623_v13  ;;  %v9637_v50 = vrot.slane %v5506_v42, 4  ;;  %v9657_v59 = vld [vmem:[#allocation63_spill] sm:$0xff] }
  0xff   :  { %v681_v60 = vsel %vm373_vm1, %v9635_v41, %v680_v38  ;;  %v699_v55 = vsel %vm373_vm1, %v696_v26, %v698_v4  ;;  %v9639_v63 = vrot.slane %v5509_v10, 4  ;;  %v715_v29 = vsel %vm373_vm1, %v712_v20, %v714_v40 }
 0x100   :  { %v5674_v25 = vadd.f32 %v681_v60, %v622_v44  ;;  %v697_v22 = vsel %vm373_vm1, %v9637_v50, %v696_v26  ;;  %v703_v33 = vadd.f32 %v699_v55, %v639_v17  ;;  %v719_v42 = vadd.f32 %v715_v29, %v655_v9 }
 0x101   :  { %v5680_v31 = vadd.f32 %v697_v22, %v638_v5  ;;  %v713_v14 = vsel %vm373_vm1, %v9639_v63, %v712_v20  ;;  %v728_v18 = vrot.slane %v722_v52, 4  ;;  %v730_v61 = vrot.slane %v723_v16, 4  ;;  %v9658_v22 = vld [vmem:[#allocation60_spill] sm:$0xff] }
 0x102   :  { %v5686_v1 = vadd.f32 %v713_v14, %v654_v35  ;;  %v745_v2 = vsel %vm275_vm2, %v740_v34, 0.0  ;;  %v746_v10 = vsel %vm275_vm2, %v742_v53, 0.0  ;;  %v5694_v43 = vsel %vm275_vm2, %v744_v0, 0.0  ;;  %v9659_v14 = vld [vmem:[#allocation61_spill] sm:$0xff] }
 0x103   :  { %v5698_v28 = vsel %vm276_vm3, %v1045_v27, 0.0  ;;  %v9645_v44 = vrot.slane %v9644_v7, 4  ;;  %v731_v8 = vsel %vm373_vm1, %v728_v18, %v730_v61  ;;  %v9646_v58 = vstv %s9638_s9  ;;  %s6421_s9 = sld [smem:[#allocation8 + $0x45]] }
 0x104   :  { %v749_v15 = vmul.f32 %v9646_v58, %v745_v2  ;;  %v9647_v5 = vmov %v9646_v58  ;;  %v735_v11 = vadd.f32 %v731_v8, %v671_v62  ;;  %v9648_v48 = vstv %s9640_s11  ;;  %s6423_s11 = sld [smem:[#allocation8 + $0x69]] }
 0x105   :  { %v729_v13 = vsel %vm373_vm1, %v9645_v44, %v728_v18  ;;  %v750_v17 = vmul.f32 %v9647_v5, %v746_v10  ;;  %v754_v35 = vmul.f32 %v9648_v48, %v745_v2  ;;  %v9649_v9 = vmov %v9648_v48 }
 0x106   :  { %v734_v24 = vadd.f32 %v729_v13, %v670_v54  ;;  %v755_v56 = vmul.f32 %v9649_v9, %v746_v10  ;;  %v9650_v34 = vstv %s9641_s3  ;;  %v9652_v12 = vstv %s9643_s27  ;;  %v9655_v54 = vld [vmem:[#allocation58_spill] sm:$0xff]  ;;  %s6435_s3 = sld [smem:[#allocation8 + $0x8d]]  ;;  %s6459_s27 = sld [smem:[#allocation8 + $0x1c]] }
 0x107   :  { %v5712_v57 = vadd.f32 %v750_v17, %v687_v39  ;;  %v759_v3 = vmul.f32 %v9650_v34, %v745_v2  ;;  %v9651_v21 = vmov %v9650_v34  ;;  %v764_v51 = vmul.f32 %v9652_v12, %v745_v2  ;;  %v9660_v13 = vld [vmem:[#allocation62_spill] sm:$0xff] }
 0x108   :  { %v760_v32 = vmul.f32 %v9651_v21, %v746_v10  ;;  %v5720_v30 = vadd.f32 %v755_v56, %v703_v33  ;;  %v9653_v47 = vmov %v9652_v12  ;;  %v769_v37 = vmul.f32 %v9654_v46, %v745_v2 }
 0x109   :  { %v765_v23 = vmul.f32 %v9653_v47, %v746_v10  ;;  %v770_v45 = vmul.f32 %v9654_v46, %v746_v10  ;;  %v785_v62 = vmul.f32 %v9655_v54, %v745_v2  ;;  %v786_v38 = vmul.f32 %v9655_v54, %v746_v10 }
 0x10a   :  { %v5726_v49 = vadd.f32 %v760_v32, %v719_v42  ;;  %v801_v26 = vmul.f32 %v9656_v19, %v745_v2  ;;  %v775_v20 = vrot.slane %v769_v37, 2  ;;  %v802_v53 = vmul.f32 %v9656_v19, %v746_v10 }
 0x10b   :  { %v5731_v4 = vadd.f32 %v765_v23, %v735_v11  ;;  %v776_v40 = vrot.slane %v770_v45, 2  ;;  %v791_v41 = vrot.slane %v785_v62, 2  ;;  %v792_v60 = vrot.slane %v786_v38, 2  ;;  %v9661_v11 = vld [vmem:[#allocation64_spill] sm:$0xff] }
 0x10c   :  { %v807_v36 = vrot.slane %v801_v26, 2  ;;  %v817_v52 = vmul.f32 %v9657_v59, %v745_v2  ;;  %v808_v39 = vrot.slane %v802_v53, 2  ;;  %v818_v50 = vmul.f32 %v9657_v59, %v746_v10 }
 0x10d   :  { %v777_v16 = vsel %vm308_vm0, %v775_v20, %v776_v40  ;;  %v833_v55 = vmul.f32 %v9658_v22, %v745_v2  ;;  %v793_v0 = vsel %vm308_vm0, %v791_v41, %v792_v60  ;;  %v834_v63 = vmul.f32 %v9658_v22, %v746_v10 }
 0x10e   :  { %v823_v33 = vrot.slane %v817_v52, 2  ;;  %v849_v29 = vmul.f32 %v9659_v14, %v745_v2  ;;  %v809_v42 = vsel %vm308_vm0, %v807_v36, %v808_v39  ;;  %v824_v18 = vrot.slane %v818_v50, 2 }
 0x10f   :  { %v839_v61 = vrot.slane %v833_v55, 4  ;;  %v850_v27 = vmul.f32 %v9659_v14, %v746_v10  ;;  %v840_v7 = vrot.slane %v834_v63, 4  ;;  %v865_v8 = vmul.f32 %v9660_v13, %v745_v2 }
 0x110   :  { %v855_v44 = vrot.slane %v849_v29, 4  ;;  %v866_v58 = vmul.f32 %v9660_v13, %v746_v10  ;;  %v825_v5 = vsel %vm308_vm0, %v823_v33, %v824_v18  ;;  %v881_v48 = vmul.f32 %v9661_v11, %v745_v2 }
 0x111   :  { %v856_v17 = vrot.slane %v850_v27, 4  ;;  %v882_v9 = vmul.f32 %v9661_v11, %v746_v10  ;;  %v841_v56 = vsel %vm373_vm1, %v839_v61, %v840_v7  ;;  %v871_v34 = vrot.slane %v865_v8, 4  ;;  %v9662_v61 = vld [vmem:[#allocation65_spill] sm:$0xff]  ;;  %v9664_v8 = vld [vmem:[#allocation67_spill] sm:$0xff] }
 0x112   :  { %v872_v21 = vrot.slane %v866_v58, 4  ;;  %v751_v32 = vadd.f32 %v749_v15, %v5674_v25  ;;  %v887_v47 = vrot.slane %v881_v48, 4  ;;  %v756_v37 = vadd.f32 %v754_v35, %v5680_v31  ;;  %v9665_v58 = vld [vmem:[#allocation69_spill] sm:$0xff]  ;;  %v9666_v48 = vld [vmem:[#allocation68_spill] sm:$0xff] }
 0x113   :  { %v857_v12 = vsel %vm373_vm1, %v855_v44, %v856_v17  ;;  %v888_v23 = vrot.slane %v882_v9, 4  ;;  %v761_v62 = vadd.f32 %v759_v3, %v5686_v1  ;;  %v766_v38 = vadd.f32 %v764_v51, %v734_v24  ;;  %v9663_v44 = vld [vmem:[#allocation66_spill] sm:$0xff]  ;;  %v9667_v9 = vld [vmem:[#allocation71_spill] sm:$0xff] }
 0x114   :  { %v873_v45 = vsel %vm373_vm1, %v871_v34, %v872_v21  ;;  %v771_v2 = vmul.f32 %v9654_v46, %v5694_v43  ;;  %v782_v26 = vadd.f32 %v777_v16, %v751_v32  ;;  %v787_v25 = vmul.f32 %v9655_v54, %v5694_v43 }
 0x115   :  { %v889_v10 = vsel %vm373_vm1, %v887_v47, %v888_v23  ;;  %v798_v15 = vadd.f32 %v793_v0, %v756_v37  ;;  %v803_v53 = vmul.f32 %v9656_v19, %v5694_v43  ;;  %v814_v31 = vadd.f32 %v809_v42, %v761_v62  ;;  %v9670_v37 = vld [vmem:[#allocation75_spill] sm:$0xff]  ;;  %v1047_v62 = vpop.permute.xlu0 %1046 }
 0x116   :  { %v778_v20 = vrot.slane %v771_v2, 2  ;;  %v819_v35 = vmul.f32 %v9657_v59, %v5694_v43  ;;  %v794_v1 = vrot.slane %v787_v25, 2  ;;  %v830_v24 = vadd.f32 %v825_v5, %v766_v38  ;;  %v9671_v2 = vld [vmem:[#allocation76_spill] sm:$0xff]  ;;  %v9673_v25 = vld [vmem:[#allocation79_spill] sm:$0xff] }
 0x117   :  { %v835_v3 = vmul.f32 %v9658_v22, %v5694_v43  ;;  %v846_v51 = vadd.f32 %v841_v56, %v782_v26  ;;  %v810_v41 = vrot.slane %v803_v53, 2  ;;  %v851_v54 = vmul.f32 %v9659_v14, %v5694_v43 }
 0x118   :  { %v779_v46 = vsel %vm308_vm0, %v776_v40, %v778_v20  ;;  %v826_v36 = vrot.slane %v819_v35, 2  ;;  %v795_v19 = vsel %vm308_vm0, %v792_v60, %v794_v1  ;;  %v862_v50 = vadd.f32 %v857_v12, %v798_v15  ;;  %v9669_v12 = vld [vmem:[#allocation74_spill] sm:$0xff] }
 0x119   :  { %v783_v52 = vadd.f32 %v779_v46, %v5712_v57  ;;  %v842_v16 = vrot.slane %v835_v3, 4  ;;  %v799_v59 = vadd.f32 %v795_v19, %v5720_v30  ;;  %v811_v55 = vsel %vm308_vm0, %v808_v39, %v810_v41  ;;  %v9674_v20 = vld [vmem:[#allocation70_spill] sm:$0xff]  ;;  %v9676_v3 = vld [vmem:[#allocation72_spill] sm:$0xff]  ;;  %v9677_v41 = vld [vmem:[#allocation87_spill] sm:$0xff] }
 0x11a   :  { %v827_v22 = vsel %vm308_vm0, %v824_v18, %v826_v36  ;;  %v858_v0 = vrot.slane %v851_v54, 4  ;;  %v815_v40 = vadd.f32 %v811_v55, %v5726_v49  ;;  %v867_v60 = vmul.f32 %v9660_v13, %v5694_v43  ;;  %v5819_v54 = vld [vmem:[#allocation2 + $0x38] sm:$0xff]  ;;  %v9678_v19 = vld [vmem:[#allocation78_spill] sm:$0xff]  ;;  %v9680_v55 = vld [vmem:[#allocation88_spill] sm:$0xff] }
 0x11b   :  { %v831_v33 = vadd.f32 %v827_v22, %v5731_v4  ;;  %v843_v57 = vsel %vm373_vm1, %v840_v7, %v842_v16  ;;  %v878_v39 = vadd.f32 %v873_v45, %v814_v31  ;;  %v883_v14 = vmul.f32 %v9661_v11, %v5694_v43  ;;  %v9668_v11 = vld [vmem:[#allocation73_spill] sm:$0xff]  ;;  %v5800_v31 = vld [vmem:[#allocation2 + $0x30] sm:$0xff] }
 0x11c   :  { %v847_v63 = vadd.f32 %v843_v57, %v783_v52  ;;  %v859_v30 = vsel %vm373_vm1, %v856_v17, %v858_v0  ;;  %v874_v42 = vrot.slane %v867_v60, 4  ;;  %v894_v18 = vadd.f32 %v889_v10, %v830_v24  ;;  %v9672_v10 = vld [vmem:[#allocation77_spill] sm:$0xff]  ;;  %v9681_v0 = vld [vmem:[#allocation91_spill] sm:$0xff] }
 0x11d   :  { %v863_v29 = vadd.f32 %v859_v30, %v799_v59  ;;  %v899_v27 = vadd.f32 %v9662_v61, %v846_v51  ;;  %v890_v49 = vrot.slane %v883_v14, 4  ;;  %v904_v7 = vadd.f32 %v9664_v8, %v862_v50  ;;  %v9685_v14 = vld [vmem:[#allocation92_spill] sm:$0xff] }
 0x11e   :  { %v900_v4 = vadd.f32 %v9663_v44, %v847_v63  ;;  %v909_v5 = vadd.f32 %v9665_v58, %v878_v39  ;;  %v875_v13 = vsel %vm373_vm1, %v872_v21, %v874_v42  ;;  %v914_v43 = vadd.f32 %v9667_v9, %v894_v18  ;;  %v9688_v44 = vld [vmem:[#allocation94_spill] sm:$0xff] }
 0x11f   :  { %v905_v17 = vadd.f32 %v9666_v48, %v863_v29  ;;  %v930_v56 = vadd.f32 %v9668_v11, %v899_v27  ;;  %v879_v34 = vadd.f32 %v875_v13, %v815_v40  ;;  %v891_v32 = vsel %vm373_vm1, %v888_v23, %v890_v49  ;;  %v9675_v23 = vld [vmem:[#allocation113_spill] sm:$0xff]  ;;  %v1049_v48 = vpop.permute.xlu1 %1048  ;;  %v9692_v11 = vld [vmem:[#allocation82_spill] sm:$0xff] }
 0x120   :  { %v931_v47 = vadd.f32 %v9669_v12, %v900_v4  ;;  %v946_v45 = vadd.f32 %v9670_v37, %v904_v7  ;;  %v895_v38 = vadd.f32 %v891_v32, %v831_v33  ;;  %v962_v26 = vadd.f32 %v9672_v10, %v909_v5  ;;  %v9682_v33 = vld [vmem:[#allocation80_spill] sm:$0xff]  ;;  %v9687_v27 = vld [vmem:[#allocation93_spill] sm:$0xff]  ;;  %v9689_v7 = vld [vmem:[#allocation95_spill] sm:$0xff] }
 0x121   :  { %v947_v21 = vadd.f32 %v9671_v2, %v905_v17  ;;  %v978_v15 = vadd.f32 %v9673_v25, %v914_v43  ;;  %v910_v53 = vadd.f32 %v9674_v20, %v879_v34  ;;  %v5804_v35 = vmul.f32 %v5800_v31, %v9675_v23  ;;  %v9690_v5 = vld [vmem:[#allocation96_spill] sm:$0xff]  ;;  %v9691_v17 = vld [vmem:[#allocation81_spill] sm:$0xff]  ;;  %v9693_v32 = vld [vmem:[#allocation83_spill] sm:$0xff] }
 0x122   :  { %v5807_v1 = vstv %s5773_s2  ;;  %v5810_v24 = vstv %s5775_s14  ;;  %v915_v51 = vadd.f32 %v9676_v3, %v895_v38  ;;  %v5815_v46 = vsel %vm276_vm3, %v1047_v62, 0.0  ;;  %v9694_v37 = vld [vmem:[#allocation84_spill] sm:$0xff]  ;;  %v9695_v2 = vld [vmem:[#allocation85_spill] sm:$0xff]  ;;  %v9696_v25 = vld [vmem:[#allocation86_spill] sm:$0xff]  ;;  %s6485_s2 = sld [smem:[#allocation8 + $0x40]]  ;;  %s6490_s14 = sld [smem:[#allocation8 + $0x64]] }
 0x123   :  { %v1074_v36 = vmul.f32 %v9677_v41, %v5698_v28  ;;  %v5823_v52 = vmul.f32 %v5819_v54, %v9675_v23  ;;  %v963_v16 = vadd.f32 %v9678_v19, %v910_v53  ;;  %v9679_v50 = vstv %s5142_s10  ;;  %v9697_v20 = vld [vmem:[#allocation89_spill] sm:$0xff]  ;;  %v9698_v3 = vld [vmem:[#allocation90_spill] sm:$0xff]  ;;  %s6146_s10 = sld [smem:[#allocation8 + $0x3d]] }
 0x124   :  { %v1054_v59 = vmul.f32 %v9679_v50, %v5698_v28  ;;  %v1090_v22 = vmul.f32 %v9680_v55, %v5698_v28  ;;  %v5833_v40 = vmul.f32 %v9681_v0, %v5698_v28  ;;  %v979_v57 = vadd.f32 %v9682_v33, %v915_v51 }
 0x125   :  { %v9683_v60 = vstv %s5154_s12  ;;  %v9684_v30 = vstv %s5166_s15  ;;  %v5844_v29 = vmul.f32 %v9685_v14, %v5698_v28  ;;  %v9686_v42 = vstv %s5176_s0  ;;  %s6162_s12 = sld [smem:[#allocation8 + $0x61]]  ;;  %s6175_s15 = sld [smem:[#allocation8 + $0x85]] }
 0x126   :  { %v1059_v63 = vmul.f32 %v9683_v60, %v5698_v28  ;;  %v1064_v39 = vmul.f32 %v9684_v30, %v5698_v28  ;;  %v1069_v18 = vmul.f32 %v9686_v42, %v5698_v28  ;;  %v1080_v61 = vrot.slane %v1074_v36, 2 }
 0x127   :  { %v5851_v49 = vmul.f32 %v9687_v27, %v5698_v28  ;;  %v5855_v4 = vmul.f32 %v9688_v44, %v5698_v28  ;;  %v1096_v8 = vrot.slane %v1090_v22, 2  ;;  %v5859_v58 = vmul.f32 %v9689_v7, %v5698_v28 }
 0x128   :  { %v5863_v13 = vmul.f32 %v9690_v5, %v5698_v28  ;;  %v994_v9 = vadd.f32 %v9691_v17, %v930_v56  ;;  %v1112_v43 = vrot.slane %v5833_v40, 2  ;;  %v995_v34 = vadd.f32 %v9692_v11, %v931_v47 }
 0x129   :  { %v1010_v12 = vadd.f32 %v9693_v32, %v946_v45  ;;  %v1011_v62 = vadd.f32 %v9694_v37, %v947_v21  ;;  %v1128_v38 = vrot.slane %v5844_v29, 2  ;;  %v1026_v10 = vadd.f32 %v9695_v2, %v962_v26 }
 0x12a   :  { %v1027_v28 = vadd.f32 %v9696_v25, %v963_v16  ;;  %v1042_v53 = vadd.f32 %v9697_v20, %v978_v15  ;;  %v1144_v56 = vrot.slane %v5851_v49, 4  ;;  %v1043_v51 = vadd.f32 %v9698_v3, %v979_v57 }
 0x12b   :  { %v5878_v47 = vsel %vm276_vm3, %v1049_v48, 0.0  ;;  %v9699_v45 = vmov %v9679_v50  ;;  %v1160_v36 = vrot.slane %v5855_v4, 4  ;;  %v1176_v26 = vrot.slane %v5859_v58, 4 }
 0x12c   :  { %v1055_v21 = vmul.f32 %v9699_v45, %v5815_v46  ;;  %v1192_v19 = vrot.slane %v5863_v13, 4  ;;  %v1056_v16 = vadd.f32 %v1054_v59, %v994_v9  ;;  %v9700_v15 = vmov %v9683_v60 }
 0x12d   :  { %v1060_v50 = vmul.f32 %v9700_v15, %v5815_v46  ;;  %v1061_v22 = vadd.f32 %v1059_v63, %v1010_v12  ;;  %v9701_v40 = vmov %v9684_v30  ;;  %v1075_v57 = vmul.f32 %v9677_v41, %v5815_v46 }
 0x12e   :  { %v1065_v33 = vmul.f32 %v9701_v40, %v5815_v46  ;;  %v1057_v60 = vadd.f32 %v1055_v21, %v995_v34  ;;  %v1066_v30 = vadd.f32 %v1064_v39, %v1026_v10  ;;  %v1076_v29 = vmul.f32 %v9677_v41, %v5878_v47 }
 0x12f   :  { %v1091_v42 = vmul.f32 %v9680_v55, %v5815_v46  ;;  %v9702_v59 = vstv %s5176_s0  ;;  %v1081_v17 = vrot.slane %v1075_v57, 2  ;;  %v1092_v63 = vmul.f32 %v9680_v55, %v5878_v47  ;;  %s6198_s0 = sld [smem:[#allocation8 + $0x17]] }
 0x130   :  { %v1070_v48 = vmul.f32 %v9702_v59, %v5815_v46  ;;  %v1107_v9 = vmul.f32 %v9681_v0, %v5815_v46  ;;  %v1071_v11 = vadd.f32 %v1069_v18, %v1042_v53  ;;  %v1083_v32 = vrot.slane %v1076_v29, 2 }
 0x131   :  { %v1097_v34 = vrot.slane %v1091_v42, 2  ;;  %v1108_v39 = vmul.f32 %v9681_v0, %v5878_v47  ;;  %v1099_v41 = vrot.slane %v1092_v63, 2  ;;  %v1123_v37 = vmul.f32 %v9685_v14, %v5815_v46 }
 0x132   :  { %v1113_v12 = vrot.slane %v1107_v9, 2  ;;  %v1124_v2 = vmul.f32 %v9685_v14, %v5878_v47  ;;  %v1062_v10 = vadd.f32 %v1060_v50, %v1011_v62  ;;  %v1082_v55 = vsel %vm308_vm0, %v1080_v61, %v1081_v17 }
 0x133   :  { %v1084_v25 = vsel %vm308_vm0, %v1081_v17, %v1083_v32  ;;  %v1115_v20 = vrot.slane %v1108_v39, 2  ;;  %v1067_v18 = vadd.f32 %v1065_v33, %v1027_v28  ;;  %v1072_v53 = vadd.f32 %v1070_v48, %v1043_v51 }
 0x134   :  { %v1087_v3 = vadd.f32 %v1082_v55, %v1056_v16  ;;  %v1098_v45 = vsel %vm308_vm0, %v1096_v8, %v1097_v34  ;;  %v1088_v0 = vadd.f32 %v1084_v25, %v1057_v60  ;;  %v1100_v21 = vsel %vm308_vm0, %v1097_v34, %v1099_v41  ;;  %v1207_v34 = vpop.permute.xlu1 %1206 }
 0x135   :  { %v1103_v15 = vadd.f32 %v1098_v45, %v1061_v22  ;;  %v1114_v40 = vsel %vm308_vm0, %v1112_v43, %v1113_v12  ;;  %v1129_v57 = vrot.slane %v1123_v37, 2  ;;  %v1131_v29 = vrot.slane %v1124_v2, 2 }
 0x136   :  { %v1139_v14 = vmul.f32 %v9687_v27, %v5815_v46  ;;  %v1140_v61 = vmul.f32 %v9687_v27, %v5878_v47  ;;  %v1116_v62 = vsel %vm308_vm0, %v1113_v12, %v1115_v20  ;;  %v1155_v28 = vmul.f32 %v9688_v44, %v5815_v46 }
 0x137   :  { %v1156_v8 = vmul.f32 %v9688_v44, %v5878_v47  ;;  %v1171_v51 = vmul.f32 %v9689_v7, %v5815_v46  ;;  %v1104_v43 = vadd.f32 %v1100_v21, %v1062_v10  ;;  %v1132_v16 = vsel %vm308_vm0, %v1129_v57, %v1131_v29 }
 0x138   :  { %v1145_v50 = vrot.slane %v1139_v14, 4  ;;  %v1147_v22 = vrot.slane %v1140_v61, 4  ;;  %v1119_v33 = vadd.f32 %v1114_v40, %v1066_v30  ;;  %v1161_v60 = vrot.slane %v1155_v28, 4 }
 0x139   :  { %v1163_v42 = vrot.slane %v1156_v8, 4  ;;  %v1172_v27 = vmul.f32 %v9689_v7, %v5878_v47  ;;  %v1120_v59 = vadd.f32 %v1116_v62, %v1067_v18  ;;  %v1130_v48 = vsel %vm308_vm0, %v1128_v38, %v1129_v57  ;;  %v9710_v62 = vld [vmem:[#allocation97_spill] sm:$0xff] }
 0x13a   :  { %v1177_v17 = vrot.slane %v1171_v51, 4  ;;  %v1187_v44 = vmul.f32 %v9690_v5, %v5815_v46  ;;  %v1135_v63 = vadd.f32 %v1130_v48, %v1071_v11  ;;  %v1136_v9 = vadd.f32 %v1132_v16, %v1072_v53  ;;  %v1205_v46 = vpop.permute.xlu0 %1204  ;;  %v9711_v51 = vld [vmem:[#allocation98_spill] sm:$0xff] }
 0x13b   :  { %v1146_v32 = vsel %vm373_vm1, %v1144_v56, %v1145_v50  ;;  %v1148_v30 = vsel %vm373_vm1, %v1145_v50, %v1147_v22  ;;  %v1162_v38 = vsel %vm373_vm1, %v1160_v36, %v1161_v60  ;;  %v1179_v41 = vrot.slane %v1172_v27, 4  ;;  %v9712_v50 = vld [vmem:[#allocation99_spill] sm:$0xff] }
 0x13c   :  { %v5937_v39 = vadd.f32 %v1146_v32, %v1087_v3  ;;  %v1152_v7 = vadd.f32 %v1148_v30, %v1088_v0  ;;  %v1164_v11 = vsel %vm373_vm1, %v1161_v60, %v1163_v42  ;;  %v1188_v49 = vmul.f32 %v9690_v5, %v5878_v47 }
 0x13d   :  { %v1193_v56 = vrot.slane %v1187_v44, 4  ;;  %v1210_v12 = vsel %vm275_vm2, %v1205_v46, 0.0  ;;  %v5947_v37 = vadd.f32 %v1162_v38, %v1103_v15  ;;  %v1168_v4 = vadd.f32 %v1164_v11, %v1104_v43 }
 0x13e   :  { %v1178_v36 = vsel %vm373_vm1, %v1176_v26, %v1177_v17  ;;  %v1211_v2 = vsel %vm275_vm2, %v1207_v34, 0.0  ;;  %v1180_v5 = vsel %vm373_vm1, %v1177_v17, %v1179_v41  ;;  %v1195_v10 = vrot.slane %v1188_v49, 4  ;;  %v9716_v49 = vld [vmem:[#allocation102_spill] sm:$0xff] }
 0x13f   :  { %v5955_v47 = vadd.f32 %v1178_v36, %v1119_v33  ;;  %v9703_v55 = vstv %s5190_s19  ;;  %v1184_v20 = vadd.f32 %v1180_v5, %v1120_v59  ;;  %v1194_v18 = vsel %vm373_vm1, %v1192_v19, %v1193_v56  ;;  %v9714_v59 = vld [vmem:[#allocation101_spill] sm:$0xff]  ;;  %s6221_s19 = sld [smem:[#allocation8 + $0x5c]] }
 0x140   :  { %v1215_v25 = vmul.f32 %v9703_v55, %v1211_v2  ;;  %v9704_v53 = vmov %v9703_v55  ;;  %v9705_v26 = vstv %s5198_s4  ;;  %v5970_v45 = vadd.f32 %v1194_v18, %v1135_v63  ;;  %s6228_s4 = sld [smem:[#allocation8 + $0x83]] }
 0x141   :  { %v5964_v58 = vmul.f32 %v9704_v53, %v1210_v12  ;;  %v5968_v3 = vmul.f32 %v9705_v26, %v1210_v12  ;;  %v9706_v0 = vmov %v9705_v26  ;;  %v9707_v15 = vstv %s5212_s30  ;;  %s6242_s30 = sld [smem:[#allocation8 + $0x86]] }
 0x142   :  { %v1220_v21 = vmul.f32 %v9706_v0, %v1211_v2  ;;  %v5976_v40 = vmul.f32 %v9707_v15, %v1210_v12  ;;  %v9708_v57 = vmov %v9707_v15  ;;  %v1196_v13 = vsel %vm373_vm1, %v1193_v56, %v1195_v10 }
 0x143   :  { %v1225_v29 = vmul.f32 %v9708_v57, %v1211_v2  ;;  %v5981_v14 = vadd.f32 %v1215_v25, %v1152_v7  ;;  %v9709_v19 = vstv %s5224_s16  ;;  %v1234_v28 = vmul.f32 %v9710_v62, %v1210_v12  ;;  %s6144_s16 = sld [smem:[#allocation8 + $0x19]] }
 0x144   :  { %v5985_v61 = vmul.f32 %v9709_v19, %v1210_v12  ;;  %v5989_v8 = vmul.f32 %v9710_v62, %v1211_v2  ;;  %v1250_v43 = vmul.f32 %v9711_v51, %v1210_v12  ;;  %v5993_v16 = vmul.f32 %v9711_v51, %v1211_v2 }
 0x145   :  { %v1266_v22 = vmul.f32 %v9712_v50, %v1210_v12  ;;  %v1200_v33 = vadd.f32 %v1196_v13, %v1136_v9  ;;  %v9713_v60 = vmov %v9709_v19  ;;  %v5999_v27 = vmul.f32 %v9712_v50, %v1211_v2  ;;  %v9715_v9 = vld [vmem:[#allocation100_spill] sm:$0xff] }
 0x146   :  { %v1230_v42 = vmul.f32 %v9713_v60, %v1211_v2  ;;  %v1282_v48 = vmul.f32 %v9714_v59, %v1210_v12  ;;  %v1240_v17 = vrot.slane %v1234_v28, 2  ;;  %v1241_v44 = vrot.slane %v5989_v8, 2  ;;  %v6042_v28 = vld [vmem:[#allocation2 + $0x40] sm:$0xf] }
 0x147   :  { %v1256_v63 = vrot.slane %v1250_v43, 2  ;;  %v1257_v32 = vrot.slane %v5993_v16, 2  ;;  %v1272_v30 = vrot.slane %v1266_v22, 2  ;;  %v9392_v34 = vrot.slane %v5999_v27, 2 }
 0x148   :  { %v6006_v7 = vmul.f32 %v9714_v59, %v1211_v2  ;;  %v1298_v38 = vmul.f32 %v9715_v9, %v1210_v12  ;;  %v6009_v41 = vadd.f32 %v1220_v21, %v1168_v4  ;;  %v6011_v46 = vadd.f32 %v1225_v29, %v1184_v20  ;;  %v9717_v20 = vld [vmem:[#allocation103_spill] sm:$0xff]  ;;  %v9718_v21 = vld [vmem:[#allocation104_spill] sm:$0xff] }
 0x149   :  { %v6014_v11 = vmul.f32 %v9715_v9, %v1211_v2  ;;  %v1314_v56 = vmul.f32 %v9716_v49, %v1210_v12  ;;  %v6017_v36 = vadd.f32 %v1230_v42, %v1200_v33  ;;  %v1288_v5 = vrot.slane %v1282_v48, 2 }
 0x14a   :  { %v9391_v10 = vrot.slane %v6006_v7, 2  ;;  %v6021_v55 = vmul.f32 %v9716_v49, %v1211_v2  ;;  %v1242_v4 = vsel %vm308_vm0, %v1240_v17, %v1241_v44  ;;  %v1258_v25 = vsel %vm308_vm0, %v1256_v63, %v1257_v32  ;;  %v9719_v17 = vld [vmem:[#allocation114_spill] sm:$0xff] }
 0x14b   :  { %v1330_v18 = vmul.f32 %v9717_v20, %v1210_v12  ;;  %v6031_v53 = vmul.f32 %v9717_v20, %v1211_v2  ;;  %v1274_v26 = vsel %vm308_vm0, %v1272_v30, %v9392_v34  ;;  %v1304_v0 = vrot.slane %v1298_v38, 4 }
 0x14c   :  { %v1346_v15 = vmul.f32 %v9718_v21, %v1210_v12  ;;  %v6038_v57 = vmul.f32 %v9718_v21, %v1211_v2  ;;  %v9396_v29 = vrot.slane %v6014_v11, 4  ;;  %v1320_v13 = vrot.slane %v1314_v56, 4 }
 0x14d   :  { %v9395_v19 = vrot.slane %v6021_v55, 4  ;;  %v1384_v43 = vmul.f32 %v6042_v28, %v9675_v23  ;;  %v1290_v22 = vsel %vm308_vm0, %v1288_v5, %v9391_v10  ;;  %v1336_v33 = vrot.slane %v1330_v18, 4 }
 0x14e   :  { %v9394_v12 = vrot.slane %v6031_v53, 4  ;;  %v1352_v60 = vrot.slane %v1346_v15, 4  ;;  %v9393_v2 = vrot.slane %v6038_v57, 4  ;;  %v1388_v42 = vrot.slane %v5804_v35, 2  ;;  %v1209_v15 = vpop.permute.xlu0 %1208 }
 0x14f   :  { %v1389_v48 = vrot.slane %v5823_v52, 2  ;;  %v1398_v63 = vmul.f32 %v5800_v31, %v9719_v17  ;;  %v1391_v30 = vrot.slane %v1384_v43, 2  ;;  %v1399_v23 = vmul.f32 %v5819_v54, %v9719_v17 }
 0x150   :  { %v1400_v38 = vmul.f32 %v6042_v28, %v9719_v17  ;;  %v6061_v56 = vmul.f32 %v5800_v31, %v5807_v1  ;;  %v1306_v35 = vsel %vm373_vm1, %v1304_v0, %v9396_v29  ;;  %v1322_v52 = vsel %vm373_vm1, %v1320_v13, %v9395_v19 }
 0x151   :  { %v1404_v5 = vrot.slane %v1398_v63, 2  ;;  %v6071_v18 = vmul.f32 %v5819_v54, %v5807_v1  ;;  %v1338_v43 = vsel %vm373_vm1, %v1336_v33, %v9394_v12  ;;  %v1405_v17 = vrot.slane %v1399_v23, 2 }
 0x152   :  { %v1407_v10 = vrot.slane %v1400_v38, 2  ;;  %v6078_v34 = vmul.f32 %v6042_v28, %v5807_v1  ;;  %v1354_v0 = vsel %vm373_vm1, %v1352_v60, %v9393_v2  ;;  %v6085_v13 = vmul.f32 %v5800_v31, %v5810_v24 }
 0x153   :  { %v6089_v63 = vmul.f32 %v5819_v54, %v5810_v24  ;;  %v6093_v33 = vmul.f32 %v6042_v28, %v5810_v24  ;;  %v6096_v23 = vsel %vm308_vm0, %v1388_v42, %v1389_v48  ;;  %v6099_v1 = vsel %vm308_vm0, %v1389_v48, %v1391_v30 }
 0x154   :  { %v1420_v60 = vrot.slane %v6061_v56, 2  ;;  %v1212_v38 = vsel %vm275_vm2, %v1209_v15, 0.0  ;;  %v6105_v2 = vsel %vm308_vm0, %v1404_v5, %v1405_v17  ;;  %v6108_v12 = vsel %vm308_vm0, %v1405_v17, %v1407_v10 }
 0x155   :  { %v1421_v24 = vrot.slane %v6071_v18, 2  ;;  %v1423_v19 = vrot.slane %v6078_v34, 2  ;;  %v1436_v42 = vrot.slane %v6085_v13, 2  ;;  %v1216_v48 = vadd.f32 %v5964_v58, %v5937_v39 }
 0x156   :  { %v1221_v30 = vadd.f32 %v5968_v3, %v5947_v37  ;;  %v1226_v56 = vadd.f32 %v5976_v40, %v5955_v47  ;;  %v1437_v5 = vrot.slane %v6089_v63, 2  ;;  %v1439_v10 = vrot.slane %v6093_v33, 2 }
 0x157   :  { %v1231_v18 = vadd.f32 %v5985_v61, %v5970_v45  ;;  %v1236_v34 = vmul.f32 %v9710_v62, %v1212_v38  ;;  %v1247_v15 = vadd.f32 %v1242_v4, %v1216_v48  ;;  %v1252_v17 = vmul.f32 %v9711_v51, %v1212_v38 }
 0x158   :  { %v1263_v13 = vadd.f32 %v1258_v25, %v1221_v30  ;;  %v1268_v39 = vmul.f32 %v9712_v50, %v1212_v38  ;;  %v1279_v37 = vadd.f32 %v1274_v26, %v1226_v56  ;;  %v1284_v3 = vmul.f32 %v9714_v59, %v1212_v38 }
 0x159   :  { %v1243_v58 = vrot.slane %v1236_v34, 2  ;;  %v1295_v47 = vadd.f32 %v1290_v22, %v1231_v18  ;;  %v1259_v40 = vrot.slane %v1252_v17, 2  ;;  %v1300_v33 = vmul.f32 %v9715_v9, %v1212_v38  ;;  %v9724_v18 = vld [vmem:[#allocation105_spill] sm:$0xff] }
 0x15a   :  { %v1275_v63 = vrot.slane %v1268_v39, 2  ;;  %v1311_v29 = vadd.f32 %v1306_v35, %v1247_v15  ;;  %v1291_v61 = vrot.slane %v1284_v3, 2  ;;  %v1316_v62 = vmul.f32 %v9716_v49, %v1212_v38 }
 0x15b   :  { %v1244_v45 = vsel %vm308_vm0, %v1241_v44, %v1243_v58  ;;  %v1327_v51 = vadd.f32 %v1322_v52, %v1263_v13  ;;  %v1260_v59 = vsel %vm308_vm0, %v1257_v32, %v1259_v40  ;;  %v9720_v4 = vrot.slane %v5999_v27, 2  ;;  %v9726_v13 = vld [vmem:[#allocation106_spill] sm:$0xff]  ;;  %v9731_v40 = vld [vmem:[#allocation111_spill] sm:$0xff] }
 0x15c   :  { %v1248_v50 = vadd.f32 %v1244_v45, %v5981_v14  ;;  %v1307_v9 = vrot.slane %v1300_v33, 4  ;;  %v1264_v26 = vadd.f32 %v1260_v59, %v6009_v41  ;;  %v9721_v44 = vrot.slane %v6006_v7, 2 }
 0x15d   :  { %v1276_v25 = vsel %vm308_vm0, %v9720_v4, %v1275_v63  ;;  %v1323_v22 = vrot.slane %v1316_v62, 4  ;;  %v9722_v16 = vrot.slane %v6014_v11, 4  ;;  %v1332_v32 = vmul.f32 %v9717_v20, %v1212_v38  ;;  %v9733_v62 = vld [vmem:[#allocation112_spill] sm:$0xff] }
 0x15e   :  { %v1280_v8 = vadd.f32 %v1276_v25, %v6011_v46  ;;  %v1292_v49 = vsel %vm308_vm0, %v9721_v44, %v1291_v61  ;;  %v1343_v41 = vadd.f32 %v1338_v43, %v1279_v37  ;;  %v9723_v46 = vrot.slane %v6021_v55, 4  ;;  %v9727_v43 = vld [vmem:[#allocation109_spill] sm:$0xff] }
 0x15f   :  { %v1296_v14 = vadd.f32 %v1292_v49, %v6017_v36  ;;  %v1308_v27 = vsel %vm373_vm1, %v9722_v16, %v1307_v9  ;;  %v1348_v52 = vmul.f32 %v9718_v21, %v1212_v38  ;;  %v1359_v48 = vadd.f32 %v1354_v0, %v1295_v47  ;;  %v9725_v36 = vld [vmem:[#allocation107_spill] sm:$0xff] }
 0x160   :  { %v1312_v35 = vadd.f32 %v1308_v27, %v1248_v50  ;;  %v1324_v7 = vsel %vm373_vm1, %v9723_v46, %v1323_v22  ;;  %v1339_v56 = vrot.slane %v1332_v32, 4  ;;  %v1364_v34 = vadd.f32 %v9724_v18, %v1311_v29  ;;  %v9729_v29 = vld [vmem:[#allocation108_spill] sm:$0xff]  ;;  %v1510_v50 = vpop.permute.xlu1 %1509 }
 0x161   :  { %v1328_v30 = vadd.f32 %v1324_v7, %v1264_v26  ;;  %v1369_v15 = vadd.f32 %v9725_v36, %v1327_v51  ;;  %v1422_v11 = vsel %vm308_vm0, %v1420_v60, %v1421_v24  ;;  %v1355_v17 = vrot.slane %v1348_v52, 4 }
 0x162   :  { %v1365_v20 = vadd.f32 %v9726_v13, %v1312_v35  ;;  %v1374_v39 = vadd.f32 %v9727_v43, %v1343_v41  ;;  %v1424_v55 = vsel %vm308_vm0, %v1421_v24, %v1423_v19  ;;  %v1438_v21 = vsel %vm308_vm0, %v1436_v42, %v1437_v5 }
 0x163   :  { %v9728_v0 = vrot.slane %v6031_v53, 4  ;;  %v1370_v58 = vadd.f32 %v9729_v29, %v1328_v30  ;;  %v1440_v60 = vsel %vm308_vm0, %v1437_v5, %v1439_v10  ;;  %v9730_v3 = vrot.slane %v6038_v57, 4  ;;  %v1512_v10 = vpop.permute.xlu0 %1511 }
 0x164   :  { %v1379_v63 = vadd.f32 %v9731_v40, %v1359_v48  ;;  %v6178_v53 = vadd.f32 %v6096_v23, %v1364_v34  ;;  %v6181_v24 = vadd.f32 %v6099_v1, %v1365_v20  ;;  %v6184_v42 = vadd.f32 %v6105_v2, %v1369_v15  ;;  %v9732_v23 = vld [vmem:[#allocation110_spill] sm:$0xff] }
 0x165   :  { %v1340_v38 = vsel %vm373_vm1, %v9728_v0, %v1339_v56  ;;  %v1356_v47 = vsel %vm373_vm1, %v9730_v3, %v1355_v17  ;;  %v6187_v5 = vadd.f32 %v6108_v12, %v1370_v58  ;;  %v6189_v57 = vadd.f32 %v1422_v11, %v1374_v39 }
 0x166   :  { %v1344_v37 = vadd.f32 %v1340_v38, %v1280_v8  ;;  %v1360_v19 = vadd.f32 %v1356_v47, %v1296_v14  ;;  %v1445_v33 = vstv %s6144_s16  ;;  %v1461_v45 = vstv %s6146_s10  ;;  %s6499_s16 = sld [smem:[#allocation8 + $0x1f]]  ;;  %s6501_s10 = sld [smem:[#allocation8 + $0x43]] }
 0x167   :  { %v1446_v1 = vmul.f32 %v5800_v31, %v1445_v33  ;;  %v1447_v2 = vmul.f32 %v5819_v54, %v1445_v33  ;;  %v1448_v12 = vmul.f32 %v6042_v28, %v1445_v33  ;;  %v1462_v59 = vmul.f32 %v5800_v31, %v1461_v45 }
 0x168   :  { %v1375_v61 = vadd.f32 %v9732_v23, %v1344_v37  ;;  %v1380_v51 = vadd.f32 %v9733_v62, %v1360_v19  ;;  %v1463_v4 = vmul.f32 %v5819_v54, %v1461_v45  ;;  %v1464_v25 = vmul.f32 %v6042_v28, %v1461_v45 }
 0x169   :  { %v6211_v9 = vadd.f32 %v1438_v21, %v1379_v63  ;;  %v6215_v26 = vsel %vm276_vm3, %v1510_v50, 0.0  ;;  %v6219_v8 = vsel %vm276_vm3, %v1512_v10, 0.0  ;;  %v1452_v44 = vrot.slane %v1446_v1, 4 }
 0x16a   :  { %v1453_v49 = vrot.slane %v1447_v2, 4  ;;  %v1455_v22 = vrot.slane %v1448_v12, 4  ;;  %v1468_v14 = vrot.slane %v1462_v59, 4  ;;  %v1477_v16 = vstv %s6162_s12  ;;  %s6510_s12 = sld [smem:[#allocation8 + $0x88]] }
 0x16b   :  { %v1469_v27 = vrot.slane %v1463_v4, 4  ;;  %v1471_v32 = vrot.slane %v1464_v25, 4  ;;  %v1478_v41 = vmul.f32 %v5800_v31, %v1477_v16  ;;  %v1479_v35 = vmul.f32 %v5819_v54, %v1477_v16 }
 0x16c   :  { %v6232_v46 = vadd.f32 %v1424_v55, %v1375_v61  ;;  %v6234_v7 = vadd.f32 %v1440_v60, %v1380_v51  ;;  %v1480_v52 = vmul.f32 %v6042_v28, %v1477_v16  ;;  %v1493_v48 = vstv %s6175_s15  ;;  %s6529_s15 = sld [smem:[#allocation8 + $0x67]] }
 0x16d   :  { %v1484_v30 = vrot.slane %v1478_v41, 4  ;;  %v1485_v56 = vrot.slane %v1479_v35, 4  ;;  %v1494_v18 = vmul.f32 %v5800_v31, %v1493_v48  ;;  %v1495_v34 = vmul.f32 %v5819_v54, %v1493_v48 }
 0x16e   :  { %v1487_v36 = vrot.slane %v1480_v52, 4  ;;  %v1496_v15 = vmul.f32 %v6042_v28, %v1493_v48  ;;  %v1518_v11 = vstv %s6191_s17  ;;  %v1523_v17 = vstv %s6193_s18  ;;  %s6531_s17 = sld [smem:[#allocation8 + $0x8b]]  ;;  %s6590_s18 = sld [smem:[#allocation8 + $0x22]] }
 0x16f   :  { %v1454_v13 = vsel %vm373_vm1, %v1452_v44, %v1453_v49  ;;  %v1456_v20 = vsel %vm373_vm1, %v1453_v49, %v1455_v22  ;;  %v1470_v43 = vsel %vm373_vm1, %v1468_v14, %v1469_v27  ;;  %v1472_v31 = vsel %vm373_vm1, %v1469_v27, %v1471_v32  ;;  %v1514_v49 = vpop.permute.xlu1 %1513 }
 0x170   :  { %v1486_v54 = vsel %vm373_vm1, %v1484_v30, %v1485_v56  ;;  %v1500_v39 = vrot.slane %v1494_v18, 4  ;;  %v1501_v55 = vrot.slane %v1495_v34, 4  ;;  %v1519_v28 = vmul.f32 %v1518_v11, %v6215_v26 }
 0x171   :  { %v1488_v21 = vsel %vm373_vm1, %v1485_v56, %v1487_v36  ;;  %v1503_v0 = vrot.slane %v1496_v15, 4  ;;  %v1524_v38 = vmul.f32 %v1523_v17, %v6215_v26  ;;  %v1538_v29 = vstv %s6198_s0  ;;  %s6592_s0 = sld [smem:[#allocation8 + $0x46]] }
 0x172   :  { %v1528_v58 = vstv %s6221_s19  ;;  %v1533_v60 = vstv %s6223_s24  ;;  %v1539_v37 = vmul.f32 %v1538_v29, %v6215_v26  ;;  %v1554_v3 = vstv %s6206_s21  ;;  %s6620_s21 = sld [smem:[#allocation8 + $0x8e]]  ;;  %s6751_s19 = sld [smem:[#allocation8 + $0x1d]] }
 0x173   :  { %v6263_v47 = vmul.f32 %v1554_v3, %v6215_v26  ;;  %v1570_v40 = vstv %s6226_s20  ;;  %v1586_v63 = vstv %s6228_s4  ;;  %v6268_v19 = vstv %s6204_s1  ;;  %s6618_s1 = sld [smem:[#allocation8 + $0x6a]]  ;;  %s6758_s24 = sld [smem:[#allocation8 + $0x41]] }
 0x174   :  { %v1502_v10 = vsel %vm373_vm1, %v1500_v39, %v1501_v55  ;;  %v6272_v33 = vmul.f32 %v1570_v40, %v6215_v26  ;;  %v6275_v45 = vmul.f32 %v1586_v63, %v6215_v26  ;;  %v6279_v23 = vmul.f32 %v6268_v19, %v6215_v26  ;;  %s6760_s20 = sld [smem:[#allocation8 + $0x65]]  ;;  %s6764_s4 = sld [smem:[#allocation8 + $0x89]] }
 0x175   :  { %v1529_v61 = vmul.f32 %v1528_v58, %v6215_v26  ;;  %v6283_v1 = vstv %s6236_s23  ;;  %v6286_v2 = vstv %s6240_s28  ;;  %v6289_v12 = vstv %s6242_s30  ;;  %s6766_s23 = sld [smem:[#allocation8 + $0x20]]  ;;  %s6777_s28 = sld [smem:[#allocation8 + $0x44]] }
 0x176   :  { %v1504_v62 = vsel %vm373_vm1, %v1501_v55, %v1503_v0  ;;  %v1534_v51 = vmul.f32 %v1533_v60, %v6215_v26  ;;  %v1545_v50 = vrot.slane %v1539_v37, 2  ;;  %v6295_v59 = vmul.f32 %v6283_v1, %v6215_v26  ;;  %s6788_s30 = sld [smem:[#allocation8 + $0x68]] }
 0x177   :  { %v1561_v4 = vrot.slane %v6263_v47, 2  ;;  %v6300_v25 = vmul.f32 %v6286_v2, %v6215_v26  ;;  %v6304_v44 = vmul.f32 %v6289_v12, %v6215_v26  ;;  %v1459_v22 = vadd.f32 %v1454_v13, %v6178_v53 }
 0x178   :  { %v1577_v14 = vrot.slane %v6272_v33, 2  ;;  %v1593_v16 = vrot.slane %v6275_v45, 2  ;;  %v1609_v27 = vrot.slane %v6279_v23, 4  ;;  %v1475_v32 = vadd.f32 %v1470_v43, %v6184_v42 }
 0x179   :  { %v1625_v41 = vrot.slane %v6295_v59, 4  ;;  %v1460_v35 = vadd.f32 %v1456_v20, %v6181_v24  ;;  %v1476_v52 = vadd.f32 %v1472_v31, %v6187_v5  ;;  %v1491_v26 = vadd.f32 %v1486_v54, %v6189_v57 }
 0x17a   :  { %v1641_v48 = vrot.slane %v6300_v25, 4  ;;  %v1657_v53 = vrot.slane %v6304_v44, 4  ;;  %v6319_v30 = vsel %vm276_vm3, %v1514_v49, 0.0  ;;  %v1520_v56 = vmul.f32 %v1518_v11, %v6219_v8 }
 0x17b   :  { %v1492_v42 = vadd.f32 %v1488_v21, %v6232_v46  ;;  %v1507_v18 = vadd.f32 %v1502_v10, %v6211_v9  ;;  %v1508_v24 = vadd.f32 %v1504_v62, %v6234_v7  ;;  %v1521_v34 = vadd.f32 %v1519_v28, %v1459_v22 }
 0x17c   :  { %v1525_v5 = vmul.f32 %v1523_v17, %v6219_v8  ;;  %v1526_v57 = vadd.f32 %v1524_v38, %v1475_v32  ;;  %v1530_v36 = vmul.f32 %v1528_v58, %v6219_v8  ;;  %v1540_v15 = vmul.f32 %v1538_v29, %v6219_v8 }
 0x17d   :  { %v1522_v13 = vadd.f32 %v1520_v56, %v1460_v35  ;;  %v1531_v20 = vadd.f32 %v1529_v61, %v1491_v26  ;;  %v1541_v43 = vmul.f32 %v1538_v29, %v6319_v30  ;;  %v1556_v11 = vmul.f32 %v1554_v3, %v6219_v8 }
 0x17e   :  { %v1535_v46 = vmul.f32 %v1533_v60, %v6219_v8  ;;  %v1546_v31 = vrot.slane %v1540_v15, 2  ;;  %v1557_v9 = vmul.f32 %v1554_v3, %v6319_v30  ;;  %v1572_v7 = vmul.f32 %v1570_v40, %v6219_v8 }
 0x17f   :  { %v1548_v54 = vrot.slane %v1541_v43, 2  ;;  %v1562_v17 = vrot.slane %v1556_v11, 2  ;;  %v1573_v39 = vmul.f32 %v1570_v40, %v6319_v30  ;;  %v1588_v55 = vmul.f32 %v1586_v63, %v6219_v8 }
 0x180   :  { %v1536_v28 = vadd.f32 %v1534_v51, %v1507_v18  ;;  %v1564_v21 = vrot.slane %v1557_v9, 2  ;;  %v1578_v0 = vrot.slane %v1572_v7, 2  ;;  %v1589_v38 = vmul.f32 %v1586_v63, %v6319_v30  ;;  %v1670_v7 = vpop.permute.xlu0 %1669 }
 0x181   :  { %v1527_v29 = vadd.f32 %v1525_v5, %v1476_v52  ;;  %v1547_v58 = vsel %vm308_vm0, %v1545_v50, %v1546_v31  ;;  %v1549_v60 = vsel %vm308_vm0, %v1546_v31, %v1548_v54  ;;  %v1580_v37 = vrot.slane %v1573_v39, 2 }
 0x182   :  { %v1532_v3 = vadd.f32 %v1530_v36, %v1492_v42  ;;  %v1537_v47 = vadd.f32 %v1535_v46, %v1508_v24  ;;  %v1552_v10 = vadd.f32 %v1547_v58, %v1521_v34  ;;  %v1563_v33 = vsel %vm308_vm0, %v1561_v4, %v1562_v17 }
 0x183   :  { %v1553_v61 = vadd.f32 %v1549_v60, %v1522_v13  ;;  %v1565_v40 = vsel %vm308_vm0, %v1562_v17, %v1564_v21  ;;  %v1568_v62 = vadd.f32 %v1563_v33, %v1526_v57  ;;  %v1594_v51 = vrot.slane %v1588_v55, 2 }
 0x184   :  { %v1579_v49 = vsel %vm308_vm0, %v1577_v14, %v1578_v0  ;;  %v1596_v22 = vrot.slane %v1589_v38, 2  ;;  %v1604_v63 = vmul.f32 %v6268_v19, %v6219_v8  ;;  %v1605_v50 = vmul.f32 %v6268_v19, %v6319_v30 }
 0x185   :  { %v1581_v4 = vsel %vm308_vm0, %v1578_v0, %v1580_v37  ;;  %v1620_v32 = vmul.f32 %v6283_v1, %v6219_v8  ;;  %v1621_v35 = vmul.f32 %v6283_v1, %v6319_v30  ;;  %v1636_v14 = vmul.f32 %v6286_v2, %v6219_v8 }
 0x186   :  { %v1569_v52 = vadd.f32 %v1565_v40, %v1527_v29  ;;  %v1597_v26 = vsel %vm308_vm0, %v1594_v51, %v1596_v22  ;;  %v1610_v56 = vrot.slane %v1604_v63, 4  ;;  %v1612_v19 = vrot.slane %v1605_v50, 4 }
 0x187   :  { %v1595_v42 = vsel %vm308_vm0, %v1593_v16, %v1594_v51  ;;  %v1626_v18 = vrot.slane %v1620_v32, 4  ;;  %v1628_v24 = vrot.slane %v1621_v35, 4  ;;  %v1637_v34 = vmul.f32 %v6286_v2, %v6319_v30  ;;  %v1672_v2 = vpop.permute.xlu1 %1671 }
 0x188   :  { %v1584_v1 = vadd.f32 %v1579_v49, %v1531_v20  ;;  %v1585_v5 = vadd.f32 %v1581_v4, %v1532_v3  ;;  %v1600_v57 = vadd.f32 %v1595_v42, %v1536_v28  ;;  %v1652_v36 = vmul.f32 %v6289_v12, %v6219_v8 }
 0x189   :  { %v1601_v15 = vadd.f32 %v1597_v26, %v1537_v47  ;;  %v1611_v45 = vsel %vm373_vm1, %v1609_v27, %v1610_v56  ;;  %v1613_v16 = vsel %vm373_vm1, %v1610_v56, %v1612_v19  ;;  %v1642_v13 = vrot.slane %v1636_v14, 4 }
 0x18a   :  { %v6376_v43 = vadd.f32 %v1611_v45, %v1552_v10  ;;  %v1617_v20 = vadd.f32 %v1613_v16, %v1553_v61  ;;  %v1627_v8 = vsel %vm373_vm1, %v1625_v41, %v1626_v18  ;;  %v1644_v11 = vrot.slane %v1637_v34, 4 }
 0x18b   :  { %v1629_v23 = vsel %vm373_vm1, %v1626_v18, %v1628_v24  ;;  %v6386_v27 = vadd.f32 %v1627_v8, %v1568_v62  ;;  %v1653_v46 = vmul.f32 %v6289_v12, %v6319_v30  ;;  %v1658_v31 = vrot.slane %v1652_v36, 4 }
 0x18c   :  { %v1633_v9 = vadd.f32 %v1629_v23, %v1569_v52  ;;  %v6392_v59 = vsel %vm275_vm2, %v1672_v2, 0.0  ;;  %v1678_v41 = vstv %s6345_s5  ;;  %v1683_v54 = vstv %s6347_s6  ;;  %s6793_s5 = sld [smem:[#allocation8 + $0x23]]  ;;  %s6795_s6 = sld [smem:[#allocation8 + $0x8c]] }
 0x18d   :  { %v1643_v17 = vsel %vm373_vm1, %v1641_v48, %v1642_v13  ;;  %v1645_v39 = vsel %vm373_vm1, %v1642_v13, %v1644_v11  ;;  %v1660_v55 = vrot.slane %v1653_v46, 4  ;;  %v6402_v12 = vsel %vm275_vm2, %v1670_v7, 0.0 }
 0x18e   :  { %v6406_v30 = vadd.f32 %v1643_v17, %v1584_v1  ;;  %v1649_v28 = vadd.f32 %v1645_v39, %v1585_v5  ;;  %v1659_v21 = vsel %vm373_vm1, %v1657_v53, %v1658_v31  ;;  %v1680_v25 = vmul.f32 %v1678_v41, %v6392_v59 }
 0x18f   :  { %v1685_v48 = vmul.f32 %v1683_v54, %v6392_v59  ;;  %v1688_v0 = vstv %s6364_s13  ;;  %v1693_v38 = vstv %s6366_s29  ;;  %v6416_v29 = vstv %s6357_s26  ;;  %s6801_s26 = sld [smem:[#allocation8 + $0x47]]  ;;  %s6803_s13 = sld [smem:[#allocation8 + $0x6b]] }
 0x190   :  { %v1661_v58 = vsel %vm373_vm1, %v1658_v31, %v1660_v55  ;;  %v6419_v60 = vadd.f32 %v1659_v21, %v1600_v57  ;;  %v6426_v44 = vmul.f32 %v1678_v41, %v6402_v12  ;;  %v6429_v53 = vmul.f32 %v1683_v54, %v6402_v12  ;;  %s6809_s29 = sld [smem:[#allocation8 + $0x8f]] }
 0x191   :  { %v1665_v37 = vadd.f32 %v1661_v58, %v1601_v15  ;;  %v1690_v3 = vmul.f32 %v1688_v0, %v6392_v59  ;;  %v1695_v47 = vmul.f32 %v1693_v38, %v6392_v59  ;;  %v1699_v10 = vmul.f32 %v6416_v29, %v6402_v12 }
 0x192   :  { %v6439_v33 = vmul.f32 %v6416_v29, %v6392_v59  ;;  %v6442_v61 = vstv %s6374_s7  ;;  %v6445_v40 = vstv %s6381_s8  ;;  %v6448_v62 = vstv %s6383_s22  ;;  %s6858_s7 = sld [smem:[#allocation9]]  ;;  %s6867_s8 = sld [smem:[#allocation9 + $0x1]] }
 0x193   :  { %v6450_v51 = vadd.f32 %v1680_v25, %v1617_v20  ;;  %v6452_v49 = vadd.f32 %v1685_v48, %v1633_v9  ;;  %v6455_v22 = vmul.f32 %v1688_v0, %v6402_v12  ;;  %v1715_v63 = vmul.f32 %v6442_v61, %v6402_v12  ;;  %s6892_s22 = sld [smem:[#allocation9 + $0x2]] }
 0x194   :  { %v6462_v50 = vmul.f32 %v1693_v38, %v6402_v12  ;;  %v6466_v4 = vmul.f32 %v6442_v61, %v6392_v59  ;;  %v1731_v32 = vmul.f32 %v6445_v40, %v6402_v12  ;;  %v6472_v35 = vmul.f32 %v6445_v40, %v6392_v59  ;;  %v6568_v38 = vld [vmem:[#allocation2 + $0x48] sm:$0xff] }
 0x195   :  { %v6474_v14 = vadd.f32 %v1690_v3, %v1649_v28  ;;  %v1747_v52 = vmul.f32 %v6448_v62, %v6402_v12  ;;  %v6480_v26 = vmul.f32 %v6448_v62, %v6392_v59  ;;  %v6483_v56 = vstv %s6404_s25  ;;  %s6895_s25 = sld [smem:[#allocation9 + $0x3]] }
 0x196   :  { %v6487_v19 = vadd.f32 %v1695_v47, %v1665_v37  ;;  %v1705_v42 = vrot.slane %v1699_v10, 2  ;;  %v9404_v18 = vrot.slane %v6439_v33, 2  ;;  %v1721_v24 = vrot.slane %v1715_v63, 2  ;;  %v6584_v10 = vld [vmem:[#allocation2 + $0x50] sm:$0xff] }
 0x197   :  { %v9403_v34 = vrot.slane %v6466_v4, 2  ;;  %v1737_v1 = vrot.slane %v1731_v32, 2  ;;  %v1763_v5 = vmul.f32 %v6483_v56, %v6402_v12  ;;  %v6497_v57 = vmul.f32 %v6483_v56, %v6392_v59 }
 0x198   :  { %v9402_v36 = vrot.slane %v6472_v35, 2  ;;  %v1753_v15 = vrot.slane %v1747_v52, 2  ;;  %v6505_v45 = vstv %s6421_s9  ;;  %v6508_v16 = vstv %s6423_s11  ;;  %s4373_s9 = sld [smem:[#allocation11 + $0x4]]  ;;  %s6951_s11 = sld [smem:[#allocation11 + $0x7]] }
 0x199   :  { %v9401_v13 = vrot.slane %v6480_v26, 2  ;;  %v1769_v2 = vrot.slane %v1763_v5, 4  ;;  %v9400_v20 = vrot.slane %v6497_v57, 4  ;;  %v1779_v8 = vmul.f32 %v6505_v45, %v6402_v12 }
 0x19a   :  { %v6518_v11 = vmul.f32 %v6505_v45, %v6392_v59  ;;  %v1795_v23 = vmul.f32 %v6508_v16, %v6402_v12  ;;  %v6524_v46 = vmul.f32 %v6508_v16, %v6392_v59  ;;  %v6527_v31 = vstv %s6435_s3  ;;  %s4409_s3 = sld [smem:[#allocation11 + $0x28]] }
 0x19b   :  { %v6536_v9 = vsel %vm308_vm0, %v1705_v42, %v9404_v18  ;;  %v1785_v7 = vrot.slane %v1779_v8, 4  ;;  %v1811_v41 = vmul.f32 %v6527_v31, %v6402_v12  ;;  %v6542_v54 = vmul.f32 %v6527_v31, %v6392_v59 }
 0x19c   :  { %9734 = vst [vmem:[#allocation20_spill] sm:$0xff] %v6524_v46  ;;  %v9399_v17 = vrot.slane %v6518_v11, 4  ;;  %v1801_v39 = vrot.slane %v1795_v23, 4  ;;  %v9398_v55 = vrot.slane %v6524_v46, 4  ;;  %v1826_v28 = vstv %s6459_s27  ;;  %v6610_v23 = vld [vmem:[#allocation2 + $0x58] sm:$0xf] }
 0x19d   :  { %9735 = vst [vmem:[#allocation28_spill] sm:$0xff] %v6542_v54  ;;  %v6550_v21 = vsel %vm308_vm0, %v1721_v24, %v9403_v34  ;;  %v6555_v12 = vsel %vm308_vm0, %v1737_v1, %v9402_v36  ;;  %v1817_v25 = vrot.slane %v1811_v41, 4  ;;  %v9397_v59 = vrot.slane %v6542_v54, 4  ;;  %s4445_s27 = sld [smem:[#allocation11 + $0x4c]] }
 0x19e   :  { %v6561_v48 = vsel %vm308_vm0, %v1753_v15, %v9401_v13  ;;  %v6566_v0 = vsel %vm373_vm1, %v1769_v2, %v9400_v20  ;;  %v6571_v58 = vmul.f32 %v6568_v38, %v1826_v28  ;;  %v1831_v37 = vstv %s6485_s2  ;;  %s4481_s2 = sld [smem:[#allocation11 + $0x70]] }
 0x19f   :  { %v6577_v3 = vsel %vm373_vm1, %v1785_v7, %v9399_v17  ;;  %v6582_v47 = vsel %vm373_vm1, %v1801_v39, %v9398_v55  ;;  %v6587_v63 = vmul.f32 %v6584_v10, %v1826_v28  ;;  %v1836_v32 = vstv %s6490_s14  ;;  %s4412_s14 = sld [smem:[#allocation11 + $0x2b]] }
 0x1a0   :  { %v6597_v52 = vsel %vm373_vm1, %v1817_v25, %v9397_v59  ;;  %v6600_v42 = vmul.f32 %v6568_v38, %v1831_v37  ;;  %v1846_v24 = vstv %s6499_s16  ;;  %v1862_v1 = vstv %s6501_s10  ;;  %s4448_s16 = sld [smem:[#allocation11 + $0x4f]]  ;;  %s4484_s10 = sld [smem:[#allocation11 + $0x73]] }
 0x1a1   :  { %9736 = vst [vmem:[#allocation22_spill] sm:$0xff] %v6587_v63  ;;  %v6605_v5 = vmul.f32 %v6584_v10, %v1831_v37  ;;  %v1841_v15 = vstv %s6510_s12  ;;  %v1847_v2 = vmul.f32 %v6568_v38, %v1846_v24  ;;  %v1848_v8 = vmul.f32 %v6584_v10, %v1846_v24  ;;  %s4647_s12 = smov 1  }
 0x1a2   :  { %9737 = vst [vmem:[#allocation29_spill] sm:$0xff] %v6600_v42  ;;  %v1849_v7 = vmul.f32 %v6610_v23, %v1846_v24  ;;  %v1863_v41 = vmul.f32 %v6568_v38, %v1862_v1  ;;  %v1864_v39 = vmul.f32 %v6584_v10, %v1862_v1  ;;  %v1865_v28 = vmul.f32 %v6610_v23, %v1862_v1 }
 0x1a3   :  { %9738 = vst [vmem:[#allocation24_spill] sm:$0xff] %v6605_v5  ;;  %v1853_v25 = vrot.slane %v1847_v2, 2  ;;  %v1854_v59 = vrot.slane %v1848_v8, 2  ;;  %v1878_v55 = vstv %s6529_s15  ;;  %v1894_v37 = vstv %s6531_s17  ;;  %s4648_s15 = smov 127   ;;  %s7035_s17 = sld [smem:[#allocation11 + $0xd]] }
 0x1a4   :  { %v1856_v17 = vrot.slane %v1849_v7, 2  ;;  %v1869_v20 = vrot.slane %v1863_v41, 2  ;;  %v1870_v13 = vrot.slane %v1864_v39, 2  ;;  %v1872_v36 = vrot.slane %v1865_v28, 2 }
 0x1a5   :  { %v6623_v24 = vmul.f32 %v6568_v38, %v1836_v32  ;;  %v1879_v34 = vmul.f32 %v6568_v38, %v1878_v55  ;;  %v1880_v1 = vmul.f32 %v6584_v10, %v1878_v55  ;;  %v1881_v2 = vmul.f32 %v6610_v23, %v1878_v55 }
 0x1a6   :  { %v6629_v8 = vmul.f32 %v6584_v10, %v1836_v32  ;;  %v6632_v7 = vmul.f32 %v6568_v38, %v1841_v15  ;;  %v6635_v41 = vmul.f32 %v6584_v10, %v1841_v15  ;;  %v1895_v39 = vmul.f32 %v6568_v38, %v1894_v37 }
 0x1a7   :  { %9739 = vst [vmem:[#allocation30_spill] sm:$0xff] %v6623_v24  ;;  %v6639_v28 = vsel %vm308_vm0, %v1853_v25, %v1854_v59  ;;  %v6642_v18 = vsel %vm308_vm0, %v1854_v59, %v1856_v17  ;;  %v6645_v54 = vsel %vm308_vm0, %v1869_v20, %v1870_v13  ;;  %v1896_v55 = vmul.f32 %v6584_v10, %v1894_v37 }
 0x1a8   :  { %9740 = vst [vmem:[#allocation25_spill] sm:$0xff] %v6629_v8  ;;  %9741 = vst [vmem:[#allocation31_spill] sm:$0xff] %v6632_v7  ;;  %v6649_v32 = vsel %vm308_vm0, %v1870_v13, %v1872_v36  ;;  %v1897_v8 = vmul.f32 %v6610_v23, %v1894_v37  ;;  %v1910_v15 = vstv %s6590_s18  ;;  %v1885_v7 = vrot.slane %v1879_v34, 2  ;;  %s7047_s18 = sld [smem:[#allocation11 + $0x31]] }
 0x1a9   :  { %9742 = vst [vmem:[#allocation21_spill] sm:$0xff] %v6635_v41  ;;  %9743 = vst [vmem:[#allocation32_spill] sm:$0xff] %v6639_v28  ;;  %v1926_v41 = vstv %s6592_s0  ;;  %v1886_v5 = vrot.slane %v1880_v1, 2  ;;  %v1888_v46 = vrot.slane %v1881_v2, 2  ;;  %v1911_v25 = vmul.f32 %v6568_v38, %v1910_v15  ;;  %s4454_s0 = sld [smem:[#allocation11 + $0x55]] }
 0x1aa   :  { %9744 = vst [vmem:[#allocation23_spill] sm:$0xff] %v6642_v18  ;;  %9745 = vst [vmem:[#allocation33_spill] sm:$0xff] %v6645_v54  ;;  %v1901_v17 = vrot.slane %v1895_v39, 2  ;;  %v1912_v20 = vmul.f32 %v6584_v10, %v1910_v15  ;;  %v1913_v59 = vmul.f32 %v6610_v23, %v1910_v15  ;;  %v1927_v18 = vmul.f32 %v6568_v38, %v1926_v41 }
 0x1ab   :  { %9746 = vst [vmem:[#allocation26_spill] sm:$0xff] %v6649_v32  ;;  %v1902_v36 = vrot.slane %v1896_v55, 2  ;;  %v1904_v13 = vrot.slane %v1897_v8, 2  ;;  %v1928_v37 = vmul.f32 %v6584_v10, %v1926_v41  ;;  %v1929_v32 = vmul.f32 %v6610_v23, %v1926_v41  ;;  %v1674_v41 = vpop.permute.xlu0 %1673 }
 0x1ac   :  { %v1917_v34 = vrot.slane %v1911_v25, 4  ;;  %v1918_v1 = vrot.slane %v1912_v20, 4  ;;  %v1920_v2 = vrot.slane %v1913_v59, 4  ;;  %v1933_v54 = vrot.slane %v1927_v18, 4 }
 0x1ad   :  { %v1934_v28 = vrot.slane %v1928_v37, 4  ;;  %v1936_v24 = vrot.slane %v1929_v32, 4  ;;  %v1942_v42 = vstv %s6618_s1  ;;  %v1958_v39 = vstv %s6620_s21  ;;  %s4490_s1 = sld [smem:[#allocation11 + $0x79]]  ;;  %s4385_s21 = sld [smem:[#allocation11 + $0x10]] }
 0x1ae   :  { %v6663_v63 = vsel %vm308_vm0, %v1885_v7, %v1886_v5  ;;  %v6666_v15 = vsel %vm308_vm0, %v1886_v5, %v1888_v46  ;;  %v6669_v8 = vmul.f32 %v6568_v38, %v1942_v42  ;;  %v6672_v55 = vmul.f32 %v6584_v10, %v1942_v42 }
 0x1af   :  { %v6675_v25 = vsel %vm308_vm0, %v1901_v17, %v1902_v36  ;;  %v6678_v18 = vsel %vm308_vm0, %v1902_v36, %v1904_v13  ;;  %v6681_v32 = vmul.f32 %v6610_v23, %v1942_v42  ;;  %v6684_v7 = vmul.f32 %v6568_v38, %v1958_v39 }
 0x1b0   :  { %v6687_v46 = vsel %vm373_vm1, %v1917_v34, %v1918_v1  ;;  %v6690_v5 = vsel %vm373_vm1, %v1918_v1, %v1920_v2  ;;  %v6693_v20 = vmul.f32 %v6584_v10, %v1958_v39  ;;  %v6696_v17 = vmul.f32 %v6610_v23, %v1958_v39 }
 0x1b1   :  { %v6699_v59 = vsel %vm373_vm1, %v1933_v54, %v1934_v28  ;;  %v6702_v42 = vsel %vm373_vm1, %v1934_v28, %v1936_v24  ;;  %v1677_v38 = vsel %vm275_vm2, %v1674_v41, 0.0  ;;  %v1681_v36 = vadd.f32 %v6426_v44, %v6376_v43 }
 0x1b2   :  { %v1949_v13 = vrot.slane %v6669_v8, 4  ;;  %v1950_v10 = vrot.slane %v6672_v55, 4  ;;  %v1952_v37 = vrot.slane %v6681_v32, 4  ;;  %v1686_v23 = vadd.f32 %v6429_v53, %v6386_v27 }
 0x1b3   :  { %v1965_v54 = vrot.slane %v6684_v7, 4  ;;  %v1691_v24 = vadd.f32 %v6455_v22, %v6406_v30  ;;  %v1696_v28 = vadd.f32 %v6462_v50, %v6419_v60  ;;  %v1701_v34 = vmul.f32 %v6416_v29, %v1677_v38 }
 0x1b4   :  { %v1966_v43 = vrot.slane %v6693_v20, 4  ;;  %v1968_v44 = vrot.slane %v6696_v17, 4  ;;  %v1712_v1 = vadd.f32 %v6536_v9, %v1681_v36  ;;  %v1717_v2 = vmul.f32 %v6442_v61, %v1677_v38 }
 0x1b5   :  { %v1708_v39 = vrot.slane %v1701_v34, 2  ;;  %v1728_v27 = vadd.f32 %v6550_v21, %v1686_v23  ;;  %v1733_v53 = vmul.f32 %v6445_v40, %v1677_v38  ;;  %v1744_v30 = vadd.f32 %v6555_v12, %v1691_v24  ;;  %v9754_v34 = vld [vmem:[#allocation29_spill] sm:$0xff] }
 0x1b6   :  { %v1724_v22 = vrot.slane %v1717_v2, 2  ;;  %v1749_v60 = vmul.f32 %v6448_v62, %v1677_v38  ;;  %v1760_v29 = vadd.f32 %v6561_v48, %v1696_v28  ;;  %v1765_v50 = vmul.f32 %v6483_v56, %v1677_v38 }
 0x1b7   :  { %v9747_v8 = vrot.slane %v6439_v33, 2  ;;  %v1740_v55 = vrot.slane %v1733_v53, 2  ;;  %v1776_v61 = vadd.f32 %v6566_v0, %v1712_v1  ;;  %v1781_v21 = vmul.f32 %v6505_v45, %v1677_v38  ;;  %v9755_v1 = vld [vmem:[#allocation30_spill] sm:$0xff] }
 0x1b8   :  { %v9748_v12 = vrot.slane %v6466_v4, 2  ;;  %v1756_v62 = vrot.slane %v1749_v60, 2  ;;  %v1772_v32 = vrot.slane %v1765_v50, 4  ;;  %v9749_v56 = vrot.slane %v6472_v35, 2 }
 0x1b9   :  { %v1709_v9 = vsel %vm308_vm0, %v9747_v8, %v1708_v39  ;;  %v1788_v7 = vrot.slane %v1781_v21, 4  ;;  %v1792_v20 = vadd.f32 %v6577_v3, %v1728_v27  ;;  %v9750_v45 = vrot.slane %v6480_v26, 2  ;;  %v9756_v39 = vld [vmem:[#allocation20_spill] sm:$0xff]  ;;  %v9761_v8 = vld [vmem:[#allocation33_spill] sm:$0xff] }
 0x1ba   :  { %v1713_v40 = vadd.f32 %v1709_v9, %v6450_v51  ;;  %v1725_v41 = vsel %vm308_vm0, %v9748_v12, %v1724_v22  ;;  %v1741_v33 = vsel %vm308_vm0, %v9749_v56, %v1740_v55  ;;  %v9751_v4 = vrot.slane %v6497_v57, 4 }
 0x1bb   :  { %v1729_v48 = vadd.f32 %v1725_v41, %v6452_v49  ;;  %v1745_v0 = vadd.f32 %v1741_v33, %v6474_v14  ;;  %v1757_v51 = vsel %vm308_vm0, %v9750_v45, %v1756_v62  ;;  %v1797_v36 = vmul.f32 %v6508_v16, %v1677_v38  ;;  %v9764_v62 = vld [vmem:[#allocation25_spill] sm:$0xff]  ;;  %v9766_v33 = vld [vmem:[#allocation26_spill] sm:$0xff] }
 0x1bc   :  { %v1773_v17 = vsel %vm373_vm1, %v9751_v4, %v1772_v32  ;;  %v1761_v49 = vadd.f32 %v1757_v51, %v6487_v19  ;;  %v9752_v23 = vrot.slane %v6518_v11, 4  ;;  %v1808_v14 = vadd.f32 %v6582_v47, %v1744_v30  ;;  %v9753_v11 = vld [vmem:[#allocation22_spill] sm:$0xff]  ;;  %v1975_v51 = vpop.permute.xlu1 %1974 }
 0x1bd   :  { %v1777_v35 = vadd.f32 %v1773_v17, %v1713_v40  ;;  %v1804_v57 = vrot.slane %v1797_v36, 4  ;;  %v1813_v24 = vmul.f32 %v6527_v31, %v1677_v38  ;;  %v1824_v16 = vadd.f32 %v6597_v52, %v1760_v29  ;;  %v9758_v31 = vld [vmem:[#allocation24_spill] sm:$0xff]  ;;  %v9759_v52 = vld [vmem:[#allocation31_spill] sm:$0xff] }
 0x1be   :  { %v1789_v3 = vsel %vm373_vm1, %v9752_v23, %v1788_v7  ;;  %v1829_v19 = vadd.f32 %v6571_v58, %v1776_v61  ;;  %v1834_v47 = vadd.f32 %v9754_v34, %v1792_v20  ;;  %v1839_v2 = vadd.f32 %v9755_v1, %v1808_v14  ;;  %v9760_v29 = vld [vmem:[#allocation32_spill] sm:$0xff]  ;;  %v9767_v7 = vld [vmem:[#allocation21_spill] sm:$0xff] }
 0x1bf   :  { %v1793_v26 = vadd.f32 %v1789_v3, %v1729_v48  ;;  %v1830_v28 = vadd.f32 %v9753_v11, %v1777_v35  ;;  %v9757_v27 = vrot.slane %v9756_v39, 4  ;;  %v1820_v30 = vrot.slane %v1813_v24, 4  ;;  %v9762_v40 = vld [vmem:[#allocation28_spill] sm:$0xff]  ;;  %v9765_v48 = vld [vmem:[#allocation23_spill] sm:$0xff] }
 0x1c0   :  { %v1844_v22 = vadd.f32 %v9759_v52, %v1824_v16  ;;  %v1951_v60 = vsel %vm373_vm1, %v1949_v13, %v1950_v10  ;;  %v1860_v50 = vadd.f32 %v9760_v29, %v1829_v19  ;;  %v1876_v9 = vadd.f32 %v9761_v8, %v1834_v47  ;;  %v1979_v1 = vpop.permute.xlu1 %1978 }
 0x1c1   :  { %v1805_v53 = vsel %vm373_vm1, %v9757_v27, %v1804_v57  ;;  %v1835_v38 = vadd.f32 %v9758_v31, %v1793_v26  ;;  %v1953_v55 = vsel %vm373_vm1, %v1950_v10, %v1952_v37  ;;  %v1967_v61 = vsel %vm373_vm1, %v1965_v54, %v1966_v43 }
 0x1c2   :  { %v1809_v58 = vadd.f32 %v1805_v53, %v1745_v0  ;;  %v1969_v21 = vsel %vm373_vm1, %v1966_v43, %v1968_v44  ;;  %v9763_v12 = vrot.slane %v9762_v40, 4  ;;  %v1861_v56 = vadd.f32 %v9765_v48, %v1830_v28  ;;  %v1977_v48 = vpop.permute.xlu0 %1976 }
 0x1c3   :  { %v1877_v10 = vadd.f32 %v9766_v33, %v1835_v38  ;;  %v1892_v37 = vadd.f32 %v6663_v63, %v1839_v2  ;;  %v1908_v54 = vadd.f32 %v6675_v25, %v1844_v22  ;;  %v1924_v43 = vadd.f32 %v6687_v46, %v1860_v50 }
 0x1c4   :  { %v1821_v41 = vsel %vm373_vm1, %v9763_v12, %v1820_v30  ;;  %v1840_v32 = vadd.f32 %v9764_v62, %v1809_v58  ;;  %v1940_v44 = vadd.f32 %v6699_v59, %v1876_v9  ;;  %v1983_v45 = vstv %s6751_s19  ;;  %s4421_s19 = sld [smem:[#allocation11 + $0x34]] }
 0x1c5   :  { %v1825_v13 = vadd.f32 %v1821_v41, %v1761_v49  ;;  %v1988_v63 = vstv %s6758_s24  ;;  %v1993_v25 = vstv %s6760_s20  ;;  %v1998_v46 = vstv %s6764_s4  ;;  %s7113_s24 = sld [smem:[#allocation11 + $0x58]]  ;;  %s7121_s20 = sld [smem:[#allocation11 + $0x7c]] }
 0x1c6   :  { %v1893_v0 = vadd.f32 %v6666_v15, %v1840_v32  ;;  %v1980_v59 = vsel %vm276_vm3, %v1975_v51, 0.0  ;;  %v6816_v4 = vstv %s6766_s23  ;;  %v6820_v36 = vadd.f32 %v6690_v5, %v1861_v56  ;;  %s4391_s4 = sld [smem:[#allocation11 + $0x16]]  ;;  %s4427_s23 = sld [smem:[#allocation11 + $0x3a]] }
 0x1c7   :  { %v1845_v20 = vadd.f32 %v9767_v7, %v1825_v13  ;;  %v1984_v15 = vmul.f32 %v1983_v45, %v1980_v59  ;;  %v1989_v49 = vmul.f32 %v1988_v63, %v1980_v59  ;;  %v6827_v35 = vadd.f32 %v6702_v42, %v1877_v10 }
 0x1c8   :  { %v1956_v23 = vadd.f32 %v1951_v60, %v1892_v37  ;;  %v1994_v3 = vmul.f32 %v1993_v25, %v1980_v59  ;;  %v2019_v14 = vstv %s6777_s28  ;;  %v6832_v26 = vadd.f32 %v1953_v55, %v1893_v0  ;;  %s4463_s28 = sld [smem:[#allocation11 + $0x5e]] }
 0x1c9   :  { %v1909_v17 = vadd.f32 %v6678_v18, %v1845_v20  ;;  %v1972_v18 = vadd.f32 %v1967_v61, %v1908_v54  ;;  %v1999_v5 = vmul.f32 %v1998_v46, %v1980_v59  ;;  %v6837_v57 = vmul.f32 %v6816_v4, %v1980_v59 }
 0x1ca   :  { %v6841_v16 = vadd.f32 %v1984_v15, %v1924_v43  ;;  %v6843_v42 = vadd.f32 %v1989_v49, %v1940_v44  ;;  %v2035_v19 = vstv %s6788_s30  ;;  %v6846_v11 = vmul.f32 %v2019_v14, %v1980_v59  ;;  %s7208_s30 = sld [smem:[#allocation11 + $0x19]] }
 0x1cb   :  { %v6839_v24 = vadd.f32 %v1969_v21, %v1909_v17  ;;  %v6848_v28 = vmul.f32 %v2035_v19, %v1980_v59  ;;  %v2051_v34 = vstv %s6795_s6  ;;  %v2067_v47 = vstv %s6793_s5  ;;  %s4499_s5 = sld [smem:[#allocation11 + $0x82]]  ;;  %s7217_s6 = sld [smem:[#allocation11 + $0x3d]] }
 0x1cc   :  { %v6852_v2 = vadd.f32 %v1994_v3, %v1956_v23  ;;  %v6854_v39 = vmul.f32 %v2051_v34, %v1980_v59  ;;  %v2083_v27 = vstv %s6801_s26  ;;  %v2099_v53 = vstv %s6803_s13  ;;  %s7219_s26 = sld [smem:[#allocation11 + $0x61]]  ;;  %s7234_s13 = sld [smem:[#allocation11 + $0x85]] }
 0x1cd   :  { %v6860_v30 = vadd.f32 %v1999_v5, %v1972_v18  ;;  %v6862_v31 = vmul.f32 %v2067_v47, %v1980_v59  ;;  %v6864_v38 = vmul.f32 %v2083_v27, %v1980_v59  ;;  %v2115_v52 = vstv %s6809_s29  ;;  %s4400_s29 = sld [smem:[#allocation11 + $0x1f]] }
 0x1ce   :  { %v2010_v22 = vrot.slane %v6837_v57, 2  ;;  %v6870_v60 = vmul.f32 %v2099_v53, %v1980_v59  ;;  %v6872_v58 = vmul.f32 %v2115_v52, %v1980_v59  ;;  %v1982_v29 = vsel %vm276_vm3, %v1979_v1, 0.0 }
 0x1cf   :  { %v2026_v50 = vrot.slane %v6846_v11, 2  ;;  %v2042_v8 = vrot.slane %v6848_v28, 2  ;;  %v2006_v9 = vmul.f32 %v6816_v4, %v1982_v29  ;;  %v2022_v55 = vmul.f32 %v2019_v14, %v1982_v29 }
 0x1d0   :  { %v2058_v61 = vrot.slane %v6854_v39, 2  ;;  %v2038_v21 = vmul.f32 %v2035_v19, %v1982_v29  ;;  %v2054_v40 = vmul.f32 %v2051_v34, %v1982_v29  ;;  %v6880_v12 = vmul.f32 %v2067_v47, %v1982_v29 }
 0x1d1   :  { %v2074_v41 = vrot.slane %v6862_v31, 4  ;;  %v2090_v13 = vrot.slane %v6864_v38, 4  ;;  %v6884_v62 = vmul.f32 %v2083_v27, %v1982_v29  ;;  %v6886_v32 = vmul.f32 %v2099_v53, %v1982_v29 }
 0x1d2   :  { %v2106_v56 = vrot.slane %v6870_v60, 4  ;;  %v2122_v33 = vrot.slane %v6872_v58, 4  ;;  %v2013_v10 = vrot.slane %v2006_v9, 2  ;;  %v6890_v37 = vmul.f32 %v2115_v52, %v1982_v29 }
 0x1d3   :  { %v2029_v54 = vrot.slane %v2022_v55, 2  ;;  %v2045_v43 = vrot.slane %v2038_v21, 2  ;;  %v2061_v44 = vrot.slane %v2054_v40, 2  ;;  %v2077_v7 = vrot.slane %v6880_v12, 4 }
 0x1d4   :  { %v2093_v20 = vrot.slane %v6884_v62, 4  ;;  %v2109_v0 = vrot.slane %v6886_v32, 4  ;;  %v2131_v51 = vstv %s6858_s7  ;;  %v1981_v59 = vsel %vm276_vm3, %v1977_v48, 0.0  ;;  %s4436_s7 = sld [smem:[#allocation11 + $0x43]] }
 0x1d5   :  { %v2125_v17 = vrot.slane %v6890_v37, 4  ;;  %v2136_v15 = vstv %s6867_s8  ;;  %v1985_v49 = vmul.f32 %v1983_v45, %v1981_v59  ;;  %v1990_v23 = vmul.f32 %v1988_v63, %v1981_v59  ;;  %s4472_s8 = sld [smem:[#allocation11 + $0x67]] }
 0x1d6   :  { %v2005_v3 = vmul.f32 %v6816_v4, %v1981_v59  ;;  %v2021_v18 = vmul.f32 %v2019_v14, %v1981_v59  ;;  %v2037_v5 = vmul.f32 %v2035_v19, %v1981_v59  ;;  %v2053_v57 = vmul.f32 %v2051_v34, %v1981_v59 }
 0x1d7   :  { %v1987_v11 = vadd.f32 %v1985_v49, %v6820_v36  ;;  %v1992_v28 = vadd.f32 %v1990_v23, %v6827_v35  ;;  %v1995_v1 = vmul.f32 %v1993_v25, %v1981_v59  ;;  %v2000_v39 = vmul.f32 %v1998_v46, %v1981_v59 }
 0x1d8   :  { %v2011_v29 = vrot.slane %v2005_v3, 2  ;;  %v2027_v9 = vrot.slane %v2021_v18, 2  ;;  %v2043_v45 = vrot.slane %v2037_v5, 2  ;;  %v2059_v55 = vrot.slane %v2053_v57, 2 }
 0x1d9   :  { %v2069_v63 = vmul.f32 %v2067_v47, %v1981_v59  ;;  %v2085_v21 = vmul.f32 %v2083_v27, %v1981_v59  ;;  %v2101_v4 = vmul.f32 %v2099_v53, %v1981_v59  ;;  %v2117_v14 = vmul.f32 %v2115_v52, %v1981_v59 }
 0x1da   :  { %v2012_v19 = vsel %vm308_vm0, %v2010_v22, %v2011_v29  ;;  %v2014_v36 = vsel %vm308_vm0, %v2011_v29, %v2013_v10  ;;  %v2028_v34 = vsel %vm308_vm0, %v2026_v50, %v2027_v9  ;;  %v2030_v35 = vsel %vm308_vm0, %v2027_v9, %v2029_v54 }
 0x1db   :  { %v2141_v40 = vstv %s6892_s22  ;;  %v2146_v25 = vstv %s6895_s25  ;;  %v1997_v46 = vadd.f32 %v1995_v1, %v6832_v26  ;;  %v2002_v12 = vadd.f32 %v2000_v39, %v6839_v24  ;;  %s4508_s22 = sld [smem:[#allocation11 + $0x8b]]  ;;  %s7300_s25 = sld [smem:[#allocation11 + $0x22]] }
 0x1dc   :  { %v2044_v62 = vsel %vm308_vm0, %v2042_v8, %v2043_v45  ;;  %v2046_v47 = vsel %vm308_vm0, %v2043_v45, %v2045_v43  ;;  %v2060_v27 = vsel %vm308_vm0, %v2058_v61, %v2059_v55  ;;  %v2062_v53 = vsel %vm308_vm0, %v2059_v55, %v2061_v44 }
 0x1dd   :  { %v2017_v52 = vadd.f32 %v2012_v19, %v6841_v16  ;;  %v2018_v22 = vadd.f32 %v2014_v36, %v1987_v11  ;;  %v2033_v50 = vadd.f32 %v2028_v34, %v6843_v42  ;;  %v2034_v32 = vadd.f32 %v2030_v35, %v1992_v28 }
 0x1de   :  { %v2075_v48 = vrot.slane %v2069_v63, 4  ;;  %v2091_v10 = vrot.slane %v2085_v21, 4  ;;  %v2107_v37 = vrot.slane %v2101_v4, 4  ;;  %v2123_v26 = vrot.slane %v2117_v14, 4 }
 0x1df   :  { %v2049_v24 = vadd.f32 %v2044_v62, %v6852_v2  ;;  %v2050_v54 = vadd.f32 %v2046_v47, %v1997_v46  ;;  %v2065_v8 = vadd.f32 %v2060_v27, %v6860_v30  ;;  %v2066_v43 = vadd.f32 %v2062_v53, %v2002_v12 }
 0x1e0   :  { %v2076_v61 = vsel %vm373_vm1, %v2074_v41, %v2075_v48  ;;  %v2078_v16 = vsel %vm373_vm1, %v2075_v48, %v2077_v7  ;;  %v2092_v42 = vsel %vm373_vm1, %v2090_v13, %v2091_v10  ;;  %v2094_v44 = vsel %vm373_vm1, %v2091_v10, %v2093_v20 }
 0x1e1   :  { %v2081_v59 = vadd.f32 %v2076_v61, %v2017_v52  ;;  %v2082_v2 = vadd.f32 %v2078_v16, %v2018_v22  ;;  %v2097_v49 = vadd.f32 %v2092_v42, %v2033_v50  ;;  %v2098_v23 = vadd.f32 %v2094_v44, %v2034_v32 }
 0x1e2   :  { %v2108_v30 = vsel %vm373_vm1, %v2106_v56, %v2107_v37  ;;  %v2110_v31 = vsel %vm373_vm1, %v2107_v37, %v2109_v0  ;;  %v2124_v41 = vsel %vm373_vm1, %v2122_v33, %v2123_v26  ;;  %v2126_v38 = vsel %vm373_vm1, %v2123_v26, %v2125_v17 }
 0x1e3   :  { %v2113_v7 = vadd.f32 %v2108_v30, %v2049_v24  ;;  %v2114_v13 = vadd.f32 %v2110_v31, %v2050_v54  ;;  %v2129_v3 = vadd.f32 %v2124_v41, %v2065_v8  ;;  %v2130_v20 = vadd.f32 %v2126_v38, %v2066_v43 }
 0x1e4   :  { %v2132_v18 = vadd.f32 %v2131_v51, %v2081_v59  ;;  %v2133_v5 = vadd.f32 %v2131_v51, %v2082_v2  ;;  %v2137_v57 = vadd.f32 %v2136_v15, %v2097_v49  ;;  %v2138_v60 = vadd.f32 %v2136_v15, %v2098_v23 }
 0x1e5   :  { %v2142_v56 = vadd.f32 %v2141_v40, %v2113_v7  ;;  %v2143_v11 = vadd.f32 %v2141_v40, %v2114_v13  ;;  %v2147_v0 = vadd.f32 %v2146_v25, %v2129_v3  ;;  %v2148_v28 = vadd.f32 %v2146_v25, %v2130_v20 }
 0x1e6   :  { %v2134_v58 = vmax.f32 %v2132_v18, 0.0  ;;  %v2135_v33 = vmax.f32 %v2133_v5, 0.0  ;;  %v2139_v17 = vmax.f32 %v2137_v57, 0.0  ;;  %v2140_v1 = vmax.f32 %v2138_v60, 0.0 }
 0x1e7   :  { %v2144_v39 = vmax.f32 %v2142_v56, 0.0  ;;  %v2145_v29 = vmax.f32 %v2143_v11, 0.0  ;;  %v2149_v9 = vmax.f32 %v2147_v0, 0.0  ;;  %v2150_v45 = vmax.f32 %v2148_v28, 0.0 }
 0x1e8   :  { %2153 = vst [vmem:[#allocation3 + $0x1] sm:$0xff] %v2134_v58  ;;  %2154 = vst [vmem:[#allocation3 + $0x9] sm:$0xff] %v2135_v33  ;;  %v2493_v51 = vstv %s4373_s9  ;;  %v6953_v15 = vstv %s4409_s3  ;;  %v2525_v4 = vstv %s4445_s27  ;;  %v6959_v14 = vstv %s4481_s2  ;;  %s7302_s9 = sld [smem:[#allocation11 + $0x46]]  ;;  %s7324_s27 = sld [smem:[#allocation11 + $0x1]] }
 0x1e9   :  { %2158 = vst [vmem:[#allocation3 + $0x19] sm:$0xff] %v2139_v17  ;;  %2159 = vst [vmem:[#allocation3 + $0x21] sm:$0xff] %v2140_v1  ;;  %v6962_v19 = vstv %s6951_s11  ;;  %v6968_v36 = vstv %s4412_s14  ;;  %v6970_v34 = vstv %s4448_s16  ;;  %v6979_v46 = vstv %s4484_s10  ;;  %s7310_s11 = sld [smem:[#allocation11 + $0x6a]]  ;;  %s7312_s3 = sld [smem:[#allocation11 + $0x8e]] }
 0x1ea   :  { %2163 = vst [vmem:[#allocation3 + $0x31] sm:$0xff] %v2144_v39  ;;  %2164 = vst [vmem:[#allocation3 + $0x39] sm:$0xff] %v2145_v29  ;;  %s7327_s2 = sld [smem:[#allocation11 + $0x25]]  ;;  %s7329_s14 = sld [smem:[#allocation11 + $0x49]]  ;;  %vm2318_vm5 = vcmp.ge.s32.totalorder %v9642_v6, 1  ;;  %vm2319_vm6 = vcmp.lt.s32.totalorder %v9642_v6, 15 }
 0x1eb   :  { %2168 = vst [vmem:[#allocation3 + $0x49] sm:$0xff] %v2149_v9  ;;  %2169 = vst [vmem:[#allocation3 + $0x51] sm:$0xff] %v2150_v45  ;;  %s7336_s16 = sld [smem:[#allocation11 + $0x6d]]  ;;  %s7338_s10 = sld [smem:[#allocation11 + $0xa]] }
 0x1ef   :  { %v6955_v55 = vld [vmem:[#allocation3 + $0x8] sm:$0xff]  ;;  %v6957_v63 = vld [vmem:[#allocation3] sm:$0xff]  ;;  %v2322_v21 = vld [vmem:[#allocation3 + $0x10] sm:$0x3] }
 0x1f0   :  { %2325 = vrot.lane.b32.xlu1 %v6955_v55, %s4647_s12  ;;  %2323 = vrot.lane.b32.xlu0 %v6957_v63, %s4647_s12  ;;  %v6973_v35 = vmul.f32 %v2493_v51, %v6955_v55  ;;  %v2496_v40 = vmul.f32 %v2493_v51, %v2322_v21  ;;  %v6977_v25 = vmul.f32 %v6953_v15, %v6955_v55  ;;  %v7030_v5 = vld [vmem:[#allocation3 + $0x20] sm:$0xff]  ;;  %v7032_v57 = vld [vmem:[#allocation3 + $0x18] sm:$0xff] }
 0x1f1   :  { %v2512_v12 = vmul.f32 %v6953_v15, %v2322_v21  ;;  %v6983_v62 = vmul.f32 %v2525_v4, %v6955_v55  ;;  %v2528_v47 = vmul.f32 %v2525_v4, %v2322_v21  ;;  %v6987_v27 = vmul.f32 %v6959_v14, %v6955_v55 }
 0x1f2   :  { %v2501_v53 = vrot.slane %v6973_v35, 1  ;;  %v2503_v52 = vrot.slane %v2496_v40, 1  ;;  %v2517_v22 = vrot.slane %v6977_v25, 1  ;;  %v2544_v50 = vmul.f32 %v6959_v14, %v2322_v21 }
 0x1f3   :  { %v2519_v32 = vrot.slane %v2512_v12, 1  ;;  %v2533_v48 = vrot.slane %v6983_v62, 1  ;;  %v2535_v10 = vrot.slane %v2528_v47, 1  ;;  %v2549_v37 = vrot.slane %v6987_v27, 1 }
 0x1f4   :  { %2621 = vrot.lane.b32.xlu1 %v6957_v63, %s4648_s15  ;;  %2327 = vrot.lane.b32.xlu0 %v2322_v21, %s4647_s12  ;;  %v6998_v26 = vsel %vm2351_vm4, %v2501_v53, %v2503_v52  ;;  %v2551_v24 = vrot.slane %v2544_v50, 1  ;;  %v2559_v54 = vmul.f32 %v6962_v19, %v6955_v55  ;;  %v2560_v8 = vmul.f32 %v6962_v19, %v2322_v21 }
 0x1f5   :  { %v7004_v43 = vsel %vm2351_vm4, %v2517_v22, %v2519_v32  ;;  %v7007_v61 = vsel %vm2351_vm4, %v2533_v48, %v2535_v10  ;;  %v2575_v16 = vmul.f32 %v6968_v36, %v6955_v55  ;;  %v2576_v42 = vmul.f32 %v6968_v36, %v2322_v21  ;;  %v7100_v32 = vld [vmem:[#allocation3 + $0x38] sm:$0xff] }
 0x1f6   :  { %v7013_v44 = vsel %vm2351_vm4, %v2549_v37, %v2551_v24  ;;  %v2565_v59 = vrot.slane %v2559_v54, 2  ;;  %v2567_v2 = vrot.slane %v2560_v8, 2  ;;  %v2591_v49 = vmul.f32 %v6970_v34, %v6955_v55 }
 0x1f7   :  { %9768 = vst [vmem:[#allocation34_spill] sm:$0xff] %v7013_v44  ;;  %v2581_v23 = vrot.slane %v2575_v16, 2  ;;  %v2583_v30 = vrot.slane %v2576_v42, 2  ;;  %v2592_v31 = vmul.f32 %v6970_v34, %v2322_v21  ;;  %v2607_v41 = vmul.f32 %v6979_v46, %v6955_v55 }
 0x1f8   :  { %2625 = vrot.lane.b32.xlu1 %v2322_v21, %s4648_s15  ;;  %2623 = vrot.lane.b32.xlu0 %v6955_v55, %s4648_s15  ;;  %v7024_v38 = vsel %vm308_vm0, %v2565_v59, %v2567_v2  ;;  %v2597_v7 = vrot.slane %v2591_v49, 2  ;;  %v2608_v13 = vmul.f32 %v6979_v46, %v2322_v21  ;;  %v2494_v56 = vmul.f32 %v2493_v51, %v6957_v63  ;;  %v7060_v51 = vld [vmem:[#allocation3 + $0x28] sm:$0x3] }
 0x1f9   :  { %v7028_v3 = vsel %vm308_vm0, %v2581_v23, %v2583_v30  ;;  %v2599_v20 = vrot.slane %v2592_v31, 2  ;;  %v2613_v18 = vrot.slane %v2607_v41, 2  ;;  %v2510_v0 = vmul.f32 %v6953_v15, %v6957_v63 }
 0x1fa   :  { %9769 = vst [vmem:[#allocation27_spill] sm:$0xff] %v7028_v3  ;;  %v2615_v60 = vrot.slane %v2608_v13, 2  ;;  %v2526_v28 = vmul.f32 %v2525_v4, %v6957_v63  ;;  %v2500_v33 = vrot.slane %v2494_v56, 1  ;;  %v2542_v17 = vmul.f32 %v6959_v14, %v6957_v63 }
 0x1fb   :  { %v7042_v11 = vsel %vm308_vm0, %v2597_v7, %v2599_v20  ;;  %v2558_v1 = vmul.f32 %v6962_v19, %v6957_v63  ;;  %v2516_v39 = vrot.slane %v2510_v0, 1  ;;  %v2574_v9 = vmul.f32 %v6968_v36, %v6957_v63  ;;  %v7119_v20 = vld [vmem:[#allocation3 + $0x40] sm:$0x3] }
 0x1fc   :  { %2783 = vrot.lane.b32.xlu1 %v7030_v5, %s4647_s12  ;;  %2781 = vrot.lane.b32.xlu0 %v7032_v57, %s4647_s12  ;;  %9770 = vst [vmem:[#allocation115_spill] sm:$0xff] %v7042_v11  ;;  %v7050_v58 = vsel %vm308_vm0, %v2613_v18, %v2615_v60  ;;  %v2532_v29 = vrot.slane %v2526_v28, 1  ;;  %v2590_v45 = vmul.f32 %v6970_v34, %v6957_v63  ;;  %v2548_v21 = vrot.slane %v2542_v17, 1 }
 0x1fd   :  { %9771 = vst [vmem:[#allocation116_spill] sm:$0xff] %v7050_v58  ;;  %v7063_v15 = vsel %vm2351_vm4, %v2500_v33, %v2501_v53  ;;  %v2564_v4 = vrot.slane %v2558_v1, 2  ;;  %v2606_v14 = vmul.f32 %v6979_v46, %v6957_v63  ;;  %v7072_v19 = vsel %vm2351_vm4, %v2516_v39, %v2517_v22 }
 0x1fe   :  { %v7075_v36 = vsel %vm2351_vm4, %v2532_v29, %v2533_v48  ;;  %v2580_v34 = vrot.slane %v2574_v9, 2  ;;  %v2596_v35 = vrot.slane %v2590_v45, 2  ;;  %v7078_v40 = vsel %vm2351_vm4, %v2548_v21, %v2549_v37  ;;  %v7102_v48 = vld [vmem:[#allocation3 + $0x30] sm:$0xff] }
 0x1ff   :  { %v7081_v25 = vsel %vm308_vm0, %v2564_v4, %v2565_v59  ;;  %v2612_v46 = vrot.slane %v2606_v14, 2  ;;  %v2958_v27 = vstv %s7035_s17  ;;  %v2974_v53 = vstv %s7047_s18  ;;  %s7363_s17 = sld [smem:[#allocation11 + $0x76]]  ;;  %s7365_s18 = sld [smem:[#allocation11 + $0x13]] }
 0x200   :  { %3086 = vrot.lane.b32.xlu1 %v7032_v57, %s4648_s15  ;;  %2785 = vrot.lane.b32.xlu0 %v7060_v51, %s4647_s12  ;;  %v7084_v12 = vsel %vm308_vm0, %v2580_v34, %v2581_v23  ;;  %v7087_v62 = vsel %vm308_vm0, %v2596_v35, %v2597_v7  ;;  %v2990_v52 = vstv %s4454_s0  ;;  %v2959_v22 = vmul.f32 %v2958_v27, %v7032_v57  ;;  %s7367_s0 = sld [smem:[#allocation11 + $0x37]] }
 0x201   :  { %v7090_v47 = vsel %vm308_vm0, %v2612_v46, %v2613_v18  ;;  %v2960_v50 = vmul.f32 %v2958_v27, %v7030_v5  ;;  %v2961_v10 = vmul.f32 %v2958_v27, %v7060_v51  ;;  %v2975_v37 = vmul.f32 %v2974_v53, %v7032_v57 }
 0x202   :  { %9772 = vst [vmem:[#allocation50_spill] sm:$0xff] %v7090_v47  ;;  %v2976_v24 = vmul.f32 %v2974_v53, %v7030_v5  ;;  %v2977_v54 = vmul.f32 %v2974_v53, %v7060_v51  ;;  %v2965_v8 = vrot.slane %v2959_v22, 1  ;;  %v2991_v42 = vmul.f32 %v2990_v52, %v7032_v57 }
 0x203   :  { %v2966_v16 = vrot.slane %v2960_v50, 1  ;;  %v3006_v59 = vstv %s4490_s1  ;;  %v2968_v2 = vrot.slane %v2961_v10, 1  ;;  %v2981_v49 = vrot.slane %v2975_v37, 1  ;;  %s7369_s1 = sld [smem:[#allocation11 + $0x5b]] }
 0x204   :  { %3090 = vrot.lane.b32.xlu1 %v7060_v51, %s4648_s15  ;;  %3088 = vrot.lane.b32.xlu0 %v7030_v5, %s4648_s15  ;;  %v3022_v23 = vstv %s4385_s21  ;;  %v3038_v30 = vstv %s4421_s19  ;;  %v2982_v41 = vrot.slane %v2976_v24, 1  ;;  %v2984_v7 = vrot.slane %v2977_v54, 1  ;;  %s7374_s21 = sld [smem:[#allocation11 + $0x7f]]  ;;  %s7376_s19 = sld [smem:[#allocation11 + $0x1c]] }
 0x205   :  { %v7116_v31 = vsel %vm2351_vm4, %v2965_v8, %v2966_v16  ;;  %v2992_v13 = vmul.f32 %v2990_v52, %v7030_v5  ;;  %v7124_v18 = vsel %vm2351_vm4, %v2966_v16, %v2968_v2  ;;  %v2993_v60 = vmul.f32 %v2990_v52, %v7060_v51  ;;  %9807 = sst [smem:[#allocation39_spill]] %s7365_s18  ;;  %s7515_s18 = sld [smem:[#allocation11 + $0x4a]] }
 0x206   :  { %9773 = vst [vmem:[#allocation53_spill] sm:$0xff] %v7116_v31  ;;  %9774 = vst [vmem:[#allocation54_spill] sm:$0xff] %v7124_v18  ;;  %v2997_v56 = vrot.slane %v2991_v42, 1  ;;  %v3007_v0 = vmul.f32 %v3006_v59, %v7032_v57  ;;  %v7133_v28 = vsel %vm2351_vm4, %v2981_v49, %v2982_v41  ;;  %v7136_v33 = vsel %vm2351_vm4, %v2982_v41, %v2984_v7  ;;  %v7170_v49 = vld [vmem:[#allocation3 + $0x50] sm:$0xff]  ;;  %9808 = sst [smem:[#allocation42_spill]] %s7367_s0  ;;  %s7508_s0 = sld [smem:[#allocation11 + $0x26]] }
 0x207   :  { %9775 = vst [vmem:[#allocation117_spill] sm:$0xff] %v7133_v28  ;;  %9776 = vst [vmem:[#allocation51_spill] sm:$0xff] %v7136_v33  ;;  %v2998_v17 = vrot.slane %v2992_v13, 1  ;;  %v3008_v1 = vmul.f32 %v3006_v59, %v7030_v5  ;;  %v3000_v39 = vrot.slane %v2993_v60, 1  ;;  %v3009_v29 = vmul.f32 %v3006_v59, %v7060_v51 }
 0x208   :  { %3248 = vrot.lane.b32.xlu1 %v7100_v32, %s4647_s12  ;;  %3246 = vrot.lane.b32.xlu0 %v7102_v48, %s4647_s12  ;;  %v3013_v9 = vrot.slane %v3007_v0, 1  ;;  %v3023_v45 = vmul.f32 %v3022_v23, %v7032_v57  ;;  %v3024_v14 = vmul.f32 %v3022_v23, %v7030_v5  ;;  %v3025_v34 = vmul.f32 %v3022_v23, %v7060_v51  ;;  %v7172_v23 = vld [vmem:[#allocation3 + $0x48] sm:$0xff] }
 0x209   :  { %v7142_v21 = vsel %vm2351_vm4, %v2997_v56, %v2998_v17  ;;  %v3014_v4 = vrot.slane %v3008_v1, 1  ;;  %v7147_v35 = vsel %vm2351_vm4, %v2998_v17, %v3000_v39  ;;  %v3016_v46 = vrot.slane %v3009_v29, 1  ;;  %9809 = sst [smem:[#allocation40_spill]] %s7369_s1  ;;  %s7506_s1 = sld [smem:[#allocation11 + $0x2]] }
 0x20a   :  { %9777 = vst [vmem:[#allocation52_spill] sm:$0xff] %v7142_v21  ;;  %9778 = vst [vmem:[#allocation55_spill] sm:$0xff] %v7147_v35  ;;  %v3029_v27 = vrot.slane %v3023_v45, 2  ;;  %v3039_v53 = vmul.f32 %v3038_v30, %v7032_v57  ;;  %v3030_v22 = vrot.slane %v3024_v14, 2  ;;  %v3032_v50 = vrot.slane %v3025_v34, 2  ;;  %9810 = sst [smem:[#allocation44_spill]] %s7374_s21 }
 0x20b   :  { %v7155_v52 = vsel %vm2351_vm4, %v3013_v9, %v3014_v4  ;;  %v3040_v10 = vmul.f32 %v3038_v30, %v7030_v5  ;;  %v7159_v37 = vsel %vm2351_vm4, %v3014_v4, %v3016_v46  ;;  %v3041_v24 = vmul.f32 %v3038_v30, %v7060_v51  ;;  %v7190_v14 = vld [vmem:[#allocation3 + $0x58] sm:$0x3]  ;;  %9811 = sst [smem:[#allocation45_spill]] %s7376_s19  ;;  %s7493_s19 = sld [smem:[#allocation11 + $0x71]] }
 0x20c   :  { %3551 = vrot.lane.b32.xlu1 %v7102_v48, %s4648_s15  ;;  %3250 = vrot.lane.b32.xlu0 %v7119_v20, %s4647_s12  ;;  %9779 = vst [vmem:[#allocation56_spill] sm:$0xff] %v7155_v52  ;;  %9780 = vst [vmem:[#allocation47_spill] sm:$0xff] %v7159_v37  ;;  %v3045_v54 = vrot.slane %v3039_v53, 2  ;;  %v3054_v8 = vstv %s7113_s24  ;;  %v7164_v16 = vsel %vm308_vm0, %v3029_v27, %v3030_v22  ;;  %v3070_v13 = vstv %s7121_s20  ;;  %s7390_s24 = sld [smem:[#allocation11]]  ;;  %s7392_s20 = sld [smem:[#allocation11 + $0x3]] }
 0x20d   :  { %9781 = vst [vmem:[#allocation118_spill] sm:$0xff] %v7164_v16  ;;  %v7167_v42 = vsel %vm308_vm0, %v3030_v22, %v3032_v50  ;;  %v3046_v59 = vrot.slane %v3040_v10, 2  ;;  %v3055_v2 = vmul.f32 %v3054_v8, %v7032_v57  ;;  %v3048_v41 = vrot.slane %v3041_v24, 2  ;;  %s7495_s21 = sld [smem:[#allocation11 + $0x74]]  ;;  %9837 = sst [smem:[#allocation49_spill]] %s7508_s0 }
 0x20e   :  { %9782 = vst [vmem:[#allocation57_spill] sm:$0xff] %v7167_v42  ;;  %v3056_v7 = vmul.f32 %v3054_v8, %v7030_v5  ;;  %v3057_v30 = vmul.f32 %v3054_v8, %v7060_v51  ;;  %v3071_v0 = vmul.f32 %v3070_v13, %v7032_v57  ;;  %v3072_v17 = vmul.f32 %v3070_v13, %v7030_v5  ;;  %9838 = sst [smem:[#allocation119_spill]] %s7515_s18  ;;  %s7666_s0 = sld [smem:[#allocation11 + $0xb]] }
 0x20f   :  { %v7182_v60 = vsel %vm308_vm0, %v3045_v54, %v3046_v59  ;;  %v3061_v56 = vrot.slane %v3055_v2, 2  ;;  %v7187_v1 = vsel %vm308_vm0, %v3046_v59, %v3048_v41  ;;  %v3073_v9 = vmul.f32 %v3070_v13, %v7060_v51  ;;  %9836 = sst [smem:[#allocation48_spill]] %s7506_s1  ;;  %s7668_s1 = sld [smem:[#allocation11 + $0x2f]] }
 0x210   :  { %3555 = vrot.lane.b32.xlu1 %v7119_v20, %s4648_s15  ;;  %3553 = vrot.lane.b32.xlu0 %v7100_v32, %s4648_s15  ;;  %9783 = vst [vmem:[#allocation58_spill] sm:$0xff] %v7182_v60  ;;  %9784 = vst [vmem:[#allocation59_spill] sm:$0xff] %v7187_v1  ;;  %v3062_v39 = vrot.slane %v3056_v7, 2  ;;  %v3064_v29 = vrot.slane %v3057_v30, 2  ;;  %v3077_v45 = vrot.slane %v3071_v0, 2  ;;  %v3078_v4 = vrot.slane %v3072_v17, 2 }
 0x211   :  { %v3080_v27 = vrot.slane %v3073_v9, 2  ;;  %v3423_v22 = vstv %s4391_s4  ;;  %v3439_v54 = vstv %s4427_s23  ;;  %v3455_v8 = vstv %s4463_s28  ;;  %s7402_s4 = sld [smem:[#allocation11 + $0x6]]  ;;  %s7404_s23 = sld [smem:[#allocation11 + $0x24]] }
 0x212   :  { %v7197_v34 = vsel %vm308_vm0, %v3061_v56, %v3062_v39  ;;  %v7200_v46 = vsel %vm308_vm0, %v3062_v39, %v3064_v29  ;;  %v7203_v51 = vsel %vm308_vm0, %v3077_v45, %v3078_v4  ;;  %v3424_v50 = vmul.f32 %v3423_v22, %v7102_v48  ;;  %s7409_s28 = sld [smem:[#allocation11 + $0x27]]  ;;  %s7689_s18 = sld [smem:[#allocation11 + $0x12]] }
 0x213   :  { %9785 = vst [vmem:[#allocation63_spill] sm:$0xff] %v7197_v34  ;;  %9786 = vst [vmem:[#allocation60_spill] sm:$0xff] %v7200_v46  ;;  %v7206_v53 = vsel %vm308_vm0, %v3078_v4, %v3080_v27  ;;  %v3425_v10 = vmul.f32 %v3423_v22, %v7100_v32  ;;  %v3426_v24 = vmul.f32 %v3423_v22, %v7119_v20  ;;  %9833 = sst [smem:[#allocation46_spill]] %s7495_s21  ;;  %s7517_s21 = sld [smem:[#allocation11 + $0x6e]] }
 0x214   :  { %3713 = vrot.lane.b32.xlu1 %v7170_v49, %s4647_s12  ;;  %3711 = vrot.lane.b32.xlu0 %v7172_v23, %s4647_s12  ;;  %9787 = vst [vmem:[#allocation61_spill] sm:$0xff] %v7203_v51  ;;  %9788 = vst [vmem:[#allocation62_spill] sm:$0xff] %v7206_v53  ;;  %v3430_v59 = vrot.slane %v3424_v50, 1  ;;  %v3440_v41 = vmul.f32 %v3439_v54, %v7102_v48  ;;  %v3441_v30 = vmul.f32 %v3439_v54, %v7100_v32 }
 0x215   :  { %v3431_v2 = vrot.slane %v3425_v10, 1  ;;  %v3433_v7 = vrot.slane %v3426_v24, 1  ;;  %v3442_v13 = vmul.f32 %v3439_v54, %v7119_v20  ;;  %v3456_v56 = vmul.f32 %v3455_v8, %v7102_v48 }
 0x216   :  { %v3446_v17 = vrot.slane %v3440_v41, 1  ;;  %v3457_v39 = vmul.f32 %v3455_v8, %v7100_v32  ;;  %v3458_v29 = vmul.f32 %v3455_v8, %v7119_v20  ;;  %v3447_v45 = vrot.slane %v3441_v30, 1 }
 0x217   :  { %v7226_v0 = vsel %vm2351_vm4, %v3430_v59, %v3431_v2  ;;  %v7231_v9 = vsel %vm2351_vm4, %v3431_v2, %v3433_v7  ;;  %v3449_v4 = vrot.slane %v3442_v13, 1  ;;  %v3462_v27 = vrot.slane %v3456_v56, 1  ;;  %9814 = sst [smem:[#allocation35_spill]] %s7404_s23  ;;  %s7678_s23 = sld [smem:[#allocation11 + $0x77]] }
 0x218   :  { %4016 = vrot.lane.b32.xlu1 %v7172_v23, %s4648_s15  ;;  %3715 = vrot.lane.b32.xlu0 %v7190_v14, %s4647_s12  ;;  %9789 = vst [vmem:[#allocation64_spill] sm:$0xff] %v7226_v0  ;;  %9790 = vst [vmem:[#allocation65_spill] sm:$0xff] %v7231_v9  ;;  %v3463_v22 = vrot.slane %v3457_v39, 1  ;;  %v3465_v50 = vrot.slane %v3458_v29, 1  ;;  %v3471_v10 = vstv %s4499_s5  ;;  %v3487_v24 = vstv %s7208_s30  ;;  %s7351_s12 = sld [smem:[#allocation11 + $0x2e]]  ;;  %s7411_s30 = sld [smem:[#allocation11 + $0x2a]] }
 0x219   :  { %v7237_v54 = vsel %vm2351_vm4, %v3446_v17, %v3447_v45  ;;  %v7240_v59 = vsel %vm2351_vm4, %v3447_v45, %v3449_v4  ;;  %v3472_v8 = vmul.f32 %v3471_v10, %v7102_v48  ;;  %v3473_v2 = vmul.f32 %v3471_v10, %v7100_v32  ;;  %s7416_s5 = sld [smem:[#allocation11 + $0x48]]  ;;  %9839 = sst [smem:[#allocation120_spill]] %s7517_s21 }
 0x21a   :  { %9791 = vst [vmem:[#allocation66_spill] sm:$0xff] %v7237_v54  ;;  %9792 = vst [vmem:[#allocation67_spill] sm:$0xff] %v7240_v59  ;;  %v7245_v41 = vsel %vm2351_vm4, %v3462_v27, %v3463_v22  ;;  %v7248_v7 = vsel %vm2351_vm4, %v3463_v22, %v3465_v50  ;;  %v3474_v30 = vmul.f32 %v3471_v10, %v7119_v20  ;;  %v3503_v59 = vstv %s7217_s6  ;;  %s7418_s6 = sld [smem:[#allocation11 + $0x4b]]  ;;  %s9868_s21 = sld [smem:[#allocation45_spill]] }
 0x21b   :  { %9793 = vst [vmem:[#allocation69_spill] sm:$0xff] %v7245_v41  ;;  %9794 = vst [vmem:[#allocation68_spill] sm:$0xff] %v7248_v7  ;;  %v3488_v13 = vmul.f32 %v3487_v24, %v7102_v48  ;;  %v3478_v56 = vrot.slane %v3472_v8, 1  ;;  %v3479_v17 = vrot.slane %v3473_v2, 1  ;;  %v3489_v39 = vmul.f32 %v3487_v24, %v7100_v32 }
 0x21c   :  { %4020 = vrot.lane.b32.xlu1 %v7190_v14, %s4648_s15  ;;  %4018 = vrot.lane.b32.xlu0 %v7170_v49, %s4648_s15  ;;  %v3490_v29 = vmul.f32 %v3487_v24, %v7119_v20  ;;  %v3481_v45 = vrot.slane %v3474_v30, 1  ;;  %v3519_v9 = vstv %s7219_s26  ;;  %v3504_v50 = vmul.f32 %v3503_v59, %v7102_v48  ;;  %s7353_s15 = sld [smem:[#allocation11 + $0x52]]  ;;  %s7425_s26 = sld [smem:[#allocation11 + $0x4e]] }
 0x21d   :  { %v3494_v4 = vrot.slane %v3488_v13, 2  ;;  %v7257_v27 = vsel %vm2351_vm4, %v3478_v56, %v3479_v17  ;;  %v3495_v41 = vrot.slane %v3489_v39, 2  ;;  %v3505_v8 = vmul.f32 %v3503_v59, %v7100_v32 }
 0x21e   :  { %9795 = vst [vmem:[#allocation71_spill] sm:$0xff] %v7257_v27  ;;  %v3497_v22 = vrot.slane %v3490_v29, 2  ;;  %v7261_v10 = vsel %vm2351_vm4, %v3479_v17, %v3481_v45  ;;  %v3506_v2 = vmul.f32 %v3503_v59, %v7119_v20  ;;  %v3520_v24 = vmul.f32 %v3519_v9, %v7102_v48 }
 0x21f   :  { %9796 = vst [vmem:[#allocation73_spill] sm:$0xff] %v7261_v10  ;;  %v7267_v30 = vsel %vm308_vm0, %v3494_v4, %v3495_v41  ;;  %v3510_v56 = vrot.slane %v3504_v50, 2  ;;  %v3521_v39 = vmul.f32 %v3519_v9, %v7100_v32  ;;  %v3511_v29 = vrot.slane %v3505_v8, 2  ;;  %9815 = sst [smem:[#allocation36_spill]] %s7416_s5  ;;  %s7676_s5 = sld [smem:[#allocation11 + $0x53]] }
 0x220   :  { %9797 = vst [vmem:[#allocation74_spill] sm:$0xff] %v7267_v30  ;;  %v7270_v13 = vsel %vm308_vm0, %v3495_v41, %v3497_v22  ;;  %v3513_v17 = vrot.slane %v3506_v2, 2  ;;  %v3522_v45 = vmul.f32 %v3519_v9, %v7119_v20  ;;  %v3526_v10 = vrot.slane %v3520_v24, 2 }
 0x221   :  { %9798 = vst [vmem:[#allocation75_spill] sm:$0xff] %v7270_v13  ;;  %v3527_v7 = vrot.slane %v3521_v39, 2  ;;  %v3535_v59 = vstv %s7234_s13  ;;  %v7276_v27 = vsel %vm308_vm0, %v3510_v56, %v3511_v29  ;;  %v7290_v13 = vstv %s4400_s29  ;;  %s7427_s13 = sld [smem:[#allocation11 + $0x6c]]  ;;  %s7432_s29 = sld [smem:[#allocation11 + $0x6f]] }
 0x222   :  { %9799 = vst [vmem:[#allocation76_spill] sm:$0xff] %v7276_v27  ;;  %v7279_v4 = vsel %vm308_vm0, %v3511_v29, %v3513_v17  ;;  %v3529_v41 = vrot.slane %v3522_v45, 2  ;;  %v3536_v50 = vmul.f32 %v3535_v59, %v7102_v48  ;;  %v3537_v8 = vmul.f32 %v3535_v59, %v7100_v32 }
 0x223   :  { %9800 = vst [vmem:[#allocation77_spill] sm:$0xff] %v7279_v4  ;;  %v7282_v22 = vsel %vm308_vm0, %v3526_v10, %v3527_v7  ;;  %v3538_v9 = vmul.f32 %v3535_v59, %v7119_v20  ;;  %v7292_v29 = vstv %s4436_s7  ;;  %v7306_v20 = vmul.f32 %v7290_v13, %v7170_v49  ;;  %s7434_s7 = sld [smem:[#allocation11 + $0x72]] }
 0x224   :  { %9801 = vst [vmem:[#allocation79_spill] sm:$0xff] %v7282_v22  ;;  %v7288_v2 = vsel %vm308_vm0, %v3527_v7, %v3529_v41  ;;  %v3542_v24 = vrot.slane %v3536_v50, 2  ;;  %v3543_v39 = vrot.slane %v3537_v8, 2  ;;  %v3891_v7 = vmul.f32 %v7290_v13, %v7190_v14 }
 0x225   :  { %9802 = vst [vmem:[#allocation70_spill] sm:$0xff] %v7288_v2  ;;  %v3545_v56 = vrot.slane %v3538_v9, 2  ;;  %v7316_v45 = vmul.f32 %v7292_v29, %v7170_v49  ;;  %v3907_v59 = vmul.f32 %v7292_v29, %v7190_v14  ;;  %v7320_v41 = vstv %s4472_s8  ;;  %s7439_s8 = sld [smem:[#allocation11 + $0x40]] }
 0x226   :  { %v7295_v17 = vsel %vm308_vm0, %v3542_v24, %v3543_v39  ;;  %v7322_v50 = vstv %s4508_s22  ;;  %v9407_v8 = vrot.slane %v7306_v20, 1  ;;  %v3898_v9 = vrot.slane %v3891_v7, 1  ;;  %s7441_s22 = sld [smem:[#allocation11 + $0x64]] }
 0x227   :  { %9803 = vst [vmem:[#allocation113_spill] sm:$0xff] %v7295_v17  ;;  %v7298_v10 = vsel %vm308_vm0, %v3543_v39, %v3545_v56  ;;  %v9408_v24 = vrot.slane %v7316_v45, 1  ;;  %v3914_v39 = vrot.slane %v3907_v59, 1  ;;  %v7334_v56 = vmul.f32 %v7320_v41, %v7170_v49  ;;  %9817 = sst [smem:[#allocation37_spill]] %s7427_s13  ;;  %s9864_s13 = sld [smem:[#allocation44_spill]] }
 0x228   :  { %9804 = vst [vmem:[#allocation72_spill] sm:$0xff] %v7298_v10  ;;  %v7343_v7 = vsel %vm2351_vm4, %v9407_v8, %v3898_v9  ;;  %v3923_v10 = vmul.f32 %v7320_v41, %v7190_v14  ;;  %v7349_v59 = vmul.f32 %v7322_v50, %v7170_v49  ;;  %v3939_v8 = vmul.f32 %v7322_v50, %v7190_v14 }
 0x229   :  { %9805 = vst [vmem:[#allocation87_spill] sm:$0xff] %v7343_v7  ;;  %v7358_v2 = vsel %vm2351_vm4, %v9408_v24, %v3914_v39  ;;  %v9409_v9 = vrot.slane %v7334_v56, 1  ;;  %v3952_v24 = vstv %s7300_s25  ;;  %v3889_v42 = vmul.f32 %v7290_v13, %v7172_v23  ;;  %s7450_s25 = sld [smem:[#allocation11 + $0x5]] }
 0x22a   :  { %9806 = vst [vmem:[#allocation78_spill] sm:$0xff] %v7358_v2  ;;  %v3930_v7 = vrot.slane %v3923_v10, 1  ;;  %v9410_v4 = vrot.slane %v7349_v59, 1  ;;  %v3946_v39 = vrot.slane %v3939_v8, 1  ;;  %v3968_v2 = vstv %s7302_s9  ;;  %s7452_s9 = sld [smem:[#allocation11 + $0x88]] }
 0x22b   :  { %v7384_v10 = vmul.f32 %v3952_v24, %v7170_v49  ;;  %v3955_v22 = vmul.f32 %v3952_v24, %v7190_v14  ;;  %v7388_v27 = vmul.f32 %v3968_v2, %v7170_v49  ;;  %9820 = sst [smem:[#allocation38_spill]] %s7439_s8  ;;  %v3905_v13 = vmul.f32 %v7292_v29, %v7172_v23  ;;  %s7473_s8 = sld [smem:[#allocation11 + $0x50]] }
 0x22c   :  { %v7381_v17 = vsel %vm2351_vm4, %v9409_v9, %v3930_v7  ;;  %v7397_v8 = vsel %vm2351_vm4, %v9410_v4, %v3946_v39  ;;  %v3971_v7 = vmul.f32 %v3968_v2, %v7190_v14  ;;  %v3984_v9 = vstv %s7310_s11  ;;  %9821 = sst [smem:[#allocation41_spill]] %s7441_s22  ;;  %s7464_s11 = sld [smem:[#allocation11 + $0x8]] }
 0x22d   :  { %9812 = vst [vmem:[#allocation88_spill] sm:$0xff] %v7381_v17  ;;  %9813 = vst [vmem:[#allocation91_spill] sm:$0xff] %v7397_v8  ;;  %v4000_v17 = vstv %s7312_s3  ;;  %v3960_v30 = vrot.slane %v7384_v10, 2  ;;  %v3962_v54 = vrot.slane %v3955_v22, 2  ;;  %v3986_v0 = vmul.f32 %v3984_v9, %v7170_v49  ;;  %s7466_s3 = sld [smem:[#allocation11 + $0x29]]  ;;  %s7471_s22 = sld [smem:[#allocation11 + $0x4d]] }
 0x22e   :  { %v3987_v53 = vmul.f32 %v3984_v9, %v7190_v14  ;;  %v3976_v39 = vrot.slane %v7388_v27, 2  ;;  %v3978_v4 = vrot.slane %v3971_v7, 2  ;;  %v4002_v8 = vmul.f32 %v4000_v17, %v7170_v49 }
 0x22f   :  { %v4003_v46 = vmul.f32 %v4000_v17, %v7190_v14  ;;  %v7421_v22 = vsel %vm308_vm0, %v3960_v30, %v3962_v54  ;;  %v3992_v10 = vrot.slane %v3986_v0, 2  ;;  %v3953_v7 = vmul.f32 %v3952_v24, %v7172_v23 }
 0x230   :  { %9816 = vst [vmem:[#allocation80_spill] sm:$0xff] %v7421_v22  ;;  %v3994_v1 = vrot.slane %v3987_v53, 2  ;;  %v7430_v27 = vsel %vm308_vm0, %v3976_v39, %v3978_v4  ;;  %v4008_v14 = vrot.slane %v4002_v8, 2  ;;  %v3895_v53 = vrot.slane %v3889_v42, 1  ;;  %9822 = sst [smem:[#allocation43_spill]] %s7452_s9  ;;  %s7468_s9 = sld [smem:[#allocation11 + $0x2c]] }
 0x231   :  { %9818 = vst [vmem:[#allocation92_spill] sm:$0xff] %v7430_v27  ;;  %v4010_v0 = vrot.slane %v4003_v46, 2  ;;  %v3921_v4 = vmul.f32 %v7320_v41, %v7172_v23  ;;  %v3937_v8 = vmul.f32 %v7322_v50, %v7172_v23  ;;  %v3969_v29 = vmul.f32 %v3968_v2, %v7172_v23 }
 0x232   :  { %v7437_v54 = vsel %vm308_vm0, %v3992_v10, %v3994_v1  ;;  %v9824_v1 = vrot.slane %v7306_v20, 1  ;;  %v3985_v41 = vmul.f32 %v3984_v9, %v7172_v23  ;;  %v3911_v50 = vrot.slane %v3905_v13, 1 }
 0x233   :  { %9819 = vst [vmem:[#allocation93_spill] sm:$0xff] %v7437_v54  ;;  %v7455_v42 = vsel %vm308_vm0, %v4008_v14, %v4010_v0  ;;  %v3927_v24 = vrot.slane %v3921_v4, 1  ;;  %v3943_v54 = vrot.slane %v3937_v8, 1  ;;  %v3959_v27 = vrot.slane %v3953_v7, 2 }
 0x234   :  { %9823 = vst [vmem:[#allocation94_spill] sm:$0xff] %v7455_v42  ;;  %v7460_v46 = vsel %vm2351_vm4, %v3895_v53, %v9824_v1  ;;  %v3975_v20 = vrot.slane %v3969_v29, 2  ;;  %v3991_v0 = vrot.slane %v3985_v41, 2  ;;  %v4001_v53 = vmul.f32 %v4000_v17, %v7172_v23 }
 0x235   :  { %9825 = vst [vmem:[#allocation95_spill] sm:$0xff] %v7460_v46  ;;  %v9826_v2 = vrot.slane %v7316_v45, 1  ;;  %v9828_v13 = vrot.slane %v7334_v56, 1  ;;  %v9830_v8 = vrot.slane %v7349_v59, 1  ;;  %v7491_v7 = vsel %vm308_vm0, %v3959_v27, %v3960_v30 }
 0x236   :  { %9832 = vst [vmem:[#allocation83_spill] sm:$0xff] %v7491_v7  ;;  %v7498_v45 = vsel %vm308_vm0, %v3975_v20, %v3976_v39  ;;  %v7501_v56 = vsel %vm308_vm0, %v3991_v0, %v3992_v10  ;;  %v4007_v59 = vrot.slane %v4001_v53, 2  ;;  %v2473_v1 = vstv %s7324_s27  ;;  %s7532_s27 = sld [smem:[#allocation11 + $0x9]] }
 0x237   :  { %v7478_v9 = vsel %vm2351_vm4, %v3911_v50, %v9826_v2  ;;  %v7483_v4 = vsel %vm2351_vm4, %v3927_v24, %v9828_v13  ;;  %v7488_v17 = vsel %vm2351_vm4, %v3943_v54, %v9830_v8  ;;  %9834 = vst [vmem:[#allocation84_spill] sm:$0xff] %v7498_v45  ;;  %9835 = vst [vmem:[#allocation85_spill] sm:$0xff] %v7501_v56  ;;  %v2478_v30 = vstv %s7327_s2  ;;  %s7534_s2 = sld [smem:[#allocation11 + $0xc]] }
 0x238   :  { %9827 = vst [vmem:[#allocation96_spill] sm:$0xff] %v7478_v9  ;;  %9829 = vst [vmem:[#allocation81_spill] sm:$0xff] %v7483_v4  ;;  %v7513_v29 = vstv %s7392_s20  ;;  %v7520_v10 = vsel %vm308_vm0, %v4007_v59, %v4008_v14  ;;  %v7524_v50 = vstv %s7409_s28  ;;  %v7527_v24 = vstv %s7418_s6  ;;  %s7544_s20 = sld [smem:[#allocation11 + $0xf]]  ;;  %s7546_s28 = sld [smem:[#allocation11 + $0x2d]] }
 0x239   :  { %9831 = vst [vmem:[#allocation82_spill] sm:$0xff] %v7488_v17  ;;  %9840 = vst [vmem:[#allocation86_spill] sm:$0xff] %v7520_v10  ;;  %v7530_v20 = vstv %s7402_s4  ;;  %v7537_v0 = vstv %s7432_s29  ;;  %v7540_v53 = vstv %s7411_s30  ;;  %v2483_v14 = vstv %s7329_s14  ;;  %s7554_s4 = sld [smem:[#allocation11 + $0x30]]  ;;  %s7556_s6 = sld [smem:[#allocation11 + $0x33]] }
 0x23a   :  { %v2488_v2 = vstv %s7336_s16  ;;  %v7549_v13 = vstv %s7425_s26  ;;  %v7552_v8 = vstv %s7434_s7  ;;  %v2938_v59 = vstv %s7338_s10  ;;  %s7566_s14 = sld [smem:[#allocation11 + $0x51]]  ;;  %s7568_s16 = sld [smem:[#allocation11 + $0x75]] }
 0x23b   :  { %v2943_v41 = vstv %s7351_s12  ;;  %v7561_v39 = vmul.f32 %v2473_v1, %v6955_v55  ;;  %v7564_v27 = vmul.f32 %v2478_v30, %v6955_v55  ;;  %v2948_v54 = vstv %s7353_s15  ;;  %s9844_s10 = sld [smem:[#allocation46_spill]]  ;;  %s7584_s12 = sld [smem:[#allocation11 + $0x54]] }
 0x23c   :  { %v2953_v10 = vstv %s7363_s17  ;;  %v7573_v56 = vmul.f32 %v2483_v14, %v6955_v55  ;;  %v7576_v45 = vmul.f32 %v2488_v2, %v6955_v55  ;;  %v7579_v7 = vmul.f32 %v2473_v1, %v6957_v63  ;;  %s7586_s15 = sld [smem:[#allocation11 + $0x57]]  ;;  %s7600_s17 = sld [smem:[#allocation11 + $0x78]] }
 0x23d   :  { %v7582_v17 = vmul.f32 %v2478_v30, %v6957_v63  ;;  %v7589_v4 = vmul.f32 %v2483_v14, %v6957_v63  ;;  %v7592_v9 = vmul.f32 %v2488_v2, %v6957_v63  ;;  %v7595_v55 = vstv %s7450_s25  ;;  %s7602_s30 = sld [smem:[#allocation11 + $0x7b]]  ;;  %s7616_s26 = sld [smem:[#allocation11 + $0xe]] }
 0x23e   :  { %9841 = sst [smem:[#allocation121_spill]] %s7546_s28  ;;  %9845 = vst [vmem:[#allocation89_spill] sm:$0xff] %v7595_v55  ;;  %v7598_v1 = vstv %s7466_s3  ;;  %v7605_v30 = vstv %s7471_s22  ;;  %v7608_v46 = vstv %s7493_s19  ;;  %v7611_v42 = vstv %s7464_s11  ;;  %s7618_s29 = sld [smem:[#allocation11 + $0x11]] }
 0x23f   :  { %9846 = vst [vmem:[#allocation90_spill] sm:$0xff] %v7598_v1  ;;  %9847 = vst [vmem:[#allocation97_spill] sm:$0xff] %v7605_v30  ;;  %v7614_v14 = vstv %s7468_s9  ;;  %v7621_v63 = vstv %s7473_s8  ;;  %v7628_v37 = vmul.f32 %v2938_v59, %v7032_v57  ;;  %s7630_s19 = sld [smem:[#allocation11 + $0x32]]  ;;  %s7632_s7 = sld [smem:[#allocation11 + $0x35]]  ;;  %v7635_v35 = vmul.f32 %v2938_v59, %v7030_v5 }
 0x240   :  { %9842 = sst [smem:[#allocation122_spill]] %s7566_s14  ;;  %9848 = vst [vmem:[#allocation98_spill] sm:$0xff] %v7608_v46  ;;  %9849 = vst [vmem:[#allocation99_spill] sm:$0xff] %v7611_v42  ;;  %s9855_s22 = sld [smem:[#allocation39_spill]]  ;;  %v7638_v51 = vmul.f32 %v2943_v41, %v7032_v57  ;;  %v7641_v33 = vmul.f32 %v2943_v41, %v7030_v5  ;;  %v7644_v22 = vmul.f32 %v2948_v54, %v7032_v57  ;;  %v7681_v60 = vstv %s7534_s2 }
 0x241   :  { %9843 = sst [smem:[#allocation123_spill]] %s7568_s16  ;;  %9850 = vst [vmem:[#allocation101_spill] sm:$0xff] %v7614_v14  ;;  %9851 = vst [vmem:[#allocation100_spill] sm:$0xff] %v7621_v63  ;;  %v7624_v2 = vstv %s9844_s10  ;;  %s9857_s8 = sld [smem:[#allocation42_spill]]  ;;  %v7652_v34 = vmul.f32 %v2948_v54, %v7030_v5  ;;  %v7655_v18 = vmul.f32 %v2953_v10, %v7032_v57  ;;  %v7658_v41 = vmul.f32 %v2953_v10, %v7030_v5 }
 0x242   :  { %9852 = vst [vmem:[#allocation102_spill] sm:$0xff] %v7624_v2  ;;  %9853 = vst [vmem:[#allocation103_spill] sm:$0xff] %v7628_v37  ;;  %s7646_s25 = sld [smem:[#allocation11 + $0x56]]  ;;  %s7648_s9 = sld [smem:[#allocation11 + $0x59]]  ;;  %v7684_v16 = vstv %s7554_s4  ;;  %v7695_v59 = vstv %s7600_s17  ;;  %v3418_v52 = vstv %s9864_s13 }
 0x243   :  { %9854 = vst [vmem:[#allocation104_spill] sm:$0xff] %v7635_v35  ;;  %9856 = vst [vmem:[#allocation114_spill] sm:$0xff] %v7638_v51  ;;  %s7660_s11 = sld [smem:[#allocation11 + $0x7a]]  ;;  %s7662_s3 = sld [smem:[#allocation11 + $0x7d]] }
 0x244   :  { %9858 = vst [vmem:[#allocation105_spill] sm:$0xff] %v7641_v33  ;;  %9859 = vst [vmem:[#allocation107_spill] sm:$0xff] %v7644_v22  ;;  %s9863_s10 = sld [smem:[#allocation40_spill]]  ;;  %s9870_s16 = sld [smem:[#allocation38_spill]]  ;;  %v7710_v33 = vstv %s7544_s20 }
 0x245   :  { %9860 = vst [vmem:[#allocation106_spill] sm:$0xff] %v7652_v34  ;;  %9861 = vst [vmem:[#allocation109_spill] sm:$0xff] %v7655_v18  ;;  %s7699_s14 = sld [smem:[#allocation11 + $0x36]]  ;;  %s7712_s4 = sld [smem:[#allocation11 + $0x39]]  ;;  %v7736_v18 = vstv %s7556_s6 }
 0x246   :  { %9862 = vst [vmem:[#allocation108_spill] sm:$0xff] %v7658_v41  ;;  %v3403_v57 = vstv %s9855_s22  ;;  %9865 = vst [vmem:[#allocation111_spill] sm:$0xff] %v7681_v60  ;;  %v7687_v41 = vstv %s7584_s12  ;;  %s7691_s22 = sld [smem:[#allocation11 + $0x15]]  ;;  %s9871_s2 = sld [smem:[#allocation41_spill]] }
 0x247   :  { %v3408_v54 = vstv %s9857_s8  ;;  %9866 = vst [vmem:[#allocation110_spill] sm:$0xff] %v7684_v16  ;;  %9867 = vst [vmem:[#allocation112_spill] sm:$0xff] %v7687_v41  ;;  %s7697_s8 = sld [smem:[#allocation11 + $0x18]]  ;;  %v7702_v10 = vmul.f32 %v3403_v57, %v7102_v48  ;;  %v7705_v5 = vmul.f32 %v3403_v57, %v7100_v32  ;;  %s7714_s17 = sld [smem:[#allocation11 + $0x3c]]  ;;  %v3868_v57 = vstv %s9868_s21 }
 0x248   :  { %9869 = vst [vmem:[#allocation22_spill] sm:$0xff] %v7695_v59  ;;  %9874 = vst [vmem:[#allocation20_spill] sm:$0xff] %v7710_v33  ;;  %s9875_s12 = sld [smem:[#allocation43_spill]]  ;;  %v7717_v21 = vmul.f32 %v3408_v54, %v7102_v48  ;;  %s7723_s13 = sld [smem:[#allocation11 + $0x5a]] }
 0x249   :  { %9872 = vst [vmem:[#allocation29_spill] sm:$0xff] %v7702_v10  ;;  %9873 = vst [vmem:[#allocation30_spill] sm:$0xff] %v7705_v5  ;;  %v7720_v10 = vmul.f32 %v3408_v54, %v7100_v32  ;;  %s7738_s20 = sld [smem:[#allocation11 + $0x5d]]  ;;  %s7740_s28 = sld [smem:[#allocation11 + $0x81]]  ;;  %v7743_v54 = vmul.f32 %v3418_v52, %v7102_v48 }
 0x24a   :  { %v3413_v34 = vstv %s9863_s10  ;;  %9876 = vst [vmem:[#allocation24_spill] sm:$0xff] %v7717_v21  ;;  %s7725_s10 = sld [smem:[#allocation11 + $0x7e]]  ;;  %v3873_v28 = vstv %s9870_s16  ;;  %9880 = vst [vmem:[#allocation28_spill] sm:$0xff] %v7736_v18  ;;  %s7758_s21 = sld [smem:[#allocation11 + $0x60]] }
 0x24b   :  { %9877 = vst [vmem:[#allocation31_spill] sm:$0xff] %v7720_v10  ;;  %v7728_v5 = vmul.f32 %v3413_v34, %v7102_v48  ;;  %v7731_v35 = vmul.f32 %v3413_v34, %v7100_v32  ;;  %9881 = vst [vmem:[#allocation25_spill] sm:$0xff] %v7743_v54  ;;  %v7746_v10 = vmul.f32 %v3418_v52, %v7100_v32  ;;  %v7753_v34 = vstv %s7602_s30  ;;  %s7760_s6 = sld [smem:[#allocation11 + $0x84]]  ;;  %s9901_s16 = sld [smem:[#allocation35_spill]] }
 0x24c   :  { %v3878_v31 = vstv %s9871_s2  ;;  %9884 = vst [vmem:[#allocation21_spill] sm:$0xff] %v7753_v34  ;;  %v7763_v32 = vmul.f32 %v3868_v57, %v7172_v23  ;;  %v7767_v48 = vmul.f32 %v3868_v57, %v7170_v49  ;;  %v7770_v52 = vmul.f32 %v3873_v28, %v7172_v23  ;;  %s9905_s30 = sld [smem:[#allocation37_spill]]  ;;  %s8810_s2 = sld [smem:[#allocation11 + $0x1b]] }
 0x24d   :  { %9878 = vst [vmem:[#allocation32_spill] sm:$0xff] %v7728_v5  ;;  %9879 = vst [vmem:[#allocation33_spill] sm:$0xff] %v7731_v35  ;;  %v7750_v5 = vstv %s7586_s15  ;;  %v7756_v35 = vstv %s7616_s26  ;;  %v7776_v54 = vmul.f32 %v3878_v31, %v7172_v23  ;;  %s9903_s15 = sld [smem:[#allocation36_spill]]  ;;  %s9935_s26 = sld [smem:[#allocation119_spill]] }
 0x24e   :  { %9882 = vst [vmem:[#allocation23_spill] sm:$0xff] %v7746_v10  ;;  %v3883_v21 = vstv %s9875_s12  ;;  %9883 = vst [vmem:[#allocation26_spill] sm:$0xff] %v7750_v5  ;;  %v7773_v10 = vmul.f32 %v3873_v28, %v7170_v49  ;;  %v7791_v28 = vstv %s7646_s25  ;;  %s9949_s25 = sld [smem:[#allocation123_spill]]  ;;  %s8831_s12 = sld [smem:[#allocation11 + $0x63]] }
 0x24f   :  { %9885 = vst [vmem:[#allocation124_spill] sm:$0xff] %v7756_v35  ;;  %9886 = vst [vmem:[#allocation125_spill] sm:$0xff] %v7763_v32  ;;  %v7779_v32 = vstv %s7630_s19  ;;  %v7782_v35 = vmul.f32 %v3878_v31, %v7170_v49  ;;  %v7785_v57 = vmul.f32 %v3883_v21, %v7172_v23  ;;  %v7803_v31 = vstv %s7648_s9  ;;  %s9945_s19 = sld [smem:[#allocation121_spill]]  ;;  %s8649_s9 = sld [smem:[#allocation11 + $0x86]] }
 0x250   :  { %9887 = vst [vmem:[#allocation126_spill] sm:$0xff] %v7767_v48  ;;  %9888 = vst [vmem:[#allocation127_spill] sm:$0xff] %v7770_v52  ;;  %v7788_v48 = vmul.f32 %v3883_v21, %v7170_v49  ;;  %v7800_v52 = vstv %s7632_s7  ;;  %v7806_v23 = vstv %s7662_s3  ;;  %s9947_s7 = sld [smem:[#allocation122_spill]]  ;;  %s8732_s3 = sld [smem:[#allocation11 + $0x38]] }
 0x251   :  { %9889 = vst [vmem:[#allocation128_spill] sm:$0xff] %v7773_v10  ;;  %9890 = vst [vmem:[#allocation129_spill] sm:$0xff] %v7776_v54  ;;  %v7794_v10 = vstv %s7660_s11  ;;  %v7797_v54 = vstv %s7618_s29  ;;  %s9936_s29 = sld [smem:[#allocation120_spill]]  ;;  %s8720_s11 = sld [smem:[#allocation11 + $0x14]] }
 0x252   :  { %9891 = vst [vmem:[#allocation130_spill] sm:$0xff] %v7779_v32  ;;  %9892 = vst [vmem:[#allocation131_spill] sm:$0xff] %v7782_v35 }
 0x253   :  { %9893 = vst [vmem:[#allocation132_spill] sm:$0xff] %v7785_v57  ;;  %9894 = vst [vmem:[#allocation133_spill] sm:$0xff] %v7788_v48  ;;  %v7823_v48 = vstv %s7738_s20  ;;  %v7826_v57 = vstv %s7740_s28  ;;  %s9934_s28 = sld [smem:[#allocation49_spill]]  ;;  %s8840_s20 = sld [smem:[#allocation11 + $0x66]] }
 0x254   :  { %9895 = vst [vmem:[#allocation134_spill] sm:$0xff] %v7791_v28  ;;  %9896 = vst [vmem:[#allocation135_spill] sm:$0xff] %v7794_v10  ;;  %v7817_v28 = vstv %s7691_s22  ;;  %v7829_v10 = vstv %s7697_s8  ;;  %s8734_s22 = sld [smem:[#allocation11 + $0x5c]]  ;;  %s8751_s8 = sld [smem:[#allocation11 + $0x80]] }
 0x255   :  { %9897 = vst [vmem:[#allocation136_spill] sm:$0xff] %v7797_v54  ;;  %9898 = vst [vmem:[#allocation137_spill] sm:$0xff] %v7800_v52  ;;  %v7832_v54 = vstv %s7714_s17  ;;  %s8833_s17 = sld [smem:[#allocation11 + $0x87]] }
 0x256   :  { %9899 = vst [vmem:[#allocation138_spill] sm:$0xff] %v7803_v31  ;;  %9900 = vst [vmem:[#allocation139_spill] sm:$0xff] %v7806_v23  ;;  %v7820_v31 = vstv %s7712_s4  ;;  %v9912_v23 = vstv %s7390_s24  ;;  %s9933_s24 = sld [smem:[#allocation48_spill]]  ;;  %s8814_s4 = sld [smem:[#allocation11 + $0x3f]] }
 0x257   :  { %9902 = vst [vmem:[#allocation140_spill] sm:$0xff] %v7817_v28  ;;  %9904 = vst [vmem:[#allocation141_spill] sm:$0xff] %v7820_v31  ;;  %v7839_v31 = vstv %s7758_s21  ;;  %v7842_v28 = vstv %s7760_s6  ;;  %v9913_v22 = vmov %v9912_v23  ;;  %s8871_s21 = sld [smem:[#allocation11 + $0x8a]]  ;;  %s8880_s6 = sld [smem:[#allocation11 + $0x21]] }
 0x258   :  { %9906 = vst [vmem:[#allocation142_spill] sm:$0xff] %v7823_v48  ;;  %9907 = vst [vmem:[#allocation143_spill] sm:$0xff] %v7826_v57  ;;  %v9914_v57 = vstv %s9901_s16  ;;  %s8882_s16 = sld [smem:[#allocation11 + $0x45]] }
 0x259   :  { %9908 = vst [vmem:[#allocation144_spill] sm:$0xff] %v7829_v10  ;;  %9909 = vst [vmem:[#allocation145_spill] sm:$0xff] %v7832_v54  ;;  %v9915_v10 = vmov %v9914_v57  ;;  %v9916_v54 = vstv %s9903_s15  ;;  %s8909_s15 = sld [smem:[#allocation11 + $0x69]] }
 0x25a   :  { %9910 = vst [vmem:[#allocation146_spill] sm:$0xff] %v7839_v31  ;;  %9911 = vst [vmem:[#allocation147_spill] sm:$0xff] %v7842_v28 }
 0x262   :  { %v2326_v35 = vpop.permute.xlu1 %2325  ;;  %v2324_v49 = vpop.permute.xlu0 %2323 }
 0x263   :  { %v2330_v52 = vsel %vm2318_vm5, %v2326_v35, 0.0  ;;  %v2329_v21 = vsel %vm2318_vm5, %v2324_v49, 0.0  ;;  %v9917_v35 = vmov %v9916_v54  ;;  %v9918_v49 = vstv %s9905_s30  ;;  %s8911_s30 = sld [smem:[#allocation11 + $0x8d]] }
 0x264   :  { %v2333_v32 = vmul.f32 %v9912_v23, %v2329_v21  ;;  %v7848_v48 = vmul.f32 %v9913_v22, %v2330_v52  ;;  %v2336_v51 = vmul.f32 %v9914_v57, %v2329_v21  ;;  %v7854_v37 = vmul.f32 %v9915_v10, %v2330_v52 }
 0x265   :  { %v2339_v34 = vmul.f32 %v9916_v54, %v2329_v21  ;;  %v7860_v5 = vmul.f32 %v9917_v35, %v2330_v52  ;;  %v2342_v18 = vmul.f32 %v9918_v49, %v2329_v21  ;;  %v9919_v31 = vmov %v9918_v49 }
 0x266   :  { %v7866_v33 = vmul.f32 %v9919_v31, %v2330_v52  ;;  %v2622_v28 = vpop.permute.xlu1 %2621  ;;  %v2345_v23 = vmul.f32 %v7513_v29, %v2329_v21  ;;  %v7870_v22 = vmul.f32 %v7513_v29, %v2330_v52  ;;  %v2362_v57 = vmul.f32 %v7524_v50, %v2329_v21  ;;  %v2328_v3 = vpop.permute.xlu0 %2327 }
 0x267   :  { %v2363_v10 = vmul.f32 %v7524_v50, %v2330_v52  ;;  %v7876_v54 = vsel %vm2319_vm6, %v2622_v28, 0.0  ;;  %v2378_v35 = vmul.f32 %v7527_v24, %v2329_v21  ;;  %v7880_v49 = vmul.f32 %v7527_v24, %v2330_v52 }
 0x268   :  { %v2394_v31 = vmul.f32 %v7537_v0, %v2329_v21  ;;  %v2352_v59 = vrot.slane %v2345_v23, 1  ;;  %v2353_v41 = vrot.slane %v7870_v22, 1  ;;  %v2368_v16 = vrot.slane %v2362_v57, 1 }
 0x269   :  { %v2369_v60 = vrot.slane %v2363_v10, 1  ;;  %v2384_v58 = vrot.slane %v2378_v35, 1  ;;  %v2385_v2 = vrot.slane %v7880_v49, 1  ;;  %v2395_v63 = vmul.f32 %v7537_v0, %v2330_v52 }
 0x26a   :  { %v2400_v14 = vrot.slane %v2394_v31, 1  ;;  %v2354_v28 = vsel %vm2351_vm4, %v2352_v59, %v2353_v41  ;;  %v2410_v46 = vmul.f32 %v7530_v20, %v2329_v21  ;;  %v2411_v44 = vmul.f32 %v7530_v20, %v2330_v52 }
 0x26b   :  { %v2370_v42 = vsel %vm2351_vm4, %v2368_v16, %v2369_v60  ;;  %v2359_v30 = vadd.f32 %v2354_v28, %v2333_v32  ;;  %v2386_v22 = vsel %vm2351_vm4, %v2384_v58, %v2385_v2  ;;  %v2401_v57 = vrot.slane %v2395_v63, 1 }
 0x26c   :  { %v2375_v23 = vadd.f32 %v2370_v42, %v2336_v51  ;;  %v2391_v10 = vadd.f32 %v2386_v22, %v2339_v34  ;;  %v2416_v35 = vrot.slane %v2410_v46, 2  ;;  %v2417_v1 = vrot.slane %v2411_v44, 2 }
 0x26d   :  { %v2426_v49 = vmul.f32 %v7540_v53, %v2329_v21  ;;  %v2402_v31 = vsel %vm2351_vm4, %v2400_v14, %v2401_v57  ;;  %v2427_v59 = vmul.f32 %v7540_v53, %v2330_v52  ;;  %v2442_v16 = vmul.f32 %v7549_v13, %v2329_v21 }
 0x26e   :  { %v2443_v11 = vmul.f32 %v7549_v13, %v2330_v52  ;;  %v2407_v47 = vadd.f32 %v2402_v31, %v2342_v18  ;;  %v2418_v51 = vsel %vm308_vm0, %v2416_v35, %v2417_v1  ;;  %v2458_v58 = vmul.f32 %v7552_v8, %v2329_v21 }
 0x26f   :  { %v2432_v42 = vrot.slane %v2426_v49, 2  ;;  %v2423_v63 = vadd.f32 %v2418_v51, %v2359_v30  ;;  %v2433_v46 = vrot.slane %v2427_v59, 2  ;;  %v2448_v44 = vrot.slane %v2442_v16, 2 }
 0x270   :  { %v2449_v34 = vrot.slane %v2443_v11, 2  ;;  %v2459_v32 = vmul.f32 %v7552_v8, %v2330_v52  ;;  %v2464_v14 = vrot.slane %v2458_v58, 2  ;;  %v2331_v28 = vsel %vm2318_vm5, %v2328_v3, 0.0 }
 0x271   :  { %v7903_v22 = vmul.f32 %v7595_v55, %v7876_v54  ;;  %v2434_v18 = vsel %vm308_vm0, %v2432_v42, %v2433_v46  ;;  %v2347_v21 = vmul.f32 %v7513_v29, %v2331_v28  ;;  %v2364_v30 = vmul.f32 %v7524_v50, %v2331_v28 }
 0x272   :  { %v2450_v35 = vsel %vm308_vm0, %v2448_v44, %v2449_v34  ;;  %v2439_v49 = vadd.f32 %v2434_v18, %v2375_v23  ;;  %v2465_v31 = vrot.slane %v2459_v32, 2  ;;  %v2380_v52 = vmul.f32 %v7527_v24, %v2331_v28 }
 0x273   :  { %v2455_v11 = vadd.f32 %v2450_v35, %v2391_v10  ;;  %v2355_v59 = vrot.slane %v2347_v21, 1  ;;  %v2371_v16 = vrot.slane %v2364_v30, 1  ;;  %v2396_v3 = vmul.f32 %v7537_v0, %v2331_v28 }
 0x274   :  { %v2412_v51 = vmul.f32 %v7530_v20, %v2331_v28  ;;  %v2466_v58 = vsel %vm308_vm0, %v2464_v14, %v2465_v31  ;;  %v2387_v42 = vrot.slane %v2380_v52, 1  ;;  %v2428_v44 = vmul.f32 %v7540_v53, %v2331_v28 }
 0x275   :  { %v2444_v29 = vmul.f32 %v7549_v13, %v2331_v28  ;;  %v2471_v55 = vadd.f32 %v2466_v58, %v2407_v47  ;;  %v2356_v50 = vsel %vm2351_vm4, %v2353_v41, %v2355_v59  ;;  %v2372_v23 = vsel %vm2351_vm4, %v2369_v60, %v2371_v16  ;;  %v2626_v59 = vpop.permute.xlu1 %2625  ;;  %v9926_v58 = vld [vmem:[#allocation98_spill] sm:$0xff] }
 0x276   :  { %v2403_v10 = vrot.slane %v2396_v3, 1  ;;  %v2360_v24 = vadd.f32 %v2356_v50, %v7848_v48  ;;  %v2376_v32 = vadd.f32 %v2372_v23, %v7854_v37  ;;  %v2388_v0 = vsel %vm2351_vm4, %v2385_v2, %v2387_v42  ;;  %v9928_v50 = vld [vmem:[#allocation101_spill] sm:$0xff] }
 0x277   :  { %v2419_v20 = vrot.slane %v2412_v51, 2  ;;  %v2392_v14 = vadd.f32 %v2388_v0, %v7860_v5  ;;  %v2435_v53 = vrot.slane %v2428_v44, 2  ;;  %v2451_v35 = vrot.slane %v2444_v29, 2  ;;  %v9927_v44 = vld [vmem:[#allocation99_spill] sm:$0xff] }
 0x278   :  { %v2404_v18 = vsel %vm2351_vm4, %v2401_v57, %v2403_v10  ;;  %v2460_v60 = vmul.f32 %v7552_v8, %v2331_v28  ;;  %v2476_v41 = vadd.f32 %v7579_v7, %v2423_v63  ;;  %v2481_v21 = vadd.f32 %v7582_v17, %v2439_v49 }
 0x279   :  { %v2408_v47 = vadd.f32 %v2404_v18, %v7866_v33  ;;  %v2420_v13 = vsel %vm308_vm0, %v2417_v1, %v2419_v20  ;;  %v2436_v37 = vsel %vm308_vm0, %v2433_v46, %v2435_v53  ;;  %v2452_v2 = vsel %vm308_vm0, %v2449_v34, %v2451_v35  ;;  %v2784_v3 = vpop.permute.xlu1 %2783  ;;  %v9930_v20 = vld [vmem:[#allocation102_spill] sm:$0xff]  ;;  %v9931_v18 = vld [vmem:[#allocation116_spill] sm:$0xff] }
 0x27a   :  { %v2424_v48 = vadd.f32 %v2420_v13, %v2360_v24  ;;  %v2440_v5 = vadd.f32 %v2436_v37, %v2376_v32  ;;  %v2456_v30 = vadd.f32 %v2452_v2, %v2392_v14  ;;  %v2467_v57 = vrot.slane %v2460_v60, 2  ;;  %v9929_v32 = vld [vmem:[#allocation100_spill] sm:$0xff]  ;;  %v9932_v2 = vld [vmem:[#allocation89_spill] sm:$0xff] }
 0x27b   :  { %v2486_v52 = vadd.f32 %v7589_v4, %v2455_v11  ;;  %v2491_v1 = vadd.f32 %v7592_v9, %v2471_v55  ;;  %v2507_v8 = vadd.f32 %v7063_v15, %v2476_v41  ;;  %v2523_v7 = vadd.f32 %v7072_v19, %v2481_v21 }
 0x27c   :  { %v2477_v33 = vadd.f32 %v7561_v39, %v2424_v48  ;;  %v2468_v63 = vsel %vm308_vm0, %v2465_v31, %v2467_v57  ;;  %v2482_v46 = vadd.f32 %v7564_v27, %v2440_v5  ;;  %v2487_v17 = vadd.f32 %v7573_v56, %v2456_v30 }
 0x27d   :  { %v2539_v34 = vadd.f32 %v7075_v36, %v2486_v52  ;;  %v2472_v28 = vadd.f32 %v2468_v63, %v2408_v47  ;;  %v2555_v49 = vadd.f32 %v7078_v40, %v2491_v1  ;;  %v7941_v39 = vadd.f32 %v7081_v25, %v2507_v8  ;;  %v9921_v25 = vld [vmem:[#allocation27_spill] sm:$0xff] }
 0x27e   :  { %v2508_v4 = vadd.f32 %v6998_v26, %v2477_v33  ;;  %v2524_v15 = vadd.f32 %v7004_v43, %v2482_v46  ;;  %v2540_v19 = vadd.f32 %v7007_v61, %v2487_v17  ;;  %v7946_v9 = vadd.f32 %v7084_v12, %v2523_v7  ;;  %v9920_v26 = vld [vmem:[#allocation50_spill] sm:$0xff]  ;;  %v9922_v43 = vld [vmem:[#allocation115_spill] sm:$0xff]  ;;  %v3087_v7 = vpop.permute.xlu1 %3086 }
 0x27f   :  { %v7949_v27 = vadd.f32 %v7087_v62, %v2539_v34  ;;  %v2492_v36 = vadd.f32 %v7576_v45, %v2472_v28  ;;  %v7954_v55 = vadd.f32 %v9920_v26, %v2555_v49  ;;  %v2657_v40 = vrot.slane %v7903_v22, 1  ;;  %v9923_v61 = vld [vmem:[#allocation90_spill] sm:$0xff]  ;;  %v9924_v62 = vld [vmem:[#allocation97_spill] sm:$0xff]  ;;  %v2624_v45 = vpop.permute.xlu0 %2623 }
 0x280   :  { %v2572_v56 = vadd.f32 %v7024_v38, %v2508_v4  ;;  %v2588_v11 = vadd.f32 %v9921_v25, %v2524_v15  ;;  %v2604_v31 = vadd.f32 %v9922_v43, %v2540_v19  ;;  %v7961_v12 = vmul.f32 %v9923_v61, %v7876_v54  ;;  %v9925_v38 = vld [vmem:[#allocation34_spill] sm:$0xff] }
 0x281   :  { %v7965_v16 = vmul.f32 %v9924_v62, %v7876_v54  ;;  %v2556_v51 = vadd.f32 %v9925_v38, %v2492_v36  ;;  %v7970_v42 = vmul.f32 %v9926_v58, %v7876_v54  ;;  %v7974_v29 = vmul.f32 %v9927_v44, %v7876_v54 }
 0x282   :  { %v7978_v23 = vmul.f32 %v9928_v50, %v7876_v54  ;;  %v2673_v10 = vrot.slane %v7961_v12, 1  ;;  %v7984_v0 = vmul.f32 %v9929_v32, %v7876_v54  ;;  %v7988_v14 = vmul.f32 %v9930_v20, %v7876_v54 }
 0x283   :  { %v2689_v24 = vrot.slane %v7965_v16, 1  ;;  %v2620_v53 = vadd.f32 %v9931_v18, %v2556_v51  ;;  %v2705_v35 = vrot.slane %v7970_v42, 1  ;;  %v2721_v47 = vrot.slane %v7974_v29, 2  ;;  %v2782_v8 = vpop.permute.xlu0 %2781 }
 0x284   :  { %v2737_v13 = vrot.slane %v7978_v23, 2  ;;  %v2753_v60 = vrot.slane %v7984_v0, 2  ;;  %v2769_v41 = vrot.slane %v7988_v14, 2  ;;  %v2629_v48 = vsel %vm2319_vm6, %v2626_v59, 0.0 }
 0x285   :  { %v2628_v37 = vsel %vm2319_vm6, %v2624_v45, 0.0  ;;  %v2653_v21 = vmul.f32 %v9932_v2, %v2629_v48  ;;  %v2669_v5 = vmul.f32 %v9923_v61, %v2629_v48  ;;  %v2685_v30 = vmul.f32 %v9924_v62, %v2629_v48 }
 0x286   :  { %v2701_v57 = vmul.f32 %v9926_v58, %v2629_v48  ;;  %v2717_v52 = vmul.f32 %v9927_v44, %v2629_v48  ;;  %v2733_v33 = vmul.f32 %v9928_v50, %v2629_v48  ;;  %v8007_v1 = vmul.f32 %v9929_v32, %v2629_v48 }
 0x287   :  { %v8010_v59 = vmul.f32 %v9930_v20, %v2629_v48  ;;  %v2660_v63 = vrot.slane %v2653_v21, 1  ;;  %v2676_v46 = vrot.slane %v2669_v5, 1  ;;  %v2692_v17 = vrot.slane %v2685_v30, 1 }
 0x288   :  { %v2708_v34 = vrot.slane %v2701_v57, 1  ;;  %v2724_v28 = vrot.slane %v2717_v52, 2  ;;  %v2740_v4 = vrot.slane %v2733_v33, 2  ;;  %v2756_v49 = vrot.slane %v8007_v1, 2 }
 0x289   :  { %v8016_v19 = vsel %vm2318_vm5, %v2784_v3, 0.0  ;;  %v8020_v36 = vsel %vm2318_vm5, %v2782_v8, 0.0  ;;  %v8024_v26 = vsel %vm2319_vm6, %v3087_v7, 0.0  ;;  %v9937_v25 = vstv %s9933_s24  ;;  %s8970_s24 = sld [smem:[#allocation11 + $0x20]] }
 0x28a   :  { %v8029_v43 = vmul.f32 %v9937_v25, %v7876_v54  ;;  %v9938_v12 = vmov %v9937_v25  ;;  %v9939_v45 = vstv %s9934_s28  ;;  %v9941_v42 = vstv %s9935_s26  ;;  %s9056_s28 = sld [smem:[#allocation11 + $0x44]]  ;;  %s9061_s26 = sld [smem:[#allocation11 + $0x68]] }
 0x28b   :  { %v2632_v16 = vmul.f32 %v9938_v12, %v2628_v37  ;;  %v8036_v38 = vmul.f32 %v9939_v45, %v7876_v54  ;;  %v9940_v3 = vmov %v9939_v45  ;;  %v8043_v18 = vmul.f32 %v9941_v42, %v7876_v54 }
 0x28c   :  { %v2637_v51 = vmul.f32 %v9940_v3, %v2628_v37  ;;  %v9942_v48 = vmov %v9941_v42  ;;  %v9943_v5 = vstv %s9936_s29  ;;  %v2652_v33 = vmul.f32 %v9932_v2, %v2628_v37  ;;  %s9066_s29 = sld [smem:[#allocation11 + $0x8c]] }
 0x28d   :  { %v2642_v21 = vmul.f32 %v9942_v48, %v2628_v37  ;;  %v8050_v30 = vmul.f32 %v9943_v5, %v7876_v54  ;;  %v9944_v57 = vmov %v9943_v5  ;;  %v2634_v1 = vadd.f32 %v2632_v16, %v2572_v56 }
 0x28e   :  { %v2647_v52 = vmul.f32 %v9944_v57, %v2628_v37  ;;  %v2639_v8 = vadd.f32 %v2637_v51, %v2588_v11  ;;  %v2668_v7 = vmul.f32 %v9923_v61, %v2628_v37  ;;  %v2684_v25 = vmul.f32 %v9924_v62, %v2628_v37 }
 0x28f   :  { %v2644_v12 = vadd.f32 %v2642_v21, %v2604_v31  ;;  %v2658_v3 = vrot.slane %v2652_v33, 1  ;;  %v2700_v42 = vmul.f32 %v9926_v58, %v2628_v37  ;;  %v2716_v54 = vmul.f32 %v9927_v44, %v2628_v37 }
 0x290   :  { %v2649_v45 = vadd.f32 %v2647_v52, %v2620_v53  ;;  %v2674_v48 = vrot.slane %v2668_v7, 1  ;;  %v2690_v15 = vrot.slane %v2684_v25, 1  ;;  %v2732_v5 = vmul.f32 %v9928_v50, %v2628_v37 }
 0x291   :  { %v8063_v56 = vsel %vm2351_vm4, %v2657_v40, %v2658_v3  ;;  %v2661_v11 = vsel %vm2351_vm4, %v2658_v3, %v2660_v63  ;;  %v2706_v61 = vrot.slane %v2700_v42, 1  ;;  %v2748_v31 = vmul.f32 %v9929_v32, %v2628_v37 }
 0x292   :  { %v2665_v62 = vadd.f32 %v2661_v11, %v2634_v1  ;;  %v8068_v58 = vsel %vm2351_vm4, %v2673_v10, %v2674_v48  ;;  %v2677_v44 = vsel %vm2351_vm4, %v2674_v48, %v2676_v46  ;;  %v8072_v50 = vsel %vm2351_vm4, %v2689_v24, %v2690_v15 }
 0x293   :  { %v2681_v22 = vadd.f32 %v2677_v44, %v2639_v8  ;;  %v2693_v40 = vsel %vm2351_vm4, %v2690_v15, %v2692_v17  ;;  %v8076_v53 = vsel %vm2351_vm4, %v2705_v35, %v2706_v61  ;;  %v2709_v2 = vsel %vm2351_vm4, %v2706_v61, %v2708_v34 }
 0x294   :  { %v2697_v63 = vadd.f32 %v2693_v40, %v2644_v12  ;;  %v2713_v32 = vadd.f32 %v2709_v2, %v2649_v45  ;;  %v2722_v16 = vrot.slane %v2716_v54, 2  ;;  %v2738_v51 = vrot.slane %v2732_v5, 2 }
 0x295   :  { %v2754_v10 = vrot.slane %v2748_v31, 2  ;;  %v2764_v46 = vmul.f32 %v9930_v20, %v2628_v37  ;;  %v9946_v24 = vstv %s7532_s27  ;;  %v9952_v7 = vstv %s9947_s7  ;;  %v9957_v31 = vld [vmem:[#allocation111_spill] sm:$0xff]  ;;  %s8640_s27 = sld [smem:[#allocation11 + $0x3e]]  ;;  %s9088_s7 = sld [smem:[#allocation11 + $0x47]] }
 0x296   :  { %v8083_v21 = vmul.f32 %v9946_v24, %v8020_v36  ;;  %v9948_v17 = vmov %v9946_v24  ;;  %v8091_v34 = vsel %vm308_vm0, %v2721_v47, %v2722_v16  ;;  %v2725_v15 = vsel %vm308_vm0, %v2722_v16, %v2724_v28 }
 0x297   :  { %v2792_v35 = vmul.f32 %v9948_v17, %v8016_v19  ;;  %v8097_v20 = vsel %vm308_vm0, %v2737_v13, %v2738_v51  ;;  %v2741_v37 = vsel %vm308_vm0, %v2738_v51, %v2740_v4  ;;  %v2729_v57 = vadd.f32 %v2725_v15, %v2665_v62  ;;  %v9960_v51 = vld [vmem:[#allocation22_spill] sm:$0xff] }
 0x298   :  { %v2745_v52 = vadd.f32 %v2741_v37, %v2681_v22  ;;  %v8103_v29 = vsel %vm308_vm0, %v2753_v60, %v2754_v10  ;;  %v2757_v47 = vsel %vm308_vm0, %v2754_v10, %v2756_v49  ;;  %v2770_v1 = vrot.slane %v2764_v46, 2  ;;  %v9959_v22 = vld [vmem:[#allocation112_spill] sm:$0xff] }
 0x299   :  { %v2761_v33 = vadd.f32 %v2757_v47, %v2697_v63  ;;  %v9950_v28 = vstv %s9945_s19  ;;  %v8114_v4 = vadd.f32 %v2792_v35, %v2729_v57  ;;  %v8119_v25 = vmul.f32 %v9952_v7, %v8020_v36  ;;  %s9071_s19 = sld [smem:[#allocation11 + $0x23]] }
 0x29a   :  { %v8109_v23 = vmul.f32 %v9950_v28, %v8020_v36  ;;  %v9951_v13 = vmov %v9950_v28  ;;  %v9953_v0 = vmov %v9952_v7  ;;  %v9954_v49 = vstv %s9949_s25  ;;  %s9090_s25 = sld [smem:[#allocation11 + $0x6b]] }
 0x29b   :  { %v2797_v8 = vmul.f32 %v9951_v13, %v8016_v19  ;;  %v2802_v60 = vmul.f32 %v9953_v0, %v8016_v19  ;;  %v8127_v12 = vmul.f32 %v9954_v49, %v8020_v36  ;;  %v8132_v45 = vsel %vm308_vm0, %v2769_v41, %v2770_v1  ;;  %v9958_v41 = vld [vmem:[#allocation110_spill] sm:$0xff] }
 0x29c   :  { %v9955_v3 = vrot.slane %v8010_v59, 2  ;;  %v9956_v54 = vmov %v9954_v49  ;;  %v2811_v62 = vmul.f32 %v9957_v31, %v8020_v36  ;;  %v8148_v14 = vmul.f32 %v9957_v31, %v8016_v19  ;;  %v9962_v13 = vld [vmem:[#allocation28_spill] sm:$0xff]  ;;  %v9963_v49 = vld [vmem:[#allocation26_spill] sm:$0xff] }
 0x29d   :  { %v8137_v48 = vadd.f32 %v2797_v8, %v2745_v52  ;;  %v2807_v5 = vmul.f32 %v9956_v54, %v8016_v19  ;;  %v8142_v61 = vadd.f32 %v2802_v60, %v2761_v33  ;;  %v2827_v59 = vmul.f32 %v9958_v41, %v8020_v36  ;;  %v9961_v52 = vld [vmem:[#allocation20_spill] sm:$0xff] }
 0x29e   :  { %v2773_v42 = vsel %vm308_vm0, %v2770_v1, %v9955_v3  ;;  %v8154_v44 = vmul.f32 %v9958_v41, %v8016_v19  ;;  %v2843_v40 = vmul.f32 %v9959_v22, %v8020_v36  ;;  %v8160_v2 = vmul.f32 %v9959_v22, %v8016_v19 }
 0x29f   :  { %v2777_v11 = vadd.f32 %v2773_v42, %v2713_v32  ;;  %v2817_v32 = vrot.slane %v2811_v62, 1  ;;  %v2818_v16 = vrot.slane %v8148_v14, 1  ;;  %v2859_v10 = vmul.f32 %v9960_v51, %v8020_v36 }
 0x2a0   :  { %v2833_v46 = vrot.slane %v2827_v59, 1  ;;  %v2834_v24 = vrot.slane %v8154_v44, 1  ;;  %v2849_v17 = vrot.slane %v2843_v40, 1  ;;  %v2850_v35 = vrot.slane %v8160_v2, 1  ;;  %v2786_v2 = vpop.permute.xlu0 %2785 }
 0x2a1   :  { %v8162_v63 = vadd.f32 %v2807_v5, %v2777_v11  ;;  %v2819_v15 = vsel %vm2351_vm4, %v2817_v32, %v2818_v16  ;;  %v8172_v37 = vmul.f32 %v9960_v51, %v8016_v19  ;;  %v2865_v57 = vrot.slane %v2859_v10, 1  ;;  %v9964_v11 = vld [vmem:[#allocation21_spill] sm:$0xff] }
 0x2a2   :  { %v2875_v47 = vmul.f32 %v9961_v52, %v8020_v36  ;;  %v2835_v33 = vsel %vm2351_vm4, %v2833_v46, %v2834_v24  ;;  %v2851_v1 = vsel %vm2351_vm4, %v2849_v17, %v2850_v35  ;;  %v8180_v28 = vmul.f32 %v9961_v52, %v8016_v19 }
 0x2a3   :  { %v2891_v8 = vmul.f32 %v9962_v13, %v8020_v36  ;;  %v2866_v7 = vrot.slane %v8172_v37, 1  ;;  %v8187_v60 = vmul.f32 %v9962_v13, %v8016_v19  ;;  %v2907_v3 = vmul.f32 %v9963_v49, %v8020_v36 }
 0x2a4   :  { %v2881_v0 = vrot.slane %v2875_v47, 2  ;;  %v2882_v42 = vrot.slane %v8180_v28, 2  ;;  %v8194_v5 = vmul.f32 %v9963_v49, %v8016_v19  ;;  %v2923_v62 = vmul.f32 %v9964_v11, %v8020_v36 }
 0x2a5   :  { %v2897_v54 = vrot.slane %v2891_v8, 2  ;;  %v2867_v14 = vsel %vm2351_vm4, %v2865_v57, %v2866_v7  ;;  %v2898_v59 = vrot.slane %v8187_v60, 2  ;;  %v2913_v44 = vrot.slane %v2907_v3, 2 }
 0x2a6   :  { %v8202_v40 = vmul.f32 %v9964_v11, %v8016_v19  ;;  %v2883_v32 = vsel %vm308_vm0, %v2881_v0, %v2882_v42  ;;  %v2914_v10 = vrot.slane %v8194_v5, 2  ;;  %v2929_v46 = vrot.slane %v2923_v62, 2  ;;  %v9976_v5 = vld [vmem:[#allocation58_spill] sm:$0xff] }
 0x2a7   :  { %v2633_v36 = vadd.f32 %v8029_v43, %v7941_v39  ;;  %v2899_v17 = vsel %vm308_vm0, %v2897_v54, %v2898_v59  ;;  %v2638_v19 = vadd.f32 %v8036_v38, %v7946_v9  ;;  %v2643_v57 = vadd.f32 %v8043_v18, %v7949_v27 }
 0x2a8   :  { %v2930_v37 = vrot.slane %v8202_v40, 2  ;;  %v2915_v47 = vsel %vm308_vm0, %v2913_v44, %v2914_v10  ;;  %v2648_v8 = vadd.f32 %v8050_v30, %v7954_v55  ;;  %v2789_v43 = vsel %vm2318_vm5, %v2786_v2, 0.0 }
 0x2a9   :  { %v2664_v39 = vadd.f32 %v8063_v56, %v2633_v36  ;;  %v2680_v3 = vadd.f32 %v8068_v58, %v2638_v19  ;;  %v2696_v9 = vadd.f32 %v8072_v50, %v2643_v57  ;;  %v2813_v27 = vmul.f32 %v9957_v31, %v2789_v43 }
 0x2aa   :  { %v2931_v0 = vsel %vm308_vm0, %v2929_v46, %v2930_v37  ;;  %v2712_v38 = vadd.f32 %v8076_v53, %v2648_v8  ;;  %v2829_v54 = vmul.f32 %v9958_v41, %v2789_v43  ;;  %v2845_v55 = vmul.f32 %v9959_v22, %v2789_v43 }
 0x2ab   :  { %v2728_v18 = vadd.f32 %v8091_v34, %v2664_v39  ;;  %v2744_v30 = vadd.f32 %v8097_v20, %v2680_v3  ;;  %v2760_v56 = vadd.f32 %v8103_v29, %v2696_v9  ;;  %v2820_v62 = vrot.slane %v2813_v27, 1  ;;  %v9970_v27 = vld [vmem:[#allocation117_spill] sm:$0xff] }
 0x2ac   :  { %v2861_v44 = vmul.f32 %v9960_v51, %v2789_v43  ;;  %v2776_v58 = vadd.f32 %v8132_v45, %v2712_v38  ;;  %v2836_v31 = vrot.slane %v2829_v54, 1  ;;  %v2852_v40 = vrot.slane %v2845_v55, 1 }
 0x2ad   :  { %v2793_v50 = vadd.f32 %v8083_v21, %v2728_v18  ;;  %v2798_v53 = vadd.f32 %v8109_v23, %v2744_v30  ;;  %v2803_v34 = vadd.f32 %v8119_v25, %v2760_v56  ;;  %v2821_v41 = vsel %vm2351_vm4, %v2818_v16, %v2820_v62  ;;  %v3091_v18 = vpop.permute.xlu1 %3090  ;;  %v9971_v30 = vld [vmem:[#allocation104_spill] sm:$0xff]  ;;  %v9973_v62 = vld [vmem:[#allocation105_spill] sm:$0xff] }
 0x2ae   :  { %v2868_v22 = vrot.slane %v2861_v44, 1  ;;  %v2808_v20 = vadd.f32 %v8127_v12, %v2776_v58  ;;  %v2825_v29 = vadd.f32 %v2821_v41, %v8114_v4  ;;  %v2837_v51 = vsel %vm2351_vm4, %v2834_v24, %v2836_v31  ;;  %v9972_v56 = vld [vmem:[#allocation52_spill] sm:$0xff]  ;;  %v9975_v31 = vld [vmem:[#allocation118_spill] sm:$0xff] }
 0x2af   :  { %v2824_v2 = vadd.f32 %v2819_v15, %v2793_v50  ;;  %v2840_v46 = vadd.f32 %v2835_v33, %v2798_v53  ;;  %v2841_v45 = vadd.f32 %v2837_v51, %v8137_v48  ;;  %v2853_v21 = vsel %vm2351_vm4, %v2850_v35, %v2852_v40  ;;  %v9974_v58 = vld [vmem:[#allocation56_spill] sm:$0xff]  ;;  %v9981_v51 = vld [vmem:[#allocation51_spill] sm:$0xff] }
 0x2b0   :  { %v2856_v36 = vadd.f32 %v2851_v1, %v2803_v34  ;;  %v2857_v23 = vadd.f32 %v2853_v21, %v8142_v61  ;;  %v2869_v25 = vsel %vm2351_vm4, %v2866_v7, %v2868_v22  ;;  %v2872_v19 = vadd.f32 %v2867_v14, %v2808_v20  ;;  %v9965_v61 = vld [vmem:[#allocation103_spill] sm:$0xff]  ;;  %v9966_v7 = vld [vmem:[#allocation114_spill] sm:$0xff]  ;;  %v9978_v34 = vld [vmem:[#allocation108_spill] sm:$0xff] }
 0x2b1   :  { %v2877_v16 = vmul.f32 %v9961_v52, %v2789_v43  ;;  %v2873_v12 = vadd.f32 %v2869_v25, %v8162_v63  ;;  %v2888_v15 = vadd.f32 %v2883_v32, %v2824_v2  ;;  %v2893_v4 = vmul.f32 %v9962_v13, %v2789_v43  ;;  %v9967_v13 = vld [vmem:[#allocation107_spill] sm:$0xff]  ;;  %v9979_v22 = vld [vmem:[#allocation54_spill] sm:$0xff]  ;;  %v9984_v25 = vld [vmem:[#allocation130_spill] sm:$0xff] }
 0x2b2   :  { %v2904_v57 = vadd.f32 %v2899_v17, %v2840_v46  ;;  %v2909_v33 = vmul.f32 %v9963_v49, %v2789_v43  ;;  %v2920_v48 = vadd.f32 %v2915_v47, %v2856_v36  ;;  %v2925_v35 = vmul.f32 %v9964_v11, %v2789_v43  ;;  %v9968_v11 = vld [vmem:[#allocation109_spill] sm:$0xff]  ;;  %v9980_v2 = vld [vmem:[#allocation63_spill] sm:$0xff] }
 0x2b3   :  { %v2884_v24 = vrot.slane %v2877_v16, 2  ;;  %v2900_v1 = vrot.slane %v2893_v4, 2  ;;  %v2936_v8 = vadd.f32 %v2931_v0, %v2872_v19  ;;  %v2941_v39 = vadd.f32 %v9965_v61, %v2888_v15  ;;  %v9969_v43 = vld [vmem:[#allocation53_spill] sm:$0xff]  ;;  %v9983_v36 = vld [vmem:[#allocation124_spill] sm:$0xff] }
 0x2b4   :  { %v2946_v14 = vadd.f32 %v9966_v7, %v2904_v57  ;;  %v2916_v52 = vrot.slane %v2909_v33, 2  ;;  %v2932_v32 = vrot.slane %v2925_v35, 2  ;;  %v2951_v17 = vadd.f32 %v9967_v13, %v2920_v48  ;;  %v9985_v16 = vld [vmem:[#allocation55_spill] sm:$0xff]  ;;  %v9986_v15 = vld [vmem:[#allocation47_spill] sm:$0xff]  ;;  %v3089_v35 = vpop.permute.xlu0 %3088  ;;  %v9990_v7 = vld [vmem:[#allocation135_spill] sm:$0xff] }
 0x2b5   :  { %v2885_v63 = vsel %vm308_vm0, %v2882_v42, %v2884_v24  ;;  %v2901_v49 = vsel %vm308_vm0, %v2898_v59, %v2900_v1  ;;  %v2956_v47 = vadd.f32 %v9968_v11, %v2936_v8  ;;  %v2972_v0 = vadd.f32 %v9969_v43, %v2941_v39  ;;  %v9987_v57 = vld [vmem:[#allocation57_spill] sm:$0xff]  ;;  %v9989_v1 = vld [vmem:[#allocation59_spill] sm:$0xff]  ;;  %v9992_v13 = vld [vmem:[#allocation62_spill] sm:$0xff] }
 0x2b6   :  { %v2889_v3 = vadd.f32 %v2885_v63, %v2825_v29  ;;  %v2905_v9 = vadd.f32 %v2901_v49, %v2841_v45  ;;  %v2917_v28 = vsel %vm308_vm0, %v2914_v10, %v2916_v52  ;;  %v2933_v42 = vsel %vm308_vm0, %v2930_v37, %v2932_v32  ;;  %v9977_v37 = vld [vmem:[#allocation106_spill] sm:$0xff]  ;;  %v9982_v45 = vld [vmem:[#allocation61_spill] sm:$0xff]  ;;  %v3249_v63 = vpop.permute.xlu1 %3248  ;;  %v9991_v52 = vld [vmem:[#allocation60_spill] sm:$0xff] }
 0x2b7   :  { %v2988_v38 = vadd.f32 %v9970_v27, %v2946_v14  ;;  %v2921_v54 = vadd.f32 %v2917_v28, %v2857_v23  ;;  %v2937_v55 = vadd.f32 %v2933_v42, %v2873_v12  ;;  %v3004_v59 = vadd.f32 %v9972_v56, %v2951_v17  ;;  %v9988_v33 = vld [vmem:[#allocation134_spill] sm:$0xff]  ;;  %v9993_v49 = vld [vmem:[#allocation136_spill] sm:$0xff]  ;;  %v9994_v43 = vld [vmem:[#allocation137_spill] sm:$0xff] }
 0x2b8   :  { %v2942_v60 = vadd.f32 %v9971_v30, %v2889_v3  ;;  %v2947_v44 = vadd.f32 %v9973_v62, %v2905_v9  ;;  %v3020_v50 = vadd.f32 %v9974_v58, %v2956_v47  ;;  %v8275_v40 = vadd.f32 %v9975_v31, %v2972_v0  ;;  %v9995_v9 = vld [vmem:[#allocation138_spill] sm:$0xff]  ;;  %v9996_v42 = vld [vmem:[#allocation139_spill] sm:$0xff]  ;;  %v3247_v31 = vpop.permute.xlu0 %3246 }
 0x2b9   :  { %v8278_v10 = vadd.f32 %v9976_v5, %v2988_v38  ;;  %v2952_v53 = vadd.f32 %v9977_v37, %v2921_v54  ;;  %v2957_v41 = vadd.f32 %v9978_v34, %v2937_v55  ;;  %v8284_v29 = vadd.f32 %v9980_v2, %v3004_v59 }
 0x2ba   :  { %v2973_v20 = vadd.f32 %v9979_v22, %v2942_v60  ;;  %v2989_v46 = vadd.f32 %v9981_v51, %v2947_v44  ;;  %v8288_v21 = vadd.f32 %v9982_v45, %v3020_v50  ;;  %v8292_v23 = vmul.f32 %v9983_v36, %v8024_v26 }
 0x2bb   :  { %v8296_v19 = vmul.f32 %v9984_v25, %v8024_v26  ;;  %v3005_v12 = vadd.f32 %v9985_v16, %v2952_v53  ;;  %v3021_v4 = vadd.f32 %v9986_v15, %v2957_v41  ;;  %v8303_v48 = vmul.f32 %v9988_v33, %v8024_v26  ;;  %v3552_v41 = vpop.permute.xlu1 %3551 }
 0x2bc   :  { %v3037_v24 = vadd.f32 %v9987_v57, %v2973_v20  ;;  %v3053_v8 = vadd.f32 %v9989_v1, %v2989_v46  ;;  %v3122_v61 = vrot.slane %v8292_v23, 1  ;;  %v8310_v14 = vmul.f32 %v9990_v7, %v8024_v26 }
 0x2bd   :  { %v3138_v39 = vrot.slane %v8296_v19, 1  ;;  %v3069_v32 = vadd.f32 %v9991_v52, %v3005_v12  ;;  %v3085_v17 = vadd.f32 %v9992_v13, %v3021_v4  ;;  %v3154_v3 = vrot.slane %v8303_v48, 1 }
 0x2be   :  { %v8317_v11 = vmul.f32 %v9993_v49, %v8024_v26  ;;  %v3170_v47 = vrot.slane %v8310_v14, 1  ;;  %v8322_v0 = vmul.f32 %v9994_v43, %v8024_v26  ;;  %v8326_v28 = vmul.f32 %v9995_v9, %v8024_v26 }
 0x2bf   :  { %v8330_v27 = vmul.f32 %v9996_v42, %v8024_v26  ;;  %v3094_v54 = vsel %vm2319_vm6, %v3091_v18, 0.0  ;;  %v8337_v55 = vsel %vm2319_vm6, %v3089_v35, 0.0  ;;  %v8341_v30 = vsel %vm2318_vm5, %v3249_v63, 0.0 }
 0x2c0   :  { %v3186_v38 = vrot.slane %v8317_v11, 2  ;;  %v3202_v60 = vrot.slane %v8322_v0, 2  ;;  %v3218_v56 = vrot.slane %v8326_v28, 2  ;;  %v3118_v62 = vmul.f32 %v9983_v36, %v3094_v54 }
 0x2c1   :  { %v3234_v59 = vrot.slane %v8330_v27, 2  ;;  %v3134_v44 = vmul.f32 %v9984_v25, %v3094_v54  ;;  %v3150_v18 = vmul.f32 %v9988_v33, %v3094_v54  ;;  %v3166_v58 = vmul.f32 %v9990_v7, %v3094_v54  ;;  %v10013_v27 = vld [vmem:[#allocation140_spill] sm:$0xff] }
 0x2c2   :  { %v3182_v50 = vmul.f32 %v9993_v49, %v3094_v54  ;;  %v3125_v5 = vrot.slane %v3118_v62, 1  ;;  %v3198_v37 = vmul.f32 %v9994_v43, %v3094_v54  ;;  %v3214_v53 = vmul.f32 %v9995_v9, %v3094_v54 }
 0x2c3   :  { %v8354_v34 = vmul.f32 %v9996_v42, %v3094_v54  ;;  %v3141_v22 = vrot.slane %v3134_v44, 1  ;;  %v3157_v20 = vrot.slane %v3150_v18, 1  ;;  %v3173_v2 = vrot.slane %v3166_v58, 1 }
 0x2c4   :  { %v3189_v51 = vrot.slane %v3182_v50, 2  ;;  %v3205_v46 = vrot.slane %v3198_v37, 2  ;;  %v3221_v45 = vrot.slane %v3214_v53, 2  ;;  %v8359_v12 = vsel %vm2318_vm5, %v3247_v31, 0.0 }
 0x2c5   :  { %v3237_v16 = vrot.slane %v8354_v34, 2  ;;  %v8363_v15 = vsel %vm2319_vm6, %v3552_v41, 0.0  ;;  %v9997_v4 = vstv %s7666_s0  ;;  %v9999_v63 = vstv %s7668_s1  ;;  %s8614_s0 = sld [smem:[#allocation11 + $0x3b]]  ;;  %s8618_s1 = sld [smem:[#allocation11 + $0x5f]] }
 0x2c6   :  { %v8368_v57 = vmul.f32 %v9997_v4, %v8024_v26  ;;  %v9998_v35 = vmov %v9997_v4  ;;  %v8376_v52 = vmul.f32 %v9999_v63, %v8024_v26  ;;  %v10000_v13 = vmov %v9999_v63 }
 0x2c7   :  { %v3097_v1 = vmul.f32 %v9998_v35, %v8337_v55  ;;  %v3102_v54 = vmul.f32 %v10000_v13, %v8337_v55  ;;  %v10001_v62 = vstv %s7676_s5  ;;  %v10003_v50 = vstv %s7678_s23  ;;  %s8632_s23 = sld [smem:[#allocation11 + $0x1a]]  ;;  %s8634_s5 = sld [smem:[#allocation11 + $0x83]] }
 0x2c8   :  { %v8384_v44 = vmul.f32 %v10001_v62, %v8024_v26  ;;  %v10002_v18 = vmov %v10001_v62  ;;  %v8392_v31 = vmul.f32 %v10003_v50, %v8024_v26  ;;  %v10004_v53 = vmov %v10003_v50 }
 0x2c9   :  { %v3107_v58 = vmul.f32 %v10002_v18, %v8337_v55  ;;  %v3099_v37 = vadd.f32 %v3097_v1, %v3037_v24  ;;  %v3112_v34 = vmul.f32 %v10004_v53, %v8337_v55  ;;  %v3117_v41 = vmul.f32 %v9983_v36, %v8337_v55 }
 0x2ca   :  { %v3133_v4 = vmul.f32 %v9984_v25, %v8337_v55  ;;  %v3104_v35 = vadd.f32 %v3102_v54, %v3053_v8  ;;  %v3149_v13 = vmul.f32 %v9988_v33, %v8337_v55  ;;  %v3165_v62 = vmul.f32 %v9990_v7, %v8337_v55 }
 0x2cb   :  { %v3109_v63 = vadd.f32 %v3107_v58, %v3069_v32  ;;  %v3114_v26 = vadd.f32 %v3112_v34, %v3085_v17  ;;  %v3123_v18 = vrot.slane %v3117_v41, 1  ;;  %v3181_v1 = vmul.f32 %v9993_v49, %v8337_v55 }
 0x2cc   :  { %v3139_v24 = vrot.slane %v3133_v4, 1  ;;  %v3155_v50 = vrot.slane %v3149_v13, 1  ;;  %v3171_v53 = vrot.slane %v3165_v62, 1  ;;  %v3197_v36 = vmul.f32 %v9994_v43, %v8337_v55 }
 0x2cd   :  { %v3213_v25 = vmul.f32 %v9995_v9, %v8337_v55  ;;  %v8414_v33 = vsel %vm2351_vm4, %v3122_v61, %v3123_v18  ;;  %v3126_v8 = vsel %vm2351_vm4, %v3123_v18, %v3125_v5  ;;  %v3187_v9 = vrot.slane %v3181_v1, 2 }
 0x2ce   :  { %v8420_v7 = vsel %vm2351_vm4, %v3138_v39, %v3139_v24  ;;  %v3142_v32 = vsel %vm2351_vm4, %v3139_v24, %v3141_v22  ;;  %v3130_v17 = vadd.f32 %v3126_v8, %v3099_v37  ;;  %v8426_v23 = vsel %vm2351_vm4, %v3154_v3, %v3155_v50 }
 0x2cf   :  { %v3146_v49 = vadd.f32 %v3142_v32, %v3104_v35  ;;  %v3158_v61 = vsel %vm2351_vm4, %v3155_v50, %v3157_v20  ;;  %v8432_v19 = vsel %vm2351_vm4, %v3170_v47, %v3171_v53  ;;  %v3174_v39 = vsel %vm2351_vm4, %v3171_v53, %v3173_v2 }
 0x2d0   :  { %v3162_v43 = vadd.f32 %v3158_v61, %v3109_v63  ;;  %v3178_v5 = vadd.f32 %v3174_v39, %v3114_v26  ;;  %v3203_v22 = vrot.slane %v3197_v36, 2  ;;  %v3219_v54 = vrot.slane %v3213_v25, 2  ;;  %v10014_v25 = vld [vmem:[#allocation141_spill] sm:$0xff]  ;;  %v10015_v61 = vld [vmem:[#allocation142_spill] sm:$0xff] }
 0x2d1   :  { %v3229_v48 = vmul.f32 %v9996_v42, %v8337_v55  ;;  %v8440_v3 = vsel %vm308_vm0, %v3186_v38, %v3187_v9  ;;  %v3190_v14 = vsel %vm308_vm0, %v3187_v9, %v3189_v51  ;;  %v10005_v47 = vstv %s7689_s18  ;;  %s8610_s18 = sld [smem:[#allocation11 + $0x17]] }
 0x2d2   :  { %v8446_v20 = vmul.f32 %v10005_v47, %v8359_v12  ;;  %v10006_v2 = vmov %v10005_v47  ;;  %v3194_v37 = vadd.f32 %v3190_v14, %v3130_v17  ;;  %v8454_v11 = vsel %vm308_vm0, %v3202_v60, %v3203_v22 }
 0x2d3   :  { %v3257_v58 = vmul.f32 %v10006_v2, %v8341_v30  ;;  %v3206_v42 = vsel %vm308_vm0, %v3203_v22, %v3205_v46  ;;  %v8460_v38 = vsel %vm308_vm0, %v3218_v56, %v3219_v54  ;;  %v3222_v51 = vsel %vm308_vm0, %v3219_v54, %v3221_v45  ;;  %v10016_v54 = vld [vmem:[#allocation143_spill] sm:$0xff] }
 0x2d4   :  { %v3210_v55 = vadd.f32 %v3206_v42, %v3146_v49  ;;  %v3235_v34 = vrot.slane %v3229_v48, 2  ;;  %v10007_v41 = vstv %s7699_s14  ;;  %v3226_v0 = vadd.f32 %v3222_v51, %v3162_v43  ;;  %s8647_s14 = sld [smem:[#allocation11 + $0x62]] }
 0x2d5   :  { %v8466_v4 = vmul.f32 %v10007_v41, %v8359_v12  ;;  %v8468_v35 = vadd.f32 %v3257_v58, %v3194_v37  ;;  %v10008_v60 = vmov %v10007_v41  ;;  %v10009_v28 = vstv %s7723_s13  ;;  %v10017_v58 = vld [vmem:[#allocation144_spill] sm:$0xff]  ;;  %s8835_s13 = sld [smem:[#allocation11 + $0x1e]] }
 0x2d6   :  { %v3262_v46 = vmul.f32 %v10008_v60, %v8341_v30  ;;  %v8476_v63 = vmul.f32 %v10009_v28, %v8359_v12  ;;  %v8481_v56 = vsel %vm308_vm0, %v3234_v59, %v3235_v34  ;;  %v3238_v45 = vsel %vm308_vm0, %v3235_v34, %v3237_v16 }
 0x2d7   :  { %v10010_v13 = vmov %v10009_v28  ;;  %v10011_v26 = vstv %s7725_s10  ;;  %v3242_v24 = vadd.f32 %v3238_v45, %v3178_v5  ;;  %v3276_v36 = vmul.f32 %v10013_v27, %v8359_v12  ;;  %s8838_s10 = sld [smem:[#allocation11 + $0x42]] }
 0x2d8   :  { %v3267_v62 = vmul.f32 %v10010_v13, %v8341_v30  ;;  %v8490_v18 = vmul.f32 %v10011_v26, %v8359_v12  ;;  %v8492_v1 = vadd.f32 %v3262_v46, %v3210_v55  ;;  %v10012_v50 = vmov %v10011_v26  ;;  %v10018_v46 = vld [vmem:[#allocation145_spill] sm:$0xff] }
 0x2d9   :  { %v3272_v53 = vmul.f32 %v10012_v50, %v8341_v30  ;;  %v8503_v16 = vmul.f32 %v10013_v27, %v8341_v30  ;;  %v3292_v8 = vmul.f32 %v10014_v25, %v8359_v12  ;;  %v8509_v32 = vmul.f32 %v10014_v25, %v8341_v30 }
 0x2da   :  { %v8499_v59 = vadd.f32 %v3267_v62, %v3226_v0  ;;  %v3282_v49 = vrot.slane %v3276_v36, 1  ;;  %v3308_v43 = vmul.f32 %v10015_v61, %v8359_v12  ;;  %v8517_v39 = vmul.f32 %v10015_v61, %v8341_v30  ;;  %v10019_v62 = vld [vmem:[#allocation146_spill] sm:$0xff]  ;;  %v10020_v36 = vld [vmem:[#allocation147_spill] sm:$0xff] }
 0x2db   :  { %v8511_v17 = vadd.f32 %v3272_v53, %v3242_v24  ;;  %v3283_v9 = vrot.slane %v8503_v16, 1  ;;  %v3298_v5 = vrot.slane %v3292_v8, 1  ;;  %v3299_v22 = vrot.slane %v8509_v32, 1 }
 0x2dc   :  { %v3324_v48 = vmul.f32 %v10016_v54, %v8359_v12  ;;  %v3314_v14 = vrot.slane %v3308_v43, 1  ;;  %v3315_v47 = vrot.slane %v8517_v39, 1  ;;  %v8526_v2 = vmul.f32 %v10016_v54, %v8341_v30 }
 0x2dd   :  { %v3340_v37 = vmul.f32 %v10017_v58, %v8359_v12  ;;  %v3284_v42 = vsel %vm2351_vm4, %v3282_v49, %v3283_v9  ;;  %v3300_v55 = vsel %vm2351_vm4, %v3298_v5, %v3299_v22  ;;  %v8534_v34 = vmul.f32 %v10017_v58, %v8341_v30  ;;  %v3251_v5 = vpop.permute.xlu0 %3250 }
 0x2de   :  { %v3330_v51 = vrot.slane %v3324_v48, 1  ;;  %v3316_v41 = vsel %vm2351_vm4, %v3314_v14, %v3315_v47  ;;  %v3331_v0 = vrot.slane %v8526_v2, 1  ;;  %v3356_v28 = vmul.f32 %v10018_v46, %v8359_v12 }
 0x2df   :  { %v3346_v60 = vrot.slane %v3340_v37, 2  ;;  %v3347_v45 = vrot.slane %v8534_v34, 2  ;;  %v8543_v13 = vmul.f32 %v10018_v46, %v8341_v30  ;;  %v3372_v26 = vmul.f32 %v10019_v62, %v8359_v12 }
 0x2e0   :  { %v8549_v24 = vmul.f32 %v10019_v62, %v8341_v30  ;;  %v3332_v50 = vsel %vm2351_vm4, %v3330_v51, %v3331_v0  ;;  %v3362_v53 = vrot.slane %v3356_v28, 2  ;;  %v3388_v16 = vmul.f32 %v10020_v36, %v8359_v12 }
 0x2e1   :  { %v8556_v8 = vmul.f32 %v10020_v36, %v8341_v30  ;;  %v3348_v32 = vsel %vm308_vm0, %v3346_v60, %v3347_v45  ;;  %v3363_v49 = vrot.slane %v8543_v13, 2  ;;  %v3378_v43 = vrot.slane %v3372_v26, 2 }
 0x2e2   :  { %v3379_v39 = vrot.slane %v8549_v24, 2  ;;  %v3394_v48 = vrot.slane %v3388_v16, 2  ;;  %v3098_v12 = vadd.f32 %v8368_v57, %v8275_v40  ;;  %v3103_v30 = vadd.f32 %v8376_v52, %v8278_v10 }
 0x2e3   :  { %v3395_v14 = vrot.slane %v8556_v8, 2  ;;  %v3364_v2 = vsel %vm308_vm0, %v3362_v53, %v3363_v49  ;;  %v3108_v51 = vadd.f32 %v8384_v44, %v8284_v29  ;;  %v3113_v60 = vadd.f32 %v8392_v31, %v8288_v21  ;;  %v3556_v8 = vpop.permute.xlu1 %3555 }
 0x2e4   :  { %v3380_v37 = vsel %vm308_vm0, %v3378_v43, %v3379_v39  ;;  %v3129_v10 = vadd.f32 %v8414_v33, %v3098_v12  ;;  %v3145_v57 = vadd.f32 %v8420_v7, %v3103_v30  ;;  %v3254_v52 = vsel %vm2318_vm5, %v3251_v5, 0.0 }
 0x2e5   :  { %v3396_v40 = vsel %vm308_vm0, %v3394_v48, %v3395_v14  ;;  %v3161_v28 = vadd.f32 %v8426_v23, %v3108_v51  ;;  %v3177_v26 = vadd.f32 %v8432_v19, %v3113_v60  ;;  %v3278_v29 = vmul.f32 %v10013_v27, %v3254_v52 }
 0x2e6   :  { %v3294_v44 = vmul.f32 %v10014_v25, %v3254_v52  ;;  %v3193_v21 = vadd.f32 %v8440_v3, %v3129_v10  ;;  %v3209_v31 = vadd.f32 %v8454_v11, %v3145_v57  ;;  %v3310_v53 = vmul.f32 %v10015_v61, %v3254_v52  ;;  %v10023_v10 = vld [vmem:[#allocation32_spill] sm:$0xff] }
 0x2e7   :  { %v3326_v33 = vmul.f32 %v10016_v54, %v3254_v52  ;;  %v3225_v7 = vadd.f32 %v8460_v38, %v3161_v28  ;;  %v3241_v16 = vadd.f32 %v8481_v56, %v3177_v26  ;;  %v3285_v43 = vrot.slane %v3278_v29, 1  ;;  %v10026_v29 = vld [vmem:[#allocation66_spill] sm:$0xff] }
 0x2e8   :  { %v3301_v23 = vrot.slane %v3294_v44, 1  ;;  %v3258_v19 = vadd.f32 %v8446_v20, %v3193_v21  ;;  %v3263_v27 = vadd.f32 %v8466_v4, %v3209_v31  ;;  %v3317_v5 = vrot.slane %v3310_v53, 1  ;;  %v10027_v31 = vld [vmem:[#allocation69_spill] sm:$0xff]  ;;  %v10029_v53 = vld [vmem:[#allocation71_spill] sm:$0xff] }
 0x2e9   :  { %v3333_v25 = vrot.slane %v3326_v33, 1  ;;  %v3268_v3 = vadd.f32 %v8476_v63, %v3225_v7  ;;  %v3273_v11 = vadd.f32 %v8490_v18, %v3241_v16  ;;  %v3286_v61 = vsel %vm2351_vm4, %v3283_v9, %v3285_v43  ;;  %v10030_v7 = vld [vmem:[#allocation74_spill] sm:$0xff] }
 0x2ea   :  { %v3302_v54 = vsel %vm2351_vm4, %v3299_v22, %v3301_v23  ;;  %v3289_v48 = vadd.f32 %v3284_v42, %v3258_v19  ;;  %v3290_v38 = vadd.f32 %v3286_v61, %v8468_v35  ;;  %v3305_v56 = vadd.f32 %v3300_v55, %v3263_v27  ;;  %v10032_v23 = vld [vmem:[#allocation33_spill] sm:$0xff]  ;;  %v10033_v27 = vld [vmem:[#allocation76_spill] sm:$0xff] }
 0x2eb   :  { %v3306_v12 = vadd.f32 %v3302_v54, %v8492_v1  ;;  %v3318_v20 = vsel %vm2351_vm4, %v3315_v47, %v3317_v5  ;;  %v3321_v30 = vadd.f32 %v3316_v41, %v3268_v3  ;;  %v3334_v4 = vsel %vm2351_vm4, %v3331_v0, %v3333_v25  ;;  %v10021_v0 = vld [vmem:[#allocation29_spill] sm:$0xff]  ;;  %v10036_v54 = vld [vmem:[#allocation65_spill] sm:$0xff] }
 0x2ec   :  { %v3337_v51 = vadd.f32 %v3332_v50, %v3273_v11  ;;  %v3322_v63 = vadd.f32 %v3318_v20, %v8499_v59  ;;  %v3338_v18 = vadd.f32 %v3334_v4, %v8511_v17  ;;  %v3342_v9 = vmul.f32 %v10017_v58, %v3254_v52  ;;  %v10022_v58 = vld [vmem:[#allocation24_spill] sm:$0xff]  ;;  %v10034_v25 = vld [vmem:[#allocation79_spill] sm:$0xff]  ;;  %v10035_v11 = vld [vmem:[#allocation23_spill] sm:$0xff] }
 0x2ed   :  { %v3353_v60 = vadd.f32 %v3348_v32, %v3289_v48  ;;  %v3358_v22 = vmul.f32 %v10018_v46, %v3254_v52  ;;  %v3369_v42 = vadd.f32 %v3364_v2, %v3305_v56  ;;  %v3374_v35 = vmul.f32 %v10019_v62, %v3254_v52  ;;  %v10038_v20 = vld [vmem:[#allocation67_spill] sm:$0xff]  ;;  %v10039_v4 = vld [vmem:[#allocation68_spill] sm:$0xff] }
 0x2ee   :  { %v3385_v55 = vadd.f32 %v3380_v37, %v3321_v30  ;;  %v3349_v1 = vrot.slane %v3342_v9, 2  ;;  %v3390_v47 = vmul.f32 %v10020_v36, %v3254_v52  ;;  %v3401_v41 = vadd.f32 %v3396_v40, %v3337_v51  ;;  %v10024_v37 = vld [vmem:[#allocation25_spill] sm:$0xff]  ;;  %v10025_v40 = vld [vmem:[#allocation64_spill] sm:$0xff]  ;;  %v10040_v9 = vld [vmem:[#allocation73_spill] sm:$0xff] }
 0x2ef   :  { %v3406_v50 = vadd.f32 %v10021_v0, %v3353_v60  ;;  %v3365_v59 = vrot.slane %v3358_v22, 2  ;;  %v3381_v17 = vrot.slane %v3374_v35, 2  ;;  %v3411_v32 = vadd.f32 %v10022_v58, %v3369_v42  ;;  %v10041_v22 = vld [vmem:[#allocation75_spill] sm:$0xff]  ;;  %v10044_v58 = vld [vmem:[#allocation72_spill] sm:$0xff] }
 0x2f0   :  { %v3416_v46 = vadd.f32 %v10023_v10, %v3385_v55  ;;  %v3350_v62 = vsel %vm308_vm0, %v3347_v45, %v3349_v1  ;;  %v3397_v2 = vrot.slane %v3390_v47, 2  ;;  %v3421_v36 = vadd.f32 %v10024_v37, %v3401_v41  ;;  %v10042_v1 = vld [vmem:[#allocation77_spill] sm:$0xff]  ;;  %v10043_v41 = vld [vmem:[#allocation70_spill] sm:$0xff] }
 0x2f1   :  { %v3437_v57 = vadd.f32 %v10025_v40, %v3406_v50  ;;  %v3354_v52 = vadd.f32 %v3350_v62, %v3290_v38  ;;  %v3366_v28 = vsel %vm308_vm0, %v3363_v49, %v3365_v59  ;;  %v3382_v26 = vsel %vm308_vm0, %v3379_v39, %v3381_v17  ;;  %v10028_v49 = vld [vmem:[#allocation30_spill] sm:$0xff]  ;;  %v10037_v38 = vld [vmem:[#allocation113_spill] sm:$0xff]  ;;  %v3554_v17 = vpop.permute.xlu0 %3553 }
 0x2f2   :  { %v3453_v44 = vadd.f32 %v10026_v29, %v3411_v32  ;;  %v3370_v34 = vadd.f32 %v3366_v28, %v3306_v12  ;;  %v3386_v45 = vadd.f32 %v3382_v26, %v3322_v63  ;;  %v3398_v21 = vsel %vm308_vm0, %v3395_v14, %v3397_v2  ;;  %v10031_v14 = vld [vmem:[#allocation31_spill] sm:$0xff]  ;;  %v3714_v2 = vpop.permute.xlu1 %3713 }
 0x2f3   :  { %v3469_v13 = vadd.f32 %v10027_v31, %v3416_v46  ;;  %v3402_v24 = vadd.f32 %v3398_v21, %v3338_v18  ;;  %v3407_v39 = vadd.f32 %v10028_v49, %v3354_v52  ;;  %v3485_v33 = vadd.f32 %v10029_v53, %v3421_v36 }
 0x2f4   :  { %v8645_v16 = vadd.f32 %v10030_v7, %v3437_v57  ;;  %v3412_v43 = vadd.f32 %v10031_v14, %v3370_v34  ;;  %v3417_v19 = vadd.f32 %v10032_v23, %v3386_v45  ;;  %v8654_v5 = vadd.f32 %v10033_v27, %v3453_v44 }
 0x2f5   :  { %v8657_v3 = vadd.f32 %v10034_v25, %v3469_v13  ;;  %v3422_v61 = vadd.f32 %v10035_v11, %v3402_v24  ;;  %v3438_v48 = vadd.f32 %v10036_v54, %v3407_v39  ;;  %v8662_v56 = vadd.f32 %v10037_v38, %v3485_v33 }
 0x2f6   :  { %v8665_v12 = vstv %s8610_s18  ;;  %v3454_v30 = vadd.f32 %v10038_v20, %v3412_v43  ;;  %v3470_v51 = vadd.f32 %v10039_v4, %v3417_v19  ;;  %v8674_v18 = vstv %s8614_s0  ;;  %v4017_v27 = vpop.permute.xlu1 %4016  ;;  %s9102_s18 = sld [smem:[#allocation11 + $0x8f]]  ;;  %s9160_s0 = sld [smem:[#allocation11 + $0x1d]] }
 0x2f7   :  { %v8671_v63 = vmul.f32 %v8665_v12, %v8363_v15  ;;  %v3486_v60 = vadd.f32 %v10040_v9, %v3422_v61  ;;  %v8678_v42 = vadd.f32 %v10041_v22, %v3438_v48  ;;  %v8682_v35 = vmul.f32 %v8674_v18, %v8363_v15 }
 0x2f8   :  { %v8685_v55 = vstv %s8618_s1  ;;  %v8688_v47 = vadd.f32 %v10042_v1, %v3454_v30  ;;  %v8691_v0 = vadd.f32 %v10043_v41, %v3470_v51  ;;  %v8703_v46 = vstv %s8634_s5  ;;  %s9174_s1 = sld [smem:[#allocation11 + $0x41]] }
 0x2f9   :  { %v3587_v50 = vrot.slane %v8671_v63, 1  ;;  %v8696_v59 = vmul.f32 %v8685_v55, %v8363_v15  ;;  %v8699_v32 = vadd.f32 %v10044_v58, %v3486_v60  ;;  %v3603_v10 = vrot.slane %v8682_v35, 1  ;;  %s9186_s5 = sld [smem:[#allocation11 + $0x89]] }
 0x2fa   :  { %v8706_v62 = vstv %s8632_s23  ;;  %v8711_v36 = vmul.f32 %v8703_v46, %v8363_v15  ;;  %v8718_v57 = vstv %s8640_s27  ;;  %v3676_v28 = vstv %s8647_s14  ;;  %s9184_s23 = sld [smem:[#allocation11 + $0x65]]  ;;  %s9234_s27 = sld [smem:[#allocation12]] }
 0x2fb   :  { %v3619_v37 = vrot.slane %v8696_v59, 1  ;;  %v8715_v40 = vmul.f32 %v8706_v62, %v8363_v15  ;;  %v8724_v52 = vmul.f32 %v8718_v57, %v8363_v15  ;;  %v8728_v26 = vstv %s8649_s9  ;;  %s9236_s14 = sld [smem:[#allocation12 + $0x1]]  ;;  %s9259_s9 = sld [smem:[#allocation12 + $0x2]] }
 0x2fc   :  { %v3559_v29 = vsel %vm2319_vm6, %v3556_v8, 0.0  ;;  %v3635_v44 = vrot.slane %v8711_v36, 1  ;;  %v8739_v45 = vmul.f32 %v3676_v28, %v8363_v15  ;;  %v8743_v21 = vmul.f32 %v8728_v26, %v8363_v15  ;;  %v3712_v8 = vpop.permute.xlu0 %3711 }
 0x2fd   :  { %v3651_v34 = vrot.slane %v8715_v40, 2  ;;  %v3667_v31 = vrot.slane %v8724_v52, 2  ;;  %v3583_v13 = vmul.f32 %v8665_v12, %v3559_v29  ;;  %v3599_v24 = vmul.f32 %v8674_v18, %v3559_v29 }
 0x2fe   :  { %v8749_v49 = vmul.f32 %v8685_v55, %v3559_v29  ;;  %v3683_v39 = vrot.slane %v8739_v45, 2  ;;  %v3699_v53 = vrot.slane %v8743_v21, 2  ;;  %v8756_v33 = vmul.f32 %v8703_v46, %v3559_v29 }
 0x2ff   :  { %v8759_v7 = vmul.f32 %v8706_v62, %v3559_v29  ;;  %v3590_v14 = vrot.slane %v3583_v13, 1  ;;  %v3606_v43 = vrot.slane %v3599_v24, 1  ;;  %v8763_v19 = vmul.f32 %v8718_v57, %v3559_v29 }
 0x300   :  { %v3622_v23 = vrot.slane %v8749_v49, 1  ;;  %v3638_v25 = vrot.slane %v8756_v33, 1  ;;  %v8767_v61 = vmul.f32 %v3676_v28, %v3559_v29  ;;  %v8770_v54 = vmul.f32 %v8728_v26, %v3559_v29 }
 0x301   :  { %v3654_v11 = vrot.slane %v8759_v7, 2  ;;  %v3670_v48 = vrot.slane %v8763_v19, 2  ;;  %v3558_v38 = vsel %vm2319_vm6, %v3554_v17, 0.0  ;;  %v8777_v20 = vsel %vm2318_vm5, %v3714_v2, 0.0 }
 0x302   :  { %v8781_v30 = vsel %vm2318_vm5, %v3712_v8, 0.0  ;;  %v3686_v4 = vrot.slane %v8767_v61, 2  ;;  %v3702_v51 = vrot.slane %v8770_v54, 2  ;;  %v8787_v9 = vsel %vm2319_vm6, %v4017_v27, 0.0 }
 0x303   :  { %v3560_v60 = vstv %s8720_s11  ;;  %v3565_v41 = vstv %s8732_s3  ;;  %v3570_v17 = vstv %s8734_s22  ;;  %v3575_v49 = vstv %s8751_s8  ;;  %s9261_s11 = sld [smem:[#allocation12 + $0x3]]  ;;  %s4649_s3 = smov [#allocation14]  }
 0x304   :  { %v8791_v22 = vmul.f32 %v3560_v60, %v8363_v15  ;;  %v3562_v1 = vmul.f32 %v3560_v60, %v3558_v38  ;;  %v8796_v58 = vmul.f32 %v3565_v41, %v8363_v15  ;;  %v3567_v2 = vmul.f32 %v3565_v41, %v3558_v38  ;;  %s4209_s22 = sshll.u32 %s4649_s3, 4  ;;  %s4210_s22 = int_to_ptr.vmem [resolvable:$true] %s4209_s22 }
 0x305   :  { %v8799_v29 = vmul.f32 %v3570_v17, %v8363_v15  ;;  %v3572_v13 = vmul.f32 %v3570_v17, %v3558_v38  ;;  %v3582_v33 = vmul.f32 %v8665_v12, %v3558_v38  ;;  %v3598_v7 = vmul.f32 %v8674_v18, %v3558_v38  ;;  %s4605_s8 = scalar_lea.vmem %s4210_s22, 1024  ;;  %p4610_p1 = scmp.lt.s32.totalorder %s4210_s22, %s4210_s22 }
 0x306   :  { %v3564_v24 = vadd.f32 %v3562_v1, %v8678_v42  ;;  %v3569_v8 = vadd.f32 %v3567_v2, %v8688_v47  ;;  %v8808_v27 = vmul.f32 %v3575_v49, %v8363_v15  ;;  %v3577_v61 = vmul.f32 %v3575_v49, %v3558_v38  ;;  %p4606_p0 = scmp.ne.s32.totalorder %s4210_s22, %s4605_s8  ;;  %p4611_p2 = scmp.lt.s32.totalorder %s4605_s8, %s4605_s8 }
 0x307   :  { %v3574_v19 = vadd.f32 %v3572_v13, %v8691_v0  ;;  %v3588_v60 = vrot.slane %v3582_v33, 1  ;;  %v3604_v41 = vrot.slane %v3598_v7, 1  ;;  %v3614_v17 = vmul.f32 %v8685_v55, %v3558_v38 }
 0x308   :  { %v3630_v42 = vmul.f32 %v8703_v46, %v3558_v38  ;;  %v3579_v12 = vadd.f32 %v3577_v61, %v8699_v32  ;;  %v3646_v18 = vmul.f32 %v8706_v62, %v3558_v38  ;;  %v3662_v47 = vmul.f32 %v8718_v57, %v3558_v38  ;;  %p4612_p3 = por %p4611_p2, %p4610_p1 }
 0x309   :  { %v3678_v0 = vmul.f32 %v3676_v28, %v3558_v38  ;;  %v8822_v15 = vsel %vm2351_vm4, %v3587_v50, %v3588_v60  ;;  %v3591_v1 = vsel %vm2351_vm4, %v3588_v60, %v3590_v14  ;;  %v8828_v55 = vsel %vm2351_vm4, %v3603_v10, %v3604_v41 }
 0x30a   :  { %v3607_v46 = vsel %vm2351_vm4, %v3604_v41, %v3606_v43  ;;  %v3595_v32 = vadd.f32 %v3591_v1, %v3564_v24  ;;  %v3620_v57 = vrot.slane %v3614_v17, 1  ;;  %v3636_v63 = vrot.slane %v3630_v42, 1  ;;  %p4613_p4 = pnand %p4612_p3, %p4606_p0 }
 0x30b   :  { %v3611_v62 = vadd.f32 %v3607_v46, %v3569_v8  ;;  %v3652_v50 = vrot.slane %v3646_v18, 2  ;;  %v3668_v28 = vrot.slane %v3662_v47, 2  ;;  %v3684_v14 = vrot.slane %v3678_v0, 2 }
 0x30c   :  { %v3694_v35 = vmul.f32 %v8728_v26, %v3558_v38  ;;  %v8845_v10 = vsel %vm2351_vm4, %v3619_v37, %v3620_v57  ;;  %v3623_v43 = vsel %vm2351_vm4, %v3620_v57, %v3622_v23  ;;  %v8851_v2 = vsel %vm2351_vm4, %v3635_v44, %v3636_v63 }
 0x30d   :  { %v3639_v13 = vsel %vm2351_vm4, %v3636_v63, %v3638_v25  ;;  %v3627_v26 = vadd.f32 %v3623_v43, %v3574_v19  ;;  %v8857_v59 = vsel %vm308_vm0, %v3651_v34, %v3652_v50  ;;  %v3655_v37 = vsel %vm308_vm0, %v3652_v50, %v3654_v11 }
 0x30e   :  { %v3643_v38 = vadd.f32 %v3639_v13, %v3579_v12  ;;  %v3659_v24 = vadd.f32 %v3655_v37, %v3595_v32  ;;  %v8863_v36 = vsel %vm308_vm0, %v3667_v31, %v3668_v28  ;;  %v3671_v44 = vsel %vm308_vm0, %v3668_v28, %v3670_v48 }
 0x30f   :  { %v8869_v23 = vsel %vm308_vm0, %v3683_v39, %v3684_v14  ;;  %v3675_v40 = vadd.f32 %v3671_v44, %v3611_v62  ;;  %v3687_v34 = vsel %vm308_vm0, %v3684_v14, %v3686_v4  ;;  %v3700_v25 = vrot.slane %v3694_v35, 2 }
 0x310   :  { %v3720_v11 = vstv %s8810_s2  ;;  %v3691_v52 = vadd.f32 %v3687_v34, %v3627_v26  ;;  %v3725_v49 = vstv %s8814_s4  ;;  %v3730_v19 = vstv %s8831_s12 }
 0x311   :  { %v8876_v31 = vmul.f32 %v3720_v11, %v8781_v30  ;;  %v3722_v48 = vmul.f32 %v3720_v11, %v8777_v20  ;;  %v8887_v45 = vsel %vm308_vm0, %v3699_v53, %v3700_v25  ;;  %v3703_v39 = vsel %vm308_vm0, %v3700_v25, %v3702_v51 }
 0x312   :  { %v8893_v4 = vmul.f32 %v3725_v49, %v8781_v30  ;;  %v3727_v33 = vmul.f32 %v3725_v49, %v8777_v20  ;;  %v3707_v7 = vadd.f32 %v3703_v39, %v3643_v38  ;;  %v3735_v21 = vstv %s8833_s17 }
 0x313   :  { %v8896_v8 = vadd.f32 %v3722_v48, %v3659_v24  ;;  %v8903_v53 = vmul.f32 %v3730_v19, %v8781_v30  ;;  %v3732_v54 = vmul.f32 %v3730_v19, %v8777_v20  ;;  %v8907_v51 = vmul.f32 %v3735_v21, %v8781_v30 }
 0x314   :  { %v8900_v61 = vadd.f32 %v3727_v33, %v3675_v40  ;;  %v3737_v60 = vmul.f32 %v3735_v21, %v8777_v20  ;;  %v8915_v41 = vstv %s8835_s13  ;;  %v8918_v17 = vstv %s8838_s10 }
 0x315   :  { %v8921_v42 = vstv %s8840_s20  ;;  %v8923_v12 = vadd.f32 %v3732_v54, %v3691_v52  ;;  %v3741_v18 = vmul.f32 %v8915_v41, %v8781_v30  ;;  %v8929_v47 = vmul.f32 %v8915_v41, %v8777_v20 }
 0x316   :  { %v3757_v0 = vmul.f32 %v8918_v17, %v8781_v30  ;;  %v8933_v1 = vadd.f32 %v3737_v60, %v3707_v7  ;;  %v8937_v46 = vmul.f32 %v8918_v17, %v8777_v20  ;;  %v3773_v32 = vmul.f32 %v8921_v42, %v8781_v30 }
 0x317   :  { %v8943_v62 = vmul.f32 %v8921_v42, %v8777_v20  ;;  %v3747_v57 = vrot.slane %v3741_v18, 1  ;;  %v3748_v63 = vrot.slane %v8929_v47, 1  ;;  %v3788_v28 = vstv %s8871_s21 }
 0x318   :  { %v3763_v50 = vrot.slane %v3757_v0, 1  ;;  %v3764_v14 = vrot.slane %v8937_v46, 1  ;;  %v3779_v35 = vrot.slane %v3773_v32, 1  ;;  %v3789_v13 = vmul.f32 %v3788_v28, %v8781_v30 }
 0x319   :  { %v3780_v43 = vrot.slane %v8943_v62, 1  ;;  %v3749_v26 = vsel %vm2351_vm4, %v3747_v57, %v3748_v63  ;;  %v8954_v38 = vmul.f32 %v3788_v28, %v8777_v20  ;;  %v8957_v37 = vstv %s8880_s6 }
 0x31a   :  { %v8960_v24 = vstv %s8882_s16  ;;  %v3765_v44 = vsel %vm2351_vm4, %v3763_v50, %v3764_v14  ;;  %v3795_v34 = vrot.slane %v3789_v13, 1  ;;  %v3805_v25 = vmul.f32 %v8957_v37, %v8781_v30 }
 0x31b   :  { %v3781_v40 = vsel %vm2351_vm4, %v3779_v35, %v3780_v43  ;;  %v3796_v11 = vrot.slane %v8954_v38, 1  ;;  %v8975_v52 = vmul.f32 %v8957_v37, %v8777_v20  ;;  %v3821_v48 = vmul.f32 %v8960_v24, %v8781_v30  ;;  %v3716_v35 = vpop.permute.xlu0 %3715 }
 0x31c   :  { %v8981_v49 = vmul.f32 %v8960_v24, %v8777_v20  ;;  %v3811_v39 = vrot.slane %v3805_v25, 2  ;;  %v8984_v33 = vstv %s8909_s15  ;;  %v8987_v7 = vstv %s8911_s30 }
 0x31d   :  { %v3563_v19 = vadd.f32 %v8791_v22, %v8645_v16  ;;  %v3797_v21 = vsel %vm2351_vm4, %v3795_v34, %v3796_v11  ;;  %v3812_v54 = vrot.slane %v8975_v52, 2  ;;  %v3827_v60 = vrot.slane %v3821_v48, 2 }
 0x31e   :  { %v9464_v18 = vrot.slane %v8981_v49, 2  ;;  %v3837_v0 = vmul.f32 %v8984_v33, %v8781_v30  ;;  %v8998_v32 = vmul.f32 %v8984_v33, %v8777_v20  ;;  %v3853_v57 = vmul.f32 %v8987_v7, %v8781_v30 }
 0x31f   :  { %v9004_v16 = vmul.f32 %v8987_v7, %v8777_v20  ;;  %v3813_v22 = vsel %vm308_vm0, %v3811_v39, %v3812_v54  ;;  %v3568_v13 = vadd.f32 %v8796_v58, %v8654_v5  ;;  %v3573_v30 = vadd.f32 %v8799_v29, %v8657_v3 }
 0x320   :  { %v3829_v50 = vsel %vm308_vm0, %v3827_v60, %v9464_v18  ;;  %v3843_v38 = vrot.slane %v3837_v0, 2  ;;  %v3844_v20 = vrot.slane %v8998_v32, 2  ;;  %v3859_v34 = vrot.slane %v3853_v57, 2 }
 0x321   :  { %v3860_v25 = vrot.slane %v9004_v16, 2  ;;  %v3578_v48 = vadd.f32 %v8808_v27, %v8662_v56  ;;  %v3594_v39 = vadd.f32 %v8822_v15, %v3563_v19  ;;  %v3610_v60 = vadd.f32 %v8828_v55, %v3568_v13 }
 0x322   :  { %v3626_v18 = vadd.f32 %v8845_v10, %v3573_v30  ;;  %v3845_v5 = vsel %vm308_vm0, %v3843_v38, %v3844_v20  ;;  %v3719_v58 = vsel %vm2318_vm5, %v3716_v35, 0.0  ;;  %v9032_v29 = vstv %s8970_s24 }
 0x323   :  { %v3861_v3 = vsel %vm308_vm0, %v3859_v34, %v3860_v25  ;;  %v3642_v56 = vadd.f32 %v8851_v2, %v3578_v48  ;;  %v3658_v27 = vadd.f32 %v8857_v59, %v3594_v39  ;;  %v3674_v15 = vadd.f32 %v8863_v36, %v3610_v60  ;;  %v10049_v60 = vld [vmem:[#allocation132_spill] sm:$0xff] }
 0x324   :  { %v3690_v55 = vadd.f32 %v8869_v23, %v3626_v18  ;;  %v3743_v10 = vmul.f32 %v8915_v41, %v3719_v58  ;;  %v3759_v19 = vmul.f32 %v8918_v17, %v3719_v58  ;;  %v3775_v0 = vmul.f32 %v8921_v42, %v3719_v58 }
 0x325   :  { %v3791_v57 = vmul.f32 %v3788_v28, %v3719_v58  ;;  %v3706_v13 = vadd.f32 %v8887_v45, %v3642_v56  ;;  %v3723_v35 = vadd.f32 %v8876_v31, %v3658_v27  ;;  %v3728_v30 = vadd.f32 %v8893_v4, %v3674_v15 }
 0x326   :  { %v3733_v2 = vadd.f32 %v8903_v53, %v3690_v55  ;;  %v3750_v59 = vrot.slane %v3743_v10, 1  ;;  %v3766_v38 = vrot.slane %v3759_v19, 1  ;;  %v3782_v36 = vrot.slane %v3775_v0, 1  ;;  %v10050_v10 = vld [vmem:[#allocation126_spill] sm:$0xff]  ;;  %v10051_v0 = vld [vmem:[#allocation128_spill] sm:$0xff] }
 0x327   :  { %v3798_v34 = vrot.slane %v3791_v57, 1  ;;  %v3738_v23 = vadd.f32 %v8907_v51, %v3706_v13  ;;  %v3754_v41 = vadd.f32 %v3749_v26, %v3723_v35  ;;  %v3770_v18 = vadd.f32 %v3765_v44, %v3728_v30  ;;  %v10053_v13 = vld [vmem:[#allocation133_spill] sm:$0xff] }
 0x328   :  { %v3786_v17 = vadd.f32 %v3781_v40, %v3733_v2  ;;  %v3751_v42 = vsel %vm2351_vm4, %v3748_v63, %v3750_v59  ;;  %v3767_v31 = vsel %vm2351_vm4, %v3764_v14, %v3766_v38  ;;  %v3783_v45 = vsel %vm2351_vm4, %v3780_v43, %v3782_v36  ;;  %v10054_v59 = vld [vmem:[#allocation87_spill] sm:$0xff]  ;;  %v10055_v36 = vld [vmem:[#allocation78_spill] sm:$0xff] }
 0x329   :  { %v3799_v4 = vsel %vm2351_vm4, %v3796_v11, %v3798_v34  ;;  %v3755_v53 = vadd.f32 %v3751_v42, %v8896_v8  ;;  %v3771_v51 = vadd.f32 %v3767_v31, %v8900_v61  ;;  %v3787_v47 = vadd.f32 %v3783_v45, %v8923_v12  ;;  %v10045_v11 = vld [vmem:[#allocation125_spill] sm:$0xff]  ;;  %v10057_v42 = vld [vmem:[#allocation91_spill] sm:$0xff] }
 0x32a   :  { %v3802_v28 = vadd.f32 %v3797_v21, %v3738_v23  ;;  %v3803_v46 = vadd.f32 %v3799_v4, %v8933_v1  ;;  %v3807_v63 = vmul.f32 %v8957_v37, %v3719_v58  ;;  %v3818_v62 = vadd.f32 %v3813_v22, %v3754_v41  ;;  %v10046_v22 = vld [vmem:[#allocation127_spill] sm:$0xff] }
 0x32b   :  { %v3823_v14 = vmul.f32 %v8960_v24, %v3719_v58  ;;  %v3834_v43 = vadd.f32 %v3829_v50, %v3770_v18  ;;  %v3839_v26 = vmul.f32 %v8984_v33, %v3719_v58  ;;  %v3850_v8 = vadd.f32 %v3845_v5, %v3786_v17  ;;  %v10047_v24 = vld [vmem:[#allocation129_spill] sm:$0xff] }
 0x32c   :  { %v3855_v61 = vmul.f32 %v8987_v7, %v3719_v58  ;;  %v3814_v44 = vrot.slane %v3807_v63, 2  ;;  %v3866_v40 = vadd.f32 %v3861_v3, %v3802_v28  ;;  %v3871_v21 = vadd.f32 %v10045_v11, %v3818_v62  ;;  %v10056_v18 = vld [vmem:[#allocation88_spill] sm:$0xff]  ;;  %v4021_v62 = vpop.permute.xlu1 %4020 }
 0x32d   :  { %v3830_v12 = vrot.slane %v3823_v14, 2  ;;  %v3846_v1 = vrot.slane %v3839_v26, 2  ;;  %v9074_v48 = vadd.f32 %v10046_v22, %v3834_v43  ;;  %v9077_v50 = vadd.f32 %v10047_v24, %v3850_v8  ;;  %v4019_v14 = vpop.permute.xlu0 %4018  ;;  %v10060_v43 = vld [vmem:[#allocation93_spill] sm:$0xff]  ;;  %v10061_v8 = vld [vmem:[#allocation94_spill] sm:$0xff] }
 0x32e   :  { %v3862_v37 = vrot.slane %v3855_v61, 2  ;;  %v3815_v33 = vsel %vm308_vm0, %v3812_v54, %v3814_v44  ;;  %v10048_v7 = vrot.slane %v8981_v49, 2  ;;  %v9086_v5 = vadd.f32 %v10049_v60, %v3866_v40 }
 0x32f   :  { %v9094_v3 = vmul.f32 %v9032_v29, %v8787_v9  ;;  %v3819_v58 = vadd.f32 %v3815_v33, %v3755_v53  ;;  %v3847_v49 = vsel %vm308_vm0, %v3844_v20, %v3846_v1  ;;  %v9106_v55 = vstv %s9056_s28  ;;  %v10052_v20 = vld [vmem:[#allocation131_spill] sm:$0xff]  ;;  %v10058_v53 = vld [vmem:[#allocation80_spill] sm:$0xff] }
 0x330   :  { %v3831_v39 = vsel %vm308_vm0, %v10048_v7, %v3830_v12  ;;  %v3863_v54 = vsel %vm308_vm0, %v3860_v25, %v3862_v37  ;;  %v3851_v56 = vadd.f32 %v3847_v49, %v3787_v47  ;;  %v9112_v32 = vmul.f32 %v9106_v55, %v8787_v9  ;;  %v10059_v47 = vld [vmem:[#allocation92_spill] sm:$0xff]  ;;  %v10062_v7 = vld [vmem:[#allocation95_spill] sm:$0xff] }
 0x331   :  { %v3835_v52 = vadd.f32 %v3831_v39, %v3771_v51  ;;  %v3867_v27 = vadd.f32 %v3863_v54, %v3803_v46  ;;  %v4052_v15 = vrot.slane %v9094_v3, 1  ;;  %v3872_v19 = vadd.f32 %v10050_v10, %v3819_v58 }
 0x332   :  { %v9115_v16 = vstv %s9061_s26  ;;  %v3882_v25 = vadd.f32 %v10052_v20, %v3851_v56  ;;  %v9124_v2 = vstv %s9066_s29  ;;  %v4068_v23 = vrot.slane %v9112_v32, 1 }
 0x333   :  { %v3877_v57 = vadd.f32 %v10051_v0, %v3835_v52  ;;  %v3887_v35 = vadd.f32 %v10053_v13, %v3867_v27  ;;  %v9121_v30 = vmul.f32 %v9115_v16, %v8787_v9  ;;  %v3903_v38 = vadd.f32 %v10054_v59, %v3872_v19 }
 0x334   :  { %v9131_v41 = vmul.f32 %v9124_v2, %v8787_v9  ;;  %v3935_v17 = vadd.f32 %v10056_v18, %v3882_v25  ;;  %v9137_v4 = vstv %s9071_s19  ;;  %v9155_v44 = vstv %s9088_s7 }
 0x335   :  { %v3919_v34 = vadd.f32 %v10055_v36, %v3877_v57  ;;  %v3951_v31 = vadd.f32 %v10057_v42, %v3887_v35  ;;  %v4084_v45 = vrot.slane %v9121_v30, 1  ;;  %v3967_v51 = vadd.f32 %v10058_v53, %v3903_v38  ;;  %v10063_v38 = vld [vmem:[#allocation96_spill] sm:$0xff]  ;;  %v10065_v42 = vld [vmem:[#allocation82_spill] sm:$0xff]  ;;  %v10066_v53 = vld [vmem:[#allocation83_spill] sm:$0xff] }
 0x336   :  { %v4100_v46 = vrot.slane %v9131_v41, 1  ;;  %v9146_v63 = vmul.f32 %v9137_v4, %v8787_v9  ;;  %v9149_v26 = vadd.f32 %v10060_v43, %v3935_v17  ;;  %v9158_v12 = vstv %s9090_s25 }
 0x337   :  { %v9141_v28 = vadd.f32 %v10059_v47, %v3919_v34  ;;  %v9152_v61 = vadd.f32 %v10061_v8, %v3951_v31  ;;  %v9165_v11 = vmul.f32 %v9155_v44, %v8787_v9  ;;  %v9169_v1 = vmul.f32 %v9158_v12, %v8787_v9  ;;  %v10064_v34 = vld [vmem:[#allocation81_spill] sm:$0xff] }
 0x338   :  { %v4116_v40 = vrot.slane %v9146_v63, 2  ;;  %v9172_v37 = vstv %s9102_s18  ;;  %v4024_v24 = vsel %vm2319_vm6, %v4021_v62, 0.0  ;;  %v4023_v33 = vsel %vm2319_vm6, %v4019_v14, 0.0  ;;  %v10067_v14 = vld [vmem:[#allocation84_spill] sm:$0xff]  ;;  %v10068_v8 = vld [vmem:[#allocation85_spill] sm:$0xff] }
 0x339   :  { %v9178_v22 = vmul.f32 %v9172_v37, %v8787_v9  ;;  %v3902_v39 = vadd.f32 %v10062_v7, %v3871_v21  ;;  %v4132_v60 = vrot.slane %v9165_v11, 2  ;;  %v4148_v58 = vrot.slane %v9169_v1, 2 }
 0x33a   :  { %v4048_v52 = vmul.f32 %v9032_v29, %v4024_v24  ;;  %v4064_v49 = vmul.f32 %v9106_v55, %v4024_v24  ;;  %v9195_v56 = vmul.f32 %v9115_v16, %v4024_v24  ;;  %v9198_v6 = vmul.f32 %v9124_v2, %v4024_v24 }
 0x33b   :  { %v9201_v27 = vmul.f32 %v9137_v4, %v4024_v24  ;;  %v9204_v19 = vmul.f32 %v9155_v44, %v4024_v24  ;;  %v9207_v0 = vmul.f32 %v9158_v12, %v4024_v24  ;;  %v9213_v13 = vmul.f32 %v9172_v37, %v4024_v24 }
 0x33c   :  { %v4055_v21 = vrot.slane %v4048_v52, 1  ;;  %v4071_v10 = vrot.slane %v4064_v49, 1  ;;  %v4087_v57 = vrot.slane %v9195_v56, 1  ;;  %v4103_v20 = vrot.slane %v9198_v6, 1  ;;  %v10069_v49 = vld [vmem:[#allocation86_spill] sm:$0xff] }
 0x33d   :  { %v4119_v25 = vrot.slane %v9201_v27, 2  ;;  %v4135_v35 = vrot.slane %v9204_v19, 2  ;;  %v3918_v36 = vadd.f32 %v10063_v38, %v9074_v48  ;;  %v3934_v18 = vadd.f32 %v10064_v34, %v9077_v50 }
 0x33e   :  { %v3950_v31 = vadd.f32 %v10065_v42, %v9086_v5  ;;  %v3966_v47 = vadd.f32 %v10066_v53, %v3902_v39  ;;  %v4025_v62 = vstv %s9160_s0  ;;  %v4030_v38 = vstv %s9174_s1 }
 0x33f   :  { %v3982_v43 = vadd.f32 %v10067_v14, %v3918_v36  ;;  %v3998_v24 = vadd.f32 %v10068_v8, %v3934_v18  ;;  %v4026_v7 = vmul.f32 %v4025_v62, %v8787_v9  ;;  %v4027_v52 = vmul.f32 %v4025_v62, %v4023_v33 }
 0x340   :  { %v4014_v48 = vadd.f32 %v10069_v49, %v3950_v31  ;;  %v4035_v54 = vstv %s9184_s23  ;;  %v4040_v50 = vstv %s9186_s5  ;;  %v4031_v59 = vmul.f32 %v4030_v38, %v8787_v9 }
 0x341   :  { %v4028_v34 = vadd.f32 %v4026_v7, %v3966_v47  ;;  %v4029_v17 = vadd.f32 %v4027_v52, %v3967_v51  ;;  %v4032_v5 = vmul.f32 %v4030_v38, %v4023_v33  ;;  %v4036_v39 = vmul.f32 %v4035_v54, %v8787_v9 }
 0x342   :  { %v4037_v36 = vmul.f32 %v4035_v54, %v4023_v33  ;;  %v4041_v18 = vmul.f32 %v4040_v50, %v8787_v9  ;;  %v4042_v42 = vmul.f32 %v4040_v50, %v4023_v33  ;;  %v4033_v53 = vadd.f32 %v4031_v59, %v3982_v43 }
 0x343   :  { %v4034_v31 = vadd.f32 %v4032_v5, %v9141_v28  ;;  %v4047_v62 = vmul.f32 %v9032_v29, %v4023_v33  ;;  %v4063_v51 = vmul.f32 %v9106_v55, %v4023_v33  ;;  %v4038_v47 = vadd.f32 %v4036_v39, %v3998_v24 }
 0x344   :  { %v4039_v14 = vadd.f32 %v4037_v36, %v9149_v26  ;;  %v4043_v8 = vadd.f32 %v4041_v18, %v4014_v48  ;;  %v4044_v7 = vadd.f32 %v4042_v42, %v9152_v61  ;;  %v4079_v54 = vmul.f32 %v9115_v16, %v4023_v33 }
 0x345   :  { %v4053_v52 = vrot.slane %v4047_v62, 1  ;;  %v4069_v49 = vrot.slane %v4063_v51, 1  ;;  %v4095_v9 = vmul.f32 %v9124_v2, %v4023_v33  ;;  %v4111_v59 = vmul.f32 %v9137_v4, %v4023_v33 }
 0x346   :  { %v4127_v28 = vmul.f32 %v9155_v44, %v4023_v33  ;;  %v4143_v29 = vmul.f32 %v9158_v12, %v4023_v33  ;;  %v4159_v55 = vmul.f32 %v9172_v37, %v4023_v33  ;;  %v4085_v24 = vrot.slane %v4079_v54, 1 }
 0x347   :  { %v4054_v26 = vsel %vm2351_vm4, %v4052_v15, %v4053_v52  ;;  %v4056_v61 = vsel %vm2351_vm4, %v4053_v52, %v4055_v21  ;;  %v4070_v16 = vsel %vm2351_vm4, %v4068_v23, %v4069_v49  ;;  %v4072_v2 = vsel %vm2351_vm4, %v4069_v49, %v4071_v10 }
 0x348   :  { %v4059_v4 = vadd.f32 %v4054_v26, %v4028_v34  ;;  %v4060_v44 = vadd.f32 %v4056_v61, %v4029_v17  ;;  %v4075_v43 = vadd.f32 %v4070_v16, %v4033_v53  ;;  %v4076_v12 = vadd.f32 %v4072_v2, %v4034_v31 }
 0x349   :  { %v4101_v37 = vrot.slane %v4095_v9, 1  ;;  %v4117_v33 = vrot.slane %v4111_v59, 2  ;;  %v4133_v3 = vrot.slane %v4127_v28, 2  ;;  %v4149_v15 = vrot.slane %v4143_v29, 2 }
 0x34a   :  { %v4165_v21 = vrot.slane %v4159_v55, 2  ;;  %v4173_v32 = vstv %s9234_s27  ;;  %v4178_v48 = vstv %s9236_s14  ;;  %v4086_v23 = vsel %vm2351_vm4, %v4084_v45, %v4085_v24 }
 0x34b   :  { %v4088_v10 = vsel %vm2351_vm4, %v4085_v24, %v4087_v57  ;;  %v4102_v17 = vsel %vm2351_vm4, %v4100_v46, %v4101_v37  ;;  %v4104_v38 = vsel %vm2351_vm4, %v4101_v37, %v4103_v20  ;;  %v4091_v50 = vadd.f32 %v4086_v23, %v4038_v47 }
 0x34c   :  { %v4092_v34 = vadd.f32 %v4088_v10, %v4039_v14  ;;  %v4107_v5 = vadd.f32 %v4102_v17, %v4043_v8  ;;  %v4108_v39 = vadd.f32 %v4104_v38, %v4044_v7  ;;  %v4118_v30 = vsel %vm308_vm0, %v4116_v40, %v4117_v33 }
 0x34d   :  { %v4120_v45 = vsel %vm308_vm0, %v4117_v33, %v4119_v25  ;;  %v4134_v41 = vsel %vm308_vm0, %v4132_v60, %v4133_v3  ;;  %v4136_v46 = vsel %vm308_vm0, %v4133_v3, %v4135_v35  ;;  %v4123_v56 = vadd.f32 %v4118_v30, %v4059_v4 }
 0x34e   :  { %v4124_v6 = vadd.f32 %v4120_v45, %v4060_v44  ;;  %v4139_v57 = vadd.f32 %v4134_v41, %v4075_v43  ;;  %v4140_v63 = vadd.f32 %v4136_v46, %v4076_v12  ;;  %v4150_v40 = vsel %vm308_vm0, %v4148_v58, %v4149_v15 }
 0x34f   :  { %v10070_v27 = vrot.slane %v9207_v0, 2  ;;  %v10071_v60 = vrot.slane %v9178_v22, 2  ;;  %v10072_v20 = vrot.slane %v9213_v13, 2  ;;  %v4155_v35 = vadd.f32 %v4150_v40, %v4091_v50 }
 0x350   :  { %v4174_v53 = vadd.f32 %v4173_v32, %v4123_v56  ;;  %v4175_v1 = vadd.f32 %v4173_v32, %v4124_v6  ;;  %v4179_v31 = vadd.f32 %v4178_v48, %v4139_v57  ;;  %v4180_v58 = vadd.f32 %v4178_v48, %v4140_v63 }
 0x351   :  { %v4152_v11 = vsel %vm308_vm0, %v4149_v15, %v10070_v27  ;;  %v4166_v19 = vsel %vm308_vm0, %v10071_v60, %v4165_v21  ;;  %v4168_v25 = vsel %vm308_vm0, %v4165_v21, %v10072_v20  ;;  %v4183_v62 = vstv %s9259_s9 }
 0x352   :  { %v4156_v36 = vadd.f32 %v4152_v11, %v4092_v34  ;;  %v4171_v18 = vadd.f32 %v4166_v19, %v4107_v5  ;;  %v4172_v42 = vadd.f32 %v4168_v25, %v4108_v39  ;;  %v4188_v0 = vstv %s9261_s11 }
 0x353   :  { %v4176_v51 = vmax.f32 %v4174_v53, 0.0  ;;  %v4177_v47 = vmax.f32 %v4175_v1, 0.0  ;;  %v4181_v14 = vmax.f32 %v4179_v31, 0.0  ;;  %v4182_v22 = vmax.f32 %v4180_v58, 0.0 }
 0x354   :  { %v4184_v8 = vadd.f32 %v4183_v62, %v4155_v35  ;;  %v4185_v13 = vadd.f32 %v4183_v62, %v4156_v36  ;;  %v4189_v7 = vadd.f32 %v4188_v0, %v4171_v18  ;;  %v4190_v52 = vadd.f32 %v4188_v0, %v4172_v42 }
 0x355   :  { %4193 = vst [vmem:[#allocation14] sm:$0xff] %v4176_v51  ;;  %4194 = vst [vmem:[#allocation14 + $0x8] sm:$0xff] %v4177_v47 }
 0x356   :  { %4196 = vst [vmem:[#allocation14 + $0x10] sm:$0xff] %v4181_v14  ;;  %4197 = vst [vmem:[#allocation14 + $0x18] sm:$0xff] %v4182_v22  ;;  %v4186_v49 = vmax.f32 %v4184_v8, 0.0  ;;  %v4187_v54 = vmax.f32 %v4185_v13, 0.0  ;;  %v4191_v9 = vmax.f32 %v4189_v7, 0.0  ;;  %v4192_v59 = vmax.f32 %v4190_v52, 0.0 }
 0x358   :  { %4199 = vst [vmem:[#allocation14 + $0x20] sm:$0xff] %v4186_v49  ;;  %4200 = vst [vmem:[#allocation14 + $0x28] sm:$0xff] %v4187_v54 }
 0x359   :  { %4202 = vst [vmem:[#allocation14 + $0x30] sm:$0xff] %v4191_v9  ;;  %4203 = vst [vmem:[#allocation14 + $0x38] sm:$0xff] %v4192_v59 }
 0x35a   :  { %4616 = shalt.err (!%p4613_p4)
}
 0x35b   :  { %s10073_s12 = sld [smem:[#allocation148_spill]] }
 0x361   :  { %s4617_s17 = scalar_lea.hbm %s10073_s12, 1024 }
 0x362   :  { %p4618_p5 = scmp.ne.s32.totalorder %s10073_s12, %s4617_s17  ;;  %p4621_p6 = scmp.lt.u32.totalorder %s4617_s17, %s10073_s12 }
 0x364   :  { %p4623_p7 = pnand %p4621_p6, %p4618_p5 }
 0x366   :  { %4626 = shalt.err (!%p4623_p7)
}
 0x367   :  { %s10074_s6 = smov 8   ;;  %s10075_s16 = smov 128  }
 0x368   :  { %4215 = dma.vmem_to_hbm [thread:$0]  %s4210_s22, 1024, %s10073_s12, [#allocation6], %s10075_s16, %s10075_s16, %s10074_s6  }
 0x369   :  { %4635 = dma.done.wait [#allocation6], 1024  }
 0x36a   :  { %4636 = vsyncadd [#allocation6], 4294966272 }
 0x36b   :  { %4219 = vsyncpa [#allocation5], 1 }
 0x36c   :  { %4220 = vsyncpa [#allocation6], 1 }
 0x36d   :  { %4221 = vsyncpa [#allocation7], 1 }
 0x36e   :  { %4222 = vsyncpa [#allocation10], 1 }
 0x36f   :  { %4223 = vsyncpa [#allocation13], 1 }

</bundles_post_ra>
